<compile_context>
chip_gen: v5e
topology: v5e:2x2
jax: 0.10.0
libtpu: 0.0.40
codegen_flags: <defaults>
</compile_context>

<pallas_src>
import functools

import jax
import jax.numpy as jnp
from jax import lax
from jax.experimental import pallas as pl
from jax.experimental.pallas import tpu as pltpu

_BN_EPS = 1e-5  # PyTorch BatchNorm default


# ----------------------------------------------------------------------------
# VMEM limit: generation-aware (v7x: 64 MiB physical, v5e/v6e: 128 MiB)
# ----------------------------------------------------------------------------
@functools.lru_cache(maxsize=None)
def _vmem_limit_bytes():
    try:
        cap = int(pltpu.get_tpu_info().vmem_capacity_bytes)
    except Exception:
        return 32 * 1024 * 1024
    return max(16 * 1024 * 1024, min(cap // 2, 64 * 1024 * 1024))


def _pick_tiles(M, N):
    """Full-K tiling; split ONE parallel axis in two when it is cheap & legal.

    A 2-block grid keeps both v7x TensorCores busy and lets the second block's
    weight DMA overlap the first block's compute.  Dims that cannot be split
    into (8,128)-legal halves use the full dim (full-array blocks are always
    legal), so odd batch sizes degrade gracefully instead of mis-tiling.
    """
    if N >= 256 and (N // 2) % 128 == 0:
        return M, N // 2            # split N: also halves per-core weight DMA
    if M >= 16 and (M // 2) % 8 == 0:
        return M // 2, N            # split M
    return M, N                     # tiny problem: grid (1, 1)


# ----------------------------------------------------------------------------
# Pallas kernel: single-step full-K matmul + fused (BN-folded) bias (+ ReLU)
# ----------------------------------------------------------------------------
def _matmul_bias_act_kernel(x_ref, w_ref, s_ref, o_ref, *, relu):
    # Full-K contraction in one step: no accumulator scratch, no pl.when.
    y = jnp.dot(x_ref[...], w_ref[...], preferred_element_type=jnp.float32)
    y = y + s_ref[...]              # BN/bias already folded into the shift
    if relu:
        y = jnp.maximum(y, 0.0)
    o_ref[...] = y.astype(o_ref.dtype)


def fused_matmul_bias(x, w, shift, *, relu, out_dtype):
    """out = act(x @ w + shift); bf16 operands, f32 MXU accumulation."""
    M, K = x.shape
    K2, N = w.shape
    assert K == K2 and shift.shape == (1, N)

    tm, tn = _pick_tiles(M, N)
    grid = (M // tm, N // tn)

    kernel = functools.partial(_matmul_bias_act_kernel, relu=relu)
    return pl.pallas_call(
        kernel,
        out_shape=jax.ShapeDtypeStruct((M, N), out_dtype),
        grid_spec=pltpu.PrefetchScalarGridSpec(
            num_scalar_prefetch=0,
            grid=grid,
            in_specs=[
                pl.BlockSpec((tm, K), lambda i, j: (i, 0)),
                pl.BlockSpec((K, tn), lambda i, j: (0, j)),
                pl.BlockSpec((1, tn), lambda i, j: (0, j)),
            ],
            out_specs=pl.BlockSpec((tm, tn), lambda i, j: (i, j)),
        ),
        compiler_params=pltpu.CompilerParams(
            dimension_semantics=("parallel", "parallel"),
            vmem_limit_bytes=_vmem_limit_bytes(),
        ),
    )(x, w, shift)


# ----------------------------------------------------------------------------
# Glue: im2col patch extraction (pad + static strided slices, runs in XLA)
# ----------------------------------------------------------------------------
def _im2col(x_nhwc, k, stride, pad):
    B, H, W, C = x_nhwc.shape
    Ho = (H + 2 * pad - k) // stride + 1
    Wo = (W + 2 * pad - k) // stride + 1
    xp = jnp.pad(x_nhwc, ((0, 0), (pad, pad), (pad, pad), (0, 0)))
    cols = [
        xp[:, kh : kh + stride * Ho : stride, kw : kw + stride * Wo : stride, :]
        for kh in range(k)
        for kw in range(k)
    ]
    patches = jnp.stack(cols, axis=3)                  # [B, Ho, Wo, k*k, C]
    return patches.reshape(B * Ho * Wo, k * k * C), Ho, Wo


def _conv_block(x_nhwc, layer):
    # NOTE: Dropout2d is identity in eval mode (inference forward).
    B = x_nhwc.shape[0]
    patches, Ho, Wo = _im2col(x_nhwc, 5, stride=2, pad=2)
    K = patches.shape[1]
    Kp = layer["w"].shape[0]
    if Kp > K:                                          # zero-pad contraction dim (conv1)
        patches = jnp.pad(patches, ((0, 0), (0, Kp - K)))
    out = fused_matmul_bias(
        patches, layer["w"], layer["shift"], relu=True, out_dtype=jnp.bfloat16
    )
    return out.reshape(B, Ho, Wo, -1)


# ----------------------------------------------------------------------------
# Full DomainFactorBackbone forward (eval mode)
# ----------------------------------------------------------------------------
def domain_factor_backbone(x_nchw, prep):
    x = jnp.transpose(x_nchw, (0, 2, 3, 1)).astype(jnp.bfloat16)   # NCHW -> NHWC
    x = _conv_block(x, prep["conv1"])                  # [B,16,16, 64]
    x = _conv_block(x, prep["conv2"])                  # [B, 8, 8,128]
    x = _conv_block(x, prep["conv3"])                  # [B, 4, 4,256]
    B = x.shape[0]
    # FC weight rows were pre-permuted to NHWC flatten order -> plain reshape.
    x = x.reshape(B, -1)                               # [B, 4096]
    return fused_matmul_bias(
        x, prep["fc"]["w"], prep["fc"]["shift"], relu=False, out_dtype=jnp.float32
    )                                                  # [B, 512]


# ----------------------------------------------------------------------------
# Pure-XLA reference forward (same folded bf16 params) for correctness check
# ----------------------------------------------------------------------------
def reference_forward(x_nchw, prep):
    x = jnp.transpose(x_nchw, (0, 2, 3, 1)).astype(jnp.bfloat16)
    for name in ("conv1", "conv2", "conv3"):
        layer = prep[name]
        y = lax.conv_general_dilated(
            x, layer["w_hwio"], window_strides=(2, 2), padding=((2, 2), (2, 2)),
            dimension_numbers=("NHWC", "HWIO", "NHWC"),
            preferred_element_type=jnp.float32)
        y = jnp.maximum(y + layer["shift"].reshape(1, 1, 1, -1), 0.0)
        x = y.astype(jnp.bfloat16)
    B = x.shape[0]
    x = x.reshape(B, -1)
    y = jnp.dot(x, prep["fc"]["w"], preferred_element_type=jnp.float32)
    return y + prep["fc"]["shift"]


# ----------------------------------------------------------------------------
# Parameter preparation: BN folding, bf16 cast, K padding, FC row permutation
# ----------------------------------------------------------------------------
def prepare_params(params):
    def bn_affine(bn):
        scale = bn["gamma"] / jnp.sqrt(bn["var"] + _BN_EPS)
        shift = bn["beta"] - bn["mean"] * scale
        return scale, shift

    def fold_conv(conv, bn, k_pad_to=None):
        w = conv["w"].astype(jnp.float32)              # [5,5,Cin,Cout] (HWIO)
        scale, shift = bn_affine(bn)
        w = w * scale                                  # fold BN scale into out channels
        b = conv["b"] * scale + shift                  # fused bias + BN shift
        k, _, cin, cout = w.shape
        w2d = w.reshape(k * k * cin, cout)             # tap-major, cin-minor rows
        if k_pad_to is not None and k_pad_to > w2d.shape[0]:
            w2d = jnp.pad(w2d, ((0, k_pad_to - w2d.shape[0]), (0, 0)))
        return {
            "w": w2d.astype(jnp.bfloat16),
            "w_hwio": w.astype(jnp.bfloat16),          # folded HWIO copy (reference only)
            "shift": b.reshape(1, cout).astype(jnp.float32),
        }

    prep = {
        # conv1: pad K 75 -> 128 (zero rows) for lane-aligned contraction.
        # No output-channel padding: keeping Cout=64 halves conv2's K and DMA.
        "conv1": fold_conv(params["conv1"], params["bn1"], k_pad_to=128),
        "conv2": fold_conv(params["conv2"], params["bn2"]),
        "conv3": fold_conv(params["conv3"], params["bn3"]),
    }

    # Linear + BatchNorm1d fold, plus NCHW-flatten -> NHWC-flatten row permutation.
    w = params["fc"]["w"].astype(jnp.float32)          # [256*4*4 (NCHW order), 512]
    scale, shift = bn_affine(params["bn_fc"])
    w = w * scale
    b = params["fc"]["b"] * scale + shift
    C, H, W = 256, 4, 4
    hh, ww, cc = jnp.meshgrid(
        jnp.arange(H), jnp.arange(W), jnp.arange(C), indexing="ij"
    )
    perm = (cc * H * W + hh * W + ww).reshape(-1)      # NHWC row -> NCHW row idx
    w = w[perm]
    prep["fc"] = {
        "w": w.astype(jnp.bfloat16),
        "shift": b.reshape(1, -1).astype(jnp.float32),
    }
    return prep


# ----------------------------------------------------------------------------
# Deterministic synthetic parameter initialization
# (conv weights in HWIO; a real PyTorch checkpoint [Cout,Cin,kh,kw] would be
#  transposed with .transpose(2,3,1,0) to this layout.)
# ----------------------------------------------------------------------------
def init_params(key):
    ks = iter(jax.random.split(key, 32))

    def conv_p(cin, cout):
        return {
            "w": 0.05 * jax.random.normal(next(ks), (5, 5, cin, cout), jnp.float32),
            "b": 0.05 * jax.random.normal(next(ks), (cout,), jnp.float32),
        }

    def bn_p(c):
        return {
            "gamma": 1.0 + 0.1 * jax.random.normal(next(ks), (c,), jnp.float32),
            "beta": 0.1 * jax.random.normal(next(ks), (c,), jnp.float32),
            "mean": 0.1 * jax.random.normal(next(ks), (c,), jnp.float32),
            "var": 1.0 + 0.1 * jnp.abs(jax.random.normal(next(ks), (c,), jnp.float32)),
        }

    return {
        "conv1": conv_p(3, 64),
        "bn1": bn_p(64),
        "conv2": conv_p(64, 128),
        "bn2": bn_p(128),
        "conv3": conv_p(128, 256),
        "bn3": bn_p(256),
        "fc": {
            "w": 0.02 * jax.random.normal(next(ks), (256 * 4 * 4, 512), jnp.float32),
            "b": 0.02 * jax.random.normal(next(ks), (512,), jnp.float32),
        },
        "bn_fc": bn_p(512),
    }


if __name__ == "__main__":
    key = jax.random.PRNGKey(0)
    pkey, xkey = jax.random.split(key)
    params = init_params(pkey)
    prep = prepare_params(params)

    # Three stride-2 convs must end at 4x4 for the fc layer -> H = W = 32;
    # batch = 2, channels = 3 (NCHW like PyTorch).
    B = 2
    x = jax.random.normal(xkey, (B, 3, 32, 32), jnp.float32)

    fwd = jax.jit(domain_factor_backbone)
    out = jax.block_until_ready(fwd(x, prep))
    assert out.shape == (B, 512), out.shape
    assert out.dtype == jnp.float32
    assert bool(jnp.all(jnp.isfinite(out)))

    # Correctness: pure-XLA reference using the SAME folded bf16 parameters and
    # f32 accumulation, so differences are only accumulation-order / cast-
    # boundary noise (loose tolerance per review's bf16-drift note).
    ref = jax.block_until_ready(jax.jit(reference_forward)(x, prep))
    max_err = float(jnp.max(jnp.abs(out - ref)))
    assert bool(jnp.allclose(out, ref, rtol=5e-2, atol=5e-2)), max_err

    print("KERNEL_OK")
</pallas_src>

<mosaic_0001>
module attributes {stable_mosaic.version = 11 : i64} {
  func.func @_matmul_bias_act_kernel(%arg0: i32, %arg1: i32, %arg2: memref<256x128xbf16, #tpu.memory_space<vmem>>, %arg3: memref<128x64xbf16, #tpu.memory_space<vmem>>, %arg4: memref<1x64xf32, #tpu.memory_space<vmem>>, %arg5: memref<256x64xbf16, #tpu.memory_space<vmem>>) attributes {dimension_semantics = [#tpu.dimension_semantics<parallel>, #tpu.dimension_semantics<parallel>], iteration_bounds = array<i64: 2, 1>, scalar_prefetch = 0 : i64, scratch_operands = 0 : i64, tpu.core_type = #tpu.core_type<tc>, window_params = [{transform_indices = @transform_0, window_bounds = array<i64: 256, 128>}, {transform_indices = @transform_1, window_bounds = array<i64: 128, 64>}, {transform_indices = @transform_2, window_bounds = array<i64: 1, 64>}, {transform_indices = @transform_3, window_bounds = array<i64: 256, 64>}]} {
    %c0 = arith.constant 0 : index
    %c0_0 = arith.constant 0 : index
    %0 = vector.load %arg2[%c0, %c0_0] : memref<256x128xbf16, #tpu.memory_space<vmem>>, vector<256x128xbf16>
    %c0_1 = arith.constant 0 : index
    %c0_2 = arith.constant 0 : index
    %1 = vector.load %arg3[%c0_1, %c0_2] : memref<128x64xbf16, #tpu.memory_space<vmem>>, vector<128x64xbf16>
    %cst = arith.constant dense<0.000000e+00> : vector<256x64xf32>
    %2 = tpu.matmul %0, %1, %cst {dimension_numbers = #tpu.dot_dimension_numbers<[1], [0], [0], [1], [0, 0, 1, 1], [], []>} : vector<256x128xbf16>, vector<128x64xbf16>, vector<256x64xf32> -> vector<256x64xf32>
    %c0_3 = arith.constant 0 : index
    %c0_4 = arith.constant 0 : index
    %3 = vector.load %arg4[%c0_3, %c0_4] : memref<1x64xf32, #tpu.memory_space<vmem>>, vector<1x64xf32>
    %4 = vector.broadcast %3 : vector<1x64xf32> to vector<256x64xf32>
    %5 = arith.addf %2, %4 : vector<256x64xf32>
    %cst_5 = arith.constant 0.000000e+00 : f32
    %6 = vector.broadcast %cst_5 : f32 to vector<256x64xf32>
    %7 = arith.maximumf %5, %6 : vector<256x64xf32>
    %8 = arith.truncf %7 : vector<256x64xf32> to vector<256x64xbf16>
    %c0_6 = arith.constant 0 : index
    %c0_7 = arith.constant 0 : index
    %9 = vector.load %arg5[%c0_6, %c0_7] : memref<256x64xbf16, #tpu.memory_space<vmem>>, vector<256x64xbf16>
    tpu.vector_store %arg5[%c0_6, %c0_7], %8 {strides = array<i32>} : memref<256x64xbf16, #tpu.memory_space<vmem>>, vector<256x64xbf16>,
    return
  }
  func.func @transform_0(%arg0: i32, %arg1: i32) -> (i32, i32) {
    %c0_i32 = arith.constant 0 : i32
    %c0_i32_0 = arith.constant 0 : i32
    return %arg0, %c0_i32 : i32, i32
  }
  func.func @transform_1(%arg0: i32, %arg1: i32) -> (i32, i32) {
    %c0_i32 = arith.constant 0 : i32
    %c0_i32_0 = arith.constant 0 : i32
    return %c0_i32, %arg1 : i32, i32
  }
  func.func @transform_2(%arg0: i32, %arg1: i32) -> (i32, i32) {
    %c0_i32 = arith.constant 0 : i32
    %c0_i32_0 = arith.constant 0 : i32
    return %c0_i32, %arg1 : i32, i32
  }
  func.func @transform_3(%arg0: i32, %arg1: i32) -> (i32, i32) {
    %c0_i32 = arith.constant 0 : i32
    return %arg0, %arg1 : i32, i32
  }
}

module attributes {stable_mosaic.version = 11 : i64} {
  func.func @_matmul_bias_act_kernel(%arg0: i32, %arg1: i32, %arg2: memref<64x1600xbf16, #tpu.memory_space<vmem>>, %arg3: memref<1600x128xbf16, #tpu.memory_space<vmem>>, %arg4: memref<1x128xf32, #tpu.memory_space<vmem>>, %arg5: memref<64x128xbf16, #tpu.memory_space<vmem>>) attributes {dimension_semantics = [#tpu.dimension_semantics<parallel>, #tpu.dimension_semantics<parallel>], iteration_bounds = array<i64: 2, 1>, scalar_prefetch = 0 : i64, scratch_operands = 0 : i64, tpu.core_type = #tpu.core_type<tc>, window_params = [{transform_indices = @transform_0, window_bounds = array<i64: 64, 1600>}, {transform_indices = @transform_1, window_bounds = array<i64: 1600, 128>}, {transform_indices = @transform_2, window_bounds = array<i64: 1, 128>}, {transform_indices = @transform_3, window_bounds = array<i64: 64, 128>}]} {
    %c0 = arith.constant 0 : index
    %c0_0 = arith.constant 0 : index
    %0 = vector.load %arg2[%c0, %c0_0] : memref<64x1600xbf16, #tpu.memory_space<vmem>>, vector<64x1600xbf16>
    %c0_1 = arith.constant 0 : index
    %c0_2 = arith.constant 0 : index
    %1 = vector.load %arg3[%c0_1, %c0_2] : memref<1600x128xbf16, #tpu.memory_space<vmem>>, vector<1600x128xbf16>
    %cst = arith.constant dense<0.000000e+00> : vector<64x128xf32>
    %2 = tpu.matmul %0, %1, %cst {dimension_numbers = #tpu.dot_dimension_numbers<[1], [0], [0], [1], [0, 0, 1, 1], [], []>} : vector<64x1600xbf16>, vector<1600x128xbf16>, vector<64x128xf32> -> vector<64x128xf32>
    %c0_3 = arith.constant 0 : index
    %c0_4 = arith.constant 0 : index
    %3 = vector.load %arg4[%c0_3, %c0_4] : memref<1x128xf32, #tpu.memory_space<vmem>>, vector<1x128xf32>
    %4 = vector.broadcast %3 : vector<1x128xf32> to vector<64x128xf32>
    %5 = arith.addf %2, %4 : vector<64x128xf32>
    %cst_5 = arith.constant 0.000000e+00 : f32
    %6 = vector.broadcast %cst_5 : f32 to vector<64x128xf32>
    %7 = arith.maximumf %5, %6 : vector<64x128xf32>
    %8 = arith.truncf %7 : vector<64x128xf32> to vector<64x128xbf16>
    %c0_6 = arith.constant 0 : index
    %c0_7 = arith.constant 0 : index
    %9 = vector.load %arg5[%c0_6, %c0_7] : memref<64x128xbf16, #tpu.memory_space<vmem>>, vector<64x128xbf16>
    tpu.vector_store %arg5[%c0_6, %c0_7], %8 {strides = array<i32>} : memref<64x128xbf16, #tpu.memory_space<vmem>>, vector<64x128xbf16>,
    return
  }
  func.func @transform_0(%arg0: i32, %arg1: i32) -> (i32, i32) {
    %c0_i32 = arith.constant 0 : i32
    %c0_i32_0 = arith.constant 0 : i32
    return %arg0, %c0_i32 : i32, i32
  }
  func.func @transform_1(%arg0: i32, %arg1: i32) -> (i32, i32) {
    %c0_i32 = arith.constant 0 : i32
    %c0_i32_0 = arith.constant 0 : i32
    return %c0_i32, %arg1 : i32, i32
  }
  func.func @transform_2(%arg0: i32, %arg1: i32) -> (i32, i32) {
    %c0_i32 = arith.constant 0 : i32
    %c0_i32_0 = arith.constant 0 : i32
    return %c0_i32, %arg1 : i32, i32
  }
  func.func @transform_3(%arg0: i32, %arg1: i32) -> (i32, i32) {
    %c0_i32 = arith.constant 0 : i32
    return %arg0, %arg1 : i32, i32
  }
}

module attributes {stable_mosaic.version = 11 : i64} {
  func.func @_matmul_bias_act_kernel(%arg0: i32, %arg1: i32, %arg2: memref<32x3200xbf16, #tpu.memory_space<vmem>>, %arg3: memref<3200x128xbf16, #tpu.memory_space<vmem>>, %arg4: memref<1x128xf32, #tpu.memory_space<vmem>>, %arg5: memref<32x128xbf16, #tpu.memory_space<vmem>>) attributes {dimension_semantics = [#tpu.dimension_semantics<parallel>, #tpu.dimension_semantics<parallel>], iteration_bounds = array<i64: 1, 2>, scalar_prefetch = 0 : i64, scratch_operands = 0 : i64, tpu.core_type = #tpu.core_type<tc>, window_params = [{transform_indices = @transform_0, window_bounds = array<i64: 32, 3200>}, {transform_indices = @transform_1, window_bounds = array<i64: 3200, 128>}, {transform_indices = @transform_2, window_bounds = array<i64: 1, 128>}, {transform_indices = @transform_3, window_bounds = array<i64: 32, 128>}]} {
    %c0 = arith.constant 0 : index
    %c0_0 = arith.constant 0 : index
    %0 = vector.load %arg2[%c0, %c0_0] : memref<32x3200xbf16, #tpu.memory_space<vmem>>, vector<32x3200xbf16>
    %c0_1 = arith.constant 0 : index
    %c0_2 = arith.constant 0 : index
    %1 = vector.load %arg3[%c0_1, %c0_2] : memref<3200x128xbf16, #tpu.memory_space<vmem>>, vector<3200x128xbf16>
    %cst = arith.constant dense<0.000000e+00> : vector<32x128xf32>
    %2 = tpu.matmul %0, %1, %cst {dimension_numbers = #tpu.dot_dimension_numbers<[1], [0], [0], [1], [0, 0, 1, 1], [], []>} : vector<32x3200xbf16>, vector<3200x128xbf16>, vector<32x128xf32> -> vector<32x128xf32>
    %c0_3 = arith.constant 0 : index
    %c0_4 = arith.constant 0 : index
    %3 = vector.load %arg4[%c0_3, %c0_4] : memref<1x128xf32, #tpu.memory_space<vmem>>, vector<1x128xf32>
    %4 = vector.broadcast %3 : vector<1x128xf32> to vector<32x128xf32>
    %5 = arith.addf %2, %4 : vector<32x128xf32>
    %cst_5 = arith.constant 0.000000e+00 : f32
    %6 = vector.broadcast %cst_5 : f32 to vector<32x128xf32>
    %7 = arith.maximumf %5, %6 : vector<32x128xf32>
    %8 = arith.truncf %7 : vector<32x128xf32> to vector<32x128xbf16>
    %c0_6 = arith.constant 0 : index
    %c0_7 = arith.constant 0 : index
    %9 = vector.load %arg5[%c0_6, %c0_7] : memref<32x128xbf16, #tpu.memory_space<vmem>>, vector<32x128xbf16>
    tpu.vector_store %arg5[%c0_6, %c0_7], %8 {strides = array<i32>} : memref<32x128xbf16, #tpu.memory_space<vmem>>, vector<32x128xbf16>,
    return
  }
  func.func @transform_0(%arg0: i32, %arg1: i32) -> (i32, i32) {
    %c0_i32 = arith.constant 0 : i32
    %c0_i32_0 = arith.constant 0 : i32
    return %arg0, %c0_i32 : i32, i32
  }
  func.func @transform_1(%arg0: i32, %arg1: i32) -> (i32, i32) {
    %c0_i32 = arith.constant 0 : i32
    %c0_i32_0 = arith.constant 0 : i32
    return %c0_i32, %arg1 : i32, i32
  }
  func.func @transform_2(%arg0: i32, %arg1: i32) -> (i32, i32) {
    %c0_i32 = arith.constant 0 : i32
    %c0_i32_0 = arith.constant 0 : i32
    return %c0_i32, %arg1 : i32, i32
  }
  func.func @transform_3(%arg0: i32, %arg1: i32) -> (i32, i32) {
    %c0_i32 = arith.constant 0 : i32
    return %arg0, %arg1 : i32, i32
  }
}

module attributes {stable_mosaic.version = 11 : i64} {
  func.func @_matmul_bias_act_kernel(%arg0: i32, %arg1: i32, %arg2: memref<2x4096xbf16, #tpu.memory_space<vmem>>, %arg3: memref<4096x256xbf16, #tpu.memory_space<vmem>>, %arg4: memref<1x256xf32, #tpu.memory_space<vmem>>, %arg5: memref<2x256xf32, #tpu.memory_space<vmem>>) attributes {dimension_semantics = [#tpu.dimension_semantics<parallel>, #tpu.dimension_semantics<parallel>], iteration_bounds = array<i64: 1, 2>, scalar_prefetch = 0 : i64, scratch_operands = 0 : i64, tpu.core_type = #tpu.core_type<tc>, window_params = [{transform_indices = @transform_0, window_bounds = array<i64: 2, 4096>}, {transform_indices = @transform_1, window_bounds = array<i64: 4096, 256>}, {transform_indices = @transform_2, window_bounds = array<i64: 1, 256>}, {transform_indices = @transform_3, window_bounds = array<i64: 2, 256>}]} {
    %c0 = arith.constant 0 : index
    %c0_0 = arith.constant 0 : index
    %0 = vector.load %arg2[%c0, %c0_0] : memref<2x4096xbf16, #tpu.memory_space<vmem>>, vector<2x4096xbf16>
    %c0_1 = arith.constant 0 : index
    %c0_2 = arith.constant 0 : index
    %1 = vector.load %arg3[%c0_1, %c0_2] : memref<4096x256xbf16, #tpu.memory_space<vmem>>, vector<4096x256xbf16>
    %cst = arith.constant dense<0.000000e+00> : vector<2x256xf32>
    %2 = tpu.matmul %0, %1, %cst {dimension_numbers = #tpu.dot_dimension_numbers<[1], [0], [0], [1], [0, 0, 1, 1], [], []>} : vector<2x4096xbf16>, vector<4096x256xbf16>, vector<2x256xf32> -> vector<2x256xf32>
    %c0_3 = arith.constant 0 : index
    %c0_4 = arith.constant 0 : index
    %3 = vector.load %arg4[%c0_3, %c0_4] : memref<1x256xf32, #tpu.memory_space<vmem>>, vector<1x256xf32>
    %4 = vector.broadcast %3 : vector<1x256xf32> to vector<2x256xf32>
    %5 = arith.addf %2, %4 : vector<2x256xf32>
    %c0_5 = arith.constant 0 : index
    %c0_6 = arith.constant 0 : index
    %6 = vector.load %arg5[%c0_5, %c0_6] : memref<2x256xf32, #tpu.memory_space<vmem>>, vector<2x256xf32>
    tpu.vector_store %arg5[%c0_5, %c0_6], %5 {strides = array<i32>} : memref<2x256xf32, #tpu.memory_space<vmem>>, vector<2x256xf32>,
    return
  }
  func.func @transform_0(%arg0: i32, %arg1: i32) -> (i32, i32) {
    %c0_i32 = arith.constant 0 : i32
    %c0_i32_0 = arith.constant 0 : i32
    return %arg0, %c0_i32 : i32, i32
  }
  func.func @transform_1(%arg0: i32, %arg1: i32) -> (i32, i32) {
    %c0_i32 = arith.constant 0 : i32
    %c0_i32_0 = arith.constant 0 : i32
    return %c0_i32, %arg1 : i32, i32
  }
  func.func @transform_2(%arg0: i32, %arg1: i32) -> (i32, i32) {
    %c0_i32 = arith.constant 0 : i32
    %c0_i32_0 = arith.constant 0 : i32
    return %c0_i32, %arg1 : i32, i32
  }
  func.func @transform_3(%arg0: i32, %arg1: i32) -> (i32, i32) {
    %c0_i32 = arith.constant 0 : i32
    return %arg0, %arg1 : i32, i32
  }
}

</mosaic_0001>

<bundles_post_ra>
// kernel: domain_factor_backbone.4
= control target key start
LH: loop header
LB: loop body
LE: loop exit
PB: predicated region body
PF: predicated region fallthrough
CT: control target
= control target key end

     0   :  { %s935_s12 = smov 0   ;;  %s937_s13 = smov 0   ;;  %s1123_s0 = inlined_call_operand.vmem [shape: bf16[512,128], index: 0, kind: input, shape index: {}]   ;;  %s1124_s1 = inlined_call_operand.vmem [shape: bf16[128,64], index: 1, kind: input, shape index: {}]   ;;  %s1125_s2 = inlined_call_operand.vmem [shape: f32[1,64], index: 2, kind: input, shape index: {}]   ;;  %s1126_s3 = inlined_call_operand.vmem [shape: bf16[512,64], index: 3, kind: output, shape index: {}]  }
   0x1   :  { %s939_s14 = smov 0  }
   0x2 LB: > { %s25_s15 = sadd.s32 1, %s909_s13  ;;  %p715_p0 = scmp.ge.s32.totalorder %s913_s14, 1  ;;  %s913_s14 = sphi %s939_s14, %s13_s14   ;;  %s909_s13 = sphi %s937_s13, %s1128_s13   ;;  %s905_s12 = sphi %s935_s12, %s1127_s12  }
   0x3   : > { %p27_p1 = scmp.ge.s32.totalorder %s25_s15, 2  ;;  %p169_p2 = scmp.lt.s32.totalorder %s913_s14, 3 }
   0x5   : > { %s1130_s15 = smov (%p27_p1, %s25_s15), 0  ;;  %p170_p3 = pnand %p715_p0, %p169_p2 }
   0x6   : > { %s716_s24 = sshll.u32 (!%p170_p3), %s905_s12, 5 }
   0x7   : > { %173 = sbr.rel (%p170_p3) target bundleno = 241 (0xf1), region = 32  ;;  %p204_p4 = scmp.lt.s32.totalorder (!%p170_p3), %s716_s24, 63 }
   0xc   : > { %v841_v0 = vld [vmem:[%s1124_s1 + $0x38] sm:$0xff]  ;;  %v840_v1 = vld [vmem:[%s1124_s1 + $0x30] sm:$0xff]  ;;  %v839_v2 = vld [vmem:[%s1124_s1 + $0x28] sm:$0xff]  ;;  %s1132_s24 = smov (!%p204_p4, %s716_s24), 63  ;;  %vm574_vm0 = vcmask 519168  }
   0xd   : > { %421 = vmatpush.bf16.msra.mxu0 %v841_v0  ;;  %842 = vmatpush.bf16.msra.mxu1 %v841_v0  ;;  %v838_v3 = vld [vmem:[%s1124_s1 + $0x20] sm:$0xff]  ;;  %v837_v4 = vld [vmem:[%s1124_s1 + $0x18] sm:$0xff]  ;;  %v836_v5 = vld [vmem:[%s1124_s1 + $0x10] sm:$0xff]  ;;  %s717_s4 = sshll.u32 %s1132_s24, 2 }
   0xe   : > { %843 = vmatpush.bf16.msra.mxu2 %v841_v0  ;;  %844 = vmatpush.bf16.msra.mxu3 %v841_v0  ;;  %v835_v6 = vld [vmem:[%s1124_s1 + $0x8] sm:$0xff]  ;;  %v834_v7 = vld [vmem:[%s1124_s1] sm:$0xff]  ;;  %s988_s9 = scalar_lea.vmem %s1123_s0, %s717_s4  ;;  %s1018_s17 = scalar_lea.vmem %s1126_s3, %s717_s4 }
   0xf   : > { %v818_v8 = vld [vmem:[%s988_s9] sm:$0xff]  ;;  %v819_v12 = vld [vmem:[%s988_s9 + $0x8] sm:$0xff]  ;;  %v820_v16 = vld [vmem:[%s988_s9 + $0x10] sm:$0xff] }
  0x10   : > { %v822_v9 = vld [vmem:[%s988_s9 + $0x20] sm:$0xff]  ;;  %v823_v13 = vld [vmem:[%s988_s9 + $0x28] sm:$0xff]  ;;  %v824_v17 = vld [vmem:[%s988_s9 + $0x30] sm:$0xff] }
  0x11   : > { %422 = vmatpush.bf16.msra.mxu0 %v840_v1  ;;  %845 = vmatpush.bf16.msra.mxu1 %v840_v1  ;;  %v826_v10 = vld [vmem:[%s988_s9 + $0x40] sm:$0xff]  ;;  %v827_v14 = vld [vmem:[%s988_s9 + $0x48] sm:$0xff]  ;;  %v828_v18 = vld [vmem:[%s988_s9 + $0x50] sm:$0xff] }
  0x12   : > { %846 = vmatpush.bf16.msra.mxu2 %v840_v1  ;;  %847 = vmatpush.bf16.msra.mxu3 %v840_v1  ;;  %v830_v11 = vld [vmem:[%s988_s9 + $0x60] sm:$0xff]  ;;  %v831_v15 = vld [vmem:[%s988_s9 + $0x68] sm:$0xff]  ;;  %v832_v19 = vld [vmem:[%s988_s9 + $0x70] sm:$0xff] }
  0x13   : > { %v821_v20 = vld [vmem:[%s988_s9 + $0x18] sm:$0xff]  ;;  %v1009_v24 = vld [vmem:[%s1125_s2] ss:$0 sm:$0xff] }
  0x14   : > { %v825_v21 = vld [vmem:[%s988_s9 + $0x38] sm:$0xff] }
  0x15   : > { %423 = vmatpush.bf16.msra.mxu0 %v839_v2  ;;  %848 = vmatpush.bf16.msra.mxu1 %v839_v2  ;;  %v829_v22 = vld [vmem:[%s988_s9 + $0x58] sm:$0xff] }
  0x16   : > { %849 = vmatpush.bf16.msra.mxu2 %v839_v2  ;;  %850 = vmatpush.bf16.msra.mxu3 %v839_v2  ;;  %v833_v23 = vld [vmem:[%s988_s9 + $0x78] sm:$0xff] }
  0x19   : > { %424 = vmatpush.bf16.msra.mxu0 %v838_v3  ;;  %851 = vmatpush.bf16.msra.mxu1 %v838_v3 }
  0x1a   : > { %852 = vmatpush.bf16.msra.mxu2 %v838_v3  ;;  %853 = vmatpush.bf16.msra.mxu3 %v838_v3 }
  0x1d   : > { %425 = vmatpush.bf16.msra.mxu0 %v837_v4  ;;  %854 = vmatpush.bf16.msra.mxu1 %v837_v4 }
  0x1e   : > { %855 = vmatpush.bf16.msra.mxu2 %v837_v4  ;;  %856 = vmatpush.bf16.msra.mxu3 %v837_v4 }
  0x21   : > { %426 = vmatpush.bf16.msra.mxu0 %v836_v5  ;;  %857 = vmatpush.bf16.msra.mxu1 %v836_v5 }
  0x22   : > { %858 = vmatpush.bf16.msra.mxu2 %v836_v5  ;;  %859 = vmatpush.bf16.msra.mxu3 %v836_v5 }
  0x25   : > { %427 = vmatpush.bf16.msra.mxu0 %v835_v6  ;;  %860 = vmatpush.bf16.msra.mxu1 %v835_v6 }
  0x26   : > { %861 = vmatpush.bf16.msra.mxu2 %v835_v6  ;;  %862 = vmatpush.bf16.msra.mxu3 %v835_v6 }
  0x29   : > { %428 = vmatpush.bf16.msra.mxu0 %v834_v7  ;;  %863 = vmatpush.bf16.msra.mxu1 %v834_v7 }
  0x2a   : > { %864 = vmatpush.bf16.msra.mxu2 %v834_v7  ;;  %865 = vmatpush.bf16.msra.mxu3 %v834_v7 }
  0x2c   : > { %429 = vmatmul.bf16.vlgmr.msra.gmra.mxu0 %v818_v8  ;;  %449 = vmatmul.bf16.vlgmr.msra.gmra.mxu1 %v822_v9 }
  0x2d   : > { %469 = vmatmul.bf16.vlgmr.msra.gmra.mxu2 %v826_v10  ;;  %489 = vmatmul.bf16.vlgmr.msra.gmra.mxu3 %v830_v11 }
  0x3c   : > { %434 = vmatmul.bf16.gmra.mxu0 %v819_v12  ;;  %454 = vmatmul.bf16.gmra.mxu1 %v823_v13 }
  0x3d   : > { %474 = vmatmul.bf16.gmra.mxu2 %v827_v14  ;;  %494 = vmatmul.bf16.gmra.mxu3 %v831_v15 }
  0x4c   : > { %439 = vmatmul.bf16.gmra.mxu0 %v820_v16  ;;  %459 = vmatmul.bf16.gmra.mxu1 %v824_v17 }
  0x4d   : > { %479 = vmatmul.bf16.gmra.mxu2 %v828_v18  ;;  %499 = vmatmul.bf16.gmra.mxu3 %v832_v19 }
  0x5c   : > { %444 = vmatmul.bf16.gmra.mxu0 %v821_v20  ;;  %464 = vmatmul.bf16.gmra.mxu1 %v825_v21 }
  0x5d   : > { %484 = vmatmul.bf16.gmra.mxu2 %v829_v22  ;;  %504 = vmatmul.bf16.gmra.mxu3 %v833_v23 }
  0xa9   : > { %v430_v25 = vpop.f32.mrf.mxu0  ;;  %v450_v26 = vpop.f32.mrf.mxu1 }
  0xaa   : > { %v431_v27 = vadd.f32 %v1009_v24, %v430_v25  ;;  %v451_v28 = vadd.f32 %v1009_v24, %v450_v26 }
  0xac   : > { %v510_v29 = vmax.f32 %v431_v27, 0.0  ;;  %v518_v30 = vmax.f32 %v451_v28, 0.0 }
  0xae   : > { %v542_v31 = vpack.c.bf16 %v510_v29, %v510_v29  ;;  %v550_v32 = vpack.c.bf16 %v518_v30, %v518_v30 }
  0xb0   : > { %575 = vst.msk [vmem:[%s1018_s17] sm:$0xf] %vm574_vm0, %v542_v31  ;;  %v470_v33 = vpop.f32.mrf.mxu2  ;;  %v490_v34 = vpop.f32.mrf.mxu3 }
  0xb1   : > { %583 = vst.msk [vmem:[%s1018_s17 + $0x20] sm:$0xf] %vm574_vm0, %v550_v32  ;;  %v471_v35 = vadd.f32 %v1009_v24, %v470_v33  ;;  %v491_v36 = vadd.f32 %v1009_v24, %v490_v34  ;;  %v432_v37 = vpop.f32.mrf.mxu0  ;;  %v452_v38 = vpop.f32.mrf.mxu1 }
  0xb2   : > { %v433_v39 = vadd.f32 %v1009_v24, %v432_v37  ;;  %v453_v40 = vadd.f32 %v1009_v24, %v452_v38 }
  0xb3   : > { %v526_v41 = vmax.f32 %v471_v35, 0.0  ;;  %v534_v42 = vmax.f32 %v491_v36, 0.0 }
  0xb4   : > { %v511_v43 = vmax.f32 %v433_v39, 0.0  ;;  %v519_v44 = vmax.f32 %v453_v40, 0.0 }
  0xb5   : > { %v558_v45 = vpack.c.bf16 %v526_v41, %v526_v41  ;;  %v566_v46 = vpack.c.bf16 %v534_v42, %v534_v42 }
  0xb6   : > { %v543_v47 = vpack.c.bf16 %v511_v43, %v511_v43  ;;  %v551_v48 = vpack.c.bf16 %v519_v44, %v519_v44 }
  0xb7   : > { %591 = vst.msk [vmem:[%s1018_s17 + $0x40] sm:$0xf] %vm574_vm0, %v558_v45 }
  0xb8   : > { %599 = vst.msk [vmem:[%s1018_s17 + $0x60] sm:$0xf] %vm574_vm0, %v566_v46  ;;  %v472_v49 = vpop.f32.mrf.mxu2  ;;  %v492_v50 = vpop.f32.mrf.mxu3 }
  0xb9   : > { %576 = vst.msk [vmem:[%s1018_s17 + $0x4] sm:$0xf] %vm574_vm0, %v543_v47  ;;  %v473_v51 = vadd.f32 %v1009_v24, %v472_v49  ;;  %v493_v52 = vadd.f32 %v1009_v24, %v492_v50  ;;  %v435_v53 = vpop.f32.mrf.mxu0  ;;  %v455_v54 = vpop.f32.mrf.mxu1 }
  0xba   : > { %584 = vst.msk [vmem:[%s1018_s17 + $0x24] sm:$0xf] %vm574_vm0, %v551_v48  ;;  %v436_v55 = vadd.f32 %v1009_v24, %v435_v53  ;;  %v456_v56 = vadd.f32 %v1009_v24, %v455_v54 }
  0xbb   : > { %v527_v57 = vmax.f32 %v473_v51, 0.0  ;;  %v535_v58 = vmax.f32 %v493_v52, 0.0 }
  0xbc   : > { %v512_v59 = vmax.f32 %v436_v55, 0.0  ;;  %v520_v60 = vmax.f32 %v456_v56, 0.0 }
  0xbd   : > { %v559_v61 = vpack.c.bf16 %v527_v57, %v527_v57  ;;  %v567_v62 = vpack.c.bf16 %v535_v58, %v535_v58 }
  0xbe   : > { %v544_v63 = vpack.c.bf16 %v512_v59, %v512_v59  ;;  %v552_v0 = vpack.c.bf16 %v520_v60, %v520_v60 }
  0xbf   : > { %592 = vst.msk [vmem:[%s1018_s17 + $0x44] sm:$0xf] %vm574_vm0, %v559_v61 }
  0xc0   : > { %600 = vst.msk [vmem:[%s1018_s17 + $0x64] sm:$0xf] %vm574_vm0, %v567_v62  ;;  %v475_v1 = vpop.f32.mrf.mxu2  ;;  %v495_v2 = vpop.f32.mrf.mxu3 }
  0xc1   : > { %577 = vst.msk [vmem:[%s1018_s17 + $0x8] sm:$0xf] %vm574_vm0, %v544_v63  ;;  %v476_v3 = vadd.f32 %v1009_v24, %v475_v1  ;;  %v496_v4 = vadd.f32 %v1009_v24, %v495_v2  ;;  %v437_v5 = vpop.f32.mrf.mxu0  ;;  %v457_v6 = vpop.f32.mrf.mxu1 }
  0xc2   : > { %585 = vst.msk [vmem:[%s1018_s17 + $0x28] sm:$0xf] %vm574_vm0, %v552_v0  ;;  %v438_v7 = vadd.f32 %v1009_v24, %v437_v5  ;;  %v458_v8 = vadd.f32 %v1009_v24, %v457_v6 }
  0xc3   : > { %v528_v9 = vmax.f32 %v476_v3, 0.0  ;;  %v536_v10 = vmax.f32 %v496_v4, 0.0 }
  0xc4   : > { %v513_v11 = vmax.f32 %v438_v7, 0.0  ;;  %v521_v12 = vmax.f32 %v458_v8, 0.0 }
  0xc5   : > { %v560_v13 = vpack.c.bf16 %v528_v9, %v528_v9  ;;  %v568_v14 = vpack.c.bf16 %v536_v10, %v536_v10 }
  0xc6   : > { %v545_v15 = vpack.c.bf16 %v513_v11, %v513_v11  ;;  %v553_v16 = vpack.c.bf16 %v521_v12, %v521_v12 }
  0xc7   : > { %593 = vst.msk [vmem:[%s1018_s17 + $0x48] sm:$0xf] %vm574_vm0, %v560_v13 }
  0xc8   : > { %601 = vst.msk [vmem:[%s1018_s17 + $0x68] sm:$0xf] %vm574_vm0, %v568_v14  ;;  %v477_v17 = vpop.f32.mrf.mxu2  ;;  %v497_v18 = vpop.f32.mrf.mxu3 }
  0xc9   : > { %578 = vst.msk [vmem:[%s1018_s17 + $0xc] sm:$0xf] %vm574_vm0, %v545_v15  ;;  %v478_v19 = vadd.f32 %v1009_v24, %v477_v17  ;;  %v498_v20 = vadd.f32 %v1009_v24, %v497_v18  ;;  %v440_v21 = vpop.f32.mrf.mxu0  ;;  %v460_v22 = vpop.f32.mrf.mxu1 }
  0xca   : > { %586 = vst.msk [vmem:[%s1018_s17 + $0x2c] sm:$0xf] %vm574_vm0, %v553_v16  ;;  %v441_v23 = vadd.f32 %v1009_v24, %v440_v21  ;;  %v461_v25 = vadd.f32 %v1009_v24, %v460_v22 }
  0xcb   : > { %v529_v26 = vmax.f32 %v478_v19, 0.0  ;;  %v537_v27 = vmax.f32 %v498_v20, 0.0 }
  0xcc   : > { %v514_v28 = vmax.f32 %v441_v23, 0.0  ;;  %v522_v29 = vmax.f32 %v461_v25, 0.0 }
  0xcd   : > { %v561_v30 = vpack.c.bf16 %v529_v26, %v529_v26  ;;  %v569_v31 = vpack.c.bf16 %v537_v27, %v537_v27 }
  0xce   : > { %v546_v32 = vpack.c.bf16 %v514_v28, %v514_v28  ;;  %v554_v33 = vpack.c.bf16 %v522_v29, %v522_v29 }
  0xcf   : > { %594 = vst.msk [vmem:[%s1018_s17 + $0x4c] sm:$0xf] %vm574_vm0, %v561_v30 }
  0xd0   : > { %602 = vst.msk [vmem:[%s1018_s17 + $0x6c] sm:$0xf] %vm574_vm0, %v569_v31  ;;  %v480_v34 = vpop.f32.mrf.mxu2  ;;  %v500_v35 = vpop.f32.mrf.mxu3 }
  0xd1   : > { %579 = vst.msk [vmem:[%s1018_s17 + $0x10] sm:$0xf] %vm574_vm0, %v546_v32  ;;  %v481_v36 = vadd.f32 %v1009_v24, %v480_v34  ;;  %v501_v37 = vadd.f32 %v1009_v24, %v500_v35  ;;  %v442_v38 = vpop.f32.mrf.mxu0  ;;  %v462_v39 = vpop.f32.mrf.mxu1 }
  0xd2   : > { %587 = vst.msk [vmem:[%s1018_s17 + $0x30] sm:$0xf] %vm574_vm0, %v554_v33  ;;  %v443_v40 = vadd.f32 %v1009_v24, %v442_v38  ;;  %v463_v41 = vadd.f32 %v1009_v24, %v462_v39 }
  0xd3   : > { %v530_v42 = vmax.f32 %v481_v36, 0.0  ;;  %v538_v43 = vmax.f32 %v501_v37, 0.0 }
  0xd4   : > { %v515_v44 = vmax.f32 %v443_v40, 0.0  ;;  %v523_v45 = vmax.f32 %v463_v41, 0.0 }
  0xd5   : > { %v562_v46 = vpack.c.bf16 %v530_v42, %v530_v42  ;;  %v570_v47 = vpack.c.bf16 %v538_v43, %v538_v43 }
  0xd6   : > { %v547_v48 = vpack.c.bf16 %v515_v44, %v515_v44  ;;  %v555_v49 = vpack.c.bf16 %v523_v45, %v523_v45 }
  0xd7   : > { %595 = vst.msk [vmem:[%s1018_s17 + $0x50] sm:$0xf] %vm574_vm0, %v562_v46 }
  0xd8   : > { %603 = vst.msk [vmem:[%s1018_s17 + $0x70] sm:$0xf] %vm574_vm0, %v570_v47  ;;  %v482_v50 = vpop.f32.mrf.mxu2  ;;  %v502_v51 = vpop.f32.mrf.mxu3 }
  0xd9   : > { %580 = vst.msk [vmem:[%s1018_s17 + $0x14] sm:$0xf] %vm574_vm0, %v547_v48  ;;  %v483_v52 = vadd.f32 %v1009_v24, %v482_v50  ;;  %v503_v53 = vadd.f32 %v1009_v24, %v502_v51  ;;  %v445_v54 = vpop.f32.mrf.mxu0  ;;  %v465_v55 = vpop.f32.mrf.mxu1 }
  0xda   : > { %588 = vst.msk [vmem:[%s1018_s17 + $0x34] sm:$0xf] %vm574_vm0, %v555_v49  ;;  %v446_v56 = vadd.f32 %v1009_v24, %v445_v54  ;;  %v466_v57 = vadd.f32 %v1009_v24, %v465_v55 }
  0xdb   : > { %v531_v58 = vmax.f32 %v483_v52, 0.0  ;;  %v539_v59 = vmax.f32 %v503_v53, 0.0 }
  0xdc   : > { %v516_v60 = vmax.f32 %v446_v56, 0.0  ;;  %v524_v61 = vmax.f32 %v466_v57, 0.0 }
  0xdd   : > { %v563_v62 = vpack.c.bf16 %v531_v58, %v531_v58  ;;  %v571_v63 = vpack.c.bf16 %v539_v59, %v539_v59 }
  0xde   : > { %v548_v0 = vpack.c.bf16 %v516_v60, %v516_v60  ;;  %v556_v1 = vpack.c.bf16 %v524_v61, %v524_v61 }
  0xdf   : > { %596 = vst.msk [vmem:[%s1018_s17 + $0x54] sm:$0xf] %vm574_vm0, %v563_v62 }
  0xe0   : > { %604 = vst.msk [vmem:[%s1018_s17 + $0x74] sm:$0xf] %vm574_vm0, %v571_v63  ;;  %v485_v2 = vpop.f32.mrf.mxu2  ;;  %v505_v3 = vpop.f32.mrf.mxu3 }
  0xe1   : > { %581 = vst.msk [vmem:[%s1018_s17 + $0x18] sm:$0xf] %vm574_vm0, %v548_v0  ;;  %v486_v4 = vadd.f32 %v1009_v24, %v485_v2  ;;  %v506_v5 = vadd.f32 %v1009_v24, %v505_v3  ;;  %v447_v6 = vpop.f32.mrf.mxu0  ;;  %v467_v7 = vpop.f32.mrf.mxu1 }
  0xe2   : > { %589 = vst.msk [vmem:[%s1018_s17 + $0x38] sm:$0xf] %vm574_vm0, %v556_v1  ;;  %v448_v8 = vadd.f32 %v1009_v24, %v447_v6  ;;  %v468_v9 = vadd.f32 %v1009_v24, %v467_v7 }
  0xe3   : > { %v532_v10 = vmax.f32 %v486_v4, 0.0  ;;  %v540_v11 = vmax.f32 %v506_v5, 0.0 }
  0xe4   : > { %v517_v12 = vmax.f32 %v448_v8, 0.0  ;;  %v525_v13 = vmax.f32 %v468_v9, 0.0 }
  0xe5   : > { %v564_v14 = vpack.c.bf16 %v532_v10, %v532_v10  ;;  %v572_v15 = vpack.c.bf16 %v540_v11, %v540_v11 }
  0xe6   : > { %v549_v16 = vpack.c.bf16 %v517_v12, %v517_v12  ;;  %v557_v17 = vpack.c.bf16 %v525_v13, %v525_v13 }
  0xe7   : > { %597 = vst.msk [vmem:[%s1018_s17 + $0x58] sm:$0xf] %vm574_vm0, %v564_v14 }
  0xe8   : > { %605 = vst.msk [vmem:[%s1018_s17 + $0x78] sm:$0xf] %vm574_vm0, %v572_v15  ;;  %v487_v18 = vpop.f32.mrf.mxu2  ;;  %v507_v19 = vpop.f32.mrf.mxu3 }
  0xe9   : > { %582 = vst.msk [vmem:[%s1018_s17 + $0x1c] sm:$0xf] %vm574_vm0, %v549_v16  ;;  %v488_v20 = vadd.f32 %v1009_v24, %v487_v18  ;;  %v508_v21 = vadd.f32 %v1009_v24, %v507_v19 }
  0xea   : > { %590 = vst.msk [vmem:[%s1018_s17 + $0x3c] sm:$0xf] %vm574_vm0, %v557_v17 }
  0xeb   : > { %v533_v22 = vmax.f32 %v488_v20, 0.0  ;;  %v541_v23 = vmax.f32 %v508_v21, 0.0 }
  0xed   : > { %v565_v25 = vpack.c.bf16 %v533_v22, %v533_v22  ;;  %v573_v26 = vpack.c.bf16 %v541_v23, %v541_v23 }
  0xef   : > { %598 = vst.msk [vmem:[%s1018_s17 + $0x5c] sm:$0xf] %vm574_vm0, %v565_v25 }
  0xf0   : > { %606 = vst.msk [vmem:[%s1018_s17 + $0x7c] sm:$0xf] %vm574_vm0, %v573_v26 }
  0xf1 PF: > { %s13_s14 = sadd.s32 1, %s913_s14   ;;  %s1127_s12 = smov %s909_s13 }
  0xf2   : > { %p10_p5 = scmp.ge.s32.totalorder %s13_s14, 4   ;;  %s1128_s13 = smov %s1130_s15 }
  0xf4   :  { %12 = sbr.rel (!%p10_p5) target bundleno = 2 (0x2), region = 68 }

// kernel: domain_factor_backbone.5
= control target key start
LH: loop header
LB: loop body
LE: loop exit
PB: predicated region body
PF: predicated region fallthrough
CT: control target
= control target key end

     0   :  { %s2747_s12 = smov 0   ;;  %s2749_s13 = smov 0   ;;  %s3267_s0 = inlined_call_operand.vmem [shape: bf16[128,1600], index: 0, kind: input, shape index: {}]   ;;  %s3268_s1 = inlined_call_operand.vmem [shape: bf16[1600,128], index: 1, kind: input, shape index: {}]   ;;  %s3269_s2 = inlined_call_operand.vmem [shape: f32[1,128], index: 2, kind: input, shape index: {}]   ;;  %s3270_s3 = inlined_call_operand.vmem [shape: bf16[128,128], index: 3, kind: output, shape index: {}]  }
   0x1   :  { %s2751_s14 = smov 0  }
   0x2 LB: > { %s25_s15 = sadd.s32 1, %s2721_s13  ;;  %p1871_p0 = scmp.ge.s32.totalorder %s2725_s14, 1  ;;  %s2725_s14 = sphi %s2751_s14, %s13_s14   ;;  %s2721_s13 = sphi %s2749_s13, %s3272_s13   ;;  %s2717_s12 = sphi %s2747_s12, %s3271_s12  }
   0x3   : > { %p27_p1 = scmp.ge.s32.totalorder %s25_s15, 2  ;;  %p170_p2 = scmp.lt.s32.totalorder %s2725_s14, 3 }
   0x5   : > { %s3274_s15 = smov (%p27_p1, %s25_s15), 0  ;;  %p171_p3 = pnand %p1871_p0, %p170_p2 }
   0x6   : > { %s1872_s5 = sshll.u32 (!%p171_p3), %s2717_s12, 3 }
   0x7   : > { %174 = sbr.rel (%p171_p3) target bundleno = 399 (0x18f), region = 32  ;;  %p206_p4 = scmp.lt.s32.totalorder (!%p171_p3), %s1872_s5, 15 }
   0xc   : > { %v2549_v0 = vld [vmem:[%s3268_s1 + $0x38] sm:$0xff]  ;;  %v2548_v2 = vld [vmem:[%s3268_s1 + $0x30] sm:$0xff]  ;;  %v2547_v6 = vld [vmem:[%s3268_s1 + $0x28] sm:$0xff]  ;;  %s3276_s5 = smov (!%p206_p4, %s1872_s5), 15  ;;  %vm1349_vm0 = vcmask 523264  }
   0xd   : > { %v2565_v1 = vld [vmem:[%s3268_s1 + $0xb8] sm:$0xff]  ;;  %2665 = vmatpush.bf16.msra.mxu1 %v2549_v0  ;;  %1362 = vmatpush.bf16.msra.mxu0 %v2549_v0  ;;  %v2564_v3 = vld [vmem:[%s3268_s1 + $0xb0] sm:$0xff]  ;;  %v2563_v7 = vld [vmem:[%s3268_s1 + $0xa8] sm:$0xff]  ;;  %s2677_s25 = smul.u32 52, %s3276_s5 }
   0xe   : > { %1420 = vmatpush.bf16.msra.mxu2 %v2565_v1  ;;  %v2573_v4 = vld [vmem:[%s3268_s1 + $0xf8] sm:$0xff]  ;;  %v2572_v5 = vld [vmem:[%s3268_s1 + $0xf0] sm:$0xff]  ;;  %v2571_v8 = vld [vmem:[%s3268_s1 + $0xe8] sm:$0xff] }
   0xf   : > { %1449 = vmatpush.bf16.msra.mxu3 %v2573_v4  ;;  %v2546_v9 = vld [vmem:[%s3268_s1 + $0x20] sm:$0xff]  ;;  %v2545_v12 = vld [vmem:[%s3268_s1 + $0x18] sm:$0xff]  ;;  %v2544_v15 = vld [vmem:[%s3268_s1 + $0x10] sm:$0xff]  ;;  %s2831_s8 = scalar_lea.vmem %s3267_s0, %s2677_s25 }
  0x10   : > { %v2562_v10 = vld [vmem:[%s3268_s1 + $0xa0] sm:$0xff]  ;;  %v2561_v13 = vld [vmem:[%s3268_s1 + $0x98] sm:$0xff]  ;;  %v2560_v16 = vld [vmem:[%s3268_s1 + $0x90] sm:$0xff] }
  0x11   : > { %2666 = vmatpush.bf16.msra.mxu1 %v2548_v2  ;;  %1363 = vmatpush.bf16.msra.mxu0 %v2548_v2  ;;  %v2570_v11 = vld [vmem:[%s3268_s1 + $0xe0] sm:$0xff]  ;;  %v2569_v14 = vld [vmem:[%s3268_s1 + $0xd8] sm:$0xff]  ;;  %v2568_v17 = vld [vmem:[%s3268_s1 + $0xd0] sm:$0xff] }
  0x12   : > { %1421 = vmatpush.bf16.msra.mxu2 %v2564_v3  ;;  %v2543_v18 = vld [vmem:[%s3268_s1 + $0x8] sm:$0xff]  ;;  %v2542_v20 = vld [vmem:[%s3268_s1] sm:$0xff]  ;;  %v1982_v21 = vld [vmem:[%s2831_s8 + $0xd0] sm:$0xf] }
  0x13   : > { %1450 = vmatpush.bf16.msra.mxu3 %v2572_v5  ;;  %v2559_v19 = vld [vmem:[%s3268_s1 + $0x88] sm:$0xff]  ;;  %v2557_v22 = vld [vmem:[%s3268_s1 + $0x78] sm:$0xff]  ;;  %v2522_v24 = vld [vmem:[%s2831_s8 + $0x100] sm:$0xf0] }
  0x14   : > { %v2567_v23 = vld [vmem:[%s3268_s1 + $0xc8] sm:$0xff]  ;;  %v1878_v25 = vld [vmem:[%s2831_s8] sm:$0xf]  ;;  %v2496_v26 = vld [vmem:[%s2831_s8 + $0x30] sm:$0xf0]  ;;  %v1983_v32 = vor.u32 %v2522_v24, %v1982_v21 }
  0x15   : > { %2667 = vmatpush.bf16.msra.mxu1 %v2547_v6  ;;  %1364 = vmatpush.bf16.msra.mxu0 %v2547_v6  ;;  %v2558_v27 = vld [vmem:[%s3268_s1 + $0x80] sm:$0xff]  ;;  %v1886_v28 = vld [vmem:[%s2831_s8 + $0x8] sm:$0xf]  ;;  %v2497_v29 = vld [vmem:[%s2831_s8 + $0x38] sm:$0xf0]  ;;  %v1879_v33 = vor.u32 %v2496_v26, %v1878_v25 }
  0x16   : > { %1422 = vmatpush.bf16.msra.mxu2 %v2563_v7  ;;  %v2581_v30 = vld [vmem:[%s3268_s1 + $0x138] sm:$0xff]  ;;  %v1887_v34 = vor.u32 %v2497_v29, %v1886_v28  ;;  %v2566_v35 = vld [vmem:[%s3268_s1 + $0xc0] sm:$0xff]  ;;  %v2491_v36 = vld [vmem:[%s2831_s8 + $0xc] sm:$0xf] }
  0x17   : > { %1451 = vmatpush.bf16.msra.mxu3 %v2571_v8  ;;  %v2597_v31 = vld [vmem:[%s3268_s1 + $0x1b8] sm:$0xff]  ;;  %v1888_v37 = vld [vmem:[%s2831_s8 + $0x3c] sm:$0xf0]  ;;  %v2556_v38 = vld [vmem:[%s3268_s1 + $0x70] sm:$0xff] }
  0x18   : > { %v2605_v39 = vld [vmem:[%s3268_s1 + $0x1f8] sm:$0xff]  ;;  %v2580_v40 = vld [vmem:[%s3268_s1 + $0x130] sm:$0xff]  ;;  %v1891_v42 = vor.u32 %v2491_v36, %v1888_v37  ;;  %v2555_v43 = vld [vmem:[%s3268_s1 + $0x68] sm:$0xff] }
  0x19   : > { %2668 = vmatpush.bf16.msra.mxu1 %v2546_v9  ;;  %1365 = vmatpush.bf16.msra.mxu0 %v2546_v9  ;;  %v2596_v41 = vld [vmem:[%s3268_s1 + $0x1b0] sm:$0xff]  ;;  %v2579_v45 = vld [vmem:[%s3268_s1 + $0x128] sm:$0xff]  ;;  %v2554_v47 = vld [vmem:[%s3268_s1 + $0x60] sm:$0xff] }
  0x1a   : > { %1423 = vmatpush.bf16.msra.mxu2 %v2562_v10  ;;  %v2604_v44 = vld [vmem:[%s3268_s1 + $0x1f0] sm:$0xff]  ;;  %v2595_v46 = vld [vmem:[%s3268_s1 + $0x1a8] sm:$0xff]  ;;  %v2578_v49 = vld [vmem:[%s3268_s1 + $0x120] sm:$0xff] }
  0x1b   : > { %1452 = vmatpush.bf16.msra.mxu3 %v2570_v11  ;;  %v2603_v48 = vld [vmem:[%s3268_s1 + $0x1e8] sm:$0xff]  ;;  %v2594_v50 = vld [vmem:[%s3268_s1 + $0x1a0] sm:$0xff]  ;;  %v2034_v51 = vld [vmem:[%s2831_s8 + $0x138] sm:$0xf] }
  0x1c   : > { %v2535_v52 = vld [vmem:[%s2831_s8 + $0x168] sm:$0xf0]  ;;  %v1930_v53 = vld [vmem:[%s2831_s8 + $0x68] sm:$0xf]  ;;  %v2509_v54 = vld [vmem:[%s2831_s8 + $0x98] sm:$0xf0] }
  0x1d   : > { %2669 = vmatpush.bf16.msra.mxu1 %v2545_v12  ;;  %1366 = vmatpush.bf16.msra.mxu0 %v2545_v12  ;;  %v2553_v55 = vld [vmem:[%s3268_s1 + $0x58] sm:$0xff]  ;;  %v1938_v56 = vld [vmem:[%s2831_s8 + $0x70] sm:$0xf]  ;;  %v2510_v57 = vld [vmem:[%s2831_s8 + $0xa0] sm:$0xf0]  ;;  %v2035_v59 = vor.u32 %v2535_v52, %v2034_v51  ;;  %v1931_v60 = vor.u32 %v2509_v54, %v1930_v53 }
  0x1e   : > { %1424 = vmatpush.bf16.msra.mxu2 %v2561_v13  ;;  %v2577_v58 = vld [vmem:[%s3268_s1 + $0x118] sm:$0xff]  ;;  %v1939_v61 = vor.u32 %v2510_v57, %v1938_v56  ;;  %v2504_v62 = vld [vmem:[%s2831_s8 + $0x74] sm:$0xf]  ;;  %v1940_v63 = vld [vmem:[%s2831_s8 + $0xa4] sm:$0xf0] }
  0x1f   : > { %1453 = vmatpush.bf16.msra.mxu3 %v2569_v14  ;;  %v2552_v0 = vld [vmem:[%s3268_s1 + $0x50] sm:$0xff]  ;;  %v1943_v2 = vor.u32 %v2504_v62, %v1940_v63  ;;  %v2593_v3 = vld [vmem:[%s3268_s1 + $0x198] sm:$0xff]  ;;  %v2551_v4 = vld [vmem:[%s3268_s1 + $0x48] sm:$0xff] }
  0x20   : > { %v2576_v1 = vld [vmem:[%s3268_s1 + $0x110] sm:$0xff]  ;;  %v2602_v5 = vld [vmem:[%s3268_s1 + $0x1e0] sm:$0xff]  ;;  %v2575_v6 = vld [vmem:[%s3268_s1 + $0x108] sm:$0xff] }
  0x21   : > { %2670 = vmatpush.bf16.msra.mxu1 %v2544_v15  ;;  %1367 = vmatpush.bf16.msra.mxu0 %v2544_v15  ;;  %v2592_v7 = vld [vmem:[%s3268_s1 + $0x190] sm:$0xff]  ;;  %v2601_v8 = vld [vmem:[%s3268_s1 + $0x1d8] sm:$0xff]  ;;  %v2550_v9 = vld [vmem:[%s3268_s1 + $0x40] sm:$0xff] }
  0x22   : > { %1425 = vmatpush.bf16.msra.mxu2 %v2560_v16  ;;  %v2589_v10 = vld [vmem:[%s3268_s1 + $0x178] sm:$0xff]  ;;  %v2574_v11 = vld [vmem:[%s3268_s1 + $0x100] sm:$0xff]  ;;  %v1894_v15 = vld [vmem:[%s2831_s8 + $0x10] sm:$0xf] }
  0x23   : > { %1454 = vmatpush.bf16.msra.mxu3 %v2568_v17  ;;  %v2490_v12 = vld [vmem:[%s2831_s8 + $0x4] sm:$0xf]  ;;  %v2613_v13 = vld [vmem:[%s3268_s1 + $0x238] sm:$0xff]  ;;  %v1992_v24 = vld [vmem:[%s2831_s8 + $0x10c] sm:$0xf0] }
  0x24   : > { %v1880_v14 = vld [vmem:[%s2831_s8 + $0x34] sm:$0xf0]  ;;  %v2498_v16 = vld [vmem:[%s2831_s8 + $0x40] sm:$0xf0]  ;;  %v2612_v25 = vld [vmem:[%s3268_s1 + $0x230] sm:$0xff] }
  0x25   : > { %2671 = vmatpush.bf16.msra.mxu1 %v2543_v18  ;;  %1368 = vmatpush.bf16.msra.mxu0 %v2543_v18  ;;  %v1990_v17 = vld [vmem:[%s2831_s8 + $0xd8] sm:$0xf]  ;;  %v2523_v18 = vld [vmem:[%s2831_s8 + $0x108] sm:$0xf0]  ;;  %v1895_v21 = vor.u32 %v2498_v16, %v1894_v15  ;;  %v2590_v29 = vld [vmem:[%s3268_s1 + $0x180] sm:$0xff] }
  0x26   : > { %1426 = vmatpush.bf16.msra.mxu2 %v2559_v19  ;;  %v2588_v19 = vld [vmem:[%s3268_s1 + $0x170] sm:$0xff]  ;;  %v2587_v26 = vld [vmem:[%s3268_s1 + $0x168] sm:$0xff]  ;;  %v1932_v37 = vld [vmem:[%s2831_s8 + $0x9c] sm:$0xf0] }
  0x27   : > { %1455 = vmatpush.bf16.msra.mxu3 %v2567_v23  ;;  %v2517_v23 = vld [vmem:[%s2831_s8 + $0xdc] sm:$0xf]  ;;  %v2503_v36 = vld [vmem:[%s2831_s8 + $0x6c] sm:$0xf]  ;;  %v2598_v51 = vld [vmem:[%s3268_s1 + $0x1c0] sm:$0xff] }
  0x28   : > { %v1995_v28 = vor.u32 %v2517_v23, %v1992_v24  ;;  %v2609_v52 = vld [vmem:[%s3268_s1 + $0x218] sm:$0xff]  ;;  %v2582_v53 = vld [vmem:[%s3268_s1 + $0x140] sm:$0xff]  ;;  %v2628_v54 = vld [vmem:[%s3268_s1 + $0x2b0] sm:$0xff] }
  0x29   : > { %2672 = vmatpush.bf16.msra.mxu1 %v2542_v20  ;;  %1369 = vmatpush.bf16.msra.mxu0 %v2542_v20  ;;  %v1883_v20 = vor.u32 %v2490_v12, %v1880_v14  ;;  %v2637_v56 = vld [vmem:[%s3268_s1 + $0x2f8] sm:$0xff]  ;;  %v2516_v57 = vld [vmem:[%s2831_s8 + $0xd4] sm:$0xf]  ;;  %v2499_v63 = vld [vmem:[%s2831_s8 + $0x48] sm:$0xf0] }
  0x2a   : > { %1427 = vmatpush.bf16.msra.mxu2 %v2558_v27  ;;  %v2591_v27 = vld [vmem:[%s3268_s1 + $0x188] sm:$0xff]  ;;  %v1902_v62 = vld [vmem:[%s2831_s8 + $0x18] sm:$0xf]  ;;  %v2036_v14 = vld [vmem:[%s2831_s8 + $0x16c] sm:$0xf0] }
  0x2b   : > { %1456 = vmatpush.bf16.msra.mxu3 %v2566_v35  ;;  %v2585_v35 = vld [vmem:[%s3268_s1 + $0x158] sm:$0xff]  ;;  %v2635_v12 = vld [vmem:[%s3268_s1 + $0x2e8] sm:$0xff] }
  0x2c   : > { %1380 = vmatmul.bf16.vlgmr.msra.gmra.mxu1 %v1983_v32  ;;  %1370 = vmatmul.bf16.vlgmr.msra.gmra.mxu0 %v1879_v33  ;;  %v2586_v32 = vld [vmem:[%s3268_s1 + $0x160] sm:$0xff]  ;;  %v2599_v33 = vld [vmem:[%s3268_s1 + $0x1c8] sm:$0xff]  ;;  %v2537_v16 = vld [vmem:[%s2831_s8 + $0x178] sm:$0xf0] }
  0x2d   : > { %1391 = vmatpush.bf16.msrb.mxu1 %v2557_v22  ;;  %1478 = vmatpush.bf16.msrb.mxu0 %v2581_v30  ;;  %v1991_v22 = vor.u32 %v2523_v18, %v1990_v17  ;;  %v2600_v30 = vld [vmem:[%s3268_s1 + $0x1d0] sm:$0xff]  ;;  %v2050_v15 = vld [vmem:[%s2831_s8 + $0x148] sm:$0xf]  ;;  %v1954_v17 = vld [vmem:[%s2831_s8 + $0x80] sm:$0xf] }
  0x2e   : > { %1536 = vmatpush.bf16.msrb.mxu2 %v2597_v31  ;;  %1457 = vmatmul.bf16.vlgmr.msra.gmra.mxu3 %v1891_v42  ;;  %v2611_v31 = vld [vmem:[%s3268_s1 + $0x228] sm:$0xff]  ;;  %v2584_v42 = vld [vmem:[%s3268_s1 + $0x150] sm:$0xff]  ;;  %v1956_v23 = vld [vmem:[%s2831_s8 + $0xb4] sm:$0xf0] }
  0x2f   : > { %1428 = vmatmul.bf16.vlgmr.msra.gmra.mxu2 %v1887_v34  ;;  %1565 = vmatpush.bf16.msrb.mxu3 %v2605_v39  ;;  %v2610_v34 = vld [vmem:[%s3268_s1 + $0x220] sm:$0xff]  ;;  %v2511_v39 = vld [vmem:[%s2831_s8 + $0xa8] sm:$0xf0]  ;;  %v2512_v18 = vld [vmem:[%s2831_s8 + $0xb0] sm:$0xf0] }
  0x31   : > { %1392 = vmatpush.bf16.msrb.mxu1 %v2556_v38  ;;  %1479 = vmatpush.bf16.msrb.mxu0 %v2580_v40  ;;  %v1946_v38 = vld [vmem:[%s2831_s8 + $0x78] sm:$0xf]  ;;  %v2042_v40 = vld [vmem:[%s2831_s8 + $0x140] sm:$0xf] }
  0x32   : > { %1537 = vmatpush.bf16.msrb.mxu2 %v2596_v41  ;;  %v2536_v41 = vld [vmem:[%s2831_s8 + $0x170] sm:$0xf0] }
  0x33   : > { %1566 = vmatpush.bf16.msrb.mxu3 %v2604_v44  ;;  %v1947_v44 = vor.u32 %v2511_v39, %v1946_v38 }
  0x35   : > { %1393 = vmatpush.bf16.msrb.mxu1 %v2555_v43  ;;  %1480 = vmatpush.bf16.msrb.mxu0 %v2579_v45  ;;  %v1935_v43 = vor.u32 %v2503_v36, %v1932_v37  ;;  %v2043_v45 = vor.u32 %v2536_v41, %v2042_v40  ;;  %v2525_v36 = vld [vmem:[%s2831_s8 + $0x118] sm:$0xf0]  ;;  %v2519_v40 = vld [vmem:[%s2831_s8 + $0xec] sm:$0xf]  ;;  %v2008_v41 = vld [vmem:[%s2831_s8 + $0x11c] sm:$0xf0] }
  0x36   : > { %1538 = vmatpush.bf16.msrb.mxu2 %v2595_v46  ;;  %v2530_v46 = vld [vmem:[%s2831_s8 + $0x144] sm:$0xf] }
  0x37   : > { %1567 = vmatpush.bf16.msrb.mxu3 %v2603_v48 }
  0x39   : > { %1394 = vmatpush.bf16.msrb.mxu1 %v2554_v47  ;;  %1481 = vmatpush.bf16.msrb.mxu0 %v2578_v49  ;;  %v2044_v47 = vld [vmem:[%s2831_s8 + $0x174] sm:$0xf0]  ;;  %v2583_v49 = vld [vmem:[%s3268_s1 + $0x148] sm:$0xff] }
  0x3a   : > { %1539 = vmatpush.bf16.msrb.mxu2 %v2594_v50  ;;  %v2047_v48 = vor.u32 %v2530_v46, %v2044_v47  ;;  %v2629_v50 = vld [vmem:[%s3268_s1 + $0x2b8] sm:$0xff]  ;;  %v2622_v46 = vld [vmem:[%s3268_s1 + $0x280] sm:$0xff]  ;;  %v2632_v47 = vld [vmem:[%s3268_s1 + $0x2d0] sm:$0xff] }
  0x3b   : > { %1568 = vmatpush.bf16.msrb.mxu3 %v2602_v5 }
  0x3c   : > { %1385 = vmatmul.bf16.gmra.mxu1 %v2035_v59  ;;  %1375 = vmatmul.bf16.gmra.mxu0 %v1931_v60  ;;  %v1984_v59 = vld [vmem:[%s2831_s8 + $0x104] sm:$0xf0]  ;;  %v1998_v60 = vld [vmem:[%s2831_s8 + $0xe0] sm:$0xf] }
  0x3d   : > { %1395 = vmatpush.bf16.msrb.mxu1 %v2553_v55  ;;  %1482 = vmatpush.bf16.msrb.mxu0 %v2577_v58  ;;  %v2608_v55 = vld [vmem:[%s3268_s1 + $0x210] sm:$0xff]  ;;  %v2607_v58 = vld [vmem:[%s3268_s1 + $0x208] sm:$0xff] }
  0x3e   : > { %1540 = vmatpush.bf16.msrb.mxu2 %v2593_v3  ;;  %1462 = vmatmul.bf16.gmra.mxu3 %v1943_v2  ;;  %v1903_v2 = vor.u32 %v2499_v63, %v1902_v62  ;;  %v2493_v3 = vld [vmem:[%s2831_s8 + $0x1c] sm:$0xf]  ;;  %v2615_v63 = vld [vmem:[%s3268_s1 + $0x248] sm:$0xff] }
  0x3f   : > { %1433 = vmatmul.bf16.gmra.mxu2 %v1939_v61  ;;  %1569 = vmatpush.bf16.msrb.mxu3 %v2601_v8  ;;  %v2524_v61 = vld [vmem:[%s2831_s8 + $0x110] sm:$0xf0]  ;;  %v2606_v8 = vld [vmem:[%s3268_s1 + $0x200] sm:$0xff] }
  0x41   : > { %1396 = vmatpush.bf16.msrb.mxu1 %v2552_v0  ;;  %1483 = vmatpush.bf16.msrb.mxu0 %v2576_v1  ;;  %v1987_v0 = vor.u32 %v2516_v57, %v1984_v59  ;;  %v1999_v1 = vor.u32 %v2524_v61, %v1998_v60  ;;  %v2532_v59 = vld [vmem:[%s2831_s8 + $0x154] sm:$0xf]  ;;  %v2060_v60 = vld [vmem:[%s2831_s8 + $0x184] sm:$0xf0] }
  0x42   : > { %1541 = vmatpush.bf16.msrb.mxu2 %v2592_v7  ;;  %v2627_v7 = vld [vmem:[%s3268_s1 + $0x2a8] sm:$0xff]  ;;  %v2063_v62 = vor.u32 %v2532_v59, %v2060_v60 }
  0x43   : > { %1570 = vmatpush.bf16.msrb.mxu3 %v2600_v30  ;;  %v2624_v30 = vld [vmem:[%s3268_s1 + $0x290] sm:$0xff]  ;;  %v2631_v61 = vld [vmem:[%s3268_s1 + $0x2c8] sm:$0xff] }
  0x45   : > { %1397 = vmatpush.bf16.msrb.mxu1 %v2551_v4  ;;  %1484 = vmatpush.bf16.msrb.mxu0 %v2575_v6  ;;  %v1904_v4 = vld [vmem:[%s2831_s8 + $0x4c] sm:$0xf0]  ;;  %v2621_v6 = vld [vmem:[%s3268_s1 + $0x278] sm:$0xff] }
  0x46   : > { %1542 = vmatpush.bf16.msrb.mxu2 %v2591_v27  ;;  %v1907_v5 = vor.u32 %v2493_v3, %v1904_v4  ;;  %v2634_v27 = vld [vmem:[%s3268_s1 + $0x2e0] sm:$0xff]  ;;  %v2000_v4 = vld [vmem:[%s2831_s8 + $0x114] sm:$0xf0] }
  0x47   : > { %1571 = vmatpush.bf16.msrb.mxu3 %v2599_v33  ;;  %v1910_v33 = vld [vmem:[%s2831_s8 + $0x20] sm:$0xf]  ;;  %v2518_v3 = vld [vmem:[%s2831_s8 + $0xe4] sm:$0xf] }
  0x49   : > { %1398 = vmatpush.bf16.msrb.mxu1 %v2550_v9  ;;  %1485 = vmatpush.bf16.msrb.mxu0 %v2574_v11  ;;  %v2636_v9 = vld [vmem:[%s3268_s1 + $0x2f0] sm:$0xff]  ;;  %v2626_v11 = vld [vmem:[%s3268_s1 + $0x2a0] sm:$0xff] }
  0x4a   : > { %1543 = vmatpush.bf16.msrb.mxu2 %v2590_v29  ;;  %v2618_v29 = vld [vmem:[%s3268_s1 + $0x260] sm:$0xff] }
  0x4b   : > { %1572 = vmatpush.bf16.msrb.mxu3 %v2598_v51  ;;  %v1948_v51 = vld [vmem:[%s2831_s8 + $0xac] sm:$0xf0] }
  0x4c   : > { %1399 = vmatmul.bf16.vlgmr.msrb.gmra.mxu1 %v1883_v20  ;;  %1486 = vmatmul.bf16.vlgmr.msrb.gmra.mxu0 %v1895_v21  ;;  %v2051_v20 = vor.u32 %v2537_v16, %v2050_v15  ;;  %v1955_v21 = vor.u32 %v2512_v18, %v1954_v17  ;;  %v1920_v15 = vld [vmem:[%s2831_s8 + $0x5c] sm:$0xf0] }
  0x4d   : > { %1507 = vmatpush.bf16.msra.mxu1 %v2589_v10  ;;  %1594 = vmatpush.bf16.msra.mxu0 %v2613_v13  ;;  %v2620_v10 = vld [vmem:[%s3268_s1 + $0x270] sm:$0xff]  ;;  %v2529_v13 = vld [vmem:[%s2831_s8 + $0x13c] sm:$0xf]  ;;  %v2638_v17 = vld [vmem:[%s3268_s1 + $0x300] sm:$0xff] }
  0x4e   : > { %1467 = vmatmul.bf16.gmra.mxu3 %v1995_v28  ;;  %1652 = vmatpush.bf16.msra.mxu2 %v2629_v50  ;;  %v2641_v28 = vld [vmem:[%s3268_s1 + $0x318] sm:$0xff] }
  0x4f   : > { %1438 = vmatmul.bf16.gmra.mxu2 %v1991_v22  ;;  %1681 = vmatpush.bf16.msra.mxu3 %v2637_v56  ;;  %v2506_v22 = vld [vmem:[%s2831_s8 + $0x84] sm:$0xf]  ;;  %v2505_v50 = vld [vmem:[%s2831_s8 + $0x7c] sm:$0xf] }
  0x50   : > { %v1959_v24 = vor.u32 %v2506_v22, %v1956_v23  ;;  %v1951_v56 = vor.u32 %v2505_v50, %v1948_v51  ;;  %v2531_v22 = vld [vmem:[%s2831_s8 + $0x14c] sm:$0xf]  ;;  %v2052_v23 = vld [vmem:[%s2831_s8 + $0x17c] sm:$0xf0] }
  0x51   : > { %1508 = vmatpush.bf16.msra.mxu1 %v2588_v19  ;;  %1595 = vmatpush.bf16.msra.mxu0 %v2612_v25  ;;  %v2039_v19 = vor.u32 %v2529_v13, %v2036_v14  ;;  %v2619_v25 = vld [vmem:[%s3268_s1 + $0x268] sm:$0xff] }
  0x52   : > { %1653 = vmatpush.bf16.msra.mxu2 %v2628_v54  ;;  %v2058_v54 = vld [vmem:[%s2831_s8 + $0x150] sm:$0xf]  ;;  %v2495_v14 = vld [vmem:[%s2831_s8 + $0x2c] sm:$0xf] }
  0x53   : > { %1682 = vmatpush.bf16.msra.mxu3 %v2636_v9  ;;  %v2003_v9 = vor.u32 %v2518_v3, %v2000_v4  ;;  %v1923_v16 = vor.u32 %v2495_v14, %v1920_v15  ;;  %v2540_v14 = vld [vmem:[%s2831_s8 + $0x190] sm:$0xf0] }
  0x55   : > { %1509 = vmatpush.bf16.msra.mxu1 %v2587_v26  ;;  %1596 = vmatpush.bf16.msra.mxu0 %v2611_v31  ;;  %v2625_v26 = vld [vmem:[%s3268_s1 + $0x298] sm:$0xff]  ;;  %v2492_v31 = vld [vmem:[%s2831_s8 + $0x14] sm:$0xf] }
  0x56   : > { %1654 = vmatpush.bf16.msra.mxu2 %v2627_v7  ;;  %v1918_v7 = vld [vmem:[%s2831_s8 + $0x28] sm:$0xf] }
  0x57   : > { %1683 = vmatpush.bf16.msra.mxu3 %v2635_v12 }
  0x59   : > { %1510 = vmatpush.bf16.msra.mxu1 %v2586_v32  ;;  %1597 = vmatpush.bf16.msra.mxu0 %v2610_v34  ;;  %v1896_v32 = vld [vmem:[%s2831_s8 + $0x44] sm:$0xf0]  ;;  %v2500_v34 = vld [vmem:[%s2831_s8 + $0x50] sm:$0xf0] }
  0x5a   : > { %1655 = vmatpush.bf16.msra.mxu2 %v2626_v11  ;;  %v1899_v37 = vor.u32 %v2492_v31, %v1896_v32  ;;  %v1911_v38 = vor.u32 %v2500_v34, %v1910_v33  ;;  %v2508_v34 = vld [vmem:[%s2831_s8 + $0x94] sm:$0xf] }
  0x5b   : > { %1684 = vmatpush.bf16.msra.mxu3 %v2634_v27  ;;  %v2514_v27 = vld [vmem:[%s2831_s8 + $0xc0] sm:$0xf0] }
  0x5c   : > { %1404 = vmatmul.bf16.gmra.mxu1 %v1935_v43  ;;  %1491 = vmatmul.bf16.gmra.mxu0 %v1947_v44  ;;  %v2623_v43 = vld [vmem:[%s3268_s1 + $0x288] sm:$0xff]  ;;  %v2011_v44 = vor.u32 %v2519_v40, %v2008_v41 }
  0x5d   : > { %1511 = vmatpush.bf16.msra.mxu1 %v2585_v35  ;;  %1598 = vmatpush.bf16.msra.mxu0 %v2609_v52  ;;  %v2006_v35 = vld [vmem:[%s2831_s8 + $0xe8] sm:$0xf] }
  0x5e   : > { %1472 = vmatmul.bf16.gmra.mxu3 %v2047_v48  ;;  %1656 = vmatpush.bf16.msra.mxu2 %v2625_v26  ;;  %v2007_v39 = vor.u32 %v2525_v36, %v2006_v35  ;;  %v2640_v48 = vld [vmem:[%s3268_s1 + $0x310] sm:$0xff]  ;;  %v1962_v52 = vld [vmem:[%s2831_s8 + $0x88] sm:$0xf] }
  0x5f   : > { %1443 = vmatmul.bf16.gmra.mxu2 %v2043_v45  ;;  %v2617_v45 = vld [vmem:[%s3268_s1 + $0x258] sm:$0xff]  ;;  %v1970_v26 = vld [vmem:[%s2831_s8 + $0x90] sm:$0xf]  ;;  %v1972_v35 = vld [vmem:[%s2831_s8 + $0xc4] sm:$0xf0] }
  0x60   : > { %v1971_v33 = vor.u32 %v2514_v27, %v1970_v26 }
  0x61   : > { %1512 = vmatpush.bf16.msra.mxu1 %v2584_v42  ;;  %1599 = vmatpush.bf16.msra.mxu0 %v2608_v55  ;;  %v2633_v42 = vld [vmem:[%s3268_s1 + $0x2d8] sm:$0xff]  ;;  %v2538_v55 = vld [vmem:[%s2831_s8 + $0x180] sm:$0xf0] }
  0x62   : > { %1657 = vmatpush.bf16.msra.mxu2 %v2624_v30  ;;  %1685 = vmatpush.bf16.msra.mxu3 %v2633_v42  ;;  %v2494_v42 = vld [vmem:[%s2831_s8 + $0x24] sm:$0xf] }
  0x65   : > { %1513 = vmatpush.bf16.msra.mxu1 %v2583_v49  ;;  %1600 = vmatpush.bf16.msra.mxu0 %v2607_v58  ;;  %v2616_v49 = vld [vmem:[%s3268_s1 + $0x250] sm:$0xff]  ;;  %v2059_v58 = vor.u32 %v2538_v55, %v2058_v54 }
  0x66   : > { %1658 = vmatpush.bf16.msra.mxu2 %v2623_v43  ;;  %1686 = vmatpush.bf16.msra.mxu3 %v2632_v47  ;;  %v1912_v43 = vld [vmem:[%s2831_s8 + $0x54] sm:$0xf0] }
  0x67   : > { %v2022_v47 = vld [vmem:[%s2831_s8 + $0xf8] sm:$0xf]  ;;  %v1915_v50 = vor.u32 %v2494_v42, %v1912_v43  ;;  %v2520_v43 = vld [vmem:[%s2831_s8 + $0xf4] sm:$0xf] }
  0x69   : > { %1514 = vmatpush.bf16.msra.mxu1 %v2582_v53  ;;  %1601 = vmatpush.bf16.msra.mxu0 %v2606_v8  ;;  %v2513_v53 = vld [vmem:[%s2831_s8 + $0xb8] sm:$0xf0] }
  0x6a   : > { %1659 = vmatpush.bf16.msra.mxu2 %v2622_v46  ;;  %v1963_v57 = vor.u32 %v2513_v53, %v1962_v52  ;;  %1687 = vmatpush.bf16.msra.mxu3 %v2631_v61  ;;  %v2501_v8 = vld [vmem:[%s2831_s8 + $0x58] sm:$0xf0]  ;;  %v3171_v46 = vld [vmem:[%s3269_s2] ss:$0 sm:$0xff] }
  0x6b   : > { %v1919_v13 = vor.u32 %v2501_v8, %v1918_v7  ;;  %v2507_v7 = vld [vmem:[%s2831_s8 + $0x8c] sm:$0xf]  ;;  %v1964_v8 = vld [vmem:[%s2831_s8 + $0xbc] sm:$0xf0] }
  0x6c   : > { %1409 = vmatmul.bf16.gmra.mxu1 %v1987_v0  ;;  %1496 = vmatmul.bf16.gmra.mxu0 %v1999_v1  ;;  %v2630_v0 = vld [vmem:[%s3268_s1 + $0x2c0] sm:$0xff]  ;;  %v2639_v1 = vld [vmem:[%s3268_s1 + $0x308] sm:$0xff] }
  0x6d   : > { %1623 = vmatpush.bf16.msrb.mxu1 %v2621_v6  ;;  %1714 = vmatpush.bf16.msrb.mxu0 %v2641_v28  ;;  %v2526_v6 = vld [vmem:[%s2831_s8 + $0x120] sm:$0xf0] }
  0x6e   : > { %1573 = vmatmul.bf16.vlgmr.msrb.gmra.mxu3 %v1907_v5  ;;  %v2014_v5 = vld [vmem:[%s2831_s8 + $0xf0] sm:$0xf] }
  0x6f   : > { %1544 = vmatmul.bf16.vlgmr.msrb.gmra.mxu2 %v1903_v2  ;;  %1688 = vmatpush.bf16.msra.mxu3 %v2630_v0  ;;  %v2614_v2 = vld [vmem:[%s3268_s1 + $0x240] sm:$0xff] }
  0x70   : > { %2673 = vmatpush.bf16.msrb.mxu2 %v2641_v28  ;;  %v2055_v28 = vor.u32 %v2531_v22, %v2052_v23 }
  0x71   : > { %1624 = vmatpush.bf16.msrb.mxu1 %v2620_v10  ;;  %1715 = vmatpush.bf16.msrb.mxu0 %v2640_v48  ;;  %v2015_v10 = vor.u32 %v2526_v6, %v2014_v5 }
  0x74   : > { %2674 = vmatpush.bf16.msrb.mxu2 %v2640_v48  ;;  %v2527_v48 = vld [vmem:[%s2831_s8 + $0x128] sm:$0xf0] }
  0x75   : > { %1625 = vmatpush.bf16.msrb.mxu1 %v2619_v25  ;;  %1716 = vmatpush.bf16.msrb.mxu0 %v2639_v1  ;;  %v2539_v25 = vld [vmem:[%s2831_s8 + $0x188] sm:$0xf0]  ;;  %v2023_v55 = vor.u32 %v2527_v48, %v2022_v47  ;;  %v2528_v47 = vld [vmem:[%s2831_s8 + $0x130] sm:$0xf0] }
  0x78   : > { %2675 = vmatpush.bf16.msrb.mxu2 %v2639_v1 }
  0x79   : > { %1626 = vmatpush.bf16.msrb.mxu1 %v2618_v29  ;;  %1717 = vmatpush.bf16.msrb.mxu0 %v2638_v17 }
  0x7c   : > { %1414 = vmatmul.bf16.gmra.mxu1 %v2039_v19  ;;  %1501 = vmatmul.bf16.gmra.mxu0 %v2051_v20 }
  0x7d   : > { %1627 = vmatpush.bf16.msrb.mxu1 %v2617_v45  ;;  %2676 = vmatpush.bf16.msrb.mxu2 %v2638_v17  ;;  %v2502_v45 = vld [vmem:[%s2831_s8 + $0x60] sm:$0xf0]  ;;  %v1967_v17 = vor.u32 %v2507_v7, %v1964_v8  ;;  %v2533_v7 = vld [vmem:[%s2831_s8 + $0x15c] sm:$0xf]  ;;  %v2068_v8 = vld [vmem:[%s2831_s8 + $0x18c] sm:$0xf0] }
  0x7e   : > { %1578 = vmatmul.bf16.gmra.mxu3 %v1959_v24  ;;  %v2066_v24 = vld [vmem:[%s2831_s8 + $0x158] sm:$0xf] }
  0x7f   : > { %1549 = vmatmul.bf16.gmra.mxu2 %v1955_v21  ;;  %v2067_v30 = vor.u32 %v2539_v25, %v2066_v24  ;;  %v2534_v24 = vld [vmem:[%s2831_s8 + $0x164] sm:$0xf]  ;;  %v2076_v25 = vld [vmem:[%s2831_s8 + $0x194] sm:$0xf0] }
  0x81   : > { %1628 = vmatpush.bf16.msrb.mxu1 %v2616_v49 }
  0x85   : > { %1629 = vmatpush.bf16.msrb.mxu1 %v2615_v63 }
  0x89   : > { %1630 = vmatpush.bf16.msrb.mxu1 %v2614_v2 }
  0x8c   : > { %1515 = vmatmul.bf16.vlgmr.msra.gmra.mxu1 %v1899_v37  ;;  %1602 = vmatmul.bf16.vlgmr.msra.gmra.mxu0 %v1911_v38  ;;  %v1975_v37 = vor.u32 %v2508_v34, %v1972_v35 }
  0x8e   : > { %1583 = vmatmul.bf16.gmra.mxu3 %v2011_v44  ;;  %v1926_v44 = vld [vmem:[%s2831_s8 + $0x30] sm:$0xf] }
  0x8f   : > { %1554 = vmatmul.bf16.gmra.mxu2 %v2007_v39  ;;  %v1927_v52 = vor.u32 %v2502_v45, %v1926_v44  ;;  %v2016_v44 = vld [vmem:[%s2831_s8 + $0x124] sm:$0xf0]  ;;  %v2030_v45 = vld [vmem:[%s2831_s8 + $0x100] sm:$0xf] }
  0x9c   : > { %1520 = vmatmul.bf16.gmra.mxu1 %v1951_v56  ;;  %1607 = vmatmul.bf16.gmra.mxu0 %v1963_v57  ;;  %v2521_v56 = vld [vmem:[%s2831_s8 + $0xfc] sm:$0xf]  ;;  %v2024_v57 = vld [vmem:[%s2831_s8 + $0x12c] sm:$0xf0] }
  0x9d   : > { %v2027_v61 = vor.u32 %v2521_v56, %v2024_v57 }
  0x9e   : > { %1588 = vmatmul.bf16.gmra.mxu3 %v2063_v62 }
  0x9f   : > { %1559 = vmatmul.bf16.gmra.mxu2 %v2059_v58 }
  0xa9   : > { %v3143_v11 = vpop.f32.mrf.mxu1  ;;  %v1371_v12 = vpop.f32.mrf.mxu0 }
  0xaa   : > { %v1372_v49 = vadd.f32 %v3171_v46, %v1371_v12 }
  0xac   : > { %1525 = vmatmul.bf16.gmra.mxu1 %v2003_v9  ;;  %1612 = vmatmul.bf16.gmra.mxu0 %v2015_v10  ;;  %v1978_v9 = vld [vmem:[%s2831_s8 + $0x98] sm:$0xf]  ;;  %v2515_v10 = vld [vmem:[%s2831_s8 + $0xc8] sm:$0xf0] }
  0xae   : > { %1689 = vmatmul.bf16.vlgmr.msra.gmra.mxu3 %v1923_v16 }
  0xaf   : > { %1660 = vmatmul.bf16.vlgmr.msra.gmra.mxu2 %v1919_v13  ;;  %v2074_v13 = vld [vmem:[%s2831_s8 + $0x160] sm:$0xf] }
  0xb0   : > { %v2075_v23 = vor.u32 %v2540_v14, %v2074_v13 }
  0xb1   : > { %v3150_v19 = vpop.f32.mrf.mxu1  ;;  %v1373_v20 = vpop.f32.mrf.mxu0 }
  0xb2   : > { %v1429_v18 = vpop.f32.mrf.mxu2  ;;  %v1458_v21 = vpop.f32.mrf.mxu3  ;;  %v1374_v63 = vadd.f32 %v3171_v46, %v1373_v20  ;;  %v1979_v20 = vor.u32 %v2515_v10, %v1978_v9 }
  0xb9   : > { %v3158_v31 = vpop.f32.mrf.mxu1  ;;  %v1376_v32 = vpop.f32.mrf.mxu0 }
  0xba   : > { %v1431_v29 = vpop.f32.mrf.mxu2  ;;  %v1460_v36 = vpop.f32.mrf.mxu3  ;;  %v1377_v15 = vadd.f32 %v3171_v46, %v1376_v32 }
  0xbc   : > { %1530 = vmatmul.bf16.gmra.mxu1 %v2055_v28  ;;  %1617 = vmatmul.bf16.gmra.mxu0 %v2067_v30 }
  0xbe   : > { %1694 = vmatmul.bf16.gmra.mxu3 %v1975_v37 }
  0xbf   : > { %1665 = vmatmul.bf16.gmra.mxu2 %v1971_v33 }
  0xc1   : > { %v3162_v39 = vpop.f32.mrf.mxu1  ;;  %v1378_v40 = vpop.f32.mrf.mxu0 }
  0xc2   : > { %v1434_v38 = vpop.f32.mrf.mxu2  ;;  %v1463_v41 = vpop.f32.mrf.mxu3  ;;  %v1379_v32 = vadd.f32 %v3171_v46, %v1378_v40 }
  0xc9   : > { %v1400_v53 = vpop.f32.mrf.mxu1  ;;  %v1487_v54 = vpop.f32.mrf.mxu0 }
  0xca   : > { %v1436_v51 = vpop.f32.mrf.mxu2  ;;  %v1401_v58 = vadd.f32 %v1400_v53, %v1372_v49  ;;  %v1465_v59 = vpop.f32.mrf.mxu3  ;;  %v2082_v49 = vld [vmem:[%s2831_s8 + $0x168] sm:$0xf] }
  0xcc   : > { %v1430_v60 = vadd.f32 %v1429_v18, %v1401_v58  ;;  %1631 = vmatmul.bf16.vlgmr.msrb.gmra.mxu1 %v1915_v50  ;;  %2484 = vmatmul.msk.bf16.vlgmr.msrb.gmra.mxu0 %vm1349_vm0, %v1927_v52  ;;  %v2541_v50 = vld [vmem:[%s2831_s8 + $0x198] sm:$0xf0]  ;;  %v2019_v52 = vor.u32 %v2520_v43, %v2016_v44  ;;  %s1875_s8 = sshll.u32 %s3276_s5, 2 }
  0xcd   : > { %v2083_v57 = vor.u32 %v2541_v50, %v2082_v49  ;;  %s3244_s24 = scalar_lea.vmem %s3270_s3, %s1875_s8 }
  0xce   : > { %v1459_v62 = vadd.f32 %v1458_v21, %v1430_v60  ;;  %1699 = vmatmul.bf16.gmra.mxu3 %v2027_v61 }
  0xcf   : > { %1670 = vmatmul.bf16.gmra.mxu2 %v2023_v55 }
  0xd0   : > { %v3180_v0 = vadd.f32 %v1487_v54, %v1459_v62  ;;  %v2031_v54 = vor.u32 %v2528_v47, %v2030_v45 }
  0xd1   : > { %v1402_v2 = vpop.f32.mrf.mxu1  ;;  %v1489_v3 = vpop.f32.mrf.mxu0 }
  0xd2   : > { %v1439_v1 = vpop.f32.mrf.mxu2  ;;  %v1403_v4 = vadd.f32 %v1402_v2, %v1374_v63  ;;  %v1468_v5 = vpop.f32.mrf.mxu3 }
  0xd4   : > { %v1432_v6 = vadd.f32 %v1431_v29, %v1403_v4  ;;  %v2079_v29 = vor.u32 %v2534_v24, %v2076_v25 }
  0xd6   : > { %v1461_v12 = vadd.f32 %v1460_v36, %v1432_v6 }
  0xd8   : > { %v3189_v16 = vadd.f32 %v1489_v3, %v1461_v12  ;;  %v2071_v12 = vor.u32 %v2533_v7, %v2068_v8 }
  0xd9   : > { %v1405_v21 = vpop.f32.mrf.mxu1  ;;  %v1492_v22 = vpop.f32.mrf.mxu0 }
  0xda   : > { %v1441_v18 = vpop.f32.mrf.mxu2  ;;  %v1406_v26 = vadd.f32 %v1405_v21, %v1377_v15  ;;  %v1470_v27 = vpop.f32.mrf.mxu3 }
  0xdc   : > { %v1435_v28 = vadd.f32 %v1434_v38, %v1406_v26  ;;  %1636 = vmatmul.bf16.gmra.mxu1 %v1967_v17  ;;  %2485 = vmatmul.msk.bf16.gmra.mxu0 %vm1349_vm0, %v1979_v20 }
  0xde   : > { %v1464_v30 = vadd.f32 %v1463_v41, %v1435_v28  ;;  %1704 = vmatmul.bf16.gmra.mxu3 %v2079_v29  ;;  %v1382_v41 = vadd.f32 %v3171_v46, %v3143_v11  ;;  %v1384_v11 = vadd.f32 %v3171_v46, %v3150_v19 }
  0xdf   : > { %1675 = vmatmul.bf16.gmra.mxu2 %v2075_v23 }
  0xe0   : > { %v3195_v33 = vadd.f32 %v1492_v22, %v1464_v30 }
  0xe1   : > { %v1407_v35 = vpop.f32.mrf.mxu1  ;;  %v1494_v36 = vpop.f32.mrf.mxu0 }
  0xe2   : > { %v1444_v34 = vpop.f32.mrf.mxu2  ;;  %v1408_v37 = vadd.f32 %v1407_v35, %v1379_v32  ;;  %v1473_v38 = vpop.f32.mrf.mxu3 }
  0xe4   : > { %v1437_v42 = vadd.f32 %v1436_v51, %v1408_v37 }
  0xe6   : > { %v1466_v48 = vadd.f32 %v1465_v59, %v1437_v42 }
  0xe8   : > { %v3205_v40 = vadd.f32 %v1494_v36, %v1466_v48 }
  0xe9   : > { %v1410_v55 = vpop.f32.mrf.mxu1  ;;  %v1497_v56 = vpop.f32.mrf.mxu0 }
  0xea   : > { %v1446_v53 = vpop.f32.mrf.mxu2  ;;  %v1411_v51 = vadd.f32 %v1410_v55, %v1382_v41  ;;  %v1475_v58 = vpop.f32.mrf.mxu3 }
  0xec   : > { %v1440_v60 = vadd.f32 %v1439_v1, %v1411_v51  ;;  %1641 = vmatmul.bf16.gmra.mxu1 %v2019_v52  ;;  %2486 = vmatmul.msk.bf16.gmra.mxu0 %vm1349_vm0, %v2031_v54  ;;  %v1387_v1 = vadd.f32 %v3171_v46, %v3158_v31 }
  0xee   : > { %v1469_v59 = vadd.f32 %v1468_v5, %v1440_v60 }
  0xef   : > { %2487 = vmatmul.msk.bf16.vlgmr.msrb.gmra.mxu2 %vm1349_vm0, %v2083_v57 }
  0xf0   : > { %v1498_v61 = vadd.f32 %v1497_v56, %v1469_v59 }
  0xf1   : > { %v1412_v63 = vpop.f32.mrf.mxu1  ;;  %v1499_v2 = vpop.f32.mrf.mxu0 }
  0xf2   : > { %v1545_v62 = vpop.f32.mrf.mxu2  ;;  %v1413_v3 = vadd.f32 %v1412_v63, %v1384_v11  ;;  %v1574_v4 = vpop.f32.mrf.mxu3 }
  0xf4   : > { %v1442_v6 = vadd.f32 %v1441_v18, %v1413_v3  ;;  %v1389_v18 = vadd.f32 %v3171_v46, %v3162_v39 }
  0xf6   : > { %v1471_v9 = vadd.f32 %v1470_v27, %v1442_v6 }
  0xf8   : > { %v1500_v10 = vadd.f32 %v1499_v2, %v1471_v9 }
  0xf9   : > { %v1415_v5 = vpop.f32.mrf.mxu1  ;;  %v1502_v14 = vpop.f32.mrf.mxu0 }
  0xfa   : > { %v1547_v13 = vpop.f32.mrf.mxu2  ;;  %v1416_v15 = vadd.f32 %v1415_v5, %v1387_v1  ;;  %v3215_v19 = vpop.f32.mrf.mxu3 }
  0xfc   : > { %v1445_v17 = vadd.f32 %v1444_v34, %v1416_v15  ;;  %1646 = vmatmul.bf16.gmra.mxu1 %v2071_v12 }
  0xfe   : > { %v1474_v20 = vadd.f32 %v1473_v38, %v1445_v17 }
 0x100   : > { %v1503_v21 = vadd.f32 %v1502_v14, %v1474_v20 }
 0x101   : > { %v1417_v23 = vpop.f32.mrf.mxu1  ;;  %v1504_v24 = vpop.f32.mrf.mxu0 }
 0x102   : > { %v1550_v22 = vpop.f32.mrf.mxu2  ;;  %v1418_v25 = vadd.f32 %v1417_v23, %v1389_v18  ;;  %v1579_v31 = vpop.f32.mrf.mxu3 }
 0x104   : > { %v1447_v26 = vadd.f32 %v1446_v53, %v1418_v25 }
 0x106   : > { %v1476_v27 = vadd.f32 %v1475_v58, %v1447_v26 }
 0x108   : > { %v1505_v28 = vadd.f32 %v1504_v24, %v1476_v27 }
 0x109   : > { %v1516_v30 = vpop.f32.mrf.mxu1  ;;  %v1603_v32 = vpop.f32.mrf.mxu0 }
 0x10a   : > { %v1552_v29 = vpop.f32.mrf.mxu2  ;;  %v1517_v35 = vadd.f32 %v1516_v30, %v3180_v0  ;;  %v3220_v36 = vpop.f32.mrf.mxu3 }
 0x10c   : > { %v1546_v34 = vadd.f32 %v1545_v62, %v1517_v35 }
 0x10e   : > { %v1575_v37 = vadd.f32 %v1574_v4, %v1546_v34 }
 0x110   : > { %v1604_v38 = vadd.f32 %v1603_v32, %v1575_v37 }
 0x111   : > { %v1518_v46 = vpop.f32.mrf.mxu1  ;;  %v1605_v42 = vpop.f32.mrf.mxu0 }
 0x112   : > { %v1555_v39 = vpop.f32.mrf.mxu2  ;;  %v1519_v43 = vadd.f32 %v1518_v46, %v3189_v16  ;;  %v1584_v45 = vpop.f32.mrf.mxu3 }
 0x114   : > { %v1548_v44 = vadd.f32 %v1547_v13, %v1519_v43 }
 0x119   : > { %v1521_v48 = vpop.f32.mrf.mxu1  ;;  %v1608_v49 = vpop.f32.mrf.mxu0 }
 0x11a   : > { %v1557_v47 = vpop.f32.mrf.mxu2  ;;  %v1522_v50 = vadd.f32 %v1521_v48, %v3195_v33  ;;  %v3224_v54 = vpop.f32.mrf.mxu3 }
 0x11c   : > { %v1551_v41 = vadd.f32 %v1550_v22, %v1522_v50 }
 0x11e   : > { %v1580_v52 = vadd.f32 %v1579_v31, %v1551_v41 }
 0x120   : > { %v1609_v0 = vadd.f32 %v1608_v49, %v1580_v52 }
 0x121   : > { %v1523_v55 = vpop.f32.mrf.mxu1  ;;  %v1610_v56 = vpop.f32.mrf.mxu0 }
 0x122   : > { %v1560_v53 = vpop.f32.mrf.mxu2  ;;  %v1524_v57 = vadd.f32 %v1523_v55, %v3205_v40  ;;  %v1589_v11 = vpop.f32.mrf.mxu3 }
 0x124   : > { %v1553_v51 = vadd.f32 %v1552_v29, %v1524_v57 }
 0x129   : > { %v1526_v16 = vpop.f32.mrf.mxu1  ;;  %v1613_v60 = vpop.f32.mrf.mxu0 }
 0x12a   : > { %v1562_v58 = vpop.f32.mrf.mxu2  ;;  %v1527_v59 = vadd.f32 %v1526_v16, %v1498_v61  ;;  %v3231_v8 = vpop.f32.mrf.mxu3 }
 0x12c   : > { %v1556_v62 = vadd.f32 %v1555_v39, %v1527_v59 }
 0x12e   : > { %v1585_v63 = vadd.f32 %v1584_v45, %v1556_v62 }
 0x130   : > { %v3227_v2 = vadd.f32 %v1613_v60, %v1585_v63 }
 0x131   : > { %v1528_v3 = vpop.f32.mrf.mxu1  ;;  %v3229_v4 = vpop.f32.mrf.mxu0 }
 0x132   : > { %v1661_v33 = vpop.f32.mrf.mxu2  ;;  %v1529_v6 = vadd.f32 %v1528_v3, %v1500_v10  ;;  %v1690_v61 = vpop.f32.mrf.mxu3 }
 0x134   : > { %v1558_v7 = vadd.f32 %v1557_v47, %v1529_v6 }
 0x136   : > { %v1587_v6 = vadd.f32 %v3224_v54, %v1558_v7 }
 0x139   : > { %v1531_v40 = vpop.f32.mrf.mxu1  ;;  %v1618_v1 = vpop.f32.mrf.mxu0 }
 0x13a   : > { %v1663_v9 = vpop.f32.mrf.mxu2  ;;  %v1532_v12 = vadd.f32 %v1531_v40, %v1503_v21  ;;  %v1692_v10 = vpop.f32.mrf.mxu3  ;;  %v1577_v21 = vadd.f32 %v3215_v19, %v1548_v44  ;;  %v1582_v19 = vadd.f32 %v3220_v36, %v1553_v51  ;;  %v1616_v40 = vadd.f32 %v3229_v4, %v1587_v6 }
 0x13c   : > { %v1561_v13 = vadd.f32 %v1560_v53, %v1532_v12  ;;  %v1606_v27 = vadd.f32 %v1605_v42, %v1577_v21  ;;  %v1611_v52 = vadd.f32 %v1610_v56, %v1582_v19 }
 0x13e   : > { %v1590_v5 = vadd.f32 %v1589_v11, %v1561_v13 }
 0x140   : > { %v3233_v14 = vadd.f32 %v1618_v1, %v1590_v5 }
 0x141   : > { %v1533_v17 = vpop.f32.mrf.mxu1  ;;  %v3235_v20 = vpop.f32.mrf.mxu0 }
 0x142   : > { %v1666_v15 = vpop.f32.mrf.mxu2  ;;  %v1534_v18 = vadd.f32 %v1533_v17, %v1505_v28  ;;  %v1695_v34 = vpop.f32.mrf.mxu3 }
 0x144   : > { %v3237_v22 = vadd.f32 %v1562_v58, %v1534_v18 }
 0x146   : > { %v1592_v4 = vadd.f32 %v3231_v8, %v3237_v22 }
 0x149   : > { %v1632_v23 = vpop.f32.mrf.mxu1  ;;  %v1719_v24 = vpop.f32.mrf.mxu0 }
 0x14a   : > { %v1633_v25 = vadd.f32 %v1632_v23, %v1604_v38  ;;  %v1668_v31 = vpop.f32.mrf.mxu2  ;;  %v1697_v44 = vpop.f32.mrf.mxu3 }
 0x14c   : > { %v1662_v26 = vadd.f32 %v1661_v33, %v1633_v25 }
 0x14e   : > { %v1691_v32 = vadd.f32 %v1690_v61, %v1662_v26 }
 0x150   : > { %v1720_v28 = vadd.f32 %v1719_v24, %v1691_v32 }
 0x151   : > { %v1634_v29 = vpop.f32.mrf.mxu1  ;;  %v1721_v30 = vpop.f32.mrf.mxu0 }
 0x152   : > { %v1635_v35 = vadd.f32 %v1634_v29, %v1606_v27  ;;  %v1671_v39 = vpop.f32.mrf.mxu2  ;;  %v1739_v48 = vmax.f32 %v1720_v28, 0.0  ;;  %v1700_v59 = vpop.f32.mrf.mxu3  ;;  %v1621_v27 = vadd.f32 %v3235_v20, %v1592_v4 }
 0x154   : > { %v1664_v37 = vadd.f32 %v1663_v9, %v1635_v35 }
 0x156   : > { %v1693_v46 = vadd.f32 %v1692_v10, %v1664_v37 }
 0x158   : > { %v1722_v43 = vadd.f32 %v1721_v30, %v1693_v46 }
 0x159   : > { %v1637_v45 = vpop.f32.mrf.mxu1  ;;  %v1724_v47 = vpop.f32.mrf.mxu0 }
 0x15a   : > { %v1740_v38 = vmax.f32 %v1722_v43, 0.0  ;;  %v1638_v49 = vadd.f32 %v1637_v45, %v1609_v0  ;;  %v1673_v41 = vpop.f32.mrf.mxu2  ;;  %v1702_v1 = vpop.f32.mrf.mxu3 }
 0x15c   : > { %v2645_v42 = vpack.c.bf16 %v1740_v38, %v1739_v48  ;;  %v1667_v50 = vadd.f32 %v1666_v15, %v1638_v49 }
 0x15e   : > { %2646 = vst [vmem:[%s3244_s24] sm:$0xff] %v2645_v42   ;;  %v1696_v57 = vadd.f32 %v1695_v34, %v1667_v50 }
 0x160   : > { %v1725_v16 = vadd.f32 %v1724_v47, %v1696_v57 }
 0x161   : > { %v1639_v53 = vpop.f32.mrf.mxu1  ;;  %v1726_v55 = vpop.f32.mrf.mxu0 }
 0x162   : > { %v1640_v58 = vadd.f32 %v1639_v53, %v1611_v52  ;;  %v1676_v62 = vpop.f32.mrf.mxu2  ;;  %v1741_v33 = vmax.f32 %v1725_v16, 0.0  ;;  %v1705_v7 = vpop.f32.mrf.mxu3 }
 0x164   : > { %v1669_v0 = vadd.f32 %v1668_v31, %v1640_v58 }
 0x166   : > { %v1698_v60 = vadd.f32 %v1697_v44, %v1669_v0 }
 0x168   : > { %v1727_v11 = vadd.f32 %v1726_v55, %v1698_v60 }
 0x169   : > { %v1642_v63 = vpop.f32.mrf.mxu1  ;;  %v1729_v3 = vpop.f32.mrf.mxu0 }
 0x16a   : > { %v1742_v36 = vmax.f32 %v1727_v11, 0.0  ;;  %v1643_v51 = vadd.f32 %v1642_v63, %v3227_v2  ;;  %v1678_v61 = vpop.f32.mrf.mxu2  ;;  %v1707_v34 = vpop.f32.mrf.mxu3 }
 0x16c   : > { %v2650_v56 = vpack.c.bf16 %v1742_v36, %v1741_v33  ;;  %v1672_v9 = vadd.f32 %v1671_v39, %v1643_v51 }
 0x16e   : > { %2662 = vst [vmem:[%s3244_s24 + $0x8] sm:$0xff] %v2650_v56   ;;  %v1701_v13 = vadd.f32 %v1700_v59, %v1672_v9 }
 0x170   : > { %v1730_v18 = vadd.f32 %v1729_v3, %v1701_v13 }
 0x171   : > { %v1644_v12 = vpop.f32.mrf.mxu1  ;;  %v1731_v17 = vpop.f32.mrf.mxu0 }
 0x172   : > { %v1645_v5 = vadd.f32 %v1644_v12, %v1616_v40  ;;  %v1743_v24 = vmax.f32 %v1730_v18, 0.0  ;;  %v1734_v21 = vpop.f32.mrf.mxu2 }
 0x174   : > { %v1674_v15 = vadd.f32 %v1673_v41, %v1645_v5 }
 0x176   : > { %v1703_v10 = vadd.f32 %v1702_v1, %v1674_v15 }
 0x178   : > { %v1732_v23 = vadd.f32 %v1731_v17, %v1703_v10 }
 0x179   : > { %v1647_v2 = vpop.f32.mrf.mxu1 }
 0x17a   : > { %v1744_v25 = vmax.f32 %v1732_v23, 0.0  ;;  %v1648_v54 = vadd.f32 %v1647_v2, %v3233_v14  ;;  %v1736_v28 = vpop.f32.mrf.mxu2 }
 0x17c   : > { %v2655_v31 = vpack.c.bf16 %v1744_v25, %v1743_v24  ;;  %v1677_v26 = vadd.f32 %v1676_v62, %v1648_v54 }
 0x17e   : > { %2663 = vst [vmem:[%s3244_s24 + $0x10] sm:$0xff] %v2655_v31   ;;  %v1706_v30 = vadd.f32 %v1705_v7, %v1677_v26 }
 0x180   : > { %v1735_v37 = vadd.f32 %v1734_v21, %v1706_v30 }
 0x181   : > { %v1649_v29 = vpop.f32.mrf.mxu1 }
 0x182   : > { %v1650_v32 = vadd.f32 %v1649_v29, %v1621_v27  ;;  %v1745_v46 = vmax.f32 %v1735_v37, 0.0 }
 0x184   : > { %v1679_v35 = vadd.f32 %v1678_v61, %v1650_v32 }
 0x186   : > { %v1708_v39 = vadd.f32 %v1707_v34, %v1679_v35 }
 0x188   : > { %v1737_v14 = vadd.f32 %v1736_v28, %v1708_v39 }
 0x18a   : > { %v1746_v43 = vmax.f32 %v1737_v14, 0.0 }
 0x18c   : > { %v2660_v45 = vpack.c.bf16 %v1746_v43, %v1745_v46 }
 0x18e   : > { %2664 = vst [vmem:[%s3244_s24 + $0x18] sm:$0xff] %v2660_v45  }
 0x18f PF: > { %s13_s14 = sadd.s32 1, %s2725_s14   ;;  %s3271_s12 = smov %s2721_s13 }
 0x190   : > { %p10_p5 = scmp.ge.s32.totalorder %s13_s14, 4   ;;  %s3272_s13 = smov %s3274_s15 }
 0x192   :  { %12 = sbr.rel (!%p10_p5) target bundleno = 2 (0x2), region = 68 }

// kernel: domain_factor_backbone.6
= control target key start
LH: loop header
LB: loop body
LE: loop exit
PB: predicated region body
PF: predicated region fallthrough
CT: control target
= control target key end

     0   :  { %s7427_s12 = smov 0   ;;  %s7429_s13 = smov 0   ;;  %s8837_s0 = inlined_call_operand.vmem [shape: bf16[32,3200], index: 0, kind: input, shape index: {}]   ;;  %s8838_s1 = inlined_call_operand.vmem [shape: bf16[3200,256], index: 1, kind: input, shape index: {}]   ;;  %s8839_s2 = inlined_call_operand.vmem [shape: f32[1,256], index: 2, kind: input, shape index: {}]   ;;  %s8840_s3 = inlined_call_operand.vmem [shape: bf16[32,256], index: 3, kind: output, shape index: {}]  }
   0x1   :  { %s7431_s14 = smov 0   ;;  %s7433_s15 = smov 0  }
   0x2   :  { %s7435_s16 = smov 0  }
   0x3 LB: > { %s22_s17 = sadd.s32 1, %s7401_s15  ;;  %s6043_s18 = sadd.s32 4294967295, %s7405_s16   ;;  %s7405_s16 = sphi %s7435_s16, %s13_s16   ;;  %s7401_s15 = sphi %s7433_s15, %s8845_s15   ;;  %s7397_s14 = sphi %s7431_s14, %s8844_s14   ;;  %s7393_s13 = sphi %s7429_s13, %s8843_s13   ;;  %s7389_s12 = sphi %s7427_s12, %s8842_s12  }
   0x4   : > { %p23_p0 = scmp.ge.s32.totalorder %s22_s17, 2  ;;  %p65_p1 = scmp.ne.s32.totalorder %s7393_s13, %s7389_s12 }
   0x5   : > { %p66_p2 = scmp.eq.s32.totalorder %s7405_s16, 0  ;;  %p123_p4 = scmp.eq.s32.totalorder %s6043_s18, 1 }
   0x6   : > { %s8847_s17 = smov (%p23_p0, %s22_s17), 0  ;;  %s58_s20 = sadd.s32 1, %s7393_s13 }
   0x7   : > { %p67_p3 = por %p66_p2, %p65_p1  ;;  %s55_s19 = ssub.s32 %s7401_s15, %s8847_s17 }
   0x8   : > { %p56_p5 = scmp.eq.s32.totalorder %s55_s19, 0  ;;  %p7462_p6 = por %p123_p4, %p65_p1 }
   0x9   : > { %p6047_p7 = scmp.ge.s32.totalorder %s7405_s16, 2 }
   0xa   : > { %s7467_s22 = scalar_select %p56_p5, %s7393_s13, %s58_s20  }
   0xb   : > { %155 = sbr.rel (%p6047_p7) target bundleno = 421 (0x1a5), region = 20 }
  0x10   : > { %158 = sbr.rel (!%p67_p3) target bundleno = 421 (0x1a5), region = 24  ;;  %s160_s23 = sand.u32 (%p67_p3), 1, %s7393_s13  }
  0x11   : > { %s6048_s24 = sshll.u32 (%p67_p3), %s7401_s15, 2  ;;  %s7324_s25 = smul.u32 (%p67_p3), 1600, %s160_s23 }
  0x12   : > { %s7475_s28 = scalar_lea.vmem (%p67_p3), %s8838_s1, %s6048_s24 }
  0x13   : > { %v181_v0 = vld [vmem:[%s7475_s28] sm:$0xf] (%p67_p3)  ;;  %v183_v1 = vld [vmem:[%s7475_s28 + $0x8] sm:$0xf] (%p67_p3)  ;;  %v185_v2 = vld [vmem:[%s7475_s28 + $0x10] sm:$0xf] (%p67_p3) }
  0x14   : > { %s7480_s29 = scalar_lea.vmem (%p67_p3), [#allocation2], %s7324_s25  ;;  %v187_v3 = vld [vmem:[%s7475_s28 + $0x18] sm:$0xf] (%p67_p3)  ;;  %v189_v4 = vld [vmem:[%s7475_s28 + $0x20] sm:$0xf] (%p67_p3) }
  0x15   : > { %182 = vst [vmem:[%s7480_s29] sm:$0xf] %v181_v0  ;;  %v191_v5 = vld [vmem:[%s7475_s28 + $0x28] sm:$0xf]  ;;  %v193_v6 = vld [vmem:[%s7475_s28 + $0x30] sm:$0xf] }
  0x16   : > { %184 = vst [vmem:[%s7480_s29 + $0x4] sm:$0xf] %v183_v1  ;;  %v195_v7 = vld [vmem:[%s7475_s28 + $0x38] sm:$0xf]  ;;  %v197_v8 = vld [vmem:[%s7475_s28 + $0x40] sm:$0xf] }
  0x17   : > { %186 = vst [vmem:[%s7480_s29 + $0x8] sm:$0xf] %v185_v2  ;;  %v199_v9 = vld [vmem:[%s7475_s28 + $0x48] sm:$0xf]  ;;  %v201_v10 = vld [vmem:[%s7475_s28 + $0x50] sm:$0xf] }
  0x18   : > { %188 = vst [vmem:[%s7480_s29 + $0xc] sm:$0xf] %v187_v3  ;;  %v203_v11 = vld [vmem:[%s7475_s28 + $0x58] sm:$0xf]  ;;  %v205_v12 = vld [vmem:[%s7475_s28 + $0x60] sm:$0xf] }
  0x19   : > { %190 = vst [vmem:[%s7480_s29 + $0x10] sm:$0xf] %v189_v4  ;;  %v207_v13 = vld [vmem:[%s7475_s28 + $0x68] sm:$0xf]  ;;  %v209_v14 = vld [vmem:[%s7475_s28 + $0x70] sm:$0xf] }
  0x1a   : > { %192 = vst [vmem:[%s7480_s29 + $0x14] sm:$0xf] %v191_v5  ;;  %v211_v15 = vld [vmem:[%s7475_s28 + $0x78] sm:$0xf]  ;;  %v213_v16 = vld [vmem:[%s7475_s28 + $0x80] sm:$0xf] }
  0x1b   : > { %194 = vst [vmem:[%s7480_s29 + $0x18] sm:$0xf] %v193_v6  ;;  %v215_v17 = vld [vmem:[%s7475_s28 + $0x88] sm:$0xf]  ;;  %v217_v18 = vld [vmem:[%s7475_s28 + $0x90] sm:$0xf] }
  0x1c   : > { %196 = vst [vmem:[%s7480_s29 + $0x1c] sm:$0xf] %v195_v7  ;;  %v219_v19 = vld [vmem:[%s7475_s28 + $0x98] sm:$0xf]  ;;  %v221_v20 = vld [vmem:[%s7475_s28 + $0xa0] sm:$0xf] }
  0x1d   : > { %198 = vst [vmem:[%s7480_s29 + $0x20] sm:$0xf] %v197_v8  ;;  %v223_v21 = vld [vmem:[%s7475_s28 + $0xa8] sm:$0xf]  ;;  %v225_v22 = vld [vmem:[%s7475_s28 + $0xb0] sm:$0xf] }
  0x1e   : > { %200 = vst [vmem:[%s7480_s29 + $0x24] sm:$0xf] %v199_v9  ;;  %v227_v23 = vld [vmem:[%s7475_s28 + $0xb8] sm:$0xf]  ;;  %v229_v24 = vld [vmem:[%s7475_s28 + $0xc0] sm:$0xf] }
  0x1f   : > { %202 = vst [vmem:[%s7480_s29 + $0x28] sm:$0xf] %v201_v10  ;;  %v231_v25 = vld [vmem:[%s7475_s28 + $0xc8] sm:$0xf]  ;;  %v233_v26 = vld [vmem:[%s7475_s28 + $0xd0] sm:$0xf] }
  0x20   : > { %204 = vst [vmem:[%s7480_s29 + $0x2c] sm:$0xf] %v203_v11  ;;  %v235_v27 = vld [vmem:[%s7475_s28 + $0xd8] sm:$0xf]  ;;  %v237_v28 = vld [vmem:[%s7475_s28 + $0xe0] sm:$0xf] }
  0x21   : > { %206 = vst [vmem:[%s7480_s29 + $0x30] sm:$0xf] %v205_v12  ;;  %v239_v29 = vld [vmem:[%s7475_s28 + $0xe8] sm:$0xf]  ;;  %v241_v30 = vld [vmem:[%s7475_s28 + $0xf0] sm:$0xf] }
  0x22   : > { %208 = vst [vmem:[%s7480_s29 + $0x34] sm:$0xf] %v207_v13  ;;  %v243_v31 = vld [vmem:[%s7475_s28 + $0xf8] sm:$0xf]  ;;  %v245_v32 = vld [vmem:[%s7475_s28 + $0x100] sm:$0xf] }
  0x23   : > { %210 = vst [vmem:[%s7480_s29 + $0x38] sm:$0xf] %v209_v14  ;;  %v247_v33 = vld [vmem:[%s7475_s28 + $0x108] sm:$0xf]  ;;  %v249_v34 = vld [vmem:[%s7475_s28 + $0x110] sm:$0xf] }
  0x24   : > { %212 = vst [vmem:[%s7480_s29 + $0x3c] sm:$0xf] %v211_v15  ;;  %v251_v35 = vld [vmem:[%s7475_s28 + $0x118] sm:$0xf]  ;;  %v253_v36 = vld [vmem:[%s7475_s28 + $0x120] sm:$0xf] }
  0x25   : > { %214 = vst [vmem:[%s7480_s29 + $0x40] sm:$0xf] %v213_v16  ;;  %v255_v37 = vld [vmem:[%s7475_s28 + $0x128] sm:$0xf]  ;;  %v257_v38 = vld [vmem:[%s7475_s28 + $0x130] sm:$0xf] }
  0x26   : > { %216 = vst [vmem:[%s7480_s29 + $0x44] sm:$0xf] %v215_v17  ;;  %v259_v39 = vld [vmem:[%s7475_s28 + $0x138] sm:$0xf]  ;;  %v261_v40 = vld [vmem:[%s7475_s28 + $0x140] sm:$0xf] }
  0x27   : > { %218 = vst [vmem:[%s7480_s29 + $0x48] sm:$0xf] %v217_v18  ;;  %v263_v41 = vld [vmem:[%s7475_s28 + $0x148] sm:$0xf]  ;;  %v265_v42 = vld [vmem:[%s7475_s28 + $0x150] sm:$0xf] }
  0x28   : > { %220 = vst [vmem:[%s7480_s29 + $0x4c] sm:$0xf] %v219_v19  ;;  %v267_v43 = vld [vmem:[%s7475_s28 + $0x158] sm:$0xf]  ;;  %v269_v44 = vld [vmem:[%s7475_s28 + $0x160] sm:$0xf] }
  0x29   : > { %222 = vst [vmem:[%s7480_s29 + $0x50] sm:$0xf] %v221_v20  ;;  %v271_v45 = vld [vmem:[%s7475_s28 + $0x168] sm:$0xf]  ;;  %v273_v46 = vld [vmem:[%s7475_s28 + $0x170] sm:$0xf] }
  0x2a   : > { %224 = vst [vmem:[%s7480_s29 + $0x54] sm:$0xf] %v223_v21  ;;  %v275_v47 = vld [vmem:[%s7475_s28 + $0x178] sm:$0xf]  ;;  %v277_v48 = vld [vmem:[%s7475_s28 + $0x180] sm:$0xf] }
  0x2b   : > { %226 = vst [vmem:[%s7480_s29 + $0x58] sm:$0xf] %v225_v22  ;;  %v279_v49 = vld [vmem:[%s7475_s28 + $0x188] sm:$0xf]  ;;  %v281_v50 = vld [vmem:[%s7475_s28 + $0x190] sm:$0xf] }
  0x2c   : > { %228 = vst [vmem:[%s7480_s29 + $0x5c] sm:$0xf] %v227_v23  ;;  %v283_v51 = vld [vmem:[%s7475_s28 + $0x198] sm:$0xf]  ;;  %v285_v52 = vld [vmem:[%s7475_s28 + $0x1a0] sm:$0xf] }
  0x2d   : > { %230 = vst [vmem:[%s7480_s29 + $0x60] sm:$0xf] %v229_v24  ;;  %v287_v53 = vld [vmem:[%s7475_s28 + $0x1a8] sm:$0xf]  ;;  %v289_v54 = vld [vmem:[%s7475_s28 + $0x1b0] sm:$0xf] }
  0x2e   : > { %232 = vst [vmem:[%s7480_s29 + $0x64] sm:$0xf] %v231_v25  ;;  %v291_v55 = vld [vmem:[%s7475_s28 + $0x1b8] sm:$0xf]  ;;  %v293_v56 = vld [vmem:[%s7475_s28 + $0x1c0] sm:$0xf] }
  0x2f   : > { %234 = vst [vmem:[%s7480_s29 + $0x68] sm:$0xf] %v233_v26  ;;  %v295_v57 = vld [vmem:[%s7475_s28 + $0x1c8] sm:$0xf]  ;;  %v297_v58 = vld [vmem:[%s7475_s28 + $0x1d0] sm:$0xf] }
  0x30   : > { %236 = vst [vmem:[%s7480_s29 + $0x6c] sm:$0xf] %v235_v27  ;;  %v299_v59 = vld [vmem:[%s7475_s28 + $0x1d8] sm:$0xf]  ;;  %v301_v60 = vld [vmem:[%s7475_s28 + $0x1e0] sm:$0xf] }
  0x31   : > { %238 = vst [vmem:[%s7480_s29 + $0x70] sm:$0xf] %v237_v28  ;;  %v303_v61 = vld [vmem:[%s7475_s28 + $0x1e8] sm:$0xf]  ;;  %v305_v62 = vld [vmem:[%s7475_s28 + $0x1f0] sm:$0xf] }
  0x32   : > { %240 = vst [vmem:[%s7480_s29 + $0x74] sm:$0xf] %v239_v29  ;;  %v307_v63 = vld [vmem:[%s7475_s28 + $0x1f8] sm:$0xf]  ;;  %v309_v0 = vld [vmem:[%s7475_s28 + $0x200] sm:$0xf] }
  0x33   : > { %242 = vst [vmem:[%s7480_s29 + $0x78] sm:$0xf] %v241_v30  ;;  %v311_v1 = vld [vmem:[%s7475_s28 + $0x208] sm:$0xf]  ;;  %v313_v2 = vld [vmem:[%s7475_s28 + $0x210] sm:$0xf] }
  0x34   : > { %244 = vst [vmem:[%s7480_s29 + $0x7c] sm:$0xf] %v243_v31  ;;  %v315_v3 = vld [vmem:[%s7475_s28 + $0x218] sm:$0xf]  ;;  %v317_v4 = vld [vmem:[%s7475_s28 + $0x220] sm:$0xf] }
  0x35   : > { %246 = vst [vmem:[%s7480_s29 + $0x80] sm:$0xf] %v245_v32  ;;  %v319_v5 = vld [vmem:[%s7475_s28 + $0x228] sm:$0xf]  ;;  %v321_v6 = vld [vmem:[%s7475_s28 + $0x230] sm:$0xf] }
  0x36   : > { %248 = vst [vmem:[%s7480_s29 + $0x84] sm:$0xf] %v247_v33  ;;  %v323_v7 = vld [vmem:[%s7475_s28 + $0x238] sm:$0xf]  ;;  %v325_v8 = vld [vmem:[%s7475_s28 + $0x240] sm:$0xf] }
  0x37   : > { %250 = vst [vmem:[%s7480_s29 + $0x88] sm:$0xf] %v249_v34  ;;  %v327_v9 = vld [vmem:[%s7475_s28 + $0x248] sm:$0xf]  ;;  %v329_v10 = vld [vmem:[%s7475_s28 + $0x250] sm:$0xf] }
  0x38   : > { %252 = vst [vmem:[%s7480_s29 + $0x8c] sm:$0xf] %v251_v35  ;;  %v331_v11 = vld [vmem:[%s7475_s28 + $0x258] sm:$0xf]  ;;  %v333_v12 = vld [vmem:[%s7475_s28 + $0x260] sm:$0xf] }
  0x39   : > { %254 = vst [vmem:[%s7480_s29 + $0x90] sm:$0xf] %v253_v36  ;;  %v335_v13 = vld [vmem:[%s7475_s28 + $0x268] sm:$0xf]  ;;  %v337_v14 = vld [vmem:[%s7475_s28 + $0x270] sm:$0xf] }
  0x3a   : > { %256 = vst [vmem:[%s7480_s29 + $0x94] sm:$0xf] %v255_v37  ;;  %v339_v15 = vld [vmem:[%s7475_s28 + $0x278] sm:$0xf]  ;;  %v341_v16 = vld [vmem:[%s7475_s28 + $0x280] sm:$0xf] }
  0x3b   : > { %258 = vst [vmem:[%s7480_s29 + $0x98] sm:$0xf] %v257_v38  ;;  %v343_v17 = vld [vmem:[%s7475_s28 + $0x288] sm:$0xf]  ;;  %v345_v18 = vld [vmem:[%s7475_s28 + $0x290] sm:$0xf] }
  0x3c   : > { %260 = vst [vmem:[%s7480_s29 + $0x9c] sm:$0xf] %v259_v39  ;;  %v347_v19 = vld [vmem:[%s7475_s28 + $0x298] sm:$0xf]  ;;  %v349_v20 = vld [vmem:[%s7475_s28 + $0x2a0] sm:$0xf] }
  0x3d   : > { %262 = vst [vmem:[%s7480_s29 + $0xa0] sm:$0xf] %v261_v40  ;;  %v351_v21 = vld [vmem:[%s7475_s28 + $0x2a8] sm:$0xf]  ;;  %v353_v22 = vld [vmem:[%s7475_s28 + $0x2b0] sm:$0xf] }
  0x3e   : > { %264 = vst [vmem:[%s7480_s29 + $0xa4] sm:$0xf] %v263_v41  ;;  %v355_v23 = vld [vmem:[%s7475_s28 + $0x2b8] sm:$0xf]  ;;  %v357_v24 = vld [vmem:[%s7475_s28 + $0x2c0] sm:$0xf] }
  0x3f   : > { %266 = vst [vmem:[%s7480_s29 + $0xa8] sm:$0xf] %v265_v42  ;;  %v359_v25 = vld [vmem:[%s7475_s28 + $0x2c8] sm:$0xf]  ;;  %v361_v26 = vld [vmem:[%s7475_s28 + $0x2d0] sm:$0xf] }
  0x40   : > { %268 = vst [vmem:[%s7480_s29 + $0xac] sm:$0xf] %v267_v43  ;;  %v363_v27 = vld [vmem:[%s7475_s28 + $0x2d8] sm:$0xf]  ;;  %v365_v28 = vld [vmem:[%s7475_s28 + $0x2e0] sm:$0xf] }
  0x41   : > { %270 = vst [vmem:[%s7480_s29 + $0xb0] sm:$0xf] %v269_v44  ;;  %v367_v29 = vld [vmem:[%s7475_s28 + $0x2e8] sm:$0xf]  ;;  %v369_v30 = vld [vmem:[%s7475_s28 + $0x2f0] sm:$0xf] }
  0x42   : > { %272 = vst [vmem:[%s7480_s29 + $0xb4] sm:$0xf] %v271_v45  ;;  %v371_v31 = vld [vmem:[%s7475_s28 + $0x2f8] sm:$0xf]  ;;  %v373_v32 = vld [vmem:[%s7475_s28 + $0x300] sm:$0xf] }
  0x43   : > { %274 = vst [vmem:[%s7480_s29 + $0xb8] sm:$0xf] %v273_v46  ;;  %v375_v33 = vld [vmem:[%s7475_s28 + $0x308] sm:$0xf]  ;;  %v377_v34 = vld [vmem:[%s7475_s28 + $0x310] sm:$0xf] }
  0x44   : > { %276 = vst [vmem:[%s7480_s29 + $0xbc] sm:$0xf] %v275_v47  ;;  %v379_v35 = vld [vmem:[%s7475_s28 + $0x318] sm:$0xf]  ;;  %v381_v36 = vld [vmem:[%s7475_s28 + $0x320] sm:$0xf] }
  0x45   : > { %278 = vst [vmem:[%s7480_s29 + $0xc0] sm:$0xf] %v277_v48  ;;  %v383_v37 = vld [vmem:[%s7475_s28 + $0x328] sm:$0xf]  ;;  %v385_v38 = vld [vmem:[%s7475_s28 + $0x330] sm:$0xf] }
  0x46   : > { %280 = vst [vmem:[%s7480_s29 + $0xc4] sm:$0xf] %v279_v49  ;;  %v387_v39 = vld [vmem:[%s7475_s28 + $0x338] sm:$0xf]  ;;  %v389_v40 = vld [vmem:[%s7475_s28 + $0x340] sm:$0xf] }
  0x47   : > { %282 = vst [vmem:[%s7480_s29 + $0xc8] sm:$0xf] %v281_v50  ;;  %v391_v41 = vld [vmem:[%s7475_s28 + $0x348] sm:$0xf]  ;;  %v393_v42 = vld [vmem:[%s7475_s28 + $0x350] sm:$0xf] }
  0x48   : > { %284 = vst [vmem:[%s7480_s29 + $0xcc] sm:$0xf] %v283_v51  ;;  %v395_v43 = vld [vmem:[%s7475_s28 + $0x358] sm:$0xf]  ;;  %v397_v44 = vld [vmem:[%s7475_s28 + $0x360] sm:$0xf] }
  0x49   : > { %286 = vst [vmem:[%s7480_s29 + $0xd0] sm:$0xf] %v285_v52  ;;  %v399_v45 = vld [vmem:[%s7475_s28 + $0x368] sm:$0xf]  ;;  %v401_v46 = vld [vmem:[%s7475_s28 + $0x370] sm:$0xf] }
  0x4a   : > { %288 = vst [vmem:[%s7480_s29 + $0xd4] sm:$0xf] %v287_v53  ;;  %v403_v47 = vld [vmem:[%s7475_s28 + $0x378] sm:$0xf]  ;;  %v405_v48 = vld [vmem:[%s7475_s28 + $0x380] sm:$0xf] }
  0x4b   : > { %290 = vst [vmem:[%s7480_s29 + $0xd8] sm:$0xf] %v289_v54  ;;  %v407_v49 = vld [vmem:[%s7475_s28 + $0x388] sm:$0xf]  ;;  %v409_v50 = vld [vmem:[%s7475_s28 + $0x390] sm:$0xf] }
  0x4c   : > { %292 = vst [vmem:[%s7480_s29 + $0xdc] sm:$0xf] %v291_v55  ;;  %v411_v51 = vld [vmem:[%s7475_s28 + $0x398] sm:$0xf]  ;;  %v413_v52 = vld [vmem:[%s7475_s28 + $0x3a0] sm:$0xf] }
  0x4d   : > { %294 = vst [vmem:[%s7480_s29 + $0xe0] sm:$0xf] %v293_v56  ;;  %v415_v53 = vld [vmem:[%s7475_s28 + $0x3a8] sm:$0xf]  ;;  %v417_v54 = vld [vmem:[%s7475_s28 + $0x3b0] sm:$0xf] }
  0x4e   : > { %296 = vst [vmem:[%s7480_s29 + $0xe4] sm:$0xf] %v295_v57  ;;  %v419_v55 = vld [vmem:[%s7475_s28 + $0x3b8] sm:$0xf]  ;;  %v421_v56 = vld [vmem:[%s7475_s28 + $0x3c0] sm:$0xf] }
  0x4f   : > { %298 = vst [vmem:[%s7480_s29 + $0xe8] sm:$0xf] %v297_v58  ;;  %v423_v57 = vld [vmem:[%s7475_s28 + $0x3c8] sm:$0xf]  ;;  %v425_v58 = vld [vmem:[%s7475_s28 + $0x3d0] sm:$0xf] }
  0x50   : > { %300 = vst [vmem:[%s7480_s29 + $0xec] sm:$0xf] %v299_v59  ;;  %v427_v59 = vld [vmem:[%s7475_s28 + $0x3d8] sm:$0xf] }
  0x51   : > { %302 = vst [vmem:[%s7480_s29 + $0xf0] sm:$0xf] %v301_v60  ;;  %v429_v60 = vld [vmem:[%s7475_s28 + $0x3e0] sm:$0xf] }
  0x52   : > { %304 = vst [vmem:[%s7480_s29 + $0xf4] sm:$0xf] %v303_v61  ;;  %v431_v61 = vld [vmem:[%s7475_s28 + $0x3e8] sm:$0xf] }
  0x53   : > { %306 = vst [vmem:[%s7480_s29 + $0xf8] sm:$0xf] %v305_v62  ;;  %v433_v62 = vld [vmem:[%s7475_s28 + $0x3f0] sm:$0xf] }
  0x54   : > { %308 = vst [vmem:[%s7480_s29 + $0xfc] sm:$0xf] %v307_v63  ;;  %v435_v63 = vld [vmem:[%s7475_s28 + $0x3f8] sm:$0xf] }
  0x55   : > { %310 = vst [vmem:[%s7480_s29 + $0x100] sm:$0xf] %v309_v0  ;;  %v437_v0 = vld [vmem:[%s7475_s28 + $0x400] sm:$0xf] }
  0x56   : > { %312 = vst [vmem:[%s7480_s29 + $0x104] sm:$0xf] %v311_v1  ;;  %v439_v1 = vld [vmem:[%s7475_s28 + $0x408] sm:$0xf] }
  0x57   : > { %314 = vst [vmem:[%s7480_s29 + $0x108] sm:$0xf] %v313_v2  ;;  %v441_v2 = vld [vmem:[%s7475_s28 + $0x410] sm:$0xf] }
  0x58   : > { %316 = vst [vmem:[%s7480_s29 + $0x10c] sm:$0xf] %v315_v3  ;;  %v443_v3 = vld [vmem:[%s7475_s28 + $0x418] sm:$0xf] }
  0x59   : > { %318 = vst [vmem:[%s7480_s29 + $0x110] sm:$0xf] %v317_v4  ;;  %v445_v4 = vld [vmem:[%s7475_s28 + $0x420] sm:$0xf] }
  0x5a   : > { %320 = vst [vmem:[%s7480_s29 + $0x114] sm:$0xf] %v319_v5  ;;  %v447_v5 = vld [vmem:[%s7475_s28 + $0x428] sm:$0xf] }
  0x5b   : > { %322 = vst [vmem:[%s7480_s29 + $0x118] sm:$0xf] %v321_v6  ;;  %v449_v6 = vld [vmem:[%s7475_s28 + $0x430] sm:$0xf] }
  0x5c   : > { %324 = vst [vmem:[%s7480_s29 + $0x11c] sm:$0xf] %v323_v7  ;;  %v451_v7 = vld [vmem:[%s7475_s28 + $0x438] sm:$0xf] }
  0x5d   : > { %326 = vst [vmem:[%s7480_s29 + $0x120] sm:$0xf] %v325_v8  ;;  %v453_v8 = vld [vmem:[%s7475_s28 + $0x440] sm:$0xf] }
  0x5e   : > { %328 = vst [vmem:[%s7480_s29 + $0x124] sm:$0xf] %v327_v9  ;;  %v455_v9 = vld [vmem:[%s7475_s28 + $0x448] sm:$0xf] }
  0x5f   : > { %330 = vst [vmem:[%s7480_s29 + $0x128] sm:$0xf] %v329_v10  ;;  %v457_v10 = vld [vmem:[%s7475_s28 + $0x450] sm:$0xf] }
  0x60   : > { %332 = vst [vmem:[%s7480_s29 + $0x12c] sm:$0xf] %v331_v11  ;;  %v459_v11 = vld [vmem:[%s7475_s28 + $0x458] sm:$0xf] }
  0x61   : > { %334 = vst [vmem:[%s7480_s29 + $0x130] sm:$0xf] %v333_v12  ;;  %v461_v12 = vld [vmem:[%s7475_s28 + $0x460] sm:$0xf] }
  0x62   : > { %336 = vst [vmem:[%s7480_s29 + $0x134] sm:$0xf] %v335_v13  ;;  %v463_v13 = vld [vmem:[%s7475_s28 + $0x468] sm:$0xf] }
  0x63   : > { %338 = vst [vmem:[%s7480_s29 + $0x138] sm:$0xf] %v337_v14  ;;  %v465_v14 = vld [vmem:[%s7475_s28 + $0x470] sm:$0xf] }
  0x64   : > { %340 = vst [vmem:[%s7480_s29 + $0x13c] sm:$0xf] %v339_v15  ;;  %v467_v15 = vld [vmem:[%s7475_s28 + $0x478] sm:$0xf] }
  0x65   : > { %342 = vst [vmem:[%s7480_s29 + $0x140] sm:$0xf] %v341_v16  ;;  %v469_v16 = vld [vmem:[%s7475_s28 + $0x480] sm:$0xf] }
  0x66   : > { %344 = vst [vmem:[%s7480_s29 + $0x144] sm:$0xf] %v343_v17  ;;  %v471_v17 = vld [vmem:[%s7475_s28 + $0x488] sm:$0xf] }
  0x67   : > { %346 = vst [vmem:[%s7480_s29 + $0x148] sm:$0xf] %v345_v18  ;;  %v473_v18 = vld [vmem:[%s7475_s28 + $0x490] sm:$0xf] }
  0x68   : > { %348 = vst [vmem:[%s7480_s29 + $0x14c] sm:$0xf] %v347_v19  ;;  %v475_v19 = vld [vmem:[%s7475_s28 + $0x498] sm:$0xf] }
  0x69   : > { %350 = vst [vmem:[%s7480_s29 + $0x150] sm:$0xf] %v349_v20  ;;  %v477_v20 = vld [vmem:[%s7475_s28 + $0x4a0] sm:$0xf] }
  0x6a   : > { %352 = vst [vmem:[%s7480_s29 + $0x154] sm:$0xf] %v351_v21  ;;  %v479_v21 = vld [vmem:[%s7475_s28 + $0x4a8] sm:$0xf] }
  0x6b   : > { %354 = vst [vmem:[%s7480_s29 + $0x158] sm:$0xf] %v353_v22  ;;  %v481_v22 = vld [vmem:[%s7475_s28 + $0x4b0] sm:$0xf] }
  0x6c   : > { %356 = vst [vmem:[%s7480_s29 + $0x15c] sm:$0xf] %v355_v23  ;;  %v483_v23 = vld [vmem:[%s7475_s28 + $0x4b8] sm:$0xf] }
  0x6d   : > { %358 = vst [vmem:[%s7480_s29 + $0x160] sm:$0xf] %v357_v24  ;;  %v485_v24 = vld [vmem:[%s7475_s28 + $0x4c0] sm:$0xf] }
  0x6e   : > { %360 = vst [vmem:[%s7480_s29 + $0x164] sm:$0xf] %v359_v25  ;;  %v487_v25 = vld [vmem:[%s7475_s28 + $0x4c8] sm:$0xf] }
  0x6f   : > { %362 = vst [vmem:[%s7480_s29 + $0x168] sm:$0xf] %v361_v26  ;;  %v489_v26 = vld [vmem:[%s7475_s28 + $0x4d0] sm:$0xf] }
  0x70   : > { %364 = vst [vmem:[%s7480_s29 + $0x16c] sm:$0xf] %v363_v27  ;;  %v491_v27 = vld [vmem:[%s7475_s28 + $0x4d8] sm:$0xf] }
  0x71   : > { %366 = vst [vmem:[%s7480_s29 + $0x170] sm:$0xf] %v365_v28  ;;  %v493_v28 = vld [vmem:[%s7475_s28 + $0x4e0] sm:$0xf] }
  0x72   : > { %368 = vst [vmem:[%s7480_s29 + $0x174] sm:$0xf] %v367_v29  ;;  %v495_v29 = vld [vmem:[%s7475_s28 + $0x4e8] sm:$0xf] }
  0x73   : > { %370 = vst [vmem:[%s7480_s29 + $0x178] sm:$0xf] %v369_v30  ;;  %v497_v30 = vld [vmem:[%s7475_s28 + $0x4f0] sm:$0xf] }
  0x74   : > { %372 = vst [vmem:[%s7480_s29 + $0x17c] sm:$0xf] %v371_v31  ;;  %v499_v31 = vld [vmem:[%s7475_s28 + $0x4f8] sm:$0xf] }
  0x75   : > { %374 = vst [vmem:[%s7480_s29 + $0x180] sm:$0xf] %v373_v32  ;;  %v501_v32 = vld [vmem:[%s7475_s28 + $0x500] sm:$0xf] }
  0x76   : > { %376 = vst [vmem:[%s7480_s29 + $0x184] sm:$0xf] %v375_v33  ;;  %v503_v33 = vld [vmem:[%s7475_s28 + $0x508] sm:$0xf] }
  0x77   : > { %378 = vst [vmem:[%s7480_s29 + $0x188] sm:$0xf] %v377_v34  ;;  %v505_v34 = vld [vmem:[%s7475_s28 + $0x510] sm:$0xf] }
  0x78   : > { %380 = vst [vmem:[%s7480_s29 + $0x18c] sm:$0xf] %v379_v35  ;;  %v507_v35 = vld [vmem:[%s7475_s28 + $0x518] sm:$0xf] }
  0x79   : > { %382 = vst [vmem:[%s7480_s29 + $0x190] sm:$0xf] %v381_v36  ;;  %v509_v36 = vld [vmem:[%s7475_s28 + $0x520] sm:$0xf] }
  0x7a   : > { %384 = vst [vmem:[%s7480_s29 + $0x194] sm:$0xf] %v383_v37  ;;  %v511_v37 = vld [vmem:[%s7475_s28 + $0x528] sm:$0xf] }
  0x7b   : > { %386 = vst [vmem:[%s7480_s29 + $0x198] sm:$0xf] %v385_v38  ;;  %v513_v38 = vld [vmem:[%s7475_s28 + $0x530] sm:$0xf] }
  0x7c   : > { %388 = vst [vmem:[%s7480_s29 + $0x19c] sm:$0xf] %v387_v39  ;;  %v515_v39 = vld [vmem:[%s7475_s28 + $0x538] sm:$0xf] }
  0x7d   : > { %390 = vst [vmem:[%s7480_s29 + $0x1a0] sm:$0xf] %v389_v40  ;;  %v517_v40 = vld [vmem:[%s7475_s28 + $0x540] sm:$0xf] }
  0x7e   : > { %392 = vst [vmem:[%s7480_s29 + $0x1a4] sm:$0xf] %v391_v41  ;;  %v519_v41 = vld [vmem:[%s7475_s28 + $0x548] sm:$0xf] }
  0x7f   : > { %394 = vst [vmem:[%s7480_s29 + $0x1a8] sm:$0xf] %v393_v42  ;;  %v521_v42 = vld [vmem:[%s7475_s28 + $0x550] sm:$0xf] }
  0x80   : > { %396 = vst [vmem:[%s7480_s29 + $0x1ac] sm:$0xf] %v395_v43  ;;  %v523_v43 = vld [vmem:[%s7475_s28 + $0x558] sm:$0xf] }
  0x81   : > { %398 = vst [vmem:[%s7480_s29 + $0x1b0] sm:$0xf] %v397_v44  ;;  %v525_v44 = vld [vmem:[%s7475_s28 + $0x560] sm:$0xf] }
  0x82   : > { %400 = vst [vmem:[%s7480_s29 + $0x1b4] sm:$0xf] %v399_v45  ;;  %v527_v45 = vld [vmem:[%s7475_s28 + $0x568] sm:$0xf] }
  0x83   : > { %402 = vst [vmem:[%s7480_s29 + $0x1b8] sm:$0xf] %v401_v46  ;;  %v529_v46 = vld [vmem:[%s7475_s28 + $0x570] sm:$0xf] }
  0x84   : > { %404 = vst [vmem:[%s7480_s29 + $0x1bc] sm:$0xf] %v403_v47  ;;  %v531_v47 = vld [vmem:[%s7475_s28 + $0x578] sm:$0xf] }
  0x85   : > { %406 = vst [vmem:[%s7480_s29 + $0x1c0] sm:$0xf] %v405_v48  ;;  %v533_v48 = vld [vmem:[%s7475_s28 + $0x580] sm:$0xf] }
  0x86   : > { %408 = vst [vmem:[%s7480_s29 + $0x1c4] sm:$0xf] %v407_v49  ;;  %v535_v49 = vld [vmem:[%s7475_s28 + $0x588] sm:$0xf] }
  0x87   : > { %410 = vst [vmem:[%s7480_s29 + $0x1c8] sm:$0xf] %v409_v50  ;;  %v537_v50 = vld [vmem:[%s7475_s28 + $0x590] sm:$0xf] }
  0x88   : > { %412 = vst [vmem:[%s7480_s29 + $0x1cc] sm:$0xf] %v411_v51  ;;  %v539_v51 = vld [vmem:[%s7475_s28 + $0x598] sm:$0xf] }
  0x89   : > { %414 = vst [vmem:[%s7480_s29 + $0x1d0] sm:$0xf] %v413_v52  ;;  %v541_v52 = vld [vmem:[%s7475_s28 + $0x5a0] sm:$0xf] }
  0x8a   : > { %416 = vst [vmem:[%s7480_s29 + $0x1d4] sm:$0xf] %v415_v53  ;;  %v543_v53 = vld [vmem:[%s7475_s28 + $0x5a8] sm:$0xf] }
  0x8b   : > { %418 = vst [vmem:[%s7480_s29 + $0x1d8] sm:$0xf] %v417_v54  ;;  %v545_v54 = vld [vmem:[%s7475_s28 + $0x5b0] sm:$0xf] }
  0x8c   : > { %420 = vst [vmem:[%s7480_s29 + $0x1dc] sm:$0xf] %v419_v55  ;;  %v547_v55 = vld [vmem:[%s7475_s28 + $0x5b8] sm:$0xf] }
  0x8d   : > { %422 = vst [vmem:[%s7480_s29 + $0x1e0] sm:$0xf] %v421_v56  ;;  %v549_v56 = vld [vmem:[%s7475_s28 + $0x5c0] sm:$0xf] }
  0x8e   : > { %424 = vst [vmem:[%s7480_s29 + $0x1e4] sm:$0xf] %v423_v57  ;;  %v551_v57 = vld [vmem:[%s7475_s28 + $0x5c8] sm:$0xf] }
  0x8f   : > { %426 = vst [vmem:[%s7480_s29 + $0x1e8] sm:$0xf] %v425_v58  ;;  %v553_v58 = vld [vmem:[%s7475_s28 + $0x5d0] sm:$0xf] }
  0x90   : > { %428 = vst [vmem:[%s7480_s29 + $0x1ec] sm:$0xf] %v427_v59  ;;  %v555_v59 = vld [vmem:[%s7475_s28 + $0x5d8] sm:$0xf] }
  0x91   : > { %430 = vst [vmem:[%s7480_s29 + $0x1f0] sm:$0xf] %v429_v60  ;;  %v557_v60 = vld [vmem:[%s7475_s28 + $0x5e0] sm:$0xf] }
  0x92   : > { %432 = vst [vmem:[%s7480_s29 + $0x1f4] sm:$0xf] %v431_v61  ;;  %v559_v61 = vld [vmem:[%s7475_s28 + $0x5e8] sm:$0xf] }
  0x93   : > { %434 = vst [vmem:[%s7480_s29 + $0x1f8] sm:$0xf] %v433_v62  ;;  %v561_v62 = vld [vmem:[%s7475_s28 + $0x5f0] sm:$0xf] }
  0x94   : > { %436 = vst [vmem:[%s7480_s29 + $0x1fc] sm:$0xf] %v435_v63  ;;  %v563_v63 = vld [vmem:[%s7475_s28 + $0x5f8] sm:$0xf] }
  0x95   : > { %438 = vst [vmem:[%s7480_s29 + $0x200] sm:$0xf] %v437_v0  ;;  %v565_v0 = vld [vmem:[%s7475_s28 + $0x600] sm:$0xf] }
  0x96   : > { %440 = vst [vmem:[%s7480_s29 + $0x204] sm:$0xf] %v439_v1  ;;  %v567_v1 = vld [vmem:[%s7475_s28 + $0x608] sm:$0xf] }
  0x97   : > { %442 = vst [vmem:[%s7480_s29 + $0x208] sm:$0xf] %v441_v2  ;;  %v569_v2 = vld [vmem:[%s7475_s28 + $0x610] sm:$0xf] }
  0x98   : > { %444 = vst [vmem:[%s7480_s29 + $0x20c] sm:$0xf] %v443_v3  ;;  %v571_v3 = vld [vmem:[%s7475_s28 + $0x618] sm:$0xf] }
  0x99   : > { %446 = vst [vmem:[%s7480_s29 + $0x210] sm:$0xf] %v445_v4  ;;  %v573_v4 = vld [vmem:[%s7475_s28 + $0x620] sm:$0xf] }
  0x9a   : > { %448 = vst [vmem:[%s7480_s29 + $0x214] sm:$0xf] %v447_v5  ;;  %v575_v5 = vld [vmem:[%s7475_s28 + $0x628] sm:$0xf] }
  0x9b   : > { %450 = vst [vmem:[%s7480_s29 + $0x218] sm:$0xf] %v449_v6  ;;  %v577_v6 = vld [vmem:[%s7475_s28 + $0x630] sm:$0xf] }
  0x9c   : > { %452 = vst [vmem:[%s7480_s29 + $0x21c] sm:$0xf] %v451_v7  ;;  %v579_v7 = vld [vmem:[%s7475_s28 + $0x638] sm:$0xf] }
  0x9d   : > { %454 = vst [vmem:[%s7480_s29 + $0x220] sm:$0xf] %v453_v8  ;;  %v581_v8 = vld [vmem:[%s7475_s28 + $0x640] sm:$0xf] }
  0x9e   : > { %456 = vst [vmem:[%s7480_s29 + $0x224] sm:$0xf] %v455_v9  ;;  %v583_v9 = vld [vmem:[%s7475_s28 + $0x648] sm:$0xf] }
  0x9f   : > { %458 = vst [vmem:[%s7480_s29 + $0x228] sm:$0xf] %v457_v10  ;;  %v585_v10 = vld [vmem:[%s7475_s28 + $0x650] sm:$0xf] }
  0xa0   : > { %460 = vst [vmem:[%s7480_s29 + $0x22c] sm:$0xf] %v459_v11  ;;  %v587_v11 = vld [vmem:[%s7475_s28 + $0x658] sm:$0xf] }
  0xa1   : > { %462 = vst [vmem:[%s7480_s29 + $0x230] sm:$0xf] %v461_v12  ;;  %v589_v12 = vld [vmem:[%s7475_s28 + $0x660] sm:$0xf] }
  0xa2   : > { %464 = vst [vmem:[%s7480_s29 + $0x234] sm:$0xf] %v463_v13  ;;  %v591_v13 = vld [vmem:[%s7475_s28 + $0x668] sm:$0xf] }
  0xa3   : > { %466 = vst [vmem:[%s7480_s29 + $0x238] sm:$0xf] %v465_v14  ;;  %v593_v14 = vld [vmem:[%s7475_s28 + $0x670] sm:$0xf] }
  0xa4   : > { %468 = vst [vmem:[%s7480_s29 + $0x23c] sm:$0xf] %v467_v15  ;;  %v595_v15 = vld [vmem:[%s7475_s28 + $0x678] sm:$0xf] }
  0xa5   : > { %470 = vst [vmem:[%s7480_s29 + $0x240] sm:$0xf] %v469_v16  ;;  %v597_v16 = vld [vmem:[%s7475_s28 + $0x680] sm:$0xf] }
  0xa6   : > { %472 = vst [vmem:[%s7480_s29 + $0x244] sm:$0xf] %v471_v17  ;;  %v599_v17 = vld [vmem:[%s7475_s28 + $0x688] sm:$0xf] }
  0xa7   : > { %474 = vst [vmem:[%s7480_s29 + $0x248] sm:$0xf] %v473_v18  ;;  %v601_v18 = vld [vmem:[%s7475_s28 + $0x690] sm:$0xf] }
  0xa8   : > { %476 = vst [vmem:[%s7480_s29 + $0x24c] sm:$0xf] %v475_v19  ;;  %v603_v19 = vld [vmem:[%s7475_s28 + $0x698] sm:$0xf] }
  0xa9   : > { %478 = vst [vmem:[%s7480_s29 + $0x250] sm:$0xf] %v477_v20  ;;  %v605_v20 = vld [vmem:[%s7475_s28 + $0x6a0] sm:$0xf] }
  0xaa   : > { %480 = vst [vmem:[%s7480_s29 + $0x254] sm:$0xf] %v479_v21  ;;  %v607_v21 = vld [vmem:[%s7475_s28 + $0x6a8] sm:$0xf] }
  0xab   : > { %482 = vst [vmem:[%s7480_s29 + $0x258] sm:$0xf] %v481_v22  ;;  %v609_v22 = vld [vmem:[%s7475_s28 + $0x6b0] sm:$0xf] }
  0xac   : > { %484 = vst [vmem:[%s7480_s29 + $0x25c] sm:$0xf] %v483_v23  ;;  %v611_v23 = vld [vmem:[%s7475_s28 + $0x6b8] sm:$0xf] }
  0xad   : > { %486 = vst [vmem:[%s7480_s29 + $0x260] sm:$0xf] %v485_v24  ;;  %v613_v24 = vld [vmem:[%s7475_s28 + $0x6c0] sm:$0xf] }
  0xae   : > { %488 = vst [vmem:[%s7480_s29 + $0x264] sm:$0xf] %v487_v25  ;;  %v615_v25 = vld [vmem:[%s7475_s28 + $0x6c8] sm:$0xf] }
  0xaf   : > { %490 = vst [vmem:[%s7480_s29 + $0x268] sm:$0xf] %v489_v26  ;;  %v617_v26 = vld [vmem:[%s7475_s28 + $0x6d0] sm:$0xf] }
  0xb0   : > { %492 = vst [vmem:[%s7480_s29 + $0x26c] sm:$0xf] %v491_v27  ;;  %v619_v27 = vld [vmem:[%s7475_s28 + $0x6d8] sm:$0xf] }
  0xb1   : > { %494 = vst [vmem:[%s7480_s29 + $0x270] sm:$0xf] %v493_v28  ;;  %v621_v28 = vld [vmem:[%s7475_s28 + $0x6e0] sm:$0xf] }
  0xb2   : > { %496 = vst [vmem:[%s7480_s29 + $0x274] sm:$0xf] %v495_v29  ;;  %v623_v29 = vld [vmem:[%s7475_s28 + $0x6e8] sm:$0xf] }
  0xb3   : > { %498 = vst [vmem:[%s7480_s29 + $0x278] sm:$0xf] %v497_v30  ;;  %v625_v30 = vld [vmem:[%s7475_s28 + $0x6f0] sm:$0xf] }
  0xb4   : > { %500 = vst [vmem:[%s7480_s29 + $0x27c] sm:$0xf] %v499_v31  ;;  %v627_v31 = vld [vmem:[%s7475_s28 + $0x6f8] sm:$0xf] }
  0xb5   : > { %502 = vst [vmem:[%s7480_s29 + $0x280] sm:$0xf] %v501_v32  ;;  %v629_v32 = vld [vmem:[%s7475_s28 + $0x700] sm:$0xf] }
  0xb6   : > { %504 = vst [vmem:[%s7480_s29 + $0x284] sm:$0xf] %v503_v33  ;;  %v631_v33 = vld [vmem:[%s7475_s28 + $0x708] sm:$0xf] }
  0xb7   : > { %506 = vst [vmem:[%s7480_s29 + $0x288] sm:$0xf] %v505_v34  ;;  %v633_v34 = vld [vmem:[%s7475_s28 + $0x710] sm:$0xf] }
  0xb8   : > { %508 = vst [vmem:[%s7480_s29 + $0x28c] sm:$0xf] %v507_v35  ;;  %v635_v35 = vld [vmem:[%s7475_s28 + $0x718] sm:$0xf] }
  0xb9   : > { %510 = vst [vmem:[%s7480_s29 + $0x290] sm:$0xf] %v509_v36  ;;  %v637_v36 = vld [vmem:[%s7475_s28 + $0x720] sm:$0xf] }
  0xba   : > { %512 = vst [vmem:[%s7480_s29 + $0x294] sm:$0xf] %v511_v37  ;;  %v639_v37 = vld [vmem:[%s7475_s28 + $0x728] sm:$0xf] }
  0xbb   : > { %514 = vst [vmem:[%s7480_s29 + $0x298] sm:$0xf] %v513_v38  ;;  %v641_v38 = vld [vmem:[%s7475_s28 + $0x730] sm:$0xf] }
  0xbc   : > { %516 = vst [vmem:[%s7480_s29 + $0x29c] sm:$0xf] %v515_v39  ;;  %v643_v39 = vld [vmem:[%s7475_s28 + $0x738] sm:$0xf] }
  0xbd   : > { %518 = vst [vmem:[%s7480_s29 + $0x2a0] sm:$0xf] %v517_v40  ;;  %v645_v40 = vld [vmem:[%s7475_s28 + $0x740] sm:$0xf] }
  0xbe   : > { %520 = vst [vmem:[%s7480_s29 + $0x2a4] sm:$0xf] %v519_v41  ;;  %v647_v41 = vld [vmem:[%s7475_s28 + $0x748] sm:$0xf] }
  0xbf   : > { %522 = vst [vmem:[%s7480_s29 + $0x2a8] sm:$0xf] %v521_v42  ;;  %v649_v42 = vld [vmem:[%s7475_s28 + $0x750] sm:$0xf] }
  0xc0   : > { %524 = vst [vmem:[%s7480_s29 + $0x2ac] sm:$0xf] %v523_v43  ;;  %v651_v43 = vld [vmem:[%s7475_s28 + $0x758] sm:$0xf] }
  0xc1   : > { %526 = vst [vmem:[%s7480_s29 + $0x2b0] sm:$0xf] %v525_v44  ;;  %v653_v44 = vld [vmem:[%s7475_s28 + $0x760] sm:$0xf] }
  0xc2   : > { %528 = vst [vmem:[%s7480_s29 + $0x2b4] sm:$0xf] %v527_v45  ;;  %v655_v45 = vld [vmem:[%s7475_s28 + $0x768] sm:$0xf] }
  0xc3   : > { %530 = vst [vmem:[%s7480_s29 + $0x2b8] sm:$0xf] %v529_v46  ;;  %v657_v46 = vld [vmem:[%s7475_s28 + $0x770] sm:$0xf] }
  0xc4   : > { %532 = vst [vmem:[%s7480_s29 + $0x2bc] sm:$0xf] %v531_v47  ;;  %v659_v47 = vld [vmem:[%s7475_s28 + $0x778] sm:$0xf] }
  0xc5   : > { %534 = vst [vmem:[%s7480_s29 + $0x2c0] sm:$0xf] %v533_v48  ;;  %v661_v48 = vld [vmem:[%s7475_s28 + $0x780] sm:$0xf] }
  0xc6   : > { %536 = vst [vmem:[%s7480_s29 + $0x2c4] sm:$0xf] %v535_v49  ;;  %v663_v49 = vld [vmem:[%s7475_s28 + $0x788] sm:$0xf] }
  0xc7   : > { %538 = vst [vmem:[%s7480_s29 + $0x2c8] sm:$0xf] %v537_v50  ;;  %v665_v50 = vld [vmem:[%s7475_s28 + $0x790] sm:$0xf] }
  0xc8   : > { %540 = vst [vmem:[%s7480_s29 + $0x2cc] sm:$0xf] %v539_v51  ;;  %v667_v51 = vld [vmem:[%s7475_s28 + $0x798] sm:$0xf] }
  0xc9   : > { %542 = vst [vmem:[%s7480_s29 + $0x2d0] sm:$0xf] %v541_v52  ;;  %v669_v52 = vld [vmem:[%s7475_s28 + $0x7a0] sm:$0xf] }
  0xca   : > { %544 = vst [vmem:[%s7480_s29 + $0x2d4] sm:$0xf] %v543_v53  ;;  %v671_v53 = vld [vmem:[%s7475_s28 + $0x7a8] sm:$0xf] }
  0xcb   : > { %546 = vst [vmem:[%s7480_s29 + $0x2d8] sm:$0xf] %v545_v54  ;;  %v673_v54 = vld [vmem:[%s7475_s28 + $0x7b0] sm:$0xf] }
  0xcc   : > { %548 = vst [vmem:[%s7480_s29 + $0x2dc] sm:$0xf] %v547_v55  ;;  %v675_v55 = vld [vmem:[%s7475_s28 + $0x7b8] sm:$0xf] }
  0xcd   : > { %550 = vst [vmem:[%s7480_s29 + $0x2e0] sm:$0xf] %v549_v56  ;;  %v677_v56 = vld [vmem:[%s7475_s28 + $0x7c0] sm:$0xf] }
  0xce   : > { %552 = vst [vmem:[%s7480_s29 + $0x2e4] sm:$0xf] %v551_v57  ;;  %v679_v57 = vld [vmem:[%s7475_s28 + $0x7c8] sm:$0xf] }
  0xcf   : > { %554 = vst [vmem:[%s7480_s29 + $0x2e8] sm:$0xf] %v553_v58  ;;  %v681_v58 = vld [vmem:[%s7475_s28 + $0x7d0] sm:$0xf] }
  0xd0   : > { %556 = vst [vmem:[%s7480_s29 + $0x2ec] sm:$0xf] %v555_v59  ;;  %v683_v59 = vld [vmem:[%s7475_s28 + $0x7d8] sm:$0xf] }
  0xd1   : > { %558 = vst [vmem:[%s7480_s29 + $0x2f0] sm:$0xf] %v557_v60  ;;  %v685_v60 = vld [vmem:[%s7475_s28 + $0x7e0] sm:$0xf] }
  0xd2   : > { %560 = vst [vmem:[%s7480_s29 + $0x2f4] sm:$0xf] %v559_v61  ;;  %v687_v61 = vld [vmem:[%s7475_s28 + $0x7e8] sm:$0xf] }
  0xd3   : > { %562 = vst [vmem:[%s7480_s29 + $0x2f8] sm:$0xf] %v561_v62  ;;  %v689_v62 = vld [vmem:[%s7475_s28 + $0x7f0] sm:$0xf] }
  0xd4   : > { %564 = vst [vmem:[%s7480_s29 + $0x2fc] sm:$0xf] %v563_v63  ;;  %v691_v63 = vld [vmem:[%s7475_s28 + $0x7f8] sm:$0xf] }
  0xd5   : > { %566 = vst [vmem:[%s7480_s29 + $0x300] sm:$0xf] %v565_v0  ;;  %v693_v0 = vld [vmem:[%s7475_s28 + $0x800] sm:$0xf] }
  0xd6   : > { %568 = vst [vmem:[%s7480_s29 + $0x304] sm:$0xf] %v567_v1  ;;  %v695_v1 = vld [vmem:[%s7475_s28 + $0x808] sm:$0xf] }
  0xd7   : > { %570 = vst [vmem:[%s7480_s29 + $0x308] sm:$0xf] %v569_v2  ;;  %v697_v2 = vld [vmem:[%s7475_s28 + $0x810] sm:$0xf] }
  0xd8   : > { %572 = vst [vmem:[%s7480_s29 + $0x30c] sm:$0xf] %v571_v3  ;;  %v699_v3 = vld [vmem:[%s7475_s28 + $0x818] sm:$0xf] }
  0xd9   : > { %574 = vst [vmem:[%s7480_s29 + $0x310] sm:$0xf] %v573_v4  ;;  %v701_v4 = vld [vmem:[%s7475_s28 + $0x820] sm:$0xf] }
  0xda   : > { %576 = vst [vmem:[%s7480_s29 + $0x314] sm:$0xf] %v575_v5  ;;  %v703_v5 = vld [vmem:[%s7475_s28 + $0x828] sm:$0xf] }
  0xdb   : > { %578 = vst [vmem:[%s7480_s29 + $0x318] sm:$0xf] %v577_v6  ;;  %v705_v6 = vld [vmem:[%s7475_s28 + $0x830] sm:$0xf] }
  0xdc   : > { %580 = vst [vmem:[%s7480_s29 + $0x31c] sm:$0xf] %v579_v7  ;;  %v707_v7 = vld [vmem:[%s7475_s28 + $0x838] sm:$0xf] }
  0xdd   : > { %582 = vst [vmem:[%s7480_s29 + $0x320] sm:$0xf] %v581_v8  ;;  %v709_v8 = vld [vmem:[%s7475_s28 + $0x840] sm:$0xf] }
  0xde   : > { %584 = vst [vmem:[%s7480_s29 + $0x324] sm:$0xf] %v583_v9  ;;  %v711_v9 = vld [vmem:[%s7475_s28 + $0x848] sm:$0xf] }
  0xdf   : > { %586 = vst [vmem:[%s7480_s29 + $0x328] sm:$0xf] %v585_v10  ;;  %v713_v10 = vld [vmem:[%s7475_s28 + $0x850] sm:$0xf] }
  0xe0   : > { %588 = vst [vmem:[%s7480_s29 + $0x32c] sm:$0xf] %v587_v11  ;;  %v715_v11 = vld [vmem:[%s7475_s28 + $0x858] sm:$0xf] }
  0xe1   : > { %590 = vst [vmem:[%s7480_s29 + $0x330] sm:$0xf] %v589_v12  ;;  %v717_v12 = vld [vmem:[%s7475_s28 + $0x860] sm:$0xf] }
  0xe2   : > { %592 = vst [vmem:[%s7480_s29 + $0x334] sm:$0xf] %v591_v13  ;;  %v719_v13 = vld [vmem:[%s7475_s28 + $0x868] sm:$0xf] }
  0xe3   : > { %594 = vst [vmem:[%s7480_s29 + $0x338] sm:$0xf] %v593_v14  ;;  %v721_v14 = vld [vmem:[%s7475_s28 + $0x870] sm:$0xf] }
  0xe4   : > { %596 = vst [vmem:[%s7480_s29 + $0x33c] sm:$0xf] %v595_v15  ;;  %v723_v15 = vld [vmem:[%s7475_s28 + $0x878] sm:$0xf] }
  0xe5   : > { %598 = vst [vmem:[%s7480_s29 + $0x340] sm:$0xf] %v597_v16  ;;  %v725_v16 = vld [vmem:[%s7475_s28 + $0x880] sm:$0xf] }
  0xe6   : > { %600 = vst [vmem:[%s7480_s29 + $0x344] sm:$0xf] %v599_v17  ;;  %v727_v17 = vld [vmem:[%s7475_s28 + $0x888] sm:$0xf] }
  0xe7   : > { %602 = vst [vmem:[%s7480_s29 + $0x348] sm:$0xf] %v601_v18  ;;  %v729_v18 = vld [vmem:[%s7475_s28 + $0x890] sm:$0xf] }
  0xe8   : > { %604 = vst [vmem:[%s7480_s29 + $0x34c] sm:$0xf] %v603_v19  ;;  %v731_v19 = vld [vmem:[%s7475_s28 + $0x898] sm:$0xf] }
  0xe9   : > { %606 = vst [vmem:[%s7480_s29 + $0x350] sm:$0xf] %v605_v20  ;;  %v733_v20 = vld [vmem:[%s7475_s28 + $0x8a0] sm:$0xf] }
  0xea   : > { %608 = vst [vmem:[%s7480_s29 + $0x354] sm:$0xf] %v607_v21  ;;  %v735_v21 = vld [vmem:[%s7475_s28 + $0x8a8] sm:$0xf] }
  0xeb   : > { %610 = vst [vmem:[%s7480_s29 + $0x358] sm:$0xf] %v609_v22  ;;  %v737_v22 = vld [vmem:[%s7475_s28 + $0x8b0] sm:$0xf] }
  0xec   : > { %612 = vst [vmem:[%s7480_s29 + $0x35c] sm:$0xf] %v611_v23  ;;  %v739_v23 = vld [vmem:[%s7475_s28 + $0x8b8] sm:$0xf] }
  0xed   : > { %614 = vst [vmem:[%s7480_s29 + $0x360] sm:$0xf] %v613_v24  ;;  %v741_v24 = vld [vmem:[%s7475_s28 + $0x8c0] sm:$0xf] }
  0xee   : > { %616 = vst [vmem:[%s7480_s29 + $0x364] sm:$0xf] %v615_v25  ;;  %v743_v25 = vld [vmem:[%s7475_s28 + $0x8c8] sm:$0xf] }
  0xef   : > { %618 = vst [vmem:[%s7480_s29 + $0x368] sm:$0xf] %v617_v26  ;;  %v745_v26 = vld [vmem:[%s7475_s28 + $0x8d0] sm:$0xf] }
  0xf0   : > { %620 = vst [vmem:[%s7480_s29 + $0x36c] sm:$0xf] %v619_v27  ;;  %v747_v27 = vld [vmem:[%s7475_s28 + $0x8d8] sm:$0xf] }
  0xf1   : > { %622 = vst [vmem:[%s7480_s29 + $0x370] sm:$0xf] %v621_v28  ;;  %v749_v28 = vld [vmem:[%s7475_s28 + $0x8e0] sm:$0xf] }
  0xf2   : > { %624 = vst [vmem:[%s7480_s29 + $0x374] sm:$0xf] %v623_v29  ;;  %v751_v29 = vld [vmem:[%s7475_s28 + $0x8e8] sm:$0xf] }
  0xf3   : > { %626 = vst [vmem:[%s7480_s29 + $0x378] sm:$0xf] %v625_v30  ;;  %v753_v30 = vld [vmem:[%s7475_s28 + $0x8f0] sm:$0xf] }
  0xf4   : > { %628 = vst [vmem:[%s7480_s29 + $0x37c] sm:$0xf] %v627_v31  ;;  %v755_v31 = vld [vmem:[%s7475_s28 + $0x8f8] sm:$0xf] }
  0xf5   : > { %630 = vst [vmem:[%s7480_s29 + $0x380] sm:$0xf] %v629_v32  ;;  %v757_v32 = vld [vmem:[%s7475_s28 + $0x900] sm:$0xf] }
  0xf6   : > { %632 = vst [vmem:[%s7480_s29 + $0x384] sm:$0xf] %v631_v33  ;;  %v759_v33 = vld [vmem:[%s7475_s28 + $0x908] sm:$0xf] }
  0xf7   : > { %634 = vst [vmem:[%s7480_s29 + $0x388] sm:$0xf] %v633_v34  ;;  %v761_v34 = vld [vmem:[%s7475_s28 + $0x910] sm:$0xf] }
  0xf8   : > { %636 = vst [vmem:[%s7480_s29 + $0x38c] sm:$0xf] %v635_v35  ;;  %v763_v35 = vld [vmem:[%s7475_s28 + $0x918] sm:$0xf] }
  0xf9   : > { %638 = vst [vmem:[%s7480_s29 + $0x390] sm:$0xf] %v637_v36  ;;  %v765_v36 = vld [vmem:[%s7475_s28 + $0x920] sm:$0xf] }
  0xfa   : > { %640 = vst [vmem:[%s7480_s29 + $0x394] sm:$0xf] %v639_v37  ;;  %v767_v37 = vld [vmem:[%s7475_s28 + $0x928] sm:$0xf] }
  0xfb   : > { %642 = vst [vmem:[%s7480_s29 + $0x398] sm:$0xf] %v641_v38  ;;  %v769_v38 = vld [vmem:[%s7475_s28 + $0x930] sm:$0xf] }
  0xfc   : > { %644 = vst [vmem:[%s7480_s29 + $0x39c] sm:$0xf] %v643_v39  ;;  %v771_v39 = vld [vmem:[%s7475_s28 + $0x938] sm:$0xf] }
  0xfd   : > { %646 = vst [vmem:[%s7480_s29 + $0x3a0] sm:$0xf] %v645_v40  ;;  %v773_v40 = vld [vmem:[%s7475_s28 + $0x940] sm:$0xf] }
  0xfe   : > { %648 = vst [vmem:[%s7480_s29 + $0x3a4] sm:$0xf] %v647_v41  ;;  %v775_v41 = vld [vmem:[%s7475_s28 + $0x948] sm:$0xf] }
  0xff   : > { %650 = vst [vmem:[%s7480_s29 + $0x3a8] sm:$0xf] %v649_v42  ;;  %v777_v42 = vld [vmem:[%s7475_s28 + $0x950] sm:$0xf] }
 0x100   : > { %652 = vst [vmem:[%s7480_s29 + $0x3ac] sm:$0xf] %v651_v43  ;;  %v779_v43 = vld [vmem:[%s7475_s28 + $0x958] sm:$0xf] }
 0x101   : > { %654 = vst [vmem:[%s7480_s29 + $0x3b0] sm:$0xf] %v653_v44  ;;  %v781_v44 = vld [vmem:[%s7475_s28 + $0x960] sm:$0xf] }
 0x102   : > { %656 = vst [vmem:[%s7480_s29 + $0x3b4] sm:$0xf] %v655_v45  ;;  %v783_v45 = vld [vmem:[%s7475_s28 + $0x968] sm:$0xf] }
 0x103   : > { %658 = vst [vmem:[%s7480_s29 + $0x3b8] sm:$0xf] %v657_v46  ;;  %v785_v46 = vld [vmem:[%s7475_s28 + $0x970] sm:$0xf] }
 0x104   : > { %660 = vst [vmem:[%s7480_s29 + $0x3bc] sm:$0xf] %v659_v47  ;;  %v787_v47 = vld [vmem:[%s7475_s28 + $0x978] sm:$0xf] }
 0x105   : > { %662 = vst [vmem:[%s7480_s29 + $0x3c0] sm:$0xf] %v661_v48  ;;  %v789_v48 = vld [vmem:[%s7475_s28 + $0x980] sm:$0xf] }
 0x106   : > { %664 = vst [vmem:[%s7480_s29 + $0x3c4] sm:$0xf] %v663_v49  ;;  %v791_v49 = vld [vmem:[%s7475_s28 + $0x988] sm:$0xf] }
 0x107   : > { %666 = vst [vmem:[%s7480_s29 + $0x3c8] sm:$0xf] %v665_v50  ;;  %v793_v50 = vld [vmem:[%s7475_s28 + $0x990] sm:$0xf] }
 0x108   : > { %668 = vst [vmem:[%s7480_s29 + $0x3cc] sm:$0xf] %v667_v51  ;;  %v795_v51 = vld [vmem:[%s7475_s28 + $0x998] sm:$0xf] }
 0x109   : > { %670 = vst [vmem:[%s7480_s29 + $0x3d0] sm:$0xf] %v669_v52  ;;  %v797_v52 = vld [vmem:[%s7475_s28 + $0x9a0] sm:$0xf] }
 0x10a   : > { %672 = vst [vmem:[%s7480_s29 + $0x3d4] sm:$0xf] %v671_v53  ;;  %v799_v53 = vld [vmem:[%s7475_s28 + $0x9a8] sm:$0xf] }
 0x10b   : > { %674 = vst [vmem:[%s7480_s29 + $0x3d8] sm:$0xf] %v673_v54  ;;  %v801_v54 = vld [vmem:[%s7475_s28 + $0x9b0] sm:$0xf] }
 0x10c   : > { %676 = vst [vmem:[%s7480_s29 + $0x3dc] sm:$0xf] %v675_v55  ;;  %v803_v55 = vld [vmem:[%s7475_s28 + $0x9b8] sm:$0xf] }
 0x10d   : > { %678 = vst [vmem:[%s7480_s29 + $0x3e0] sm:$0xf] %v677_v56  ;;  %v805_v56 = vld [vmem:[%s7475_s28 + $0x9c0] sm:$0xf] }
 0x10e   : > { %680 = vst [vmem:[%s7480_s29 + $0x3e4] sm:$0xf] %v679_v57  ;;  %v807_v57 = vld [vmem:[%s7475_s28 + $0x9c8] sm:$0xf] }
 0x10f   : > { %682 = vst [vmem:[%s7480_s29 + $0x3e8] sm:$0xf] %v681_v58  ;;  %v809_v58 = vld [vmem:[%s7475_s28 + $0x9d0] sm:$0xf] }
 0x110   : > { %684 = vst [vmem:[%s7480_s29 + $0x3ec] sm:$0xf] %v683_v59  ;;  %v811_v59 = vld [vmem:[%s7475_s28 + $0x9d8] sm:$0xf] }
 0x111   : > { %686 = vst [vmem:[%s7480_s29 + $0x3f0] sm:$0xf] %v685_v60  ;;  %v813_v60 = vld [vmem:[%s7475_s28 + $0x9e0] sm:$0xf] }
 0x112   : > { %688 = vst [vmem:[%s7480_s29 + $0x3f4] sm:$0xf] %v687_v61  ;;  %v815_v61 = vld [vmem:[%s7475_s28 + $0x9e8] sm:$0xf] }
 0x113   : > { %690 = vst [vmem:[%s7480_s29 + $0x3f8] sm:$0xf] %v689_v62  ;;  %v817_v62 = vld [vmem:[%s7475_s28 + $0x9f0] sm:$0xf] }
 0x114   : > { %692 = vst [vmem:[%s7480_s29 + $0x3fc] sm:$0xf] %v691_v63  ;;  %v819_v63 = vld [vmem:[%s7475_s28 + $0x9f8] sm:$0xf] }
 0x115   : > { %694 = vst [vmem:[%s7480_s29 + $0x400] sm:$0xf] %v693_v0  ;;  %v821_v0 = vld [vmem:[%s7475_s28 + $0xa00] sm:$0xf] }
 0x116   : > { %696 = vst [vmem:[%s7480_s29 + $0x404] sm:$0xf] %v695_v1  ;;  %v823_v1 = vld [vmem:[%s7475_s28 + $0xa08] sm:$0xf] }
 0x117   : > { %698 = vst [vmem:[%s7480_s29 + $0x408] sm:$0xf] %v697_v2  ;;  %v825_v2 = vld [vmem:[%s7475_s28 + $0xa10] sm:$0xf] }
 0x118   : > { %700 = vst [vmem:[%s7480_s29 + $0x40c] sm:$0xf] %v699_v3  ;;  %v827_v3 = vld [vmem:[%s7475_s28 + $0xa18] sm:$0xf] }
 0x119   : > { %702 = vst [vmem:[%s7480_s29 + $0x410] sm:$0xf] %v701_v4  ;;  %v829_v4 = vld [vmem:[%s7475_s28 + $0xa20] sm:$0xf] }
 0x11a   : > { %704 = vst [vmem:[%s7480_s29 + $0x414] sm:$0xf] %v703_v5  ;;  %v831_v5 = vld [vmem:[%s7475_s28 + $0xa28] sm:$0xf] }
 0x11b   : > { %706 = vst [vmem:[%s7480_s29 + $0x418] sm:$0xf] %v705_v6  ;;  %v833_v6 = vld [vmem:[%s7475_s28 + $0xa30] sm:$0xf] }
 0x11c   : > { %708 = vst [vmem:[%s7480_s29 + $0x41c] sm:$0xf] %v707_v7  ;;  %v835_v7 = vld [vmem:[%s7475_s28 + $0xa38] sm:$0xf] }
 0x11d   : > { %710 = vst [vmem:[%s7480_s29 + $0x420] sm:$0xf] %v709_v8  ;;  %v837_v8 = vld [vmem:[%s7475_s28 + $0xa40] sm:$0xf] }
 0x11e   : > { %712 = vst [vmem:[%s7480_s29 + $0x424] sm:$0xf] %v711_v9  ;;  %v839_v9 = vld [vmem:[%s7475_s28 + $0xa48] sm:$0xf] }
 0x11f   : > { %714 = vst [vmem:[%s7480_s29 + $0x428] sm:$0xf] %v713_v10  ;;  %v841_v10 = vld [vmem:[%s7475_s28 + $0xa50] sm:$0xf] }
 0x120   : > { %716 = vst [vmem:[%s7480_s29 + $0x42c] sm:$0xf] %v715_v11  ;;  %v843_v11 = vld [vmem:[%s7475_s28 + $0xa58] sm:$0xf] }
 0x121   : > { %718 = vst [vmem:[%s7480_s29 + $0x430] sm:$0xf] %v717_v12  ;;  %v845_v12 = vld [vmem:[%s7475_s28 + $0xa60] sm:$0xf] }
 0x122   : > { %720 = vst [vmem:[%s7480_s29 + $0x434] sm:$0xf] %v719_v13  ;;  %v847_v13 = vld [vmem:[%s7475_s28 + $0xa68] sm:$0xf] }
 0x123   : > { %722 = vst [vmem:[%s7480_s29 + $0x438] sm:$0xf] %v721_v14  ;;  %v849_v14 = vld [vmem:[%s7475_s28 + $0xa70] sm:$0xf] }
 0x124   : > { %724 = vst [vmem:[%s7480_s29 + $0x43c] sm:$0xf] %v723_v15  ;;  %v851_v15 = vld [vmem:[%s7475_s28 + $0xa78] sm:$0xf] }
 0x125   : > { %726 = vst [vmem:[%s7480_s29 + $0x440] sm:$0xf] %v725_v16  ;;  %v853_v16 = vld [vmem:[%s7475_s28 + $0xa80] sm:$0xf] }
 0x126   : > { %728 = vst [vmem:[%s7480_s29 + $0x444] sm:$0xf] %v727_v17  ;;  %v855_v17 = vld [vmem:[%s7475_s28 + $0xa88] sm:$0xf] }
 0x127   : > { %730 = vst [vmem:[%s7480_s29 + $0x448] sm:$0xf] %v729_v18  ;;  %v857_v18 = vld [vmem:[%s7475_s28 + $0xa90] sm:$0xf] }
 0x128   : > { %732 = vst [vmem:[%s7480_s29 + $0x44c] sm:$0xf] %v731_v19  ;;  %v859_v19 = vld [vmem:[%s7475_s28 + $0xa98] sm:$0xf] }
 0x129   : > { %734 = vst [vmem:[%s7480_s29 + $0x450] sm:$0xf] %v733_v20  ;;  %v861_v20 = vld [vmem:[%s7475_s28 + $0xaa0] sm:$0xf] }
 0x12a   : > { %736 = vst [vmem:[%s7480_s29 + $0x454] sm:$0xf] %v735_v21  ;;  %v863_v21 = vld [vmem:[%s7475_s28 + $0xaa8] sm:$0xf] }
 0x12b   : > { %738 = vst [vmem:[%s7480_s29 + $0x458] sm:$0xf] %v737_v22  ;;  %v865_v22 = vld [vmem:[%s7475_s28 + $0xab0] sm:$0xf] }
 0x12c   : > { %740 = vst [vmem:[%s7480_s29 + $0x45c] sm:$0xf] %v739_v23  ;;  %v867_v23 = vld [vmem:[%s7475_s28 + $0xab8] sm:$0xf] }
 0x12d   : > { %742 = vst [vmem:[%s7480_s29 + $0x460] sm:$0xf] %v741_v24  ;;  %v869_v24 = vld [vmem:[%s7475_s28 + $0xac0] sm:$0xf] }
 0x12e   : > { %744 = vst [vmem:[%s7480_s29 + $0x464] sm:$0xf] %v743_v25  ;;  %v871_v25 = vld [vmem:[%s7475_s28 + $0xac8] sm:$0xf] }
 0x12f   : > { %746 = vst [vmem:[%s7480_s29 + $0x468] sm:$0xf] %v745_v26  ;;  %v873_v26 = vld [vmem:[%s7475_s28 + $0xad0] sm:$0xf] }
 0x130   : > { %748 = vst [vmem:[%s7480_s29 + $0x46c] sm:$0xf] %v747_v27  ;;  %v875_v27 = vld [vmem:[%s7475_s28 + $0xad8] sm:$0xf] }
 0x131   : > { %750 = vst [vmem:[%s7480_s29 + $0x470] sm:$0xf] %v749_v28  ;;  %v877_v28 = vld [vmem:[%s7475_s28 + $0xae0] sm:$0xf] }
 0x132   : > { %752 = vst [vmem:[%s7480_s29 + $0x474] sm:$0xf] %v751_v29  ;;  %v879_v29 = vld [vmem:[%s7475_s28 + $0xae8] sm:$0xf] }
 0x133   : > { %754 = vst [vmem:[%s7480_s29 + $0x478] sm:$0xf] %v753_v30  ;;  %v881_v30 = vld [vmem:[%s7475_s28 + $0xaf0] sm:$0xf] }
 0x134   : > { %756 = vst [vmem:[%s7480_s29 + $0x47c] sm:$0xf] %v755_v31  ;;  %v883_v31 = vld [vmem:[%s7475_s28 + $0xaf8] sm:$0xf] }
 0x135   : > { %758 = vst [vmem:[%s7480_s29 + $0x480] sm:$0xf] %v757_v32  ;;  %v885_v32 = vld [vmem:[%s7475_s28 + $0xb00] sm:$0xf] }
 0x136   : > { %760 = vst [vmem:[%s7480_s29 + $0x484] sm:$0xf] %v759_v33  ;;  %v887_v33 = vld [vmem:[%s7475_s28 + $0xb08] sm:$0xf] }
 0x137   : > { %762 = vst [vmem:[%s7480_s29 + $0x488] sm:$0xf] %v761_v34  ;;  %v889_v34 = vld [vmem:[%s7475_s28 + $0xb10] sm:$0xf] }
 0x138   : > { %764 = vst [vmem:[%s7480_s29 + $0x48c] sm:$0xf] %v763_v35  ;;  %v891_v35 = vld [vmem:[%s7475_s28 + $0xb18] sm:$0xf] }
 0x139   : > { %766 = vst [vmem:[%s7480_s29 + $0x490] sm:$0xf] %v765_v36  ;;  %v893_v36 = vld [vmem:[%s7475_s28 + $0xb20] sm:$0xf] }
 0x13a   : > { %768 = vst [vmem:[%s7480_s29 + $0x494] sm:$0xf] %v767_v37  ;;  %v895_v37 = vld [vmem:[%s7475_s28 + $0xb28] sm:$0xf] }
 0x13b   : > { %770 = vst [vmem:[%s7480_s29 + $0x498] sm:$0xf] %v769_v38  ;;  %v897_v38 = vld [vmem:[%s7475_s28 + $0xb30] sm:$0xf] }
 0x13c   : > { %772 = vst [vmem:[%s7480_s29 + $0x49c] sm:$0xf] %v771_v39  ;;  %v899_v39 = vld [vmem:[%s7475_s28 + $0xb38] sm:$0xf] }
 0x13d   : > { %774 = vst [vmem:[%s7480_s29 + $0x4a0] sm:$0xf] %v773_v40  ;;  %v901_v40 = vld [vmem:[%s7475_s28 + $0xb40] sm:$0xf] }
 0x13e   : > { %776 = vst [vmem:[%s7480_s29 + $0x4a4] sm:$0xf] %v775_v41  ;;  %v903_v41 = vld [vmem:[%s7475_s28 + $0xb48] sm:$0xf] }
 0x13f   : > { %778 = vst [vmem:[%s7480_s29 + $0x4a8] sm:$0xf] %v777_v42  ;;  %v905_v42 = vld [vmem:[%s7475_s28 + $0xb50] sm:$0xf] }
 0x140   : > { %780 = vst [vmem:[%s7480_s29 + $0x4ac] sm:$0xf] %v779_v43  ;;  %v907_v43 = vld [vmem:[%s7475_s28 + $0xb58] sm:$0xf] }
 0x141   : > { %782 = vst [vmem:[%s7480_s29 + $0x4b0] sm:$0xf] %v781_v44  ;;  %v909_v44 = vld [vmem:[%s7475_s28 + $0xb60] sm:$0xf] }
 0x142   : > { %784 = vst [vmem:[%s7480_s29 + $0x4b4] sm:$0xf] %v783_v45  ;;  %v911_v45 = vld [vmem:[%s7475_s28 + $0xb68] sm:$0xf] }
 0x143   : > { %786 = vst [vmem:[%s7480_s29 + $0x4b8] sm:$0xf] %v785_v46  ;;  %v913_v46 = vld [vmem:[%s7475_s28 + $0xb70] sm:$0xf] }
 0x144   : > { %788 = vst [vmem:[%s7480_s29 + $0x4bc] sm:$0xf] %v787_v47  ;;  %v915_v47 = vld [vmem:[%s7475_s28 + $0xb78] sm:$0xf] }
 0x145   : > { %790 = vst [vmem:[%s7480_s29 + $0x4c0] sm:$0xf] %v789_v48  ;;  %v917_v48 = vld [vmem:[%s7475_s28 + $0xb80] sm:$0xf] }
 0x146   : > { %792 = vst [vmem:[%s7480_s29 + $0x4c4] sm:$0xf] %v791_v49  ;;  %v919_v49 = vld [vmem:[%s7475_s28 + $0xb88] sm:$0xf] }
 0x147   : > { %794 = vst [vmem:[%s7480_s29 + $0x4c8] sm:$0xf] %v793_v50  ;;  %v921_v50 = vld [vmem:[%s7475_s28 + $0xb90] sm:$0xf] }
 0x148   : > { %796 = vst [vmem:[%s7480_s29 + $0x4cc] sm:$0xf] %v795_v51  ;;  %v923_v51 = vld [vmem:[%s7475_s28 + $0xb98] sm:$0xf] }
 0x149   : > { %798 = vst [vmem:[%s7480_s29 + $0x4d0] sm:$0xf] %v797_v52  ;;  %v925_v52 = vld [vmem:[%s7475_s28 + $0xba0] sm:$0xf] }
 0x14a   : > { %800 = vst [vmem:[%s7480_s29 + $0x4d4] sm:$0xf] %v799_v53  ;;  %v927_v53 = vld [vmem:[%s7475_s28 + $0xba8] sm:$0xf] }
 0x14b   : > { %802 = vst [vmem:[%s7480_s29 + $0x4d8] sm:$0xf] %v801_v54  ;;  %v929_v54 = vld [vmem:[%s7475_s28 + $0xbb0] sm:$0xf] }
 0x14c   : > { %804 = vst [vmem:[%s7480_s29 + $0x4dc] sm:$0xf] %v803_v55  ;;  %v931_v55 = vld [vmem:[%s7475_s28 + $0xbb8] sm:$0xf] }
 0x14d   : > { %806 = vst [vmem:[%s7480_s29 + $0x4e0] sm:$0xf] %v805_v56  ;;  %v933_v56 = vld [vmem:[%s7475_s28 + $0xbc0] sm:$0xf] }
 0x14e   : > { %808 = vst [vmem:[%s7480_s29 + $0x4e4] sm:$0xf] %v807_v57  ;;  %v935_v57 = vld [vmem:[%s7475_s28 + $0xbc8] sm:$0xf] }
 0x14f   : > { %810 = vst [vmem:[%s7480_s29 + $0x4e8] sm:$0xf] %v809_v58  ;;  %v937_v58 = vld [vmem:[%s7475_s28 + $0xbd0] sm:$0xf] }
 0x150   : > { %812 = vst [vmem:[%s7480_s29 + $0x4ec] sm:$0xf] %v811_v59  ;;  %v939_v59 = vld [vmem:[%s7475_s28 + $0xbd8] sm:$0xf] }
 0x151   : > { %814 = vst [vmem:[%s7480_s29 + $0x4f0] sm:$0xf] %v813_v60  ;;  %v941_v60 = vld [vmem:[%s7475_s28 + $0xbe0] sm:$0xf] }
 0x152   : > { %816 = vst [vmem:[%s7480_s29 + $0x4f4] sm:$0xf] %v815_v61  ;;  %v943_v61 = vld [vmem:[%s7475_s28 + $0xbe8] sm:$0xf] }
 0x153   : > { %818 = vst [vmem:[%s7480_s29 + $0x4f8] sm:$0xf] %v817_v62  ;;  %v945_v62 = vld [vmem:[%s7475_s28 + $0xbf0] sm:$0xf] }
 0x154   : > { %820 = vst [vmem:[%s7480_s29 + $0x4fc] sm:$0xf] %v819_v63  ;;  %v947_v63 = vld [vmem:[%s7475_s28 + $0xbf8] sm:$0xf] }
 0x155   : > { %822 = vst [vmem:[%s7480_s29 + $0x500] sm:$0xf] %v821_v0  ;;  %v949_v0 = vld [vmem:[%s7475_s28 + $0xc00] sm:$0xf] }
 0x156   : > { %824 = vst [vmem:[%s7480_s29 + $0x504] sm:$0xf] %v823_v1  ;;  %v951_v1 = vld [vmem:[%s7475_s28 + $0xc08] sm:$0xf] }
 0x157   : > { %826 = vst [vmem:[%s7480_s29 + $0x508] sm:$0xf] %v825_v2  ;;  %v953_v2 = vld [vmem:[%s7475_s28 + $0xc10] sm:$0xf] }
 0x158   : > { %828 = vst [vmem:[%s7480_s29 + $0x50c] sm:$0xf] %v827_v3  ;;  %v955_v3 = vld [vmem:[%s7475_s28 + $0xc18] sm:$0xf] }
 0x159   : > { %830 = vst [vmem:[%s7480_s29 + $0x510] sm:$0xf] %v829_v4  ;;  %v957_v4 = vld [vmem:[%s7475_s28 + $0xc20] sm:$0xf] }
 0x15a   : > { %832 = vst [vmem:[%s7480_s29 + $0x514] sm:$0xf] %v831_v5  ;;  %v959_v5 = vld [vmem:[%s7475_s28 + $0xc28] sm:$0xf] }
 0x15b   : > { %834 = vst [vmem:[%s7480_s29 + $0x518] sm:$0xf] %v833_v6  ;;  %v961_v6 = vld [vmem:[%s7475_s28 + $0xc30] sm:$0xf] }
 0x15c   : > { %836 = vst [vmem:[%s7480_s29 + $0x51c] sm:$0xf] %v835_v7  ;;  %v963_v7 = vld [vmem:[%s7475_s28 + $0xc38] sm:$0xf] }
 0x15d   : > { %838 = vst [vmem:[%s7480_s29 + $0x520] sm:$0xf] %v837_v8  ;;  %v965_v8 = vld [vmem:[%s7475_s28 + $0xc40] sm:$0xf] }
 0x15e   : > { %840 = vst [vmem:[%s7480_s29 + $0x524] sm:$0xf] %v839_v9  ;;  %v967_v9 = vld [vmem:[%s7475_s28 + $0xc48] sm:$0xf] }
 0x15f   : > { %842 = vst [vmem:[%s7480_s29 + $0x528] sm:$0xf] %v841_v10  ;;  %v969_v10 = vld [vmem:[%s7475_s28 + $0xc50] sm:$0xf] }
 0x160   : > { %844 = vst [vmem:[%s7480_s29 + $0x52c] sm:$0xf] %v843_v11  ;;  %v971_v11 = vld [vmem:[%s7475_s28 + $0xc58] sm:$0xf] }
 0x161   : > { %846 = vst [vmem:[%s7480_s29 + $0x530] sm:$0xf] %v845_v12  ;;  %v973_v12 = vld [vmem:[%s7475_s28 + $0xc60] sm:$0xf] }
 0x162   : > { %848 = vst [vmem:[%s7480_s29 + $0x534] sm:$0xf] %v847_v13  ;;  %v975_v13 = vld [vmem:[%s7475_s28 + $0xc68] sm:$0xf] }
 0x163   : > { %850 = vst [vmem:[%s7480_s29 + $0x538] sm:$0xf] %v849_v14  ;;  %v977_v14 = vld [vmem:[%s7475_s28 + $0xc70] sm:$0xf] }
 0x164   : > { %852 = vst [vmem:[%s7480_s29 + $0x53c] sm:$0xf] %v851_v15  ;;  %v979_v15 = vld [vmem:[%s7475_s28 + $0xc78] sm:$0xf] }
 0x165   : > { %854 = vst [vmem:[%s7480_s29 + $0x540] sm:$0xf] %v853_v16 }
 0x166   : > { %856 = vst [vmem:[%s7480_s29 + $0x544] sm:$0xf] %v855_v17 }
 0x167   : > { %858 = vst [vmem:[%s7480_s29 + $0x548] sm:$0xf] %v857_v18 }
 0x168   : > { %860 = vst [vmem:[%s7480_s29 + $0x54c] sm:$0xf] %v859_v19 }
 0x169   : > { %862 = vst [vmem:[%s7480_s29 + $0x550] sm:$0xf] %v861_v20 }
 0x16a   : > { %864 = vst [vmem:[%s7480_s29 + $0x554] sm:$0xf] %v863_v21 }
 0x16b   : > { %866 = vst [vmem:[%s7480_s29 + $0x558] sm:$0xf] %v865_v22 }
 0x16c   : > { %868 = vst [vmem:[%s7480_s29 + $0x55c] sm:$0xf] %v867_v23 }
 0x16d   : > { %870 = vst [vmem:[%s7480_s29 + $0x560] sm:$0xf] %v869_v24 }
 0x16e   : > { %872 = vst [vmem:[%s7480_s29 + $0x564] sm:$0xf] %v871_v25 }
 0x16f   : > { %874 = vst [vmem:[%s7480_s29 + $0x568] sm:$0xf] %v873_v26 }
 0x170   : > { %876 = vst [vmem:[%s7480_s29 + $0x56c] sm:$0xf] %v875_v27 }
 0x171   : > { %878 = vst [vmem:[%s7480_s29 + $0x570] sm:$0xf] %v877_v28 }
 0x172   : > { %880 = vst [vmem:[%s7480_s29 + $0x574] sm:$0xf] %v879_v29 }
 0x173   : > { %882 = vst [vmem:[%s7480_s29 + $0x578] sm:$0xf] %v881_v30 }
 0x174   : > { %884 = vst [vmem:[%s7480_s29 + $0x57c] sm:$0xf] %v883_v31 }
 0x175   : > { %886 = vst [vmem:[%s7480_s29 + $0x580] sm:$0xf] %v885_v32 }
 0x176   : > { %888 = vst [vmem:[%s7480_s29 + $0x584] sm:$0xf] %v887_v33 }
 0x177   : > { %890 = vst [vmem:[%s7480_s29 + $0x588] sm:$0xf] %v889_v34 }
 0x178   : > { %892 = vst [vmem:[%s7480_s29 + $0x58c] sm:$0xf] %v891_v35 }
 0x179   : > { %894 = vst [vmem:[%s7480_s29 + $0x590] sm:$0xf] %v893_v36 }
 0x17a   : > { %896 = vst [vmem:[%s7480_s29 + $0x594] sm:$0xf] %v895_v37 }
 0x17b   : > { %898 = vst [vmem:[%s7480_s29 + $0x598] sm:$0xf] %v897_v38 }
 0x17c   : > { %900 = vst [vmem:[%s7480_s29 + $0x59c] sm:$0xf] %v899_v39 }
 0x17d   : > { %902 = vst [vmem:[%s7480_s29 + $0x5a0] sm:$0xf] %v901_v40 }
 0x17e   : > { %904 = vst [vmem:[%s7480_s29 + $0x5a4] sm:$0xf] %v903_v41 }
 0x17f   : > { %906 = vst [vmem:[%s7480_s29 + $0x5a8] sm:$0xf] %v905_v42 }
 0x180   : > { %908 = vst [vmem:[%s7480_s29 + $0x5ac] sm:$0xf] %v907_v43 }
 0x181   : > { %910 = vst [vmem:[%s7480_s29 + $0x5b0] sm:$0xf] %v909_v44 }
 0x182   : > { %912 = vst [vmem:[%s7480_s29 + $0x5b4] sm:$0xf] %v911_v45 }
 0x183   : > { %914 = vst [vmem:[%s7480_s29 + $0x5b8] sm:$0xf] %v913_v46 }
 0x184   : > { %916 = vst [vmem:[%s7480_s29 + $0x5bc] sm:$0xf] %v915_v47 }
 0x185   : > { %918 = vst [vmem:[%s7480_s29 + $0x5c0] sm:$0xf] %v917_v48 }
 0x186   : > { %920 = vst [vmem:[%s7480_s29 + $0x5c4] sm:$0xf] %v919_v49 }
 0x187   : > { %922 = vst [vmem:[%s7480_s29 + $0x5c8] sm:$0xf] %v921_v50 }
 0x188   : > { %924 = vst [vmem:[%s7480_s29 + $0x5cc] sm:$0xf] %v923_v51 }
 0x189   : > { %926 = vst [vmem:[%s7480_s29 + $0x5d0] sm:$0xf] %v925_v52 }
 0x18a   : > { %928 = vst [vmem:[%s7480_s29 + $0x5d4] sm:$0xf] %v927_v53 }
 0x18b   : > { %930 = vst [vmem:[%s7480_s29 + $0x5d8] sm:$0xf] %v929_v54 }
 0x18c   : > { %932 = vst [vmem:[%s7480_s29 + $0x5dc] sm:$0xf] %v931_v55 }
 0x18d   : > { %934 = vst [vmem:[%s7480_s29 + $0x5e0] sm:$0xf] %v933_v56 }
 0x18e   : > { %936 = vst [vmem:[%s7480_s29 + $0x5e4] sm:$0xf] %v935_v57 }
 0x18f   : > { %938 = vst [vmem:[%s7480_s29 + $0x5e8] sm:$0xf] %v937_v58 }
 0x190   : > { %940 = vst [vmem:[%s7480_s29 + $0x5ec] sm:$0xf] %v939_v59 }
 0x191   : > { %942 = vst [vmem:[%s7480_s29 + $0x5f0] sm:$0xf] %v941_v60 }
 0x192   : > { %944 = vst [vmem:[%s7480_s29 + $0x5f4] sm:$0xf] %v943_v61 }
 0x193   : > { %946 = vst [vmem:[%s7480_s29 + $0x5f8] sm:$0xf] %v945_v62 }
 0x194   : > { %948 = vst [vmem:[%s7480_s29 + $0x5fc] sm:$0xf] %v947_v63 }
 0x195   : > { %950 = vst [vmem:[%s7480_s29 + $0x600] sm:$0xf] %v949_v0 }
 0x196   : > { %952 = vst [vmem:[%s7480_s29 + $0x604] sm:$0xf] %v951_v1 }
 0x197   : > { %954 = vst [vmem:[%s7480_s29 + $0x608] sm:$0xf] %v953_v2 }
 0x198   : > { %956 = vst [vmem:[%s7480_s29 + $0x60c] sm:$0xf] %v955_v3 }
 0x199   : > { %958 = vst [vmem:[%s7480_s29 + $0x610] sm:$0xf] %v957_v4 }
 0x19a   : > { %960 = vst [vmem:[%s7480_s29 + $0x614] sm:$0xf] %v959_v5 }
 0x19b   : > { %962 = vst [vmem:[%s7480_s29 + $0x618] sm:$0xf] %v961_v6 }
 0x19c   : > { %964 = vst [vmem:[%s7480_s29 + $0x61c] sm:$0xf] %v963_v7 }
 0x19d   : > { %966 = vst [vmem:[%s7480_s29 + $0x620] sm:$0xf] %v965_v8 }
 0x19e   : > { %968 = vst [vmem:[%s7480_s29 + $0x624] sm:$0xf] %v967_v9 }
 0x19f   : > { %970 = vst [vmem:[%s7480_s29 + $0x628] sm:$0xf] %v969_v10 }
 0x1a0   : > { %972 = vst [vmem:[%s7480_s29 + $0x62c] sm:$0xf] %v971_v11 }
 0x1a1   : > { %974 = vst [vmem:[%s7480_s29 + $0x630] sm:$0xf] %v973_v12 }
 0x1a2   : > { %976 = vst [vmem:[%s7480_s29 + $0x634] sm:$0xf] %v975_v13 }
 0x1a3   : > { %978 = vst [vmem:[%s7480_s29 + $0x638] sm:$0xf] %v977_v14 }
 0x1a4   : > { %980 = vst [vmem:[%s7480_s29 + $0x63c] sm:$0xf] %v979_v15 }
 0x1a5 PF: > { %p6049_p8 = scmp.ge.s32.totalorder %s7405_s16, 1  ;;  %p3435_p9 = scmp.lt.s32.totalorder %s7405_s16, 3 }
 0x1a7   : > { %p3436_p10 = pnand %p6049_p8, %p3435_p9 }
 0x1a8   : > { %s3442_s30 = sand.u32 (!%p3436_p10), 1, %s7389_s12   ;;  %p3480_p11 = scmp.lt.s32.totalorder (!%p3436_p10), %s7397_s14, 1 }
 0x1a9   : > { %3439 = sbr.rel (%p3436_p10) target bundleno = 806 (0x326), region = 80 }
 0x1aa   : > { %s7325_s4 = smul.u32 (!%p3436_p10), 1600, %s3442_s30 }
 0x1ac   : > { %s8284_s5 = scalar_lea.vmem (!%p3436_p10), [#allocation2], %s7325_s4 }
 0x1ae   : > { %v7112_v16 = vld [vmem:[%s8284_s5 + $0x38] sm:$0xff]  ;;  %v7111_v20 = vld [vmem:[%s8284_s5 + $0x30] sm:$0xff]  ;;  %v7110_v24 = vld [vmem:[%s8284_s5 + $0x28] sm:$0xff]  ;;  %s8344_s4 = scalar_select %p3480_p11, %s7397_s14, 1 }
 0x1af   : > { %v7120_v17 = vld [vmem:[%s8284_s5 + $0x78] sm:$0xff]  ;;  %5392 = vmatpush.bf16.msra.mxu0 %v7112_v16  ;;  %v7119_v21 = vld [vmem:[%s8284_s5 + $0x70] sm:$0xff]  ;;  %v7118_v25 = vld [vmem:[%s8284_s5 + $0x68] sm:$0xff]  ;;  %s7052_s7 = sshll.u32 (%p7462_p6), %s7397_s14, 2 }
 0x1b0   : > { %v7128_v18 = vld [vmem:[%s8284_s5 + $0xb8] sm:$0xff]  ;;  %5411 = vmatpush.bf16.msra.mxu1 %v7120_v17  ;;  %v7127_v22 = vld [vmem:[%s8284_s5 + $0xb0] sm:$0xff]  ;;  %v7126_v26 = vld [vmem:[%s8284_s5 + $0xa8] sm:$0xff]  ;;  %s3482_s8 = scalar_lea.vmem %s8839_s2, %s8344_s4  ;;  %s5890_s9 = scalar_lea.vmem (%p7462_p6), %s8840_s3, %s7052_s7 }
 0x1b1   : > { %v7136_v19 = vld [vmem:[%s8284_s5 + $0xf8] sm:$0xff]  ;;  %5430 = vmatpush.bf16.msra.mxu2 %v7128_v18  ;;  %v7135_v23 = vld [vmem:[%s8284_s5 + $0xf0] sm:$0xff]  ;;  %v7134_v27 = vld [vmem:[%s8284_s5 + $0xe8] sm:$0xff] }
 0x1b2   : > { %5449 = vmatpush.bf16.msra.mxu3 %v7136_v19  ;;  %v7109_v28 = vld [vmem:[%s8284_s5 + $0x20] sm:$0xff]  ;;  %v7108_v32 = vld [vmem:[%s8284_s5 + $0x18] sm:$0xff]  ;;  %v7107_v36 = vld [vmem:[%s8284_s5 + $0x10] sm:$0xff] }
 0x1b3   : > { %5393 = vmatpush.bf16.msra.mxu0 %v7111_v20  ;;  %v7117_v29 = vld [vmem:[%s8284_s5 + $0x60] sm:$0xff]  ;;  %v7116_v33 = vld [vmem:[%s8284_s5 + $0x58] sm:$0xff]  ;;  %v7115_v37 = vld [vmem:[%s8284_s5 + $0x50] sm:$0xff] }
 0x1b4   : > { %5412 = vmatpush.bf16.msra.mxu1 %v7119_v21  ;;  %v7125_v30 = vld [vmem:[%s8284_s5 + $0xa0] sm:$0xff]  ;;  %v7124_v34 = vld [vmem:[%s8284_s5 + $0x98] sm:$0xff]  ;;  %v7123_v38 = vld [vmem:[%s8284_s5 + $0x90] sm:$0xff] }
 0x1b5   : > { %5431 = vmatpush.bf16.msra.mxu2 %v7127_v22  ;;  %v7133_v31 = vld [vmem:[%s8284_s5 + $0xe0] sm:$0xff]  ;;  %v7132_v35 = vld [vmem:[%s8284_s5 + $0xd8] sm:$0xff]  ;;  %v7131_v39 = vld [vmem:[%s8284_s5 + $0xd0] sm:$0xff] }
 0x1b6   : > { %5450 = vmatpush.bf16.msra.mxu3 %v7135_v23  ;;  %v7106_v40 = vld [vmem:[%s8284_s5 + $0x8] sm:$0xff]  ;;  %v7105_v44 = vld [vmem:[%s8284_s5] sm:$0xff]  ;;  %v6063_v55 = vld [vmem:[%s8837_s0 + $0x6c] sm:$0xf0] }
 0x1b7   : > { %5394 = vmatpush.bf16.msra.mxu0 %v7110_v24  ;;  %v7114_v41 = vld [vmem:[%s8284_s5 + $0x48] sm:$0xff]  ;;  %v6053_v45 = vld [vmem:[%s8837_s0] sm:$0xf]  ;;  %v7067_v46 = vld [vmem:[%s8837_s0 + $0x60] sm:$0xf0] }
 0x1b8   : > { %5413 = vmatpush.bf16.msra.mxu1 %v7118_v25  ;;  %v7122_v42 = vld [vmem:[%s8284_s5 + $0x88] sm:$0xff]  ;;  %v7113_v47 = vld [vmem:[%s8284_s5 + $0x40] sm:$0xff]  ;;  %v7144_v56 = vld [vmem:[%s8284_s5 + $0x138] sm:$0xff]  ;;  %v6054_v58 = vor.u32 %v7067_v46, %v6053_v45 }
 0x1b9   : > { %5432 = vmatpush.bf16.msra.mxu2 %v7126_v26  ;;  %v7130_v43 = vld [vmem:[%s8284_s5 + $0xc8] sm:$0xff]  ;;  %v7121_v48 = vld [vmem:[%s8284_s5 + $0x80] sm:$0xff]  ;;  %v7152_v57 = vld [vmem:[%s8284_s5 + $0x178] sm:$0xff] }
 0x1ba   : > { %5451 = vmatpush.bf16.msra.mxu3 %v7134_v27  ;;  %v7055_v49 = vld [vmem:[%s8837_s0 + $0x4] sm:$0xf]  ;;  %v6055_v50 = vld [vmem:[%s8837_s0 + $0x64] sm:$0xf0]  ;;  %v7068_v52 = vld [vmem:[%s8837_s0 + $0x68] sm:$0xf0] }
 0x1bb   : > { %5395 = vmatpush.bf16.msra.mxu0 %v7109_v28  ;;  %v6061_v51 = vld [vmem:[%s8837_s0 + $0x8] sm:$0xf]  ;;  %v7129_v53 = vld [vmem:[%s8284_s5 + $0xc0] sm:$0xff]  ;;  %v7056_v54 = vld [vmem:[%s8837_s0 + $0xc] sm:$0xf]  ;;  %v6058_v59 = vor.u32 %v7055_v49, %v6055_v50 }
 0x1bc   : > { %5414 = vmatpush.bf16.msra.mxu1 %v7117_v29  ;;  %v6062_v60 = vor.u32 %v7068_v52, %v6061_v51  ;;  %v6066_v61 = vor.u32 %v7056_v54, %v6063_v55  ;;  %v7160_v62 = vld [vmem:[%s8284_s5 + $0x1b8] sm:$0xff]  ;;  %v7143_v0 = vld [vmem:[%s8284_s5 + $0x130] sm:$0xff]  ;;  %v7142_v4 = vld [vmem:[%s8284_s5 + $0x128] sm:$0xff] }
 0x1bd   : > { %5433 = vmatpush.bf16.msra.mxu2 %v7125_v30  ;;  %v7168_v63 = vld [vmem:[%s8284_s5 + $0x1f8] sm:$0xff]  ;;  %v7151_v1 = vld [vmem:[%s8284_s5 + $0x170] sm:$0xff]  ;;  %v7150_v5 = vld [vmem:[%s8284_s5 + $0x168] sm:$0xff] }
 0x1be   : > { %5452 = vmatpush.bf16.msra.mxu3 %v7133_v31  ;;  %v7159_v2 = vld [vmem:[%s8284_s5 + $0x1b0] sm:$0xff]  ;;  %v7158_v6 = vld [vmem:[%s8284_s5 + $0x1a8] sm:$0xff]  ;;  %v7141_v8 = vld [vmem:[%s8284_s5 + $0x120] sm:$0xff] }
 0x1bf   : > { %5396 = vmatpush.bf16.msra.mxu0 %v7108_v32  ;;  %v7167_v3 = vld [vmem:[%s8284_s5 + $0x1f0] sm:$0xff]  ;;  %v7166_v7 = vld [vmem:[%s8284_s5 + $0x1e8] sm:$0xff]  ;;  %v7149_v9 = vld [vmem:[%s8284_s5 + $0x160] sm:$0xff] }
 0x1c0   : > { %5415 = vmatpush.bf16.msra.mxu1 %v7116_v33  ;;  %v7157_v10 = vld [vmem:[%s8284_s5 + $0x1a0] sm:$0xff]  ;;  %v6153_v12 = vld [vmem:[%s8837_s0 + $0xc8] sm:$0xf]  ;;  %v7092_v13 = vld [vmem:[%s8837_s0 + $0x128] sm:$0xf0] }
 0x1c1   : > { %5434 = vmatpush.bf16.msra.mxu2 %v7124_v34  ;;  %v7165_v11 = vld [vmem:[%s8284_s5 + $0x1e0] sm:$0xff]  ;;  %v7080_v14 = vld [vmem:[%s8837_s0 + $0xcc] sm:$0xf]  ;;  %v6155_v15 = vld [vmem:[%s8837_s0 + $0x12c] sm:$0xf0]  ;;  %v6154_v22 = vor.u32 %v7092_v13, %v6153_v12 }
 0x1c2   : > { %5453 = vmatpush.bf16.msra.mxu3 %v7132_v35  ;;  %v6161_v16 = vld [vmem:[%s8837_s0 + $0xd0] sm:$0xf]  ;;  %v7093_v17 = vld [vmem:[%s8837_s0 + $0x130] sm:$0xf0]  ;;  %v6163_v19 = vld [vmem:[%s8837_s0 + $0x134] sm:$0xf0]  ;;  %v6158_v23 = vor.u32 %v7080_v14, %v6155_v15 }
 0x1c3   : > { %5397 = vmatpush.bf16.msra.mxu0 %v7107_v36  ;;  %v7081_v18 = vld [vmem:[%s8837_s0 + $0xd4] sm:$0xf]  ;;  %v7140_v20 = vld [vmem:[%s8284_s5 + $0x118] sm:$0xff]  ;;  %v6162_v24 = vor.u32 %v7093_v17, %v6161_v16  ;;  %v7138_v32 = vld [vmem:[%s8284_s5 + $0x108] sm:$0xff] }
 0x1c4   : > { %5416 = vmatpush.bf16.msra.mxu1 %v7115_v37  ;;  %v7148_v21 = vld [vmem:[%s8284_s5 + $0x158] sm:$0xff]  ;;  %v6166_v25 = vor.u32 %v7081_v18, %v6163_v19  ;;  %v7139_v28 = vld [vmem:[%s8284_s5 + $0x110] sm:$0xff]  ;;  %v7146_v33 = vld [vmem:[%s8284_s5 + $0x148] sm:$0xff] }
 0x1c5   : > { %5435 = vmatpush.bf16.msra.mxu2 %v7123_v38  ;;  %v7156_v26 = vld [vmem:[%s8284_s5 + $0x198] sm:$0xff]  ;;  %v7147_v29 = vld [vmem:[%s8284_s5 + $0x150] sm:$0xff]  ;;  %v7154_v34 = vld [vmem:[%s8284_s5 + $0x188] sm:$0xff] }
 0x1c6   : > { %5454 = vmatpush.bf16.msra.mxu3 %v7131_v39  ;;  %v7164_v27 = vld [vmem:[%s8284_s5 + $0x1d8] sm:$0xff]  ;;  %v7155_v30 = vld [vmem:[%s8284_s5 + $0x190] sm:$0xff]  ;;  %v7162_v35 = vld [vmem:[%s8284_s5 + $0x1c8] sm:$0xff] }
 0x1c7   : > { %5398 = vmatpush.bf16.msra.mxu0 %v7106_v40  ;;  %v7163_v31 = vld [vmem:[%s8284_s5 + $0x1d0] sm:$0xff]  ;;  %v7137_v36 = vld [vmem:[%s8284_s5 + $0x100] sm:$0xff]  ;;  %v6071_v45 = vld [vmem:[%s8837_s0 + $0x74] sm:$0xf0] }
 0x1c8   : > { %5417 = vmatpush.bf16.msra.mxu1 %v7114_v41  ;;  %v7145_v37 = vld [vmem:[%s8284_s5 + $0x140] sm:$0xff]  ;;  %v6069_v38 = vld [vmem:[%s8837_s0 + $0x10] sm:$0xf]  ;;  %v7069_v41 = vld [vmem:[%s8837_s0 + $0x70] sm:$0xf0] }
 0x1c9   : > { %5436 = vmatpush.bf16.msra.mxu2 %v7122_v42  ;;  %v7153_v39 = vld [vmem:[%s8284_s5 + $0x180] sm:$0xff]  ;;  %v7176_v42 = vld [vmem:[%s8284_s5 + $0x238] sm:$0xff]  ;;  %v6070_v52 = vor.u32 %v7069_v41, %v6069_v38  ;;  %v6093_v38 = vld [vmem:[%s8837_s0 + $0x28] sm:$0xf] }
 0x1ca   : > { %5455 = vmatpush.bf16.msra.mxu3 %v7130_v43  ;;  %v7161_v40 = vld [vmem:[%s8284_s5 + $0x1c0] sm:$0xff]  ;;  %v7184_v43 = vld [vmem:[%s8284_s5 + $0x278] sm:$0xff]  ;;  %v7072_v41 = vld [vmem:[%s8837_s0 + $0x88] sm:$0xf0] }
 0x1cb   : > { %5399 = vmatpush.bf16.msra.mxu0 %v7105_v44  ;;  %v7057_v44 = vld [vmem:[%s8837_s0 + $0x14] sm:$0xf]  ;;  %v6077_v46 = vld [vmem:[%s8837_s0 + $0x18] sm:$0xf]  ;;  %v6079_v49 = vld [vmem:[%s8837_s0 + $0x7c] sm:$0xf0] }
 0x1cc   : > { %5418 = vmatpush.bf16.msra.mxu1 %v7113_v47  ;;  %v7070_v47 = vld [vmem:[%s8837_s0 + $0x78] sm:$0xf0] }
 0x1cd   : > { %5437 = vmatpush.bf16.msra.mxu2 %v7121_v48  ;;  %v7058_v48 = vld [vmem:[%s8837_s0 + $0x1c] sm:$0xf]  ;;  %v6078_v54 = vor.u32 %v7070_v47, %v6077_v46  ;;  %v6094_v46 = vor.u32 %v7072_v41, %v6093_v38  ;;  %v7247_v41 = vld [vmem:[%s8284_s5 + $0x470] sm:$0xff] }
 0x1ce   : > { %5456 = vmatpush.bf16.msra.mxu3 %v7129_v53  ;;  %5400 = vmatmul.bf16.vlgmr.msra.gmra.mxu0 %v6054_v58  ;;  %v7192_v50 = vld [vmem:[%s8284_s5 + $0x2b8] sm:$0xff]  ;;  %v6074_v53 = vor.u32 %v7057_v44, %v6071_v45  ;;  %v6082_v55 = vor.u32 %v7058_v48, %v6079_v49  ;;  %v7191_v58 = vld [vmem:[%s8284_s5 + $0x2b0] sm:$0xff] }
 0x1cf   : > { %5468 = vmatpush.bf16.msrb.mxu0 %v7144_v56  ;;  %5419 = vmatmul.bf16.vlgmr.msra.gmra.mxu1 %v6058_v59  ;;  %v7200_v51 = vld [vmem:[%s8284_s5 + $0x2f8] sm:$0xff]  ;;  %v7175_v56 = vld [vmem:[%s8284_s5 + $0x230] sm:$0xff] }
 0x1d0   : > { %5487 = vmatpush.bf16.msrb.mxu1 %v7152_v57  ;;  %5438 = vmatmul.bf16.vlgmr.msra.gmra.mxu2 %v6062_v60  ;;  %v7183_v57 = vld [vmem:[%s8284_s5 + $0x270] sm:$0xff]  ;;  %v7174_v60 = vld [vmem:[%s8284_s5 + $0x228] sm:$0xff]  ;;  %v7172_v12 = vld [vmem:[%s8284_s5 + $0x218] sm:$0xff] }
 0x1d1   : > { %5457 = vmatmul.bf16.vlgmr.msra.gmra.mxu3 %v6066_v61  ;;  %5506 = vmatpush.bf16.msrb.mxu2 %v7160_v62  ;;  %v7199_v59 = vld [vmem:[%s8284_s5 + $0x2f0] sm:$0xff]  ;;  %v7182_v61 = vld [vmem:[%s8284_s5 + $0x268] sm:$0xff]  ;;  %v7180_v13 = vld [vmem:[%s8284_s5 + $0x258] sm:$0xff] }
 0x1d2   : > { %5525 = vmatpush.bf16.msrb.mxu3 %v7168_v63  ;;  %v7190_v62 = vld [vmem:[%s8284_s5 + $0x2a8] sm:$0xff]  ;;  %v7188_v14 = vld [vmem:[%s8284_s5 + $0x298] sm:$0xff]  ;;  %v7207_v48 = vld [vmem:[%s8284_s5 + $0x330] sm:$0xff] }
 0x1d3   : > { %5469 = vmatpush.bf16.msrb.mxu0 %v7143_v0  ;;  %v7198_v63 = vld [vmem:[%s8284_s5 + $0x2e8] sm:$0xff]  ;;  %v7173_v0 = vld [vmem:[%s8284_s5 + $0x220] sm:$0xff]  ;;  %v7196_v15 = vld [vmem:[%s8284_s5 + $0x2d8] sm:$0xff] }
 0x1d4   : > { %5488 = vmatpush.bf16.msrb.mxu1 %v7151_v1  ;;  %v7181_v1 = vld [vmem:[%s8284_s5 + $0x260] sm:$0xff]  ;;  %v7215_v49 = vld [vmem:[%s8284_s5 + $0x370] sm:$0xff] }
 0x1d5   : > { %5507 = vmatpush.bf16.msrb.mxu2 %v7159_v2  ;;  %v7189_v2 = vld [vmem:[%s8284_s5 + $0x2a0] sm:$0xff] }
 0x1d6   : > { %5526 = vmatpush.bf16.msrb.mxu3 %v7167_v3  ;;  %v7197_v3 = vld [vmem:[%s8284_s5 + $0x2e0] sm:$0xff] }
 0x1d7   : > { %5470 = vmatpush.bf16.msrb.mxu0 %v7142_v4  ;;  %v6169_v4 = vld [vmem:[%s8837_s0 + $0xd8] sm:$0xf] }
 0x1d8   : > { %5489 = vmatpush.bf16.msrb.mxu1 %v7150_v5  ;;  %v7094_v5 = vld [vmem:[%s8837_s0 + $0x138] sm:$0xf0] }
 0x1d9   : > { %5508 = vmatpush.bf16.msrb.mxu2 %v7158_v6  ;;  %v7082_v6 = vld [vmem:[%s8837_s0 + $0xdc] sm:$0xf]  ;;  %v6170_v16 = vor.u32 %v7094_v5, %v6169_v4 }
 0x1da   : > { %5527 = vmatpush.bf16.msrb.mxu3 %v7166_v7  ;;  %v6171_v7 = vld [vmem:[%s8837_s0 + $0x13c] sm:$0xf0]  ;;  %v7204_v4 = vld [vmem:[%s8284_s5 + $0x318] sm:$0xff] }
 0x1db   : > { %5471 = vmatpush.bf16.msrb.mxu0 %v7141_v8  ;;  %v6177_v8 = vld [vmem:[%s8837_s0 + $0xe0] sm:$0xf]  ;;  %v6174_v17 = vor.u32 %v7082_v6, %v6171_v7  ;;  %v7212_v5 = vld [vmem:[%s8284_s5 + $0x358] sm:$0xff] }
 0x1dc   : > { %5490 = vmatpush.bf16.msrb.mxu1 %v7149_v9  ;;  %v7095_v9 = vld [vmem:[%s8837_s0 + $0x140] sm:$0xf0]  ;;  %v7220_v6 = vld [vmem:[%s8284_s5 + $0x398] sm:$0xff] }
 0x1dd   : > { %5509 = vmatpush.bf16.msrb.mxu2 %v7157_v10  ;;  %v7083_v10 = vld [vmem:[%s8837_s0 + $0xe4] sm:$0xf]  ;;  %v6178_v18 = vor.u32 %v7095_v9, %v6177_v8  ;;  %v7228_v7 = vld [vmem:[%s8284_s5 + $0x3d8] sm:$0xff] }
 0x1de   : > { %5528 = vmatpush.bf16.msrb.mxu3 %v7165_v11  ;;  %5405 = vmatmul.bf16.gmra.mxu0 %v6154_v22  ;;  %v6179_v11 = vld [vmem:[%s8837_s0 + $0x144] sm:$0xf0]  ;;  %v7187_v22 = vld [vmem:[%s8284_s5 + $0x290] sm:$0xff] }
 0x1df   : > { %5472 = vmatpush.bf16.msrb.mxu0 %v7140_v20  ;;  %5424 = vmatmul.bf16.gmra.mxu1 %v6158_v23  ;;  %v6182_v19 = vor.u32 %v7083_v10, %v6179_v11  ;;  %v7171_v20 = vld [vmem:[%s8284_s5 + $0x210] sm:$0xff] }
 0x1e0   : > { %5491 = vmatpush.bf16.msrb.mxu1 %v7148_v21  ;;  %5443 = vmatmul.bf16.gmra.mxu2 %v6162_v24  ;;  %v7179_v21 = vld [vmem:[%s8284_s5 + $0x250] sm:$0xff]  ;;  %v7170_v24 = vld [vmem:[%s8284_s5 + $0x208] sm:$0xff] }
 0x1e1   : > { %5462 = vmatmul.bf16.gmra.mxu3 %v6166_v25  ;;  %5510 = vmatpush.bf16.msrb.mxu2 %v7156_v26  ;;  %v7195_v23 = vld [vmem:[%s8284_s5 + $0x2d0] sm:$0xff]  ;;  %v7178_v25 = vld [vmem:[%s8284_s5 + $0x248] sm:$0xff] }
 0x1e2   : > { %5529 = vmatpush.bf16.msrb.mxu3 %v7164_v27  ;;  %v7186_v26 = vld [vmem:[%s8284_s5 + $0x288] sm:$0xff] }
 0x1e3   : > { %5473 = vmatpush.bf16.msrb.mxu0 %v7139_v28  ;;  %v7194_v27 = vld [vmem:[%s8284_s5 + $0x2c8] sm:$0xff]  ;;  %v7169_v28 = vld [vmem:[%s8284_s5 + $0x200] sm:$0xff] }
 0x1e4   : > { %5492 = vmatpush.bf16.msrb.mxu1 %v7147_v29  ;;  %v7177_v29 = vld [vmem:[%s8284_s5 + $0x240] sm:$0xff] }
 0x1e5   : > { %5511 = vmatpush.bf16.msrb.mxu2 %v7155_v30  ;;  %v7185_v30 = vld [vmem:[%s8284_s5 + $0x280] sm:$0xff] }
 0x1e6   : > { %5530 = vmatpush.bf16.msrb.mxu3 %v7163_v31  ;;  %v7193_v31 = vld [vmem:[%s8284_s5 + $0x2c0] sm:$0xff] }
 0x1e7   : > { %5474 = vmatpush.bf16.msrb.mxu0 %v7138_v32  ;;  %v6085_v32 = vld [vmem:[%s8837_s0 + $0x20] sm:$0xf] }
 0x1e8   : > { %5493 = vmatpush.bf16.msrb.mxu1 %v7146_v33  ;;  %v7071_v33 = vld [vmem:[%s8837_s0 + $0x80] sm:$0xf0] }
 0x1e9   : > { %5512 = vmatpush.bf16.msrb.mxu2 %v7154_v34  ;;  %v7059_v34 = vld [vmem:[%s8837_s0 + $0x24] sm:$0xf]  ;;  %v6086_v44 = vor.u32 %v7071_v33, %v6085_v32  ;;  %v7264_v32 = vld [vmem:[%s8284_s5 + $0x4f8] sm:$0xff] }
 0x1ea   : > { %5531 = vmatpush.bf16.msrb.mxu3 %v7162_v35  ;;  %v6087_v35 = vld [vmem:[%s8837_s0 + $0x84] sm:$0xf0]  ;;  %v7074_v33 = vld [vmem:[%s8837_s0 + $0x98] sm:$0xf0] }
 0x1eb   : > { %5475 = vmatpush.bf16.msrb.mxu0 %v7137_v36  ;;  %v7208_v36 = vld [vmem:[%s8284_s5 + $0x338] sm:$0xff]  ;;  %v6090_v45 = vor.u32 %v7059_v34, %v6087_v35  ;;  %v6111_v35 = vld [vmem:[%s8837_s0 + $0x9c] sm:$0xf0] }
 0x1ec   : > { %5494 = vmatpush.bf16.msrb.mxu1 %v7145_v37  ;;  %v7216_v37 = vld [vmem:[%s8284_s5 + $0x378] sm:$0xff] }
 0x1ed   : > { %5513 = vmatpush.bf16.msrb.mxu2 %v7153_v39  ;;  %v7224_v39 = vld [vmem:[%s8284_s5 + $0x3b8] sm:$0xff] }
 0x1ee   : > { %5532 = vmatpush.bf16.msrb.mxu3 %v7161_v40  ;;  %5476 = vmatmul.bf16.vlgmr.msrb.gmra.mxu0 %v6070_v52  ;;  %v7232_v40 = vld [vmem:[%s8284_s5 + $0x3f8] sm:$0xff]  ;;  %v7206_v52 = vld [vmem:[%s8284_s5 + $0x328] sm:$0xff] }
 0x1ef   : > { %5544 = vmatpush.bf16.msra.mxu0 %v7176_v42  ;;  %5495 = vmatmul.bf16.vlgmr.msrb.gmra.mxu1 %v6074_v53  ;;  %v7060_v42 = vld [vmem:[%s8837_s0 + $0x2c] sm:$0xf]  ;;  %v7062_v34 = vld [vmem:[%s8837_s0 + $0x3c] sm:$0xf] }
 0x1f0   : > { %5563 = vmatpush.bf16.msra.mxu1 %v7184_v43  ;;  %5514 = vmatmul.bf16.vlgmr.msrb.gmra.mxu2 %v6078_v54  ;;  %v6095_v43 = vld [vmem:[%s8837_s0 + $0x8c] sm:$0xf0]  ;;  %v7214_v53 = vld [vmem:[%s8284_s5 + $0x368] sm:$0xff] }
 0x1f1   : > { %5582 = vmatpush.bf16.msra.mxu2 %v7192_v50  ;;  %5533 = vmatmul.bf16.vlgmr.msrb.gmra.mxu3 %v6082_v55  ;;  %v6098_v47 = vor.u32 %v7060_v42, %v6095_v43  ;;  %v7223_v50 = vld [vmem:[%s8284_s5 + $0x3b0] sm:$0xff]  ;;  %v7222_v54 = vld [vmem:[%s8284_s5 + $0x3a8] sm:$0xff] }
 0x1f2   : > { %5601 = vmatpush.bf16.msra.mxu3 %v7200_v51  ;;  %v7231_v51 = vld [vmem:[%s8284_s5 + $0x3f0] sm:$0xff]  ;;  %v7230_v55 = vld [vmem:[%s8284_s5 + $0x3e8] sm:$0xff] }
 0x1f3   : > { %5545 = vmatpush.bf16.msra.mxu0 %v7175_v56  ;;  %v7205_v56 = vld [vmem:[%s8284_s5 + $0x320] sm:$0xff]  ;;  %v7255_v42 = vld [vmem:[%s8284_s5 + $0x4b0] sm:$0xff] }
 0x1f4   : > { %5564 = vmatpush.bf16.msra.mxu1 %v7183_v57  ;;  %v7213_v57 = vld [vmem:[%s8284_s5 + $0x360] sm:$0xff]  ;;  %v7263_v43 = vld [vmem:[%s8284_s5 + $0x4f0] sm:$0xff] }
 0x1f5   : > { %5583 = vmatpush.bf16.msra.mxu2 %v7191_v58  ;;  %v7221_v58 = vld [vmem:[%s8284_s5 + $0x3a0] sm:$0xff] }
 0x1f6   : > { %5602 = vmatpush.bf16.msra.mxu3 %v7199_v59  ;;  %v7229_v59 = vld [vmem:[%s8284_s5 + $0x3e0] sm:$0xff] }
 0x1f7   : > { %5546 = vmatpush.bf16.msra.mxu0 %v7174_v60  ;;  %v6185_v60 = vld [vmem:[%s8837_s0 + $0xe8] sm:$0xf] }
 0x1f8   : > { %5565 = vmatpush.bf16.msra.mxu1 %v7182_v61  ;;  %v7096_v61 = vld [vmem:[%s8837_s0 + $0x148] sm:$0xf0] }
 0x1f9   : > { %5584 = vmatpush.bf16.msra.mxu2 %v7190_v62  ;;  %v7084_v62 = vld [vmem:[%s8837_s0 + $0xec] sm:$0xf]  ;;  %v6186_v8 = vor.u32 %v7096_v61, %v6185_v60  ;;  %v7236_v60 = vld [vmem:[%s8284_s5 + $0x418] sm:$0xff] }
 0x1fa   : > { %5603 = vmatpush.bf16.msra.mxu3 %v7198_v63  ;;  %v6187_v63 = vld [vmem:[%s8837_s0 + $0x14c] sm:$0xf0]  ;;  %v7244_v61 = vld [vmem:[%s8284_s5 + $0x458] sm:$0xff] }
 0x1fb   : > { %5547 = vmatpush.bf16.msra.mxu0 %v7173_v0  ;;  %v6193_v0 = vld [vmem:[%s8837_s0 + $0xf0] sm:$0xf]  ;;  %v6190_v9 = vor.u32 %v7084_v62, %v6187_v63  ;;  %v7252_v62 = vld [vmem:[%s8284_s5 + $0x498] sm:$0xff] }
 0x1fc   : > { %5566 = vmatpush.bf16.msra.mxu1 %v7181_v1  ;;  %v7097_v1 = vld [vmem:[%s8837_s0 + $0x150] sm:$0xf0]  ;;  %v7260_v63 = vld [vmem:[%s8284_s5 + $0x4d8] sm:$0xff] }
 0x1fd   : > { %5585 = vmatpush.bf16.msra.mxu2 %v7189_v2  ;;  %v7085_v2 = vld [vmem:[%s8837_s0 + $0xf4] sm:$0xf]  ;;  %v6194_v10 = vor.u32 %v7097_v1, %v6193_v0 }
 0x1fe   : > { %5604 = vmatpush.bf16.msra.mxu3 %v7197_v3  ;;  %5481 = vmatmul.bf16.gmra.mxu0 %v6170_v16  ;;  %v6195_v3 = vld [vmem:[%s8837_s0 + $0x154] sm:$0xf0]  ;;  %v7202_v16 = vld [vmem:[%s8284_s5 + $0x308] sm:$0xff] }
 0x1ff   : > { %5548 = vmatpush.bf16.msra.mxu0 %v7172_v12  ;;  %5500 = vmatmul.bf16.gmra.mxu1 %v6174_v17  ;;  %v6198_v11 = vor.u32 %v7085_v2, %v6195_v3  ;;  %v7203_v12 = vld [vmem:[%s8284_s5 + $0x310] sm:$0xff]  ;;  %v7210_v17 = vld [vmem:[%s8284_s5 + $0x348] sm:$0xff] }
 0x200   : > { %5567 = vmatpush.bf16.msra.mxu1 %v7180_v13  ;;  %5519 = vmatmul.bf16.gmra.mxu2 %v6178_v18  ;;  %v7211_v13 = vld [vmem:[%s8284_s5 + $0x350] sm:$0xff]  ;;  %v7218_v18 = vld [vmem:[%s8284_s5 + $0x388] sm:$0xff] }
 0x201   : > { %5586 = vmatpush.bf16.msra.mxu2 %v7188_v14  ;;  %5538 = vmatmul.bf16.gmra.mxu3 %v6182_v19  ;;  %v7219_v14 = vld [vmem:[%s8284_s5 + $0x390] sm:$0xff]  ;;  %v7226_v19 = vld [vmem:[%s8284_s5 + $0x3c8] sm:$0xff] }
 0x202   : > { %5605 = vmatpush.bf16.msra.mxu3 %v7196_v15  ;;  %v7227_v15 = vld [vmem:[%s8284_s5 + $0x3d0] sm:$0xff] }
 0x203   : > { %5549 = vmatpush.bf16.msra.mxu0 %v7171_v20  ;;  %v7201_v20 = vld [vmem:[%s8284_s5 + $0x300] sm:$0xff] }
 0x204   : > { %5568 = vmatpush.bf16.msra.mxu1 %v7179_v21  ;;  %v7209_v21 = vld [vmem:[%s8284_s5 + $0x340] sm:$0xff] }
 0x205   : > { %5587 = vmatpush.bf16.msra.mxu2 %v7187_v22  ;;  %v7217_v22 = vld [vmem:[%s8284_s5 + $0x380] sm:$0xff] }
 0x206   : > { %5606 = vmatpush.bf16.msra.mxu3 %v7195_v23  ;;  %v7225_v23 = vld [vmem:[%s8284_s5 + $0x3c0] sm:$0xff] }
 0x207   : > { %5550 = vmatpush.bf16.msra.mxu0 %v7170_v24  ;;  %v6101_v24 = vld [vmem:[%s8837_s0 + $0x30] sm:$0xf] }
 0x208   : > { %5569 = vmatpush.bf16.msra.mxu1 %v7178_v25  ;;  %v7073_v25 = vld [vmem:[%s8837_s0 + $0x90] sm:$0xf0] }
 0x209   : > { %5588 = vmatpush.bf16.msra.mxu2 %v7186_v26  ;;  %v7061_v26 = vld [vmem:[%s8837_s0 + $0x34] sm:$0xf] }
 0x20a   : > { %5607 = vmatpush.bf16.msra.mxu3 %v7194_v27  ;;  %v6103_v27 = vld [vmem:[%s8837_s0 + $0x94] sm:$0xf0] }
 0x20b   : > { %5551 = vmatpush.bf16.msra.mxu0 %v7169_v28  ;;  %v7240_v28 = vld [vmem:[%s8284_s5 + $0x438] sm:$0xff] }
 0x20c   : > { %5570 = vmatpush.bf16.msra.mxu1 %v7177_v29  ;;  %v7248_v29 = vld [vmem:[%s8284_s5 + $0x478] sm:$0xff] }
 0x20d   : > { %5589 = vmatpush.bf16.msra.mxu2 %v7185_v30  ;;  %v6109_v30 = vld [vmem:[%s8837_s0 + $0x38] sm:$0xf] }
 0x20e   : > { %5608 = vmatpush.bf16.msra.mxu3 %v7193_v31  ;;  %5552 = vmatmul.bf16.vlgmr.msra.gmra.mxu0 %v6086_v44  ;;  %v7256_v31 = vld [vmem:[%s8284_s5 + $0x4b8] sm:$0xff]  ;;  %v6110_v38 = vor.u32 %v7074_v33, %v6109_v30  ;;  %v7238_v44 = vld [vmem:[%s8284_s5 + $0x428] sm:$0xff] }
 0x20f   : > { %5620 = vmatpush.bf16.msrb.mxu0 %v7208_v36  ;;  %5571 = vmatmul.bf16.vlgmr.msra.gmra.mxu1 %v6090_v45  ;;  %v6102_v36 = vor.u32 %v7073_v25, %v6101_v24  ;;  %v7246_v45 = vld [vmem:[%s8284_s5 + $0x468] sm:$0xff]  ;;  %v7288_v24 = vld [vmem:[%s8284_s5 + $0x5b8] sm:$0xff] }
 0x210   : > { %5639 = vmatpush.bf16.msrb.mxu1 %v7216_v37  ;;  %5590 = vmatmul.bf16.vlgmr.msra.gmra.mxu2 %v6094_v46  ;;  %v6106_v37 = vor.u32 %v7061_v26, %v6103_v27  ;;  %v7254_v46 = vld [vmem:[%s8284_s5 + $0x4a8] sm:$0xff]  ;;  %v7296_v25 = vld [vmem:[%s8284_s5 + $0x5f8] sm:$0xff] }
 0x211   : > { %5658 = vmatpush.bf16.msrb.mxu2 %v7224_v39  ;;  %5609 = vmatmul.bf16.vlgmr.msra.gmra.mxu3 %v6098_v47  ;;  %v6114_v39 = vor.u32 %v7062_v34, %v6111_v35  ;;  %v7262_v47 = vld [vmem:[%s8284_s5 + $0x4e8] sm:$0xff] }
 0x212   : > { %5677 = vmatpush.bf16.msrb.mxu3 %v7232_v40  ;;  %v7239_v40 = vld [vmem:[%s8284_s5 + $0x430] sm:$0xff]  ;;  %v7076_v26 = vld [vmem:[%s8837_s0 + $0xa8] sm:$0xf0] }
 0x213   : > { %5621 = vmatpush.bf16.msrb.mxu0 %v7207_v48  ;;  %v7237_v48 = vld [vmem:[%s8284_s5 + $0x420] sm:$0xff]  ;;  %v7064_v27 = vld [vmem:[%s8837_s0 + $0x4c] sm:$0xf] }
 0x214   : > { %5640 = vmatpush.bf16.msrb.mxu1 %v7215_v49  ;;  %v7245_v49 = vld [vmem:[%s8284_s5 + $0x460] sm:$0xff] }
 0x215   : > { %5659 = vmatpush.bf16.msrb.mxu2 %v7223_v50  ;;  %v7253_v50 = vld [vmem:[%s8284_s5 + $0x4a0] sm:$0xff] }
 0x216   : > { %5678 = vmatpush.bf16.msrb.mxu3 %v7231_v51  ;;  %v7261_v51 = vld [vmem:[%s8284_s5 + $0x4e0] sm:$0xff] }
 0x217   : > { %5622 = vmatpush.bf16.msrb.mxu0 %v7206_v52  ;;  %v6201_v52 = vld [vmem:[%s8837_s0 + $0xf8] sm:$0xf] }
 0x218   : > { %5641 = vmatpush.bf16.msrb.mxu1 %v7214_v53  ;;  %v7098_v53 = vld [vmem:[%s8837_s0 + $0x158] sm:$0xf0] }
 0x219   : > { %5660 = vmatpush.bf16.msrb.mxu2 %v7222_v54  ;;  %v7086_v54 = vld [vmem:[%s8837_s0 + $0xfc] sm:$0xf]  ;;  %v6202_v0 = vor.u32 %v7098_v53, %v6201_v52  ;;  %v7277_v52 = vld [vmem:[%s8284_s5 + $0x560] sm:$0xff] }
 0x21a   : > { %5679 = vmatpush.bf16.msrb.mxu3 %v7230_v55  ;;  %v6203_v55 = vld [vmem:[%s8837_s0 + $0x15c] sm:$0xf0] }
 0x21b   : > { %5623 = vmatpush.bf16.msrb.mxu0 %v7205_v56  ;;  %v6209_v56 = vld [vmem:[%s8837_s0 + $0x100] sm:$0xf]  ;;  %v6206_v1 = vor.u32 %v7086_v54, %v6203_v55 }
 0x21c   : > { %5642 = vmatpush.bf16.msrb.mxu1 %v7213_v57  ;;  %v7099_v57 = vld [vmem:[%s8837_s0 + $0x160] sm:$0xf0] }
 0x21d   : > { %5661 = vmatpush.bf16.msrb.mxu2 %v7221_v58  ;;  %v7087_v58 = vld [vmem:[%s8837_s0 + $0x104] sm:$0xf]  ;;  %v6210_v2 = vor.u32 %v7099_v57, %v6209_v56  ;;  %v6217_v56 = vld [vmem:[%s8837_s0 + $0x108] sm:$0xf] }
 0x21e   : > { %5680 = vmatpush.bf16.msrb.mxu3 %v7229_v59  ;;  %5557 = vmatmul.bf16.gmra.mxu0 %v6186_v8  ;;  %v6211_v59 = vld [vmem:[%s8837_s0 + $0x164] sm:$0xf0]  ;;  %v7285_v54 = vld [vmem:[%s8284_s5 + $0x5a0] sm:$0xff] }
 0x21f   : > { %5624 = vmatpush.bf16.msrb.mxu0 %v7204_v4  ;;  %5576 = vmatmul.bf16.gmra.mxu1 %v6190_v9  ;;  %v6214_v3 = vor.u32 %v7087_v58, %v6211_v59  ;;  %v7235_v4 = vld [vmem:[%s8284_s5 + $0x410] sm:$0xff]  ;;  %v7234_v8 = vld [vmem:[%s8284_s5 + $0x408] sm:$0xff]  ;;  %v7293_v55 = vld [vmem:[%s8284_s5 + $0x5e0] sm:$0xff] }
 0x220   : > { %5643 = vmatpush.bf16.msrb.mxu1 %v7212_v5  ;;  %5595 = vmatmul.bf16.gmra.mxu2 %v6194_v10  ;;  %v7243_v5 = vld [vmem:[%s8284_s5 + $0x450] sm:$0xff]  ;;  %v7242_v9 = vld [vmem:[%s8284_s5 + $0x448] sm:$0xff] }
 0x221   : > { %5662 = vmatpush.bf16.msrb.mxu2 %v7220_v6  ;;  %5614 = vmatmul.bf16.gmra.mxu3 %v6198_v11  ;;  %v7251_v6 = vld [vmem:[%s8284_s5 + $0x490] sm:$0xff]  ;;  %v7250_v10 = vld [vmem:[%s8284_s5 + $0x488] sm:$0xff] }
 0x222   : > { %5681 = vmatpush.bf16.msrb.mxu3 %v7228_v7  ;;  %v7259_v7 = vld [vmem:[%s8284_s5 + $0x4d0] sm:$0xff]  ;;  %v7258_v11 = vld [vmem:[%s8284_s5 + $0x4c8] sm:$0xff] }
 0x223   : > { %5625 = vmatpush.bf16.msrb.mxu0 %v7203_v12  ;;  %v7233_v12 = vld [vmem:[%s8284_s5 + $0x400] sm:$0xff]  ;;  %v7100_v58 = vld [vmem:[%s8837_s0 + $0x168] sm:$0xf0] }
 0x224   : > { %5644 = vmatpush.bf16.msrb.mxu1 %v7211_v13  ;;  %v7241_v13 = vld [vmem:[%s8284_s5 + $0x440] sm:$0xff]  ;;  %v7088_v59 = vld [vmem:[%s8837_s0 + $0x10c] sm:$0xf] }
 0x225   : > { %5663 = vmatpush.bf16.msrb.mxu2 %v7219_v14  ;;  %v7249_v14 = vld [vmem:[%s8284_s5 + $0x480] sm:$0xff] }
 0x226   : > { %5682 = vmatpush.bf16.msrb.mxu3 %v7227_v15  ;;  %v7257_v15 = vld [vmem:[%s8284_s5 + $0x4c0] sm:$0xff] }
 0x227   : > { %5626 = vmatpush.bf16.msrb.mxu0 %v7202_v16  ;;  %v6117_v16 = vld [vmem:[%s8837_s0 + $0x40] sm:$0xf] }
 0x228   : > { %5645 = vmatpush.bf16.msrb.mxu1 %v7210_v17  ;;  %v7075_v17 = vld [vmem:[%s8837_s0 + $0xa0] sm:$0xf0] }
 0x229   : > { %5664 = vmatpush.bf16.msrb.mxu2 %v7218_v18  ;;  %v7063_v18 = vld [vmem:[%s8837_s0 + $0x44] sm:$0xf] }
 0x22a   : > { %5683 = vmatpush.bf16.msrb.mxu3 %v7226_v19  ;;  %v8660_v19 = vld [vmem:[%s3482_s8] ss:$0 sm:$0xff] }
 0x22b   : > { %5627 = vmatpush.bf16.msrb.mxu0 %v7201_v20  ;;  %v6119_v20 = vld [vmem:[%s8837_s0 + $0xa4] sm:$0xf0] }
 0x22c   : > { %5646 = vmatpush.bf16.msrb.mxu1 %v7209_v21  ;;  %v7272_v21 = vld [vmem:[%s8284_s5 + $0x538] sm:$0xff]  ;;  %v6122_v30 = vor.u32 %v7063_v18, %v6119_v20  ;;  %v7283_v18 = vld [vmem:[%s8284_s5 + $0x590] sm:$0xff] }
 0x22d   : > { %5665 = vmatpush.bf16.msrb.mxu2 %v7217_v22  ;;  %v7280_v22 = vld [vmem:[%s8284_s5 + $0x578] sm:$0xff]  ;;  %v7291_v20 = vld [vmem:[%s8284_s5 + $0x5d0] sm:$0xff] }
 0x22e   : > { %5684 = vmatpush.bf16.msrb.mxu3 %v7225_v23  ;;  %5628 = vmatmul.bf16.vlgmr.msrb.gmra.mxu0 %v6102_v36  ;;  %v6125_v23 = vld [vmem:[%s8837_s0 + $0x48] sm:$0xf]  ;;  %v7271_v36 = vld [vmem:[%s8284_s5 + $0x530] sm:$0xff] }
 0x22f   : > { %5696 = vmatpush.bf16.msra.mxu0 %v7240_v28  ;;  %5647 = vmatmul.bf16.vlgmr.msrb.gmra.mxu1 %v6106_v37  ;;  %v6127_v28 = vld [vmem:[%s8837_s0 + $0xac] sm:$0xf0]  ;;  %v6126_v33 = vor.u32 %v7076_v26, %v6125_v23  ;;  %v7274_v23 = vld [vmem:[%s8284_s5 + $0x548] sm:$0xff] }
 0x230   : > { %5715 = vmatpush.bf16.msra.mxu1 %v7248_v29  ;;  %5666 = vmatmul.bf16.vlgmr.msrb.gmra.mxu2 %v6110_v38  ;;  %v6118_v29 = vor.u32 %v7075_v17, %v6117_v16  ;;  %v6130_v34 = vor.u32 %v7064_v27, %v6127_v28  ;;  %v7279_v37 = vld [vmem:[%s8284_s5 + $0x570] sm:$0xff] }
 0x231   : > { %5734 = vmatpush.bf16.msra.mxu2 %v7256_v31  ;;  %5685 = vmatmul.bf16.vlgmr.msrb.gmra.mxu3 %v6114_v39  ;;  %v7287_v38 = vld [vmem:[%s8284_s5 + $0x5b0] sm:$0xff] }
 0x232   : > { %5753 = vmatpush.bf16.msra.mxu3 %v7264_v32  ;;  %v7295_v39 = vld [vmem:[%s8284_s5 + $0x5f0] sm:$0xff] }
 0x233   : > { %5697 = vmatpush.bf16.msra.mxu0 %v7239_v40  ;;  %v7275_v16 = vld [vmem:[%s8284_s5 + $0x550] sm:$0xff] }
 0x234   : > { %5716 = vmatpush.bf16.msra.mxu1 %v7247_v41  ;;  %v7270_v41 = vld [vmem:[%s8284_s5 + $0x528] sm:$0xff] }
 0x235   : > { %5735 = vmatpush.bf16.msra.mxu2 %v7255_v42  ;;  %v7278_v42 = vld [vmem:[%s8284_s5 + $0x568] sm:$0xff] }
 0x236   : > { %5754 = vmatpush.bf16.msra.mxu3 %v7263_v43  ;;  %v7286_v43 = vld [vmem:[%s8284_s5 + $0x5a8] sm:$0xff] }
 0x237   : > { %5698 = vmatpush.bf16.msra.mxu0 %v7238_v44  ;;  %v7294_v44 = vld [vmem:[%s8284_s5 + $0x5e8] sm:$0xff] }
 0x238   : > { %5717 = vmatpush.bf16.msra.mxu1 %v7246_v45 }
 0x239   : > { %5736 = vmatpush.bf16.msra.mxu2 %v7254_v46 }
 0x23a   : > { %5755 = vmatpush.bf16.msra.mxu3 %v7262_v47 }
 0x23b   : > { %5699 = vmatpush.bf16.msra.mxu0 %v7237_v48 }
 0x23c   : > { %5718 = vmatpush.bf16.msra.mxu1 %v7245_v49 }
 0x23d   : > { %5737 = vmatpush.bf16.msra.mxu2 %v7253_v50 }
 0x23e   : > { %5756 = vmatpush.bf16.msra.mxu3 %v7261_v51  ;;  %5633 = vmatmul.bf16.gmra.mxu0 %v6202_v0  ;;  %v7269_v51 = vld [vmem:[%s8284_s5 + $0x520] sm:$0xff]  ;;  %v6227_v0 = vld [vmem:[%s8837_s0 + $0x174] sm:$0xf0] }
 0x23f   : > { %5700 = vmatpush.bf16.msra.mxu0 %v7236_v60  ;;  %5652 = vmatmul.bf16.gmra.mxu1 %v6206_v1  ;;  %v6219_v60 = vld [vmem:[%s8837_s0 + $0x16c] sm:$0xf0]  ;;  %v7268_v1 = vld [vmem:[%s8284_s5 + $0x518] sm:$0xff] }
 0x240   : > { %5719 = vmatpush.bf16.msra.mxu1 %v7244_v61  ;;  %5671 = vmatmul.bf16.gmra.mxu2 %v6210_v2  ;;  %v6225_v61 = vld [vmem:[%s8837_s0 + $0x110] sm:$0xf]  ;;  %v7276_v2 = vld [vmem:[%s8284_s5 + $0x558] sm:$0xff] }
 0x241   : > { %5738 = vmatpush.bf16.msra.mxu2 %v7252_v62  ;;  %5690 = vmatmul.bf16.gmra.mxu3 %v6214_v3  ;;  %v7101_v62 = vld [vmem:[%s8837_s0 + $0x170] sm:$0xf0]  ;;  %v7284_v3 = vld [vmem:[%s8284_s5 + $0x598] sm:$0xff] }
 0x242   : > { %5757 = vmatpush.bf16.msra.mxu3 %v7260_v63  ;;  %v7089_v63 = vld [vmem:[%s8837_s0 + $0x114] sm:$0xf] }
 0x243   : > { %5701 = vmatpush.bf16.msra.mxu0 %v7235_v4  ;;  %v7292_v4 = vld [vmem:[%s8284_s5 + $0x5d8] sm:$0xff] }
 0x244   : > { %5720 = vmatpush.bf16.msra.mxu1 %v7243_v5 }
 0x245   : > { %5739 = vmatpush.bf16.msra.mxu2 %v7251_v6 }
 0x246   : > { %5758 = vmatpush.bf16.msra.mxu3 %v7259_v7  ;;  %v6218_v7 = vor.u32 %v7100_v58, %v6217_v56 }
 0x247   : > { %5702 = vmatpush.bf16.msra.mxu0 %v7234_v8  ;;  %v6222_v8 = vor.u32 %v7088_v59, %v6219_v60  ;;  %v7302_v60 = vld [vmem:[%s8284_s5 + $0x628] sm:$0xff] }
 0x248   : > { %5721 = vmatpush.bf16.msra.mxu1 %v7242_v9 }
 0x249   : > { %5740 = vmatpush.bf16.msra.mxu2 %v7250_v10 }
 0x24a   : > { %5759 = vmatpush.bf16.msra.mxu3 %v7258_v11 }
 0x24b   : > { %5703 = vmatpush.bf16.msra.mxu0 %v7233_v12  ;;  %v5401_v31 = vpop.f32.mrf.mxu0  ;;  %v6226_v12 = vor.u32 %v7101_v62, %v6225_v61 }
 0x24c   : > { %5722 = vmatpush.bf16.msra.mxu1 %v7241_v13  ;;  %v5420_v32 = vpop.f32.mrf.mxu1  ;;  %v5402_v35 = vadd.f32 %v8660_v19, %v5401_v31  ;;  %v6230_v13 = vor.u32 %v7089_v63, %v6227_v0 }
 0x24d   : > { %5741 = vmatpush.bf16.msra.mxu2 %v7249_v14 }
 0x24e   : > { %5760 = vmatpush.bf16.msra.mxu3 %v7257_v15  ;;  %v5421_v40 = vadd.f32 %v5420_v32, %v5402_v35  ;;  %5704 = vmatmul.bf16.vlgmr.msra.gmra.mxu0 %v6118_v29  ;;  %v7267_v15 = vld [vmem:[%s8284_s5 + $0x510] sm:$0xff]  ;;  %v7265_v32 = vld [vmem:[%s8284_s5 + $0x500] sm:$0xff] }
 0x24f   : > { %5772 = vmatpush.bf16.msrb.mxu0 %v7272_v21  ;;  %5723 = vmatmul.bf16.vlgmr.msra.gmra.mxu1 %v6122_v30  ;;  %v7281_v35 = vld [vmem:[%s8284_s5 + $0x580] sm:$0xff] }
 0x250   : > { %5791 = vmatpush.bf16.msrb.mxu1 %v7280_v22  ;;  %5742 = vmatmul.bf16.vlgmr.msra.gmra.mxu2 %v6126_v33  ;;  %v7266_v22 = vld [vmem:[%s8284_s5 + $0x508] sm:$0xff]  ;;  %v7273_v33 = vld [vmem:[%s8284_s5 + $0x540] sm:$0xff] }
 0x251   : > { %5810 = vmatpush.bf16.msrb.mxu2 %v7288_v24  ;;  %5761 = vmatmul.bf16.vlgmr.msra.gmra.mxu3 %v6130_v34  ;;  %v7282_v24 = vld [vmem:[%s8284_s5 + $0x588] sm:$0xff] }
 0x252   : > { %5829 = vmatpush.bf16.msrb.mxu3 %v7296_v25  ;;  %v7290_v25 = vld [vmem:[%s8284_s5 + $0x5c8] sm:$0xff] }
 0x253   : > { %5773 = vmatpush.bf16.msrb.mxu0 %v7271_v36  ;;  %v5439_v45 = vpop.f32.mrf.mxu2  ;;  %v5403_v48 = vpop.f32.mrf.mxu0  ;;  %v7289_v36 = vld [vmem:[%s8284_s5 + $0x5c0] sm:$0xff] }
 0x254   : > { %5792 = vmatpush.bf16.msrb.mxu1 %v7279_v37  ;;  %v5458_v46 = vpop.f32.mrf.mxu3  ;;  %v5440_v47 = vadd.f32 %v5439_v45, %v5421_v40  ;;  %v5422_v49 = vpop.f32.mrf.mxu1  ;;  %v5404_v50 = vadd.f32 %v8660_v19, %v5403_v48  ;;  %v7065_v40 = vld [vmem:[%s8837_s0 + $0x54] sm:$0xf]  ;;  %v6143_v45 = vld [vmem:[%s8837_s0 + $0xbc] sm:$0xf0] }
 0x255   : > { %5811 = vmatpush.bf16.msrb.mxu2 %v7287_v38  ;;  %v6133_v38 = vld [vmem:[%s8837_s0 + $0x50] sm:$0xf] }
 0x256   : > { %5830 = vmatpush.bf16.msrb.mxu3 %v7295_v39  ;;  %v8693_v53 = vadd.f32 %v5458_v46, %v5440_v47  ;;  %v5423_v57 = vadd.f32 %v5422_v49, %v5404_v50  ;;  %v7077_v39 = vld [vmem:[%s8837_s0 + $0xb0] sm:$0xf0] }
 0x257   : > { %5774 = vmatpush.bf16.msrb.mxu0 %v7270_v41  ;;  %v6135_v41 = vld [vmem:[%s8837_s0 + $0xb4] sm:$0xf0]  ;;  %v6134_v48 = vor.u32 %v7077_v39, %v6133_v38  ;;  %v6149_v38 = vld [vmem:[%s8837_s0 + $0x60] sm:$0xf]  ;;  %v7079_v39 = vld [vmem:[%s8837_s0 + $0xc0] sm:$0xf0] }
 0x258   : > { %5793 = vmatpush.bf16.msrb.mxu1 %v7278_v42  ;;  %v6141_v42 = vld [vmem:[%s8837_s0 + $0x58] sm:$0xf]  ;;  %v6138_v49 = vor.u32 %v7065_v40, %v6135_v41  ;;  %v7104_v40 = vld [vmem:[%s8837_s0 + $0x188] sm:$0xf0] }
 0x259   : > { %5812 = vmatpush.bf16.msrb.mxu2 %v7286_v43  ;;  %v7078_v43 = vld [vmem:[%s8837_s0 + $0xb8] sm:$0xf0] }
 0x25a   : > { %5831 = vmatpush.bf16.msrb.mxu3 %v7294_v44  ;;  %v7066_v44 = vld [vmem:[%s8837_s0 + $0x5c] sm:$0xf] }
 0x25b   : > { %5775 = vmatpush.bf16.msrb.mxu0 %v7269_v51  ;;  %v5441_v5 = vpop.f32.mrf.mxu2  ;;  %v5406_v10 = vpop.f32.mrf.mxu0 }
 0x25c   : > { %5794 = vmatpush.bf16.msrb.mxu1 %v7277_v52  ;;  %v5460_v6 = vpop.f32.mrf.mxu3  ;;  %v5442_v9 = vadd.f32 %v5441_v5, %v5423_v57  ;;  %v5425_v11 = vpop.f32.mrf.mxu1  ;;  %v5407_v14 = vadd.f32 %v8660_v19, %v5406_v10  ;;  %v7303_v57 = vld [vmem:[%s8284_s5 + $0x630] sm:$0xff]  ;;  %v6233_v5 = vld [vmem:[%s8837_s0 + $0x118] sm:$0xf]  ;;  %v7103_v10 = vld [vmem:[%s8837_s0 + $0x180] sm:$0xf0] }
 0x25d   : > { %5813 = vmatpush.bf16.msrb.mxu2 %v7285_v54  ;;  %v6142_v54 = vor.u32 %v7078_v43, %v6141_v42  ;;  %v6150_v43 = vor.u32 %v7079_v39, %v6149_v38 }
 0x25e   : > { %5832 = vmatpush.bf16.msrb.mxu3 %v7293_v55  ;;  %v8728_v17 = vadd.f32 %v5460_v6, %v5442_v9  ;;  %v5426_v21 = vadd.f32 %v5425_v11, %v5407_v14  ;;  %5709 = vmatmul.bf16.gmra.mxu0 %v6218_v7  ;;  %v6146_v55 = vor.u32 %v7066_v44, %v6143_v45  ;;  %v7102_v6 = vld [vmem:[%s8837_s0 + $0x178] sm:$0xf0]  ;;  %v6241_v9 = vld [vmem:[%s8837_s0 + $0x120] sm:$0xf]  ;;  %v7091_v11 = vld [vmem:[%s8837_s0 + $0x124] sm:$0xf] }
 0x25f   : > { %5776 = vmatpush.bf16.msrb.mxu0 %v7268_v1  ;;  %5728 = vmatmul.bf16.gmra.mxu1 %v6222_v8  ;;  %v7090_v7 = vld [vmem:[%s8837_s0 + $0x11c] sm:$0xf]  ;;  %v6235_v8 = vld [vmem:[%s8837_s0 + $0x17c] sm:$0xf0] }
 0x260   : > { %5795 = vmatpush.bf16.msrb.mxu1 %v7276_v2  ;;  %5747 = vmatmul.bf16.gmra.mxu2 %v6226_v12  ;;  %v6243_v12 = vld [vmem:[%s8837_s0 + $0x184] sm:$0xf0] }
 0x261   : > { %5814 = vmatpush.bf16.msrb.mxu2 %v7284_v3  ;;  %5766 = vmatmul.bf16.gmra.mxu3 %v6230_v13  ;;  %v7300_v13 = vld [vmem:[%s8284_s5 + $0x618] sm:$0xff] }
 0x262   : > { %5833 = vmatpush.bf16.msrb.mxu3 %v7292_v4 }
 0x263   : > { %5777 = vmatpush.bf16.msrb.mxu0 %v7267_v15  ;;  %v5444_v26 = vpop.f32.mrf.mxu2  ;;  %v5408_v29 = vpop.f32.mrf.mxu0 }
 0x264   : > { %5796 = vmatpush.bf16.msrb.mxu1 %v7275_v16  ;;  %v5463_v27 = vpop.f32.mrf.mxu3  ;;  %v5445_v28 = vadd.f32 %v5444_v26, %v5426_v21  ;;  %v5427_v30 = vpop.f32.mrf.mxu1  ;;  %v5409_v31 = vadd.f32 %v8660_v19, %v5408_v29  ;;  %v7304_v19 = vld [vmem:[%s8284_s5 + $0x638] sm:$0xff]  ;;  %v6234_v16 = vor.u32 %v7102_v6, %v6233_v5 }
 0x265   : > { %5815 = vmatpush.bf16.msrb.mxu2 %v7283_v18 }
 0x266   : > { %5834 = vmatpush.bf16.msrb.mxu3 %v7291_v20  ;;  %v8739_v34 = vadd.f32 %v5463_v27, %v5445_v28  ;;  %v5428_v37 = vadd.f32 %v5427_v30, %v5409_v31  ;;  %v7298_v28 = vld [vmem:[%s8284_s5 + $0x608] sm:$0xff] }
 0x267   : > { %5778 = vmatpush.bf16.msrb.mxu0 %v7266_v22  ;;  %v6242_v22 = vor.u32 %v7103_v10, %v6241_v9 }
 0x268   : > { %5797 = vmatpush.bf16.msrb.mxu1 %v7274_v23  ;;  %v6246_v23 = vor.u32 %v7091_v11, %v6243_v12 }
 0x269   : > { %5816 = vmatpush.bf16.msrb.mxu2 %v7282_v24 }
 0x26a   : > { %5835 = vmatpush.bf16.msrb.mxu3 %v7290_v25  ;;  %v7299_v25 = vld [vmem:[%s8284_s5 + $0x610] sm:$0xff] }
 0x26b   : > { %5779 = vmatpush.bf16.msrb.mxu0 %v7265_v32  ;;  %v5446_v46 = vpop.f32.mrf.mxu2  ;;  %v5477_v51 = vpop.f32.mrf.mxu0 }
 0x26c   : > { %5798 = vmatpush.bf16.msrb.mxu1 %v7273_v33  ;;  %v5465_v47 = vpop.f32.mrf.mxu3  ;;  %v5447_v50 = vadd.f32 %v5446_v46, %v5428_v37  ;;  %v5496_v52 = vpop.f32.mrf.mxu1  ;;  %v5478_v56 = vadd.f32 %v5477_v51, %v8693_v53  ;;  %v7301_v53 = vld [vmem:[%s8284_s5 + $0x620] sm:$0xff] }
 0x26d   : > { %5817 = vmatpush.bf16.msrb.mxu2 %v7281_v35 }
 0x26e   : > { %5836 = vmatpush.bf16.msrb.mxu3 %v7289_v36  ;;  %v5466_v58 = vadd.f32 %v5465_v47, %v5447_v50  ;;  %v5497_v59 = vadd.f32 %v5496_v52, %v5478_v56  ;;  %5780 = vmatmul.bf16.vlgmr.msrb.gmra.mxu0 %v6134_v48 }
 0x26f   : > { %5848 = vmatpush.bf16.msra.mxu0 %v7304_v19  ;;  %5799 = vmatmul.bf16.vlgmr.msrb.gmra.mxu1 %v6138_v49 }
 0x270   : > { %7316 = vmatpush.bf16.msra.mxu1 %v7304_v19  ;;  %5818 = vmatmul.bf16.vlgmr.msrb.gmra.mxu2 %v6142_v54  ;;  %v6249_v19 = vld [vmem:[%s8837_s0 + $0x128] sm:$0xf] }
 0x271   : > { %5837 = vmatmul.bf16.vlgmr.msrb.gmra.mxu3 %v6146_v55  ;;  %v6250_v44 = vor.u32 %v7104_v40, %v6249_v19 }
 0x273   : > { %5849 = vmatpush.bf16.msra.mxu0 %v7303_v57  ;;  %v5515_v61 = vpop.f32.mrf.mxu2  ;;  %v5479_v0 = vpop.f32.mrf.mxu0 }
 0x274   : > { %7317 = vmatpush.bf16.msra.mxu1 %v7303_v57  ;;  %v5534_v62 = vpop.f32.mrf.mxu3  ;;  %v5516_v63 = vadd.f32 %v5515_v61, %v5497_v59  ;;  %v5498_v1 = vpop.f32.mrf.mxu1  ;;  %v5480_v2 = vadd.f32 %v5479_v0, %v8728_v17  ;;  %v6238_v17 = vor.u32 %v7090_v7, %v6235_v8 }
 0x276   : > { %v5535_v3 = vadd.f32 %v5534_v62, %v5516_v63  ;;  %v5499_v4 = vadd.f32 %v5498_v1, %v5480_v2 }
 0x277   : > { %5850 = vmatpush.bf16.msra.mxu0 %v7302_v60 }
 0x278   : > { %7318 = vmatpush.bf16.msra.mxu1 %v7302_v60 }
 0x27b   : > { %5851 = vmatpush.bf16.msra.mxu0 %v7301_v53  ;;  %v5517_v14 = vpop.f32.mrf.mxu2  ;;  %v5482_v20 = vpop.f32.mrf.mxu0 }
 0x27c   : > { %7319 = vmatpush.bf16.msra.mxu1 %v7301_v53  ;;  %v5536_v15 = vpop.f32.mrf.mxu3  ;;  %v5518_v18 = vadd.f32 %v5517_v14, %v5499_v4  ;;  %v5501_v21 = vpop.f32.mrf.mxu1  ;;  %v5483_v24 = vadd.f32 %v5482_v20, %v8739_v34  ;;  %v7297_v34 = vld [vmem:[%s8284_s5 + $0x600] sm:$0xff]  ;;  %s6050_s5 = sshll.u32 %s3442_s30, 4 }
 0x27d   : > { %s3472_s6 = scalar_lea.vmem [#allocation3], %s6050_s5 }
 0x27e   : > { %v5537_v26 = vadd.f32 %v5536_v15, %v5518_v18  ;;  %v5502_v27 = vadd.f32 %v5501_v21, %v5483_v24  ;;  %5785 = vmatmul.bf16.gmra.mxu0 %v6234_v16 }
 0x27f   : > { %5852 = vmatpush.bf16.msra.mxu0 %v7300_v13  ;;  %5804 = vmatmul.bf16.gmra.mxu1 %v6238_v17 }
 0x280   : > { %7320 = vmatpush.bf16.msra.mxu1 %v7300_v13  ;;  %5823 = vmatmul.bf16.gmra.mxu2 %v6242_v22 }
 0x281   : > { %5842 = vmatmul.bf16.gmra.mxu3 %v6246_v23 }
 0x283   : > { %5853 = vmatpush.bf16.msra.mxu0 %v7299_v25  ;;  %v5520_v29 = vpop.f32.mrf.mxu2  ;;  %v5484_v32 = vpop.f32.mrf.mxu0 }
 0x284   : > { %7321 = vmatpush.bf16.msra.mxu1 %v7299_v25  ;;  %v5539_v30 = vpop.f32.mrf.mxu3  ;;  %v5521_v31 = vadd.f32 %v5520_v29, %v5502_v27  ;;  %v5503_v33 = vpop.f32.mrf.mxu1  ;;  %v5485_v35 = vadd.f32 %v5484_v32, %v5466_v58 }
 0x286   : > { %v5540_v36 = vadd.f32 %v5539_v30, %v5521_v31  ;;  %v5504_v37 = vadd.f32 %v5503_v33, %v5485_v35 }
 0x287   : > { %5854 = vmatpush.bf16.msra.mxu0 %v7298_v28 }
 0x288   : > { %7322 = vmatpush.bf16.msra.mxu1 %v7298_v28 }
 0x28b   : > { %5855 = vmatpush.bf16.msra.mxu0 %v7297_v34  ;;  %v5522_v41 = vpop.f32.mrf.mxu2  ;;  %v5553_v46 = vpop.f32.mrf.mxu0 }
 0x28c   : > { %7323 = vmatpush.bf16.msra.mxu1 %v7297_v34  ;;  %v5541_v42 = vpop.f32.mrf.mxu3  ;;  %v5523_v45 = vadd.f32 %v5522_v41, %v5504_v37  ;;  %v5572_v47 = vpop.f32.mrf.mxu1  ;;  %v5554_v48 = vadd.f32 %v5553_v46, %v5535_v3 }
 0x28e   : > { %v5542_v49 = vadd.f32 %v5541_v42, %v5523_v45  ;;  %v5573_v50 = vadd.f32 %v5572_v47, %v5554_v48  ;;  %5856 = vmatmul.bf16.vlgmr.msra.gmra.mxu0 %v6150_v43 }
 0x28f   : > { %5861 = vmatmul.bf16.vlgmr.msra.gmra.mxu1 %v6250_v44 }
 0x293   : > { %v5591_v51 = vpop.f32.mrf.mxu2  ;;  %v5555_v55 = vpop.f32.mrf.mxu0 }
 0x294   : > { %v5610_v52 = vpop.f32.mrf.mxu3  ;;  %v5592_v54 = vadd.f32 %v5591_v51, %v5573_v50  ;;  %v5574_v56 = vpop.f32.mrf.mxu1  ;;  %v5556_v57 = vadd.f32 %v5555_v55, %v5537_v26 }
 0x296   : > { %v5611_v58 = vadd.f32 %v5610_v52, %v5592_v54  ;;  %v5575_v59 = vadd.f32 %v5574_v56, %v5556_v57 }
 0x29b   : > { %v5593_v60 = vpop.f32.mrf.mxu2  ;;  %v5558_v63 = vpop.f32.mrf.mxu0 }
 0x29c   : > { %v5612_v61 = vpop.f32.mrf.mxu3  ;;  %v5594_v62 = vadd.f32 %v5593_v60, %v5575_v59  ;;  %v5577_v0 = vpop.f32.mrf.mxu1  ;;  %v5559_v1 = vadd.f32 %v5558_v63, %v5540_v36 }
 0x29e   : > { %v5613_v2 = vadd.f32 %v5612_v61, %v5594_v62  ;;  %v5578_v53 = vadd.f32 %v5577_v0, %v5559_v1 }
 0x2a3   : > { %v5596_v3 = vpop.f32.mrf.mxu2  ;;  %v5560_v6 = vpop.f32.mrf.mxu0 }
 0x2a4   : > { %v5615_v4 = vpop.f32.mrf.mxu3  ;;  %v5597_v5 = vadd.f32 %v5596_v3, %v5578_v53  ;;  %v5579_v7 = vpop.f32.mrf.mxu1  ;;  %v5561_v8 = vadd.f32 %v5560_v6, %v5542_v49 }
 0x2a6   : > { %v5616_v9 = vadd.f32 %v5615_v4, %v5597_v5  ;;  %v5580_v10 = vadd.f32 %v5579_v7, %v5561_v8 }
 0x2ab   : > { %v5598_v11 = vpop.f32.mrf.mxu2  ;;  %v5629_v14 = vpop.f32.mrf.mxu0 }
 0x2ac   : > { %v5617_v12 = vpop.f32.mrf.mxu3  ;;  %v5599_v13 = vadd.f32 %v5598_v11, %v5580_v10  ;;  %v5648_v15 = vpop.f32.mrf.mxu1  ;;  %v5630_v16 = vadd.f32 %v5629_v14, %v5611_v58 }
 0x2ae   : > { %v5618_v17 = vadd.f32 %v5617_v12, %v5599_v13  ;;  %v5649_v18 = vadd.f32 %v5648_v15, %v5630_v16 }
 0x2b3   : > { %v5667_v20 = vpop.f32.mrf.mxu2  ;;  %v5631_v23 = vpop.f32.mrf.mxu0 }
 0x2b4   : > { %v5686_v21 = vpop.f32.mrf.mxu3  ;;  %v5668_v22 = vadd.f32 %v5667_v20, %v5649_v18  ;;  %v5650_v24 = vpop.f32.mrf.mxu1  ;;  %v5632_v25 = vadd.f32 %v5631_v23, %v5613_v2 }
 0x2b6   : > { %v5687_v26 = vadd.f32 %v5686_v21, %v5668_v22  ;;  %v5651_v27 = vadd.f32 %v5650_v24, %v5632_v25 }
 0x2bb   : > { %v5669_v28 = vpop.f32.mrf.mxu2  ;;  %v5634_v30 = vpop.f32.mrf.mxu0 }
 0x2bc   : > { %v5688_v29 = vpop.f32.mrf.mxu3  ;;  %v5653_v31 = vpop.f32.mrf.mxu1  ;;  %v5635_v32 = vadd.f32 %v5634_v30, %v5616_v9  ;;  %v5670_v1 = vadd.f32 %v5669_v28, %v5651_v27 }
 0x2be   : > { %v5654_v33 = vadd.f32 %v5653_v31, %v5635_v32  ;;  %v5689_v3 = vadd.f32 %v5688_v29, %v5670_v1 }
 0x2c3   : > { %v5672_v35 = vpop.f32.mrf.mxu2  ;;  %v5636_v36 = vpop.f32.mrf.mxu0 }
 0x2c4   : > { %v5691_v34 = vpop.f32.mrf.mxu3  ;;  %v5655_v37 = vpop.f32.mrf.mxu1  ;;  %v5637_v58 = vadd.f32 %v5636_v36, %v5618_v17  ;;  %v5673_v63 = vadd.f32 %v5672_v35, %v5654_v33 }
 0x2c6   : > { %v5656_v0 = vadd.f32 %v5655_v37, %v5637_v58  ;;  %v5692_v53 = vadd.f32 %v5691_v34, %v5673_v63 }
 0x2cb   : > { %v5674_v38 = vpop.f32.mrf.mxu2  ;;  %v5705_v19 = vpop.f32.mrf.mxu0 }
 0x2cc   : > { %v5693_v39 = vpop.f32.mrf.mxu3  ;;  %v5724_v40 = vpop.f32.mrf.mxu1  ;;  %v5675_v2 = vadd.f32 %v5674_v38, %v5656_v0  ;;  %v5706_v5 = vadd.f32 %v5705_v19, %v5687_v26 }
 0x2ce   : > { %v5694_v4 = vadd.f32 %v5693_v39, %v5675_v2  ;;  %v5725_v13 = vadd.f32 %v5724_v40, %v5706_v5 }
 0x2d3   : > { %v5743_v41 = vpop.f32.mrf.mxu2  ;;  %v5707_v43 = vpop.f32.mrf.mxu0 }
 0x2d4   : > { %v5762_v42 = vpop.f32.mrf.mxu3  ;;  %v5726_v44 = vpop.f32.mrf.mxu1  ;;  %v5708_v10 = vadd.f32 %v5707_v43, %v5689_v3  ;;  %v5744_v15 = vadd.f32 %v5743_v41, %v5725_v13 }
 0x2d6   : > { %v5727_v16 = vadd.f32 %v5726_v44, %v5708_v10  ;;  %v5763_v25 = vadd.f32 %v5762_v42, %v5744_v15 }
 0x2db   : > { %v5745_v45 = vpop.f32.mrf.mxu2  ;;  %v5710_v47 = vpop.f32.mrf.mxu0 }
 0x2dc   : > { %v5764_v46 = vpop.f32.mrf.mxu3  ;;  %v5729_v48 = vpop.f32.mrf.mxu1  ;;  %v5711_v6 = vadd.f32 %v5710_v47, %v5692_v53  ;;  %v5746_v20 = vadd.f32 %v5745_v45, %v5727_v16 }
 0x2de   : > { %v5730_v14 = vadd.f32 %v5729_v48, %v5711_v6  ;;  %v5765_v27 = vadd.f32 %v5764_v46, %v5746_v20 }
 0x2e3   : > { %v5748_v49 = vpop.f32.mrf.mxu2  ;;  %v5712_v51 = vpop.f32.mrf.mxu0 }
 0x2e4   : > { %v5767_v50 = vpop.f32.mrf.mxu3  ;;  %v5731_v52 = vpop.f32.mrf.mxu1  ;;  %v5713_v11 = vadd.f32 %v5712_v51, %v5694_v4  ;;  %v5749_v17 = vadd.f32 %v5748_v49, %v5730_v14 }
 0x2e6   : > { %v5732_v18 = vadd.f32 %v5731_v52, %v5713_v11  ;;  %v5768_v26 = vadd.f32 %v5767_v50, %v5749_v17 }
 0x2eb   : > { %v5750_v54 = vpop.f32.mrf.mxu2  ;;  %v5781_v56 = vpop.f32.mrf.mxu0 }
 0x2ec   : > { %v5769_v55 = vpop.f32.mrf.mxu3  ;;  %v5800_v57 = vpop.f32.mrf.mxu1  ;;  %v5751_v21 = vadd.f32 %v5750_v54, %v5732_v18  ;;  %v5782_v29 = vadd.f32 %v5781_v56, %v5763_v25 }
 0x2ee   : > { %v5770_v28 = vadd.f32 %v5769_v55, %v5751_v21  ;;  %v5801_v35 = vadd.f32 %v5800_v57, %v5782_v29 }
 0x2f3   : > { %v5819_v59 = vpop.f32.mrf.mxu2  ;;  %v5783_v61 = vpop.f32.mrf.mxu0 }
 0x2f4   : > { %v5838_v60 = vpop.f32.mrf.mxu3  ;;  %v5802_v62 = vpop.f32.mrf.mxu1  ;;  %v5784_v32 = vadd.f32 %v5783_v61, %v5765_v27  ;;  %v5820_v39 = vadd.f32 %v5819_v59, %v5801_v35 }
 0x2f6   : > { %v5803_v19 = vadd.f32 %v5802_v62, %v5784_v32  ;;  %v5839_v44 = vadd.f32 %v5838_v60, %v5820_v39 }
 0x2fb   : > { %v5821_v7 = vpop.f32.mrf.mxu2  ;;  %v5786_v8 = vpop.f32.mrf.mxu0 }
 0x2fc   : > { %v5805_v9 = vpop.f32.mrf.mxu1  ;;  %v5840_v12 = vpop.f32.mrf.mxu3  ;;  %v5787_v30 = vadd.f32 %v5786_v8, %v5768_v26  ;;  %v5822_v43 = vadd.f32 %v5821_v7, %v5803_v19 }
 0x2fe   : > { %v5806_v34 = vadd.f32 %v5805_v9, %v5787_v30  ;;  %v5841_v47 = vadd.f32 %v5840_v12, %v5822_v43 }
 0x303   : > { %v5824_v22 = vpop.f32.mrf.mxu2  ;;  %v5788_v23 = vpop.f32.mrf.mxu0 }
 0x304   : > { %v5807_v24 = vpop.f32.mrf.mxu1  ;;  %v5843_v31 = vpop.f32.mrf.mxu3  ;;  %v5789_v33 = vadd.f32 %v5788_v23, %v5770_v28  ;;  %v5825_v40 = vadd.f32 %v5824_v22, %v5806_v34 }
 0x306   : > { %v5808_v41 = vadd.f32 %v5807_v24, %v5789_v33  ;;  %v5844_v45 = vadd.f32 %v5843_v31, %v5825_v40 }
 0x30b   : > { %v5826_v36 = vpop.f32.mrf.mxu2  ;;  %v5857_v37 = vpop.f32.mrf.mxu0 }
 0x30c   : > { %v5862_v38 = vpop.f32.mrf.mxu1  ;;  %v5827_v42 = vadd.f32 %v5826_v36, %v5808_v41  ;;  %v5845_v46 = vpop.f32.mrf.mxu3  ;;  %v5858_v49 = vadd.f32 %v5857_v37, %v5839_v44 }
 0x30d   : > { %v5863_v50 = vadd.f32 %v5862_v38, %v5844_v45 }
 0x30e   : > { %v5846_v48 = vadd.f32 %v5845_v46, %v5827_v42  ;;  %v5867_v56 = vmax.f32 %v5858_v49, 0.0 }
 0x30f   : > { %v5869_v57 = vmax.f32 %v5863_v50, 0.0 }
 0x313   : > { %v5859_v51 = vpop.f32.mrf.mxu0 }
 0x314   : > { %v5864_v52 = vpop.f32.mrf.mxu1  ;;  %v5860_v54 = vadd.f32 %v5859_v51, %v5841_v47 }
 0x315   : > { %v5865_v55 = vadd.f32 %v5864_v52, %v5846_v48 }
 0x316   : > { %v5868_v58 = vmax.f32 %v5860_v54, 0.0 }
 0x317   : > { %v5870_v59 = vmax.f32 %v5865_v55, 0.0  ;;  %5885 = sbr.rel (!%p7462_p6) target bundleno = 806 (0x326), region = 88 }
 0x318   : > { %v7308_v61 = vpack.c.bf16 %v5868_v58, %v5867_v56 }
 0x319   : > { %v7313_v62 = vpack.c.bf16 %v5870_v59, %v5869_v57 }
 0x31a   : > { %7309 = vst [vmem:[%s3472_s6] sm:$0xff] %v7308_v61  }
 0x31b   : > { %7315 = vst [vmem:[%s3472_s6 + $0x8] sm:$0xff] %v7313_v62  }
 0x321   : > { %v5907_v60 = vld [vmem:[%s3472_s6] sm:$0xf]  ;;  %v5909_v63 = vld [vmem:[%s3472_s6 + $0x4] sm:$0xf] }
 0x322   : > { %v5911_v0 = vld [vmem:[%s3472_s6 + $0x8] sm:$0xf]  ;;  %5908 = vst [vmem:[%s5890_s9] sm:$0xf] %v5907_v60  ;;  %v5913_v1 = vld [vmem:[%s3472_s6 + $0xc] sm:$0xf] }
 0x323   : > { %5910 = vst [vmem:[%s5890_s9 + $0x8] sm:$0xf] %v5909_v63 }
 0x324   : > { %5912 = vst [vmem:[%s5890_s9 + $0x10] sm:$0xf] %v5911_v0 }
 0x325   : > { %5914 = vst [vmem:[%s5890_s9 + $0x18] sm:$0xf] %v5913_v1 }
 0x326 PF: > { %s13_s16 = sadd.s32 1, %s7405_s16   ;;  %s8842_s12 = smov %s7393_s13 }
 0x327   : > { %p10_p12 = scmp.ge.s32.totalorder %s13_s16, 4   ;;  %s8843_s13 = smov %s7467_s22 }
 0x328   : > { %s8844_s14 = smov %s7401_s15  ;;  %s8845_s15 = smov %s8847_s17 }
 0x329   :  { %12 = sbr.rel (!%p10_p12) target bundleno = 3 (0x3), region = 170 }

// kernel: domain_factor_backbone.7
= control target key start
LH: loop header
LB: loop body
LE: loop exit
PB: predicated region body
PF: predicated region fallthrough
CT: control target
= control target key end

     0   :  { %8 = vsyncpa [#allocation4], 0  ;;  %s13566_s0 = inlined_call_operand.vmem [shape: bf16[2,4096], index: 0, kind: input, shape index: {}]   ;;  %s13567_s1 = inlined_call_operand.vmem [shape: bf16[4096,512], index: 1, kind: input, shape index: {}]   ;;  %s13568_s2 = inlined_call_operand.vmem [shape: f32[1,512], index: 2, kind: input, shape index: {}]   ;;  %s13569_s3 = inlined_call_operand.hbm [shape: f32[2,512], index: 3, kind: output, shape index: {}]  }
   0x1   :  { %10 = vsyncpa [#allocation4 + $0x1], 0  ;;  %s11249_s12 = smov 0   ;;  %s11251_s13 = smov 0  }
   0x2   :  { %s11253_s14 = smov 0   ;;  %s11255_s15 = smov 0  }
   0x3   :  { %s11257_s16 = smov 0   ;;  %s11259_s17 = smov 0  }
   0x4 LB: > { %s8506_s18 = sadd.s32 4294967295, %s11227_s17   ;;  %s8507_s19 = sadd.s32 4294967294, %s11227_s17   ;;  %s11227_s17 = sphi %s11259_s17, %s16_s17   ;;  %s11223_s16 = sphi %s11257_s16, %s13577_s16   ;;  %s11219_s15 = sphi %s11255_s15, %s13576_s15   ;;  %s11215_s14 = sphi %s11253_s14, %s13575_s14   ;;  %s11211_s13 = sphi %s11251_s13, %s13574_s13   ;;  %s11207_s12 = sphi %s11249_s12, %s13573_s12  }
   0x5   : > { %s25_s20 = sadd.s32 1, %s11223_s16  ;;  %s61_s21 = sadd.s32 1, %s11215_s14 }
   0x6   : > { %p26_p0 = scmp.ge.s32.totalorder %s25_s20, 2  ;;  %p68_p1 = scmp.ne.s32.totalorder %s11215_s14, %s11211_s13 }
   0x7   : > { %p69_p2 = scmp.eq.s32.totalorder %s11227_s17, 0  ;;  %p126_p3 = scmp.eq.s32.totalorder %s8506_s18, 1 }
   0x8   : > { %s13579_s20 = smov (%p26_p0, %s25_s20), 0  ;;  %p131_p6 = scmp.ne.s32.totalorder %s11211_s13, %s11207_s12 }
   0x9   : > { %p70_p4 = por %p69_p2, %p68_p1  ;;  %p11288_p5 = por %p126_p3, %p68_p1 }
   0xa   : > { %s58_s23 = ssub.s32 %s11223_s16, %s13579_s20  ;;  %p132_p8 = scmp.eq.s32.totalorder %s8507_s19, 1 }
   0xb   : > { %p59_p7 = scmp.eq.s32.totalorder %s58_s23, 0  ;;  %p8510_p10 = scmp.ge.s32.totalorder %s11227_s17, 2 }
   0xc   : > { %p11299_p9 = por %p132_p8, %p131_p6 }
   0xd   : > { %s11297_s24 = scalar_select %p59_p7, %s11215_s14, %s61_s21  }
   0xe   : > { %155 = sbr.rel (%p8510_p10) target bundleno = 535 (0x217), region = 20 }
  0x13   : > { %158 = sbr.rel (!%p70_p4) target bundleno = 535 (0x217), region = 24  ;;  %s160_s26 = sand.u32 (%p70_p4), 1, %s11215_s14  }
  0x14   : > { %s10571_s27 = sshll.u32 (%p70_p4), %s11223_s16, 3  ;;  %s8511_s28 = sshll.u32 (%p70_p4), %s160_s26, 12 }
  0x15   : > { %s11311_s4 = scalar_lea.vmem (%p70_p4), %s13567_s1, %s10571_s27  ;;  %s11316_s5 = scalar_lea.vmem (%p70_p4), [#allocation2], %s8511_s28 }
  0x16   : > { %v1217_v0 = vld [vmem:[%s11311_s4] sm:$0xff] (%p70_p4)  ;;  %v1219_v1 = vld [vmem:[%s11311_s4 + $0x10] sm:$0xff] (%p70_p4) }
  0x17   : > { %v1221_v2 = vld [vmem:[%s11311_s4 + $0x20] sm:$0xff] (%p70_p4)  ;;  %1218 = vst [vmem:[%s11316_s5] sm:$0xff] (%p70_p4), %v1217_v0  ;;  %v1223_v3 = vld [vmem:[%s11311_s4 + $0x30] sm:$0xff] (%p70_p4) }
  0x18   : > { %1220 = vst [vmem:[%s11316_s5 + $0x8] sm:$0xff] %v1219_v1  ;;  %v1225_v4 = vld [vmem:[%s11311_s4 + $0x40] sm:$0xff]  ;;  %v1227_v5 = vld [vmem:[%s11311_s4 + $0x50] sm:$0xff] }
  0x19   : > { %1222 = vst [vmem:[%s11316_s5 + $0x10] sm:$0xff] %v1221_v2  ;;  %v1229_v6 = vld [vmem:[%s11311_s4 + $0x60] sm:$0xff]  ;;  %v1231_v7 = vld [vmem:[%s11311_s4 + $0x70] sm:$0xff] }
  0x1a   : > { %1224 = vst [vmem:[%s11316_s5 + $0x18] sm:$0xff] %v1223_v3  ;;  %v1233_v8 = vld [vmem:[%s11311_s4 + $0x80] sm:$0xff]  ;;  %v1235_v9 = vld [vmem:[%s11311_s4 + $0x90] sm:$0xff] }
  0x1b   : > { %1226 = vst [vmem:[%s11316_s5 + $0x20] sm:$0xff] %v1225_v4  ;;  %v1237_v10 = vld [vmem:[%s11311_s4 + $0xa0] sm:$0xff]  ;;  %v1239_v11 = vld [vmem:[%s11311_s4 + $0xb0] sm:$0xff] }
  0x1c   : > { %1228 = vst [vmem:[%s11316_s5 + $0x28] sm:$0xff] %v1227_v5  ;;  %v1241_v12 = vld [vmem:[%s11311_s4 + $0xc0] sm:$0xff]  ;;  %v1243_v13 = vld [vmem:[%s11311_s4 + $0xd0] sm:$0xff] }
  0x1d   : > { %1230 = vst [vmem:[%s11316_s5 + $0x30] sm:$0xff] %v1229_v6  ;;  %v1245_v14 = vld [vmem:[%s11311_s4 + $0xe0] sm:$0xff]  ;;  %v1247_v15 = vld [vmem:[%s11311_s4 + $0xf0] sm:$0xff] }
  0x1e   : > { %1232 = vst [vmem:[%s11316_s5 + $0x38] sm:$0xff] %v1231_v7  ;;  %v1249_v16 = vld [vmem:[%s11311_s4 + $0x100] sm:$0xff]  ;;  %v1251_v17 = vld [vmem:[%s11311_s4 + $0x110] sm:$0xff] }
  0x1f   : > { %1234 = vst [vmem:[%s11316_s5 + $0x40] sm:$0xff] %v1233_v8  ;;  %v1253_v18 = vld [vmem:[%s11311_s4 + $0x120] sm:$0xff]  ;;  %v1255_v19 = vld [vmem:[%s11311_s4 + $0x130] sm:$0xff] }
  0x20   : > { %1236 = vst [vmem:[%s11316_s5 + $0x48] sm:$0xff] %v1235_v9  ;;  %v1257_v20 = vld [vmem:[%s11311_s4 + $0x140] sm:$0xff]  ;;  %v1259_v21 = vld [vmem:[%s11311_s4 + $0x150] sm:$0xff] }
  0x21   : > { %1238 = vst [vmem:[%s11316_s5 + $0x50] sm:$0xff] %v1237_v10  ;;  %v1261_v22 = vld [vmem:[%s11311_s4 + $0x160] sm:$0xff]  ;;  %v1263_v23 = vld [vmem:[%s11311_s4 + $0x170] sm:$0xff] }
  0x22   : > { %1240 = vst [vmem:[%s11316_s5 + $0x58] sm:$0xff] %v1239_v11  ;;  %v1265_v24 = vld [vmem:[%s11311_s4 + $0x180] sm:$0xff]  ;;  %v1267_v25 = vld [vmem:[%s11311_s4 + $0x190] sm:$0xff] }
  0x23   : > { %1242 = vst [vmem:[%s11316_s5 + $0x60] sm:$0xff] %v1241_v12  ;;  %v1269_v26 = vld [vmem:[%s11311_s4 + $0x1a0] sm:$0xff]  ;;  %v1271_v27 = vld [vmem:[%s11311_s4 + $0x1b0] sm:$0xff] }
  0x24   : > { %1244 = vst [vmem:[%s11316_s5 + $0x68] sm:$0xff] %v1243_v13  ;;  %v1273_v28 = vld [vmem:[%s11311_s4 + $0x1c0] sm:$0xff]  ;;  %v1275_v29 = vld [vmem:[%s11311_s4 + $0x1d0] sm:$0xff] }
  0x25   : > { %1246 = vst [vmem:[%s11316_s5 + $0x70] sm:$0xff] %v1245_v14  ;;  %v1277_v30 = vld [vmem:[%s11311_s4 + $0x1e0] sm:$0xff]  ;;  %v1279_v31 = vld [vmem:[%s11311_s4 + $0x1f0] sm:$0xff] }
  0x26   : > { %1248 = vst [vmem:[%s11316_s5 + $0x78] sm:$0xff] %v1247_v15  ;;  %v1281_v32 = vld [vmem:[%s11311_s4 + $0x200] sm:$0xff]  ;;  %v1283_v33 = vld [vmem:[%s11311_s4 + $0x210] sm:$0xff] }
  0x27   : > { %1250 = vst [vmem:[%s11316_s5 + $0x80] sm:$0xff] %v1249_v16  ;;  %v1285_v34 = vld [vmem:[%s11311_s4 + $0x220] sm:$0xff]  ;;  %v1287_v35 = vld [vmem:[%s11311_s4 + $0x230] sm:$0xff] }
  0x28   : > { %1252 = vst [vmem:[%s11316_s5 + $0x88] sm:$0xff] %v1251_v17  ;;  %v1289_v36 = vld [vmem:[%s11311_s4 + $0x240] sm:$0xff]  ;;  %v1291_v37 = vld [vmem:[%s11311_s4 + $0x250] sm:$0xff] }
  0x29   : > { %1254 = vst [vmem:[%s11316_s5 + $0x90] sm:$0xff] %v1253_v18  ;;  %v1293_v38 = vld [vmem:[%s11311_s4 + $0x260] sm:$0xff]  ;;  %v1295_v39 = vld [vmem:[%s11311_s4 + $0x270] sm:$0xff] }
  0x2a   : > { %1256 = vst [vmem:[%s11316_s5 + $0x98] sm:$0xff] %v1255_v19  ;;  %v1297_v40 = vld [vmem:[%s11311_s4 + $0x280] sm:$0xff]  ;;  %v1299_v41 = vld [vmem:[%s11311_s4 + $0x290] sm:$0xff] }
  0x2b   : > { %1258 = vst [vmem:[%s11316_s5 + $0xa0] sm:$0xff] %v1257_v20  ;;  %v1301_v42 = vld [vmem:[%s11311_s4 + $0x2a0] sm:$0xff]  ;;  %v1303_v43 = vld [vmem:[%s11311_s4 + $0x2b0] sm:$0xff] }
  0x2c   : > { %1260 = vst [vmem:[%s11316_s5 + $0xa8] sm:$0xff] %v1259_v21  ;;  %v1305_v44 = vld [vmem:[%s11311_s4 + $0x2c0] sm:$0xff]  ;;  %v1307_v45 = vld [vmem:[%s11311_s4 + $0x2d0] sm:$0xff] }
  0x2d   : > { %1262 = vst [vmem:[%s11316_s5 + $0xb0] sm:$0xff] %v1261_v22  ;;  %v1309_v46 = vld [vmem:[%s11311_s4 + $0x2e0] sm:$0xff]  ;;  %v1311_v47 = vld [vmem:[%s11311_s4 + $0x2f0] sm:$0xff] }
  0x2e   : > { %1264 = vst [vmem:[%s11316_s5 + $0xb8] sm:$0xff] %v1263_v23  ;;  %v1313_v48 = vld [vmem:[%s11311_s4 + $0x300] sm:$0xff]  ;;  %v1315_v49 = vld [vmem:[%s11311_s4 + $0x310] sm:$0xff] }
  0x2f   : > { %1266 = vst [vmem:[%s11316_s5 + $0xc0] sm:$0xff] %v1265_v24  ;;  %v1317_v50 = vld [vmem:[%s11311_s4 + $0x320] sm:$0xff]  ;;  %v1319_v51 = vld [vmem:[%s11311_s4 + $0x330] sm:$0xff] }
  0x30   : > { %1268 = vst [vmem:[%s11316_s5 + $0xc8] sm:$0xff] %v1267_v25  ;;  %v1321_v52 = vld [vmem:[%s11311_s4 + $0x340] sm:$0xff]  ;;  %v1323_v53 = vld [vmem:[%s11311_s4 + $0x350] sm:$0xff] }
  0x31   : > { %1270 = vst [vmem:[%s11316_s5 + $0xd0] sm:$0xff] %v1269_v26  ;;  %v1325_v54 = vld [vmem:[%s11311_s4 + $0x360] sm:$0xff]  ;;  %v1327_v55 = vld [vmem:[%s11311_s4 + $0x370] sm:$0xff] }
  0x32   : > { %1272 = vst [vmem:[%s11316_s5 + $0xd8] sm:$0xff] %v1271_v27  ;;  %v1329_v56 = vld [vmem:[%s11311_s4 + $0x380] sm:$0xff]  ;;  %v1331_v57 = vld [vmem:[%s11311_s4 + $0x390] sm:$0xff] }
  0x33   : > { %1274 = vst [vmem:[%s11316_s5 + $0xe0] sm:$0xff] %v1273_v28  ;;  %v1333_v58 = vld [vmem:[%s11311_s4 + $0x3a0] sm:$0xff]  ;;  %v1335_v59 = vld [vmem:[%s11311_s4 + $0x3b0] sm:$0xff] }
  0x34   : > { %1276 = vst [vmem:[%s11316_s5 + $0xe8] sm:$0xff] %v1275_v29  ;;  %v1337_v60 = vld [vmem:[%s11311_s4 + $0x3c0] sm:$0xff]  ;;  %v1339_v61 = vld [vmem:[%s11311_s4 + $0x3d0] sm:$0xff] }
  0x35   : > { %1278 = vst [vmem:[%s11316_s5 + $0xf0] sm:$0xff] %v1277_v30  ;;  %v1341_v62 = vld [vmem:[%s11311_s4 + $0x3e0] sm:$0xff]  ;;  %v1343_v63 = vld [vmem:[%s11311_s4 + $0x3f0] sm:$0xff] }
  0x36   : > { %1280 = vst [vmem:[%s11316_s5 + $0xf8] sm:$0xff] %v1279_v31  ;;  %v1345_v0 = vld [vmem:[%s11311_s4 + $0x400] sm:$0xff]  ;;  %v1347_v1 = vld [vmem:[%s11311_s4 + $0x410] sm:$0xff] }
  0x37   : > { %1282 = vst [vmem:[%s11316_s5 + $0x100] sm:$0xff] %v1281_v32  ;;  %v1349_v2 = vld [vmem:[%s11311_s4 + $0x420] sm:$0xff]  ;;  %v1351_v3 = vld [vmem:[%s11311_s4 + $0x430] sm:$0xff] }
  0x38   : > { %1284 = vst [vmem:[%s11316_s5 + $0x108] sm:$0xff] %v1283_v33  ;;  %v1353_v4 = vld [vmem:[%s11311_s4 + $0x440] sm:$0xff]  ;;  %v1355_v5 = vld [vmem:[%s11311_s4 + $0x450] sm:$0xff] }
  0x39   : > { %1286 = vst [vmem:[%s11316_s5 + $0x110] sm:$0xff] %v1285_v34  ;;  %v1357_v6 = vld [vmem:[%s11311_s4 + $0x460] sm:$0xff]  ;;  %v1359_v7 = vld [vmem:[%s11311_s4 + $0x470] sm:$0xff] }
  0x3a   : > { %1288 = vst [vmem:[%s11316_s5 + $0x118] sm:$0xff] %v1287_v35  ;;  %v1361_v8 = vld [vmem:[%s11311_s4 + $0x480] sm:$0xff]  ;;  %v1363_v9 = vld [vmem:[%s11311_s4 + $0x490] sm:$0xff] }
  0x3b   : > { %1290 = vst [vmem:[%s11316_s5 + $0x120] sm:$0xff] %v1289_v36  ;;  %v1365_v10 = vld [vmem:[%s11311_s4 + $0x4a0] sm:$0xff]  ;;  %v1367_v11 = vld [vmem:[%s11311_s4 + $0x4b0] sm:$0xff] }
  0x3c   : > { %1292 = vst [vmem:[%s11316_s5 + $0x128] sm:$0xff] %v1291_v37  ;;  %v1369_v12 = vld [vmem:[%s11311_s4 + $0x4c0] sm:$0xff]  ;;  %v1371_v13 = vld [vmem:[%s11311_s4 + $0x4d0] sm:$0xff] }
  0x3d   : > { %1294 = vst [vmem:[%s11316_s5 + $0x130] sm:$0xff] %v1293_v38  ;;  %v1373_v14 = vld [vmem:[%s11311_s4 + $0x4e0] sm:$0xff]  ;;  %v1375_v15 = vld [vmem:[%s11311_s4 + $0x4f0] sm:$0xff] }
  0x3e   : > { %1296 = vst [vmem:[%s11316_s5 + $0x138] sm:$0xff] %v1295_v39  ;;  %v1377_v16 = vld [vmem:[%s11311_s4 + $0x500] sm:$0xff]  ;;  %v1379_v17 = vld [vmem:[%s11311_s4 + $0x510] sm:$0xff] }
  0x3f   : > { %1298 = vst [vmem:[%s11316_s5 + $0x140] sm:$0xff] %v1297_v40  ;;  %v1381_v18 = vld [vmem:[%s11311_s4 + $0x520] sm:$0xff]  ;;  %v1383_v19 = vld [vmem:[%s11311_s4 + $0x530] sm:$0xff] }
  0x40   : > { %1300 = vst [vmem:[%s11316_s5 + $0x148] sm:$0xff] %v1299_v41  ;;  %v1385_v20 = vld [vmem:[%s11311_s4 + $0x540] sm:$0xff]  ;;  %v1387_v21 = vld [vmem:[%s11311_s4 + $0x550] sm:$0xff] }
  0x41   : > { %1302 = vst [vmem:[%s11316_s5 + $0x150] sm:$0xff] %v1301_v42  ;;  %v1389_v22 = vld [vmem:[%s11311_s4 + $0x560] sm:$0xff]  ;;  %v1391_v23 = vld [vmem:[%s11311_s4 + $0x570] sm:$0xff] }
  0x42   : > { %1304 = vst [vmem:[%s11316_s5 + $0x158] sm:$0xff] %v1303_v43  ;;  %v1393_v24 = vld [vmem:[%s11311_s4 + $0x580] sm:$0xff]  ;;  %v1395_v25 = vld [vmem:[%s11311_s4 + $0x590] sm:$0xff] }
  0x43   : > { %1306 = vst [vmem:[%s11316_s5 + $0x160] sm:$0xff] %v1305_v44  ;;  %v1397_v26 = vld [vmem:[%s11311_s4 + $0x5a0] sm:$0xff]  ;;  %v1399_v27 = vld [vmem:[%s11311_s4 + $0x5b0] sm:$0xff] }
  0x44   : > { %1308 = vst [vmem:[%s11316_s5 + $0x168] sm:$0xff] %v1307_v45  ;;  %v1401_v28 = vld [vmem:[%s11311_s4 + $0x5c0] sm:$0xff]  ;;  %v1403_v29 = vld [vmem:[%s11311_s4 + $0x5d0] sm:$0xff] }
  0x45   : > { %1310 = vst [vmem:[%s11316_s5 + $0x170] sm:$0xff] %v1309_v46  ;;  %v1405_v30 = vld [vmem:[%s11311_s4 + $0x5e0] sm:$0xff]  ;;  %v1407_v31 = vld [vmem:[%s11311_s4 + $0x5f0] sm:$0xff] }
  0x46   : > { %1312 = vst [vmem:[%s11316_s5 + $0x178] sm:$0xff] %v1311_v47  ;;  %v1409_v32 = vld [vmem:[%s11311_s4 + $0x600] sm:$0xff]  ;;  %v1411_v33 = vld [vmem:[%s11311_s4 + $0x610] sm:$0xff] }
  0x47   : > { %1314 = vst [vmem:[%s11316_s5 + $0x180] sm:$0xff] %v1313_v48  ;;  %v1413_v34 = vld [vmem:[%s11311_s4 + $0x620] sm:$0xff]  ;;  %v1415_v35 = vld [vmem:[%s11311_s4 + $0x630] sm:$0xff] }
  0x48   : > { %1316 = vst [vmem:[%s11316_s5 + $0x188] sm:$0xff] %v1315_v49  ;;  %v1417_v36 = vld [vmem:[%s11311_s4 + $0x640] sm:$0xff]  ;;  %v1419_v37 = vld [vmem:[%s11311_s4 + $0x650] sm:$0xff] }
  0x49   : > { %1318 = vst [vmem:[%s11316_s5 + $0x190] sm:$0xff] %v1317_v50  ;;  %v1421_v38 = vld [vmem:[%s11311_s4 + $0x660] sm:$0xff]  ;;  %v1423_v39 = vld [vmem:[%s11311_s4 + $0x670] sm:$0xff] }
  0x4a   : > { %1320 = vst [vmem:[%s11316_s5 + $0x198] sm:$0xff] %v1319_v51  ;;  %v1425_v40 = vld [vmem:[%s11311_s4 + $0x680] sm:$0xff]  ;;  %v1427_v41 = vld [vmem:[%s11311_s4 + $0x690] sm:$0xff] }
  0x4b   : > { %1322 = vst [vmem:[%s11316_s5 + $0x1a0] sm:$0xff] %v1321_v52  ;;  %v1429_v42 = vld [vmem:[%s11311_s4 + $0x6a0] sm:$0xff]  ;;  %v1431_v43 = vld [vmem:[%s11311_s4 + $0x6b0] sm:$0xff] }
  0x4c   : > { %1324 = vst [vmem:[%s11316_s5 + $0x1a8] sm:$0xff] %v1323_v53  ;;  %v1433_v44 = vld [vmem:[%s11311_s4 + $0x6c0] sm:$0xff]  ;;  %v1435_v45 = vld [vmem:[%s11311_s4 + $0x6d0] sm:$0xff] }
  0x4d   : > { %1326 = vst [vmem:[%s11316_s5 + $0x1b0] sm:$0xff] %v1325_v54  ;;  %v1437_v46 = vld [vmem:[%s11311_s4 + $0x6e0] sm:$0xff]  ;;  %v1439_v47 = vld [vmem:[%s11311_s4 + $0x6f0] sm:$0xff] }
  0x4e   : > { %1328 = vst [vmem:[%s11316_s5 + $0x1b8] sm:$0xff] %v1327_v55  ;;  %v1441_v48 = vld [vmem:[%s11311_s4 + $0x700] sm:$0xff]  ;;  %v1443_v49 = vld [vmem:[%s11311_s4 + $0x710] sm:$0xff] }
  0x4f   : > { %1330 = vst [vmem:[%s11316_s5 + $0x1c0] sm:$0xff] %v1329_v56  ;;  %v1445_v50 = vld [vmem:[%s11311_s4 + $0x720] sm:$0xff]  ;;  %v1447_v51 = vld [vmem:[%s11311_s4 + $0x730] sm:$0xff] }
  0x50   : > { %1332 = vst [vmem:[%s11316_s5 + $0x1c8] sm:$0xff] %v1331_v57  ;;  %v1449_v52 = vld [vmem:[%s11311_s4 + $0x740] sm:$0xff]  ;;  %v1451_v53 = vld [vmem:[%s11311_s4 + $0x750] sm:$0xff] }
  0x51   : > { %1334 = vst [vmem:[%s11316_s5 + $0x1d0] sm:$0xff] %v1333_v58  ;;  %v1453_v54 = vld [vmem:[%s11311_s4 + $0x760] sm:$0xff]  ;;  %v1455_v55 = vld [vmem:[%s11311_s4 + $0x770] sm:$0xff] }
  0x52   : > { %1336 = vst [vmem:[%s11316_s5 + $0x1d8] sm:$0xff] %v1335_v59  ;;  %v1457_v56 = vld [vmem:[%s11311_s4 + $0x780] sm:$0xff]  ;;  %v1459_v57 = vld [vmem:[%s11311_s4 + $0x790] sm:$0xff] }
  0x53   : > { %1338 = vst [vmem:[%s11316_s5 + $0x1e0] sm:$0xff] %v1337_v60  ;;  %v1461_v58 = vld [vmem:[%s11311_s4 + $0x7a0] sm:$0xff]  ;;  %v1463_v59 = vld [vmem:[%s11311_s4 + $0x7b0] sm:$0xff] }
  0x54   : > { %1340 = vst [vmem:[%s11316_s5 + $0x1e8] sm:$0xff] %v1339_v61  ;;  %v1465_v60 = vld [vmem:[%s11311_s4 + $0x7c0] sm:$0xff]  ;;  %v1467_v61 = vld [vmem:[%s11311_s4 + $0x7d0] sm:$0xff] }
  0x55   : > { %1342 = vst [vmem:[%s11316_s5 + $0x1f0] sm:$0xff] %v1341_v62  ;;  %v1469_v62 = vld [vmem:[%s11311_s4 + $0x7e0] sm:$0xff] }
  0x56   : > { %1344 = vst [vmem:[%s11316_s5 + $0x1f8] sm:$0xff] %v1343_v63  ;;  %v1471_v63 = vld [vmem:[%s11311_s4 + $0x7f0] sm:$0xff] }
  0x57   : > { %1346 = vst [vmem:[%s11316_s5 + $0x200] sm:$0xff] %v1345_v0  ;;  %v1473_v0 = vld [vmem:[%s11311_s4 + $0x800] sm:$0xff] }
  0x58   : > { %1348 = vst [vmem:[%s11316_s5 + $0x208] sm:$0xff] %v1347_v1  ;;  %v1475_v1 = vld [vmem:[%s11311_s4 + $0x810] sm:$0xff] }
  0x59   : > { %1350 = vst [vmem:[%s11316_s5 + $0x210] sm:$0xff] %v1349_v2  ;;  %v1477_v2 = vld [vmem:[%s11311_s4 + $0x820] sm:$0xff] }
  0x5a   : > { %1352 = vst [vmem:[%s11316_s5 + $0x218] sm:$0xff] %v1351_v3  ;;  %v1479_v3 = vld [vmem:[%s11311_s4 + $0x830] sm:$0xff] }
  0x5b   : > { %1354 = vst [vmem:[%s11316_s5 + $0x220] sm:$0xff] %v1353_v4  ;;  %v1481_v4 = vld [vmem:[%s11311_s4 + $0x840] sm:$0xff] }
  0x5c   : > { %1356 = vst [vmem:[%s11316_s5 + $0x228] sm:$0xff] %v1355_v5  ;;  %v1483_v5 = vld [vmem:[%s11311_s4 + $0x850] sm:$0xff] }
  0x5d   : > { %1358 = vst [vmem:[%s11316_s5 + $0x230] sm:$0xff] %v1357_v6  ;;  %v1485_v6 = vld [vmem:[%s11311_s4 + $0x860] sm:$0xff] }
  0x5e   : > { %1360 = vst [vmem:[%s11316_s5 + $0x238] sm:$0xff] %v1359_v7  ;;  %v1487_v7 = vld [vmem:[%s11311_s4 + $0x870] sm:$0xff] }
  0x5f   : > { %1362 = vst [vmem:[%s11316_s5 + $0x240] sm:$0xff] %v1361_v8  ;;  %v1489_v8 = vld [vmem:[%s11311_s4 + $0x880] sm:$0xff] }
  0x60   : > { %1364 = vst [vmem:[%s11316_s5 + $0x248] sm:$0xff] %v1363_v9  ;;  %v1491_v9 = vld [vmem:[%s11311_s4 + $0x890] sm:$0xff] }
  0x61   : > { %1366 = vst [vmem:[%s11316_s5 + $0x250] sm:$0xff] %v1365_v10  ;;  %v1493_v10 = vld [vmem:[%s11311_s4 + $0x8a0] sm:$0xff] }
  0x62   : > { %1368 = vst [vmem:[%s11316_s5 + $0x258] sm:$0xff] %v1367_v11  ;;  %v1495_v11 = vld [vmem:[%s11311_s4 + $0x8b0] sm:$0xff] }
  0x63   : > { %1370 = vst [vmem:[%s11316_s5 + $0x260] sm:$0xff] %v1369_v12  ;;  %v1497_v12 = vld [vmem:[%s11311_s4 + $0x8c0] sm:$0xff] }
  0x64   : > { %1372 = vst [vmem:[%s11316_s5 + $0x268] sm:$0xff] %v1371_v13  ;;  %v1499_v13 = vld [vmem:[%s11311_s4 + $0x8d0] sm:$0xff] }
  0x65   : > { %1374 = vst [vmem:[%s11316_s5 + $0x270] sm:$0xff] %v1373_v14  ;;  %v1501_v14 = vld [vmem:[%s11311_s4 + $0x8e0] sm:$0xff] }
  0x66   : > { %1376 = vst [vmem:[%s11316_s5 + $0x278] sm:$0xff] %v1375_v15  ;;  %v1503_v15 = vld [vmem:[%s11311_s4 + $0x8f0] sm:$0xff] }
  0x67   : > { %1378 = vst [vmem:[%s11316_s5 + $0x280] sm:$0xff] %v1377_v16  ;;  %v1505_v16 = vld [vmem:[%s11311_s4 + $0x900] sm:$0xff] }
  0x68   : > { %1380 = vst [vmem:[%s11316_s5 + $0x288] sm:$0xff] %v1379_v17  ;;  %v1507_v17 = vld [vmem:[%s11311_s4 + $0x910] sm:$0xff] }
  0x69   : > { %1382 = vst [vmem:[%s11316_s5 + $0x290] sm:$0xff] %v1381_v18  ;;  %v1509_v18 = vld [vmem:[%s11311_s4 + $0x920] sm:$0xff] }
  0x6a   : > { %1384 = vst [vmem:[%s11316_s5 + $0x298] sm:$0xff] %v1383_v19  ;;  %v1511_v19 = vld [vmem:[%s11311_s4 + $0x930] sm:$0xff] }
  0x6b   : > { %1386 = vst [vmem:[%s11316_s5 + $0x2a0] sm:$0xff] %v1385_v20  ;;  %v1513_v20 = vld [vmem:[%s11311_s4 + $0x940] sm:$0xff] }
  0x6c   : > { %1388 = vst [vmem:[%s11316_s5 + $0x2a8] sm:$0xff] %v1387_v21  ;;  %v1515_v21 = vld [vmem:[%s11311_s4 + $0x950] sm:$0xff] }
  0x6d   : > { %1390 = vst [vmem:[%s11316_s5 + $0x2b0] sm:$0xff] %v1389_v22  ;;  %v1517_v22 = vld [vmem:[%s11311_s4 + $0x960] sm:$0xff] }
  0x6e   : > { %1392 = vst [vmem:[%s11316_s5 + $0x2b8] sm:$0xff] %v1391_v23  ;;  %v1519_v23 = vld [vmem:[%s11311_s4 + $0x970] sm:$0xff] }
  0x6f   : > { %1394 = vst [vmem:[%s11316_s5 + $0x2c0] sm:$0xff] %v1393_v24  ;;  %v1521_v24 = vld [vmem:[%s11311_s4 + $0x980] sm:$0xff] }
  0x70   : > { %1396 = vst [vmem:[%s11316_s5 + $0x2c8] sm:$0xff] %v1395_v25  ;;  %v1523_v25 = vld [vmem:[%s11311_s4 + $0x990] sm:$0xff] }
  0x71   : > { %1398 = vst [vmem:[%s11316_s5 + $0x2d0] sm:$0xff] %v1397_v26  ;;  %v1525_v26 = vld [vmem:[%s11311_s4 + $0x9a0] sm:$0xff] }
  0x72   : > { %1400 = vst [vmem:[%s11316_s5 + $0x2d8] sm:$0xff] %v1399_v27  ;;  %v1527_v27 = vld [vmem:[%s11311_s4 + $0x9b0] sm:$0xff] }
  0x73   : > { %1402 = vst [vmem:[%s11316_s5 + $0x2e0] sm:$0xff] %v1401_v28  ;;  %v1529_v28 = vld [vmem:[%s11311_s4 + $0x9c0] sm:$0xff] }
  0x74   : > { %1404 = vst [vmem:[%s11316_s5 + $0x2e8] sm:$0xff] %v1403_v29  ;;  %v1531_v29 = vld [vmem:[%s11311_s4 + $0x9d0] sm:$0xff] }
  0x75   : > { %1406 = vst [vmem:[%s11316_s5 + $0x2f0] sm:$0xff] %v1405_v30  ;;  %v1533_v30 = vld [vmem:[%s11311_s4 + $0x9e0] sm:$0xff] }
  0x76   : > { %1408 = vst [vmem:[%s11316_s5 + $0x2f8] sm:$0xff] %v1407_v31  ;;  %v1535_v31 = vld [vmem:[%s11311_s4 + $0x9f0] sm:$0xff] }
  0x77   : > { %1410 = vst [vmem:[%s11316_s5 + $0x300] sm:$0xff] %v1409_v32  ;;  %v1537_v32 = vld [vmem:[%s11311_s4 + $0xa00] sm:$0xff] }
  0x78   : > { %1412 = vst [vmem:[%s11316_s5 + $0x308] sm:$0xff] %v1411_v33  ;;  %v1539_v33 = vld [vmem:[%s11311_s4 + $0xa10] sm:$0xff] }
  0x79   : > { %1414 = vst [vmem:[%s11316_s5 + $0x310] sm:$0xff] %v1413_v34  ;;  %v1541_v34 = vld [vmem:[%s11311_s4 + $0xa20] sm:$0xff] }
  0x7a   : > { %1416 = vst [vmem:[%s11316_s5 + $0x318] sm:$0xff] %v1415_v35  ;;  %v1543_v35 = vld [vmem:[%s11311_s4 + $0xa30] sm:$0xff] }
  0x7b   : > { %1418 = vst [vmem:[%s11316_s5 + $0x320] sm:$0xff] %v1417_v36  ;;  %v1545_v36 = vld [vmem:[%s11311_s4 + $0xa40] sm:$0xff] }
  0x7c   : > { %1420 = vst [vmem:[%s11316_s5 + $0x328] sm:$0xff] %v1419_v37  ;;  %v1547_v37 = vld [vmem:[%s11311_s4 + $0xa50] sm:$0xff] }
  0x7d   : > { %1422 = vst [vmem:[%s11316_s5 + $0x330] sm:$0xff] %v1421_v38  ;;  %v1549_v38 = vld [vmem:[%s11311_s4 + $0xa60] sm:$0xff] }
  0x7e   : > { %1424 = vst [vmem:[%s11316_s5 + $0x338] sm:$0xff] %v1423_v39  ;;  %v1551_v39 = vld [vmem:[%s11311_s4 + $0xa70] sm:$0xff] }
  0x7f   : > { %1426 = vst [vmem:[%s11316_s5 + $0x340] sm:$0xff] %v1425_v40  ;;  %v1553_v40 = vld [vmem:[%s11311_s4 + $0xa80] sm:$0xff] }
  0x80   : > { %1428 = vst [vmem:[%s11316_s5 + $0x348] sm:$0xff] %v1427_v41  ;;  %v1555_v41 = vld [vmem:[%s11311_s4 + $0xa90] sm:$0xff] }
  0x81   : > { %1430 = vst [vmem:[%s11316_s5 + $0x350] sm:$0xff] %v1429_v42  ;;  %v1557_v42 = vld [vmem:[%s11311_s4 + $0xaa0] sm:$0xff] }
  0x82   : > { %1432 = vst [vmem:[%s11316_s5 + $0x358] sm:$0xff] %v1431_v43  ;;  %v1559_v43 = vld [vmem:[%s11311_s4 + $0xab0] sm:$0xff] }
  0x83   : > { %1434 = vst [vmem:[%s11316_s5 + $0x360] sm:$0xff] %v1433_v44  ;;  %v1561_v44 = vld [vmem:[%s11311_s4 + $0xac0] sm:$0xff] }
  0x84   : > { %1436 = vst [vmem:[%s11316_s5 + $0x368] sm:$0xff] %v1435_v45  ;;  %v1563_v45 = vld [vmem:[%s11311_s4 + $0xad0] sm:$0xff] }
  0x85   : > { %1438 = vst [vmem:[%s11316_s5 + $0x370] sm:$0xff] %v1437_v46  ;;  %v1565_v46 = vld [vmem:[%s11311_s4 + $0xae0] sm:$0xff] }
  0x86   : > { %1440 = vst [vmem:[%s11316_s5 + $0x378] sm:$0xff] %v1439_v47  ;;  %v1567_v47 = vld [vmem:[%s11311_s4 + $0xaf0] sm:$0xff] }
  0x87   : > { %1442 = vst [vmem:[%s11316_s5 + $0x380] sm:$0xff] %v1441_v48  ;;  %v1569_v48 = vld [vmem:[%s11311_s4 + $0xb00] sm:$0xff] }
  0x88   : > { %1444 = vst [vmem:[%s11316_s5 + $0x388] sm:$0xff] %v1443_v49  ;;  %v1571_v49 = vld [vmem:[%s11311_s4 + $0xb10] sm:$0xff] }
  0x89   : > { %1446 = vst [vmem:[%s11316_s5 + $0x390] sm:$0xff] %v1445_v50  ;;  %v1573_v50 = vld [vmem:[%s11311_s4 + $0xb20] sm:$0xff] }
  0x8a   : > { %1448 = vst [vmem:[%s11316_s5 + $0x398] sm:$0xff] %v1447_v51  ;;  %v1575_v51 = vld [vmem:[%s11311_s4 + $0xb30] sm:$0xff] }
  0x8b   : > { %1450 = vst [vmem:[%s11316_s5 + $0x3a0] sm:$0xff] %v1449_v52  ;;  %v1577_v52 = vld [vmem:[%s11311_s4 + $0xb40] sm:$0xff] }
  0x8c   : > { %1452 = vst [vmem:[%s11316_s5 + $0x3a8] sm:$0xff] %v1451_v53  ;;  %v1579_v53 = vld [vmem:[%s11311_s4 + $0xb50] sm:$0xff] }
  0x8d   : > { %1454 = vst [vmem:[%s11316_s5 + $0x3b0] sm:$0xff] %v1453_v54  ;;  %v1581_v54 = vld [vmem:[%s11311_s4 + $0xb60] sm:$0xff] }
  0x8e   : > { %1456 = vst [vmem:[%s11316_s5 + $0x3b8] sm:$0xff] %v1455_v55  ;;  %v1583_v55 = vld [vmem:[%s11311_s4 + $0xb70] sm:$0xff] }
  0x8f   : > { %1458 = vst [vmem:[%s11316_s5 + $0x3c0] sm:$0xff] %v1457_v56  ;;  %v1585_v56 = vld [vmem:[%s11311_s4 + $0xb80] sm:$0xff] }
  0x90   : > { %1460 = vst [vmem:[%s11316_s5 + $0x3c8] sm:$0xff] %v1459_v57  ;;  %v1587_v57 = vld [vmem:[%s11311_s4 + $0xb90] sm:$0xff] }
  0x91   : > { %1462 = vst [vmem:[%s11316_s5 + $0x3d0] sm:$0xff] %v1461_v58  ;;  %v1589_v58 = vld [vmem:[%s11311_s4 + $0xba0] sm:$0xff] }
  0x92   : > { %1464 = vst [vmem:[%s11316_s5 + $0x3d8] sm:$0xff] %v1463_v59  ;;  %v1591_v59 = vld [vmem:[%s11311_s4 + $0xbb0] sm:$0xff] }
  0x93   : > { %1466 = vst [vmem:[%s11316_s5 + $0x3e0] sm:$0xff] %v1465_v60  ;;  %v1593_v60 = vld [vmem:[%s11311_s4 + $0xbc0] sm:$0xff] }
  0x94   : > { %1468 = vst [vmem:[%s11316_s5 + $0x3e8] sm:$0xff] %v1467_v61  ;;  %v1595_v61 = vld [vmem:[%s11311_s4 + $0xbd0] sm:$0xff] }
  0x95   : > { %1470 = vst [vmem:[%s11316_s5 + $0x3f0] sm:$0xff] %v1469_v62  ;;  %v1597_v62 = vld [vmem:[%s11311_s4 + $0xbe0] sm:$0xff] }
  0x96   : > { %1472 = vst [vmem:[%s11316_s5 + $0x3f8] sm:$0xff] %v1471_v63  ;;  %v1599_v63 = vld [vmem:[%s11311_s4 + $0xbf0] sm:$0xff] }
  0x97   : > { %1474 = vst [vmem:[%s11316_s5 + $0x400] sm:$0xff] %v1473_v0  ;;  %v1601_v0 = vld [vmem:[%s11311_s4 + $0xc00] sm:$0xff] }
  0x98   : > { %1476 = vst [vmem:[%s11316_s5 + $0x408] sm:$0xff] %v1475_v1  ;;  %v1603_v1 = vld [vmem:[%s11311_s4 + $0xc10] sm:$0xff] }
  0x99   : > { %1478 = vst [vmem:[%s11316_s5 + $0x410] sm:$0xff] %v1477_v2  ;;  %v1605_v2 = vld [vmem:[%s11311_s4 + $0xc20] sm:$0xff] }
  0x9a   : > { %1480 = vst [vmem:[%s11316_s5 + $0x418] sm:$0xff] %v1479_v3  ;;  %v1607_v3 = vld [vmem:[%s11311_s4 + $0xc30] sm:$0xff] }
  0x9b   : > { %1482 = vst [vmem:[%s11316_s5 + $0x420] sm:$0xff] %v1481_v4  ;;  %v1609_v4 = vld [vmem:[%s11311_s4 + $0xc40] sm:$0xff] }
  0x9c   : > { %1484 = vst [vmem:[%s11316_s5 + $0x428] sm:$0xff] %v1483_v5  ;;  %v1611_v5 = vld [vmem:[%s11311_s4 + $0xc50] sm:$0xff] }
  0x9d   : > { %1486 = vst [vmem:[%s11316_s5 + $0x430] sm:$0xff] %v1485_v6  ;;  %v1613_v6 = vld [vmem:[%s11311_s4 + $0xc60] sm:$0xff] }
  0x9e   : > { %1488 = vst [vmem:[%s11316_s5 + $0x438] sm:$0xff] %v1487_v7  ;;  %v1615_v7 = vld [vmem:[%s11311_s4 + $0xc70] sm:$0xff] }
  0x9f   : > { %1490 = vst [vmem:[%s11316_s5 + $0x440] sm:$0xff] %v1489_v8  ;;  %v1617_v8 = vld [vmem:[%s11311_s4 + $0xc80] sm:$0xff] }
  0xa0   : > { %1492 = vst [vmem:[%s11316_s5 + $0x448] sm:$0xff] %v1491_v9  ;;  %v1619_v9 = vld [vmem:[%s11311_s4 + $0xc90] sm:$0xff] }
  0xa1   : > { %1494 = vst [vmem:[%s11316_s5 + $0x450] sm:$0xff] %v1493_v10  ;;  %v1621_v10 = vld [vmem:[%s11311_s4 + $0xca0] sm:$0xff] }
  0xa2   : > { %1496 = vst [vmem:[%s11316_s5 + $0x458] sm:$0xff] %v1495_v11  ;;  %v1623_v11 = vld [vmem:[%s11311_s4 + $0xcb0] sm:$0xff] }
  0xa3   : > { %1498 = vst [vmem:[%s11316_s5 + $0x460] sm:$0xff] %v1497_v12  ;;  %v1625_v12 = vld [vmem:[%s11311_s4 + $0xcc0] sm:$0xff] }
  0xa4   : > { %1500 = vst [vmem:[%s11316_s5 + $0x468] sm:$0xff] %v1499_v13  ;;  %v1627_v13 = vld [vmem:[%s11311_s4 + $0xcd0] sm:$0xff] }
  0xa5   : > { %1502 = vst [vmem:[%s11316_s5 + $0x470] sm:$0xff] %v1501_v14  ;;  %v1629_v14 = vld [vmem:[%s11311_s4 + $0xce0] sm:$0xff] }
  0xa6   : > { %1504 = vst [vmem:[%s11316_s5 + $0x478] sm:$0xff] %v1503_v15  ;;  %v1631_v15 = vld [vmem:[%s11311_s4 + $0xcf0] sm:$0xff] }
  0xa7   : > { %1506 = vst [vmem:[%s11316_s5 + $0x480] sm:$0xff] %v1505_v16  ;;  %v1633_v16 = vld [vmem:[%s11311_s4 + $0xd00] sm:$0xff] }
  0xa8   : > { %1508 = vst [vmem:[%s11316_s5 + $0x488] sm:$0xff] %v1507_v17  ;;  %v1635_v17 = vld [vmem:[%s11311_s4 + $0xd10] sm:$0xff] }
  0xa9   : > { %1510 = vst [vmem:[%s11316_s5 + $0x490] sm:$0xff] %v1509_v18  ;;  %v1637_v18 = vld [vmem:[%s11311_s4 + $0xd20] sm:$0xff] }
  0xaa   : > { %1512 = vst [vmem:[%s11316_s5 + $0x498] sm:$0xff] %v1511_v19  ;;  %v1639_v19 = vld [vmem:[%s11311_s4 + $0xd30] sm:$0xff] }
  0xab   : > { %1514 = vst [vmem:[%s11316_s5 + $0x4a0] sm:$0xff] %v1513_v20  ;;  %v1641_v20 = vld [vmem:[%s11311_s4 + $0xd40] sm:$0xff] }
  0xac   : > { %1516 = vst [vmem:[%s11316_s5 + $0x4a8] sm:$0xff] %v1515_v21  ;;  %v1643_v21 = vld [vmem:[%s11311_s4 + $0xd50] sm:$0xff] }
  0xad   : > { %1518 = vst [vmem:[%s11316_s5 + $0x4b0] sm:$0xff] %v1517_v22  ;;  %v1645_v22 = vld [vmem:[%s11311_s4 + $0xd60] sm:$0xff] }
  0xae   : > { %1520 = vst [vmem:[%s11316_s5 + $0x4b8] sm:$0xff] %v1519_v23  ;;  %v1647_v23 = vld [vmem:[%s11311_s4 + $0xd70] sm:$0xff] }
  0xaf   : > { %1522 = vst [vmem:[%s11316_s5 + $0x4c0] sm:$0xff] %v1521_v24  ;;  %v1649_v24 = vld [vmem:[%s11311_s4 + $0xd80] sm:$0xff] }
  0xb0   : > { %1524 = vst [vmem:[%s11316_s5 + $0x4c8] sm:$0xff] %v1523_v25  ;;  %v1651_v25 = vld [vmem:[%s11311_s4 + $0xd90] sm:$0xff] }
  0xb1   : > { %1526 = vst [vmem:[%s11316_s5 + $0x4d0] sm:$0xff] %v1525_v26  ;;  %v1653_v26 = vld [vmem:[%s11311_s4 + $0xda0] sm:$0xff] }
  0xb2   : > { %1528 = vst [vmem:[%s11316_s5 + $0x4d8] sm:$0xff] %v1527_v27  ;;  %v1655_v27 = vld [vmem:[%s11311_s4 + $0xdb0] sm:$0xff] }
  0xb3   : > { %1530 = vst [vmem:[%s11316_s5 + $0x4e0] sm:$0xff] %v1529_v28  ;;  %v1657_v28 = vld [vmem:[%s11311_s4 + $0xdc0] sm:$0xff] }
  0xb4   : > { %1532 = vst [vmem:[%s11316_s5 + $0x4e8] sm:$0xff] %v1531_v29  ;;  %v1659_v29 = vld [vmem:[%s11311_s4 + $0xdd0] sm:$0xff] }
  0xb5   : > { %1534 = vst [vmem:[%s11316_s5 + $0x4f0] sm:$0xff] %v1533_v30  ;;  %v1661_v30 = vld [vmem:[%s11311_s4 + $0xde0] sm:$0xff] }
  0xb6   : > { %1536 = vst [vmem:[%s11316_s5 + $0x4f8] sm:$0xff] %v1535_v31  ;;  %v1663_v31 = vld [vmem:[%s11311_s4 + $0xdf0] sm:$0xff] }
  0xb7   : > { %1538 = vst [vmem:[%s11316_s5 + $0x500] sm:$0xff] %v1537_v32  ;;  %v1665_v32 = vld [vmem:[%s11311_s4 + $0xe00] sm:$0xff] }
  0xb8   : > { %1540 = vst [vmem:[%s11316_s5 + $0x508] sm:$0xff] %v1539_v33  ;;  %v1667_v33 = vld [vmem:[%s11311_s4 + $0xe10] sm:$0xff] }
  0xb9   : > { %1542 = vst [vmem:[%s11316_s5 + $0x510] sm:$0xff] %v1541_v34  ;;  %v1669_v34 = vld [vmem:[%s11311_s4 + $0xe20] sm:$0xff] }
  0xba   : > { %1544 = vst [vmem:[%s11316_s5 + $0x518] sm:$0xff] %v1543_v35  ;;  %v1671_v35 = vld [vmem:[%s11311_s4 + $0xe30] sm:$0xff] }
  0xbb   : > { %1546 = vst [vmem:[%s11316_s5 + $0x520] sm:$0xff] %v1545_v36  ;;  %v1673_v36 = vld [vmem:[%s11311_s4 + $0xe40] sm:$0xff] }
  0xbc   : > { %1548 = vst [vmem:[%s11316_s5 + $0x528] sm:$0xff] %v1547_v37  ;;  %v1675_v37 = vld [vmem:[%s11311_s4 + $0xe50] sm:$0xff] }
  0xbd   : > { %1550 = vst [vmem:[%s11316_s5 + $0x530] sm:$0xff] %v1549_v38  ;;  %v1677_v38 = vld [vmem:[%s11311_s4 + $0xe60] sm:$0xff] }
  0xbe   : > { %1552 = vst [vmem:[%s11316_s5 + $0x538] sm:$0xff] %v1551_v39  ;;  %v1679_v39 = vld [vmem:[%s11311_s4 + $0xe70] sm:$0xff] }
  0xbf   : > { %1554 = vst [vmem:[%s11316_s5 + $0x540] sm:$0xff] %v1553_v40  ;;  %v1681_v40 = vld [vmem:[%s11311_s4 + $0xe80] sm:$0xff] }
  0xc0   : > { %1556 = vst [vmem:[%s11316_s5 + $0x548] sm:$0xff] %v1555_v41  ;;  %v1683_v41 = vld [vmem:[%s11311_s4 + $0xe90] sm:$0xff] }
  0xc1   : > { %1558 = vst [vmem:[%s11316_s5 + $0x550] sm:$0xff] %v1557_v42  ;;  %v1685_v42 = vld [vmem:[%s11311_s4 + $0xea0] sm:$0xff] }
  0xc2   : > { %1560 = vst [vmem:[%s11316_s5 + $0x558] sm:$0xff] %v1559_v43  ;;  %v1687_v43 = vld [vmem:[%s11311_s4 + $0xeb0] sm:$0xff] }
  0xc3   : > { %1562 = vst [vmem:[%s11316_s5 + $0x560] sm:$0xff] %v1561_v44  ;;  %v1689_v44 = vld [vmem:[%s11311_s4 + $0xec0] sm:$0xff] }
  0xc4   : > { %1564 = vst [vmem:[%s11316_s5 + $0x568] sm:$0xff] %v1563_v45  ;;  %v1691_v45 = vld [vmem:[%s11311_s4 + $0xed0] sm:$0xff] }
  0xc5   : > { %1566 = vst [vmem:[%s11316_s5 + $0x570] sm:$0xff] %v1565_v46  ;;  %v1693_v46 = vld [vmem:[%s11311_s4 + $0xee0] sm:$0xff] }
  0xc6   : > { %1568 = vst [vmem:[%s11316_s5 + $0x578] sm:$0xff] %v1567_v47  ;;  %v1695_v47 = vld [vmem:[%s11311_s4 + $0xef0] sm:$0xff] }
  0xc7   : > { %1570 = vst [vmem:[%s11316_s5 + $0x580] sm:$0xff] %v1569_v48  ;;  %v1697_v48 = vld [vmem:[%s11311_s4 + $0xf00] sm:$0xff] }
  0xc8   : > { %1572 = vst [vmem:[%s11316_s5 + $0x588] sm:$0xff] %v1571_v49  ;;  %v1699_v49 = vld [vmem:[%s11311_s4 + $0xf10] sm:$0xff] }
  0xc9   : > { %1574 = vst [vmem:[%s11316_s5 + $0x590] sm:$0xff] %v1573_v50  ;;  %v1701_v50 = vld [vmem:[%s11311_s4 + $0xf20] sm:$0xff] }
  0xca   : > { %1576 = vst [vmem:[%s11316_s5 + $0x598] sm:$0xff] %v1575_v51  ;;  %v1703_v51 = vld [vmem:[%s11311_s4 + $0xf30] sm:$0xff] }
  0xcb   : > { %1578 = vst [vmem:[%s11316_s5 + $0x5a0] sm:$0xff] %v1577_v52  ;;  %v1705_v52 = vld [vmem:[%s11311_s4 + $0xf40] sm:$0xff] }
  0xcc   : > { %1580 = vst [vmem:[%s11316_s5 + $0x5a8] sm:$0xff] %v1579_v53  ;;  %v1707_v53 = vld [vmem:[%s11311_s4 + $0xf50] sm:$0xff] }
  0xcd   : > { %1582 = vst [vmem:[%s11316_s5 + $0x5b0] sm:$0xff] %v1581_v54  ;;  %v1709_v54 = vld [vmem:[%s11311_s4 + $0xf60] sm:$0xff] }
  0xce   : > { %1584 = vst [vmem:[%s11316_s5 + $0x5b8] sm:$0xff] %v1583_v55  ;;  %v1711_v55 = vld [vmem:[%s11311_s4 + $0xf70] sm:$0xff] }
  0xcf   : > { %1586 = vst [vmem:[%s11316_s5 + $0x5c0] sm:$0xff] %v1585_v56  ;;  %v1713_v56 = vld [vmem:[%s11311_s4 + $0xf80] sm:$0xff] }
  0xd0   : > { %1588 = vst [vmem:[%s11316_s5 + $0x5c8] sm:$0xff] %v1587_v57  ;;  %v1715_v57 = vld [vmem:[%s11311_s4 + $0xf90] sm:$0xff] }
  0xd1   : > { %1590 = vst [vmem:[%s11316_s5 + $0x5d0] sm:$0xff] %v1589_v58  ;;  %v1717_v58 = vld [vmem:[%s11311_s4 + $0xfa0] sm:$0xff] }
  0xd2   : > { %1592 = vst [vmem:[%s11316_s5 + $0x5d8] sm:$0xff] %v1591_v59  ;;  %v1719_v59 = vld [vmem:[%s11311_s4 + $0xfb0] sm:$0xff] }
  0xd3   : > { %1594 = vst [vmem:[%s11316_s5 + $0x5e0] sm:$0xff] %v1593_v60  ;;  %v1721_v60 = vld [vmem:[%s11311_s4 + $0xfc0] sm:$0xff] }
  0xd4   : > { %1596 = vst [vmem:[%s11316_s5 + $0x5e8] sm:$0xff] %v1595_v61  ;;  %v1723_v61 = vld [vmem:[%s11311_s4 + $0xfd0] sm:$0xff] }
  0xd5   : > { %1598 = vst [vmem:[%s11316_s5 + $0x5f0] sm:$0xff] %v1597_v62  ;;  %v1725_v62 = vld [vmem:[%s11311_s4 + $0xfe0] sm:$0xff] }
  0xd6   : > { %1600 = vst [vmem:[%s11316_s5 + $0x5f8] sm:$0xff] %v1599_v63  ;;  %v1727_v63 = vld [vmem:[%s11311_s4 + $0xff0] sm:$0xff] }
  0xd7   : > { %1602 = vst [vmem:[%s11316_s5 + $0x600] sm:$0xff] %v1601_v0  ;;  %v1729_v0 = vld [vmem:[%s11311_s4 + $0x1000] sm:$0xff] }
  0xd8   : > { %1604 = vst [vmem:[%s11316_s5 + $0x608] sm:$0xff] %v1603_v1  ;;  %v1731_v1 = vld [vmem:[%s11311_s4 + $0x1010] sm:$0xff] }
  0xd9   : > { %1606 = vst [vmem:[%s11316_s5 + $0x610] sm:$0xff] %v1605_v2  ;;  %v1733_v2 = vld [vmem:[%s11311_s4 + $0x1020] sm:$0xff] }
  0xda   : > { %1608 = vst [vmem:[%s11316_s5 + $0x618] sm:$0xff] %v1607_v3  ;;  %v1735_v3 = vld [vmem:[%s11311_s4 + $0x1030] sm:$0xff] }
  0xdb   : > { %1610 = vst [vmem:[%s11316_s5 + $0x620] sm:$0xff] %v1609_v4  ;;  %v1737_v4 = vld [vmem:[%s11311_s4 + $0x1040] sm:$0xff] }
  0xdc   : > { %1612 = vst [vmem:[%s11316_s5 + $0x628] sm:$0xff] %v1611_v5  ;;  %v1739_v5 = vld [vmem:[%s11311_s4 + $0x1050] sm:$0xff] }
  0xdd   : > { %1614 = vst [vmem:[%s11316_s5 + $0x630] sm:$0xff] %v1613_v6  ;;  %v1741_v6 = vld [vmem:[%s11311_s4 + $0x1060] sm:$0xff] }
  0xde   : > { %1616 = vst [vmem:[%s11316_s5 + $0x638] sm:$0xff] %v1615_v7  ;;  %v1743_v7 = vld [vmem:[%s11311_s4 + $0x1070] sm:$0xff] }
  0xdf   : > { %1618 = vst [vmem:[%s11316_s5 + $0x640] sm:$0xff] %v1617_v8  ;;  %v1745_v8 = vld [vmem:[%s11311_s4 + $0x1080] sm:$0xff] }
  0xe0   : > { %1620 = vst [vmem:[%s11316_s5 + $0x648] sm:$0xff] %v1619_v9  ;;  %v1747_v9 = vld [vmem:[%s11311_s4 + $0x1090] sm:$0xff] }
  0xe1   : > { %1622 = vst [vmem:[%s11316_s5 + $0x650] sm:$0xff] %v1621_v10  ;;  %v1749_v10 = vld [vmem:[%s11311_s4 + $0x10a0] sm:$0xff] }
  0xe2   : > { %1624 = vst [vmem:[%s11316_s5 + $0x658] sm:$0xff] %v1623_v11  ;;  %v1751_v11 = vld [vmem:[%s11311_s4 + $0x10b0] sm:$0xff] }
  0xe3   : > { %1626 = vst [vmem:[%s11316_s5 + $0x660] sm:$0xff] %v1625_v12  ;;  %v1753_v12 = vld [vmem:[%s11311_s4 + $0x10c0] sm:$0xff] }
  0xe4   : > { %1628 = vst [vmem:[%s11316_s5 + $0x668] sm:$0xff] %v1627_v13  ;;  %v1755_v13 = vld [vmem:[%s11311_s4 + $0x10d0] sm:$0xff] }
  0xe5   : > { %1630 = vst [vmem:[%s11316_s5 + $0x670] sm:$0xff] %v1629_v14  ;;  %v1757_v14 = vld [vmem:[%s11311_s4 + $0x10e0] sm:$0xff] }
  0xe6   : > { %1632 = vst [vmem:[%s11316_s5 + $0x678] sm:$0xff] %v1631_v15  ;;  %v1759_v15 = vld [vmem:[%s11311_s4 + $0x10f0] sm:$0xff] }
  0xe7   : > { %1634 = vst [vmem:[%s11316_s5 + $0x680] sm:$0xff] %v1633_v16  ;;  %v1761_v16 = vld [vmem:[%s11311_s4 + $0x1100] sm:$0xff] }
  0xe8   : > { %1636 = vst [vmem:[%s11316_s5 + $0x688] sm:$0xff] %v1635_v17  ;;  %v1763_v17 = vld [vmem:[%s11311_s4 + $0x1110] sm:$0xff] }
  0xe9   : > { %1638 = vst [vmem:[%s11316_s5 + $0x690] sm:$0xff] %v1637_v18  ;;  %v1765_v18 = vld [vmem:[%s11311_s4 + $0x1120] sm:$0xff] }
  0xea   : > { %1640 = vst [vmem:[%s11316_s5 + $0x698] sm:$0xff] %v1639_v19  ;;  %v1767_v19 = vld [vmem:[%s11311_s4 + $0x1130] sm:$0xff] }
  0xeb   : > { %1642 = vst [vmem:[%s11316_s5 + $0x6a0] sm:$0xff] %v1641_v20  ;;  %v1769_v20 = vld [vmem:[%s11311_s4 + $0x1140] sm:$0xff] }
  0xec   : > { %1644 = vst [vmem:[%s11316_s5 + $0x6a8] sm:$0xff] %v1643_v21  ;;  %v1771_v21 = vld [vmem:[%s11311_s4 + $0x1150] sm:$0xff] }
  0xed   : > { %1646 = vst [vmem:[%s11316_s5 + $0x6b0] sm:$0xff] %v1645_v22  ;;  %v1773_v22 = vld [vmem:[%s11311_s4 + $0x1160] sm:$0xff] }
  0xee   : > { %1648 = vst [vmem:[%s11316_s5 + $0x6b8] sm:$0xff] %v1647_v23  ;;  %v1775_v23 = vld [vmem:[%s11311_s4 + $0x1170] sm:$0xff] }
  0xef   : > { %1650 = vst [vmem:[%s11316_s5 + $0x6c0] sm:$0xff] %v1649_v24  ;;  %v1777_v24 = vld [vmem:[%s11311_s4 + $0x1180] sm:$0xff] }
  0xf0   : > { %1652 = vst [vmem:[%s11316_s5 + $0x6c8] sm:$0xff] %v1651_v25  ;;  %v1779_v25 = vld [vmem:[%s11311_s4 + $0x1190] sm:$0xff] }
  0xf1   : > { %1654 = vst [vmem:[%s11316_s5 + $0x6d0] sm:$0xff] %v1653_v26  ;;  %v1781_v26 = vld [vmem:[%s11311_s4 + $0x11a0] sm:$0xff] }
  0xf2   : > { %1656 = vst [vmem:[%s11316_s5 + $0x6d8] sm:$0xff] %v1655_v27  ;;  %v1783_v27 = vld [vmem:[%s11311_s4 + $0x11b0] sm:$0xff] }
  0xf3   : > { %1658 = vst [vmem:[%s11316_s5 + $0x6e0] sm:$0xff] %v1657_v28  ;;  %v1785_v28 = vld [vmem:[%s11311_s4 + $0x11c0] sm:$0xff] }
  0xf4   : > { %1660 = vst [vmem:[%s11316_s5 + $0x6e8] sm:$0xff] %v1659_v29  ;;  %v1787_v29 = vld [vmem:[%s11311_s4 + $0x11d0] sm:$0xff] }
  0xf5   : > { %1662 = vst [vmem:[%s11316_s5 + $0x6f0] sm:$0xff] %v1661_v30  ;;  %v1789_v30 = vld [vmem:[%s11311_s4 + $0x11e0] sm:$0xff] }
  0xf6   : > { %1664 = vst [vmem:[%s11316_s5 + $0x6f8] sm:$0xff] %v1663_v31  ;;  %v1791_v31 = vld [vmem:[%s11311_s4 + $0x11f0] sm:$0xff] }
  0xf7   : > { %1666 = vst [vmem:[%s11316_s5 + $0x700] sm:$0xff] %v1665_v32  ;;  %v1793_v32 = vld [vmem:[%s11311_s4 + $0x1200] sm:$0xff] }
  0xf8   : > { %1668 = vst [vmem:[%s11316_s5 + $0x708] sm:$0xff] %v1667_v33  ;;  %v1795_v33 = vld [vmem:[%s11311_s4 + $0x1210] sm:$0xff] }
  0xf9   : > { %1670 = vst [vmem:[%s11316_s5 + $0x710] sm:$0xff] %v1669_v34  ;;  %v1797_v34 = vld [vmem:[%s11311_s4 + $0x1220] sm:$0xff] }
  0xfa   : > { %1672 = vst [vmem:[%s11316_s5 + $0x718] sm:$0xff] %v1671_v35  ;;  %v1799_v35 = vld [vmem:[%s11311_s4 + $0x1230] sm:$0xff] }
  0xfb   : > { %1674 = vst [vmem:[%s11316_s5 + $0x720] sm:$0xff] %v1673_v36  ;;  %v1801_v36 = vld [vmem:[%s11311_s4 + $0x1240] sm:$0xff] }
  0xfc   : > { %1676 = vst [vmem:[%s11316_s5 + $0x728] sm:$0xff] %v1675_v37  ;;  %v1803_v37 = vld [vmem:[%s11311_s4 + $0x1250] sm:$0xff] }
  0xfd   : > { %1678 = vst [vmem:[%s11316_s5 + $0x730] sm:$0xff] %v1677_v38  ;;  %v1805_v38 = vld [vmem:[%s11311_s4 + $0x1260] sm:$0xff] }
  0xfe   : > { %1680 = vst [vmem:[%s11316_s5 + $0x738] sm:$0xff] %v1679_v39  ;;  %v1807_v39 = vld [vmem:[%s11311_s4 + $0x1270] sm:$0xff] }
  0xff   : > { %1682 = vst [vmem:[%s11316_s5 + $0x740] sm:$0xff] %v1681_v40  ;;  %v1809_v40 = vld [vmem:[%s11311_s4 + $0x1280] sm:$0xff] }
 0x100   : > { %1684 = vst [vmem:[%s11316_s5 + $0x748] sm:$0xff] %v1683_v41  ;;  %v1811_v41 = vld [vmem:[%s11311_s4 + $0x1290] sm:$0xff] }
 0x101   : > { %1686 = vst [vmem:[%s11316_s5 + $0x750] sm:$0xff] %v1685_v42  ;;  %v1813_v42 = vld [vmem:[%s11311_s4 + $0x12a0] sm:$0xff] }
 0x102   : > { %1688 = vst [vmem:[%s11316_s5 + $0x758] sm:$0xff] %v1687_v43  ;;  %v1815_v43 = vld [vmem:[%s11311_s4 + $0x12b0] sm:$0xff] }
 0x103   : > { %1690 = vst [vmem:[%s11316_s5 + $0x760] sm:$0xff] %v1689_v44  ;;  %v1817_v44 = vld [vmem:[%s11311_s4 + $0x12c0] sm:$0xff] }
 0x104   : > { %1692 = vst [vmem:[%s11316_s5 + $0x768] sm:$0xff] %v1691_v45  ;;  %v1819_v45 = vld [vmem:[%s11311_s4 + $0x12d0] sm:$0xff] }
 0x105   : > { %1694 = vst [vmem:[%s11316_s5 + $0x770] sm:$0xff] %v1693_v46  ;;  %v1821_v46 = vld [vmem:[%s11311_s4 + $0x12e0] sm:$0xff] }
 0x106   : > { %1696 = vst [vmem:[%s11316_s5 + $0x778] sm:$0xff] %v1695_v47  ;;  %v1823_v47 = vld [vmem:[%s11311_s4 + $0x12f0] sm:$0xff] }
 0x107   : > { %1698 = vst [vmem:[%s11316_s5 + $0x780] sm:$0xff] %v1697_v48  ;;  %v1825_v48 = vld [vmem:[%s11311_s4 + $0x1300] sm:$0xff] }
 0x108   : > { %1700 = vst [vmem:[%s11316_s5 + $0x788] sm:$0xff] %v1699_v49  ;;  %v1827_v49 = vld [vmem:[%s11311_s4 + $0x1310] sm:$0xff] }
 0x109   : > { %1702 = vst [vmem:[%s11316_s5 + $0x790] sm:$0xff] %v1701_v50  ;;  %v1829_v50 = vld [vmem:[%s11311_s4 + $0x1320] sm:$0xff] }
 0x10a   : > { %1704 = vst [vmem:[%s11316_s5 + $0x798] sm:$0xff] %v1703_v51  ;;  %v1831_v51 = vld [vmem:[%s11311_s4 + $0x1330] sm:$0xff] }
 0x10b   : > { %1706 = vst [vmem:[%s11316_s5 + $0x7a0] sm:$0xff] %v1705_v52  ;;  %v1833_v52 = vld [vmem:[%s11311_s4 + $0x1340] sm:$0xff] }
 0x10c   : > { %1708 = vst [vmem:[%s11316_s5 + $0x7a8] sm:$0xff] %v1707_v53  ;;  %v1835_v53 = vld [vmem:[%s11311_s4 + $0x1350] sm:$0xff] }
 0x10d   : > { %1710 = vst [vmem:[%s11316_s5 + $0x7b0] sm:$0xff] %v1709_v54  ;;  %v1837_v54 = vld [vmem:[%s11311_s4 + $0x1360] sm:$0xff] }
 0x10e   : > { %1712 = vst [vmem:[%s11316_s5 + $0x7b8] sm:$0xff] %v1711_v55  ;;  %v1839_v55 = vld [vmem:[%s11311_s4 + $0x1370] sm:$0xff] }
 0x10f   : > { %1714 = vst [vmem:[%s11316_s5 + $0x7c0] sm:$0xff] %v1713_v56  ;;  %v1841_v56 = vld [vmem:[%s11311_s4 + $0x1380] sm:$0xff] }
 0x110   : > { %1716 = vst [vmem:[%s11316_s5 + $0x7c8] sm:$0xff] %v1715_v57  ;;  %v1843_v57 = vld [vmem:[%s11311_s4 + $0x1390] sm:$0xff] }
 0x111   : > { %1718 = vst [vmem:[%s11316_s5 + $0x7d0] sm:$0xff] %v1717_v58  ;;  %v1845_v58 = vld [vmem:[%s11311_s4 + $0x13a0] sm:$0xff] }
 0x112   : > { %1720 = vst [vmem:[%s11316_s5 + $0x7d8] sm:$0xff] %v1719_v59  ;;  %v1847_v59 = vld [vmem:[%s11311_s4 + $0x13b0] sm:$0xff] }
 0x113   : > { %1722 = vst [vmem:[%s11316_s5 + $0x7e0] sm:$0xff] %v1721_v60  ;;  %v1849_v60 = vld [vmem:[%s11311_s4 + $0x13c0] sm:$0xff] }
 0x114   : > { %1724 = vst [vmem:[%s11316_s5 + $0x7e8] sm:$0xff] %v1723_v61  ;;  %v1851_v61 = vld [vmem:[%s11311_s4 + $0x13d0] sm:$0xff] }
 0x115   : > { %1726 = vst [vmem:[%s11316_s5 + $0x7f0] sm:$0xff] %v1725_v62  ;;  %v1853_v62 = vld [vmem:[%s11311_s4 + $0x13e0] sm:$0xff] }
 0x116   : > { %1728 = vst [vmem:[%s11316_s5 + $0x7f8] sm:$0xff] %v1727_v63  ;;  %v1855_v63 = vld [vmem:[%s11311_s4 + $0x13f0] sm:$0xff] }
 0x117   : > { %1730 = vst [vmem:[%s11316_s5 + $0x800] sm:$0xff] %v1729_v0  ;;  %v1857_v0 = vld [vmem:[%s11311_s4 + $0x1400] sm:$0xff] }
 0x118   : > { %1732 = vst [vmem:[%s11316_s5 + $0x808] sm:$0xff] %v1731_v1  ;;  %v1859_v1 = vld [vmem:[%s11311_s4 + $0x1410] sm:$0xff] }
 0x119   : > { %1734 = vst [vmem:[%s11316_s5 + $0x810] sm:$0xff] %v1733_v2  ;;  %v1861_v2 = vld [vmem:[%s11311_s4 + $0x1420] sm:$0xff] }
 0x11a   : > { %1736 = vst [vmem:[%s11316_s5 + $0x818] sm:$0xff] %v1735_v3  ;;  %v1863_v3 = vld [vmem:[%s11311_s4 + $0x1430] sm:$0xff] }
 0x11b   : > { %1738 = vst [vmem:[%s11316_s5 + $0x820] sm:$0xff] %v1737_v4  ;;  %v1865_v4 = vld [vmem:[%s11311_s4 + $0x1440] sm:$0xff] }
 0x11c   : > { %1740 = vst [vmem:[%s11316_s5 + $0x828] sm:$0xff] %v1739_v5  ;;  %v1867_v5 = vld [vmem:[%s11311_s4 + $0x1450] sm:$0xff] }
 0x11d   : > { %1742 = vst [vmem:[%s11316_s5 + $0x830] sm:$0xff] %v1741_v6  ;;  %v1869_v6 = vld [vmem:[%s11311_s4 + $0x1460] sm:$0xff] }
 0x11e   : > { %1744 = vst [vmem:[%s11316_s5 + $0x838] sm:$0xff] %v1743_v7  ;;  %v1871_v7 = vld [vmem:[%s11311_s4 + $0x1470] sm:$0xff] }
 0x11f   : > { %1746 = vst [vmem:[%s11316_s5 + $0x840] sm:$0xff] %v1745_v8  ;;  %v1873_v8 = vld [vmem:[%s11311_s4 + $0x1480] sm:$0xff] }
 0x120   : > { %1748 = vst [vmem:[%s11316_s5 + $0x848] sm:$0xff] %v1747_v9  ;;  %v1875_v9 = vld [vmem:[%s11311_s4 + $0x1490] sm:$0xff] }
 0x121   : > { %1750 = vst [vmem:[%s11316_s5 + $0x850] sm:$0xff] %v1749_v10  ;;  %v1877_v10 = vld [vmem:[%s11311_s4 + $0x14a0] sm:$0xff] }
 0x122   : > { %1752 = vst [vmem:[%s11316_s5 + $0x858] sm:$0xff] %v1751_v11  ;;  %v1879_v11 = vld [vmem:[%s11311_s4 + $0x14b0] sm:$0xff] }
 0x123   : > { %1754 = vst [vmem:[%s11316_s5 + $0x860] sm:$0xff] %v1753_v12  ;;  %v1881_v12 = vld [vmem:[%s11311_s4 + $0x14c0] sm:$0xff] }
 0x124   : > { %1756 = vst [vmem:[%s11316_s5 + $0x868] sm:$0xff] %v1755_v13  ;;  %v1883_v13 = vld [vmem:[%s11311_s4 + $0x14d0] sm:$0xff] }
 0x125   : > { %1758 = vst [vmem:[%s11316_s5 + $0x870] sm:$0xff] %v1757_v14  ;;  %v1885_v14 = vld [vmem:[%s11311_s4 + $0x14e0] sm:$0xff] }
 0x126   : > { %1760 = vst [vmem:[%s11316_s5 + $0x878] sm:$0xff] %v1759_v15  ;;  %v1887_v15 = vld [vmem:[%s11311_s4 + $0x14f0] sm:$0xff] }
 0x127   : > { %1762 = vst [vmem:[%s11316_s5 + $0x880] sm:$0xff] %v1761_v16  ;;  %v1889_v16 = vld [vmem:[%s11311_s4 + $0x1500] sm:$0xff] }
 0x128   : > { %1764 = vst [vmem:[%s11316_s5 + $0x888] sm:$0xff] %v1763_v17  ;;  %v1891_v17 = vld [vmem:[%s11311_s4 + $0x1510] sm:$0xff] }
 0x129   : > { %1766 = vst [vmem:[%s11316_s5 + $0x890] sm:$0xff] %v1765_v18  ;;  %v1893_v18 = vld [vmem:[%s11311_s4 + $0x1520] sm:$0xff] }
 0x12a   : > { %1768 = vst [vmem:[%s11316_s5 + $0x898] sm:$0xff] %v1767_v19  ;;  %v1895_v19 = vld [vmem:[%s11311_s4 + $0x1530] sm:$0xff] }
 0x12b   : > { %1770 = vst [vmem:[%s11316_s5 + $0x8a0] sm:$0xff] %v1769_v20  ;;  %v1897_v20 = vld [vmem:[%s11311_s4 + $0x1540] sm:$0xff] }
 0x12c   : > { %1772 = vst [vmem:[%s11316_s5 + $0x8a8] sm:$0xff] %v1771_v21  ;;  %v1899_v21 = vld [vmem:[%s11311_s4 + $0x1550] sm:$0xff] }
 0x12d   : > { %1774 = vst [vmem:[%s11316_s5 + $0x8b0] sm:$0xff] %v1773_v22  ;;  %v1901_v22 = vld [vmem:[%s11311_s4 + $0x1560] sm:$0xff] }
 0x12e   : > { %1776 = vst [vmem:[%s11316_s5 + $0x8b8] sm:$0xff] %v1775_v23  ;;  %v1903_v23 = vld [vmem:[%s11311_s4 + $0x1570] sm:$0xff] }
 0x12f   : > { %1778 = vst [vmem:[%s11316_s5 + $0x8c0] sm:$0xff] %v1777_v24  ;;  %v1905_v24 = vld [vmem:[%s11311_s4 + $0x1580] sm:$0xff] }
 0x130   : > { %1780 = vst [vmem:[%s11316_s5 + $0x8c8] sm:$0xff] %v1779_v25  ;;  %v1907_v25 = vld [vmem:[%s11311_s4 + $0x1590] sm:$0xff] }
 0x131   : > { %1782 = vst [vmem:[%s11316_s5 + $0x8d0] sm:$0xff] %v1781_v26  ;;  %v1909_v26 = vld [vmem:[%s11311_s4 + $0x15a0] sm:$0xff] }
 0x132   : > { %1784 = vst [vmem:[%s11316_s5 + $0x8d8] sm:$0xff] %v1783_v27  ;;  %v1911_v27 = vld [vmem:[%s11311_s4 + $0x15b0] sm:$0xff] }
 0x133   : > { %1786 = vst [vmem:[%s11316_s5 + $0x8e0] sm:$0xff] %v1785_v28  ;;  %v1913_v28 = vld [vmem:[%s11311_s4 + $0x15c0] sm:$0xff] }
 0x134   : > { %1788 = vst [vmem:[%s11316_s5 + $0x8e8] sm:$0xff] %v1787_v29  ;;  %v1915_v29 = vld [vmem:[%s11311_s4 + $0x15d0] sm:$0xff] }
 0x135   : > { %1790 = vst [vmem:[%s11316_s5 + $0x8f0] sm:$0xff] %v1789_v30  ;;  %v1917_v30 = vld [vmem:[%s11311_s4 + $0x15e0] sm:$0xff] }
 0x136   : > { %1792 = vst [vmem:[%s11316_s5 + $0x8f8] sm:$0xff] %v1791_v31  ;;  %v1919_v31 = vld [vmem:[%s11311_s4 + $0x15f0] sm:$0xff] }
 0x137   : > { %1794 = vst [vmem:[%s11316_s5 + $0x900] sm:$0xff] %v1793_v32  ;;  %v1921_v32 = vld [vmem:[%s11311_s4 + $0x1600] sm:$0xff] }
 0x138   : > { %1796 = vst [vmem:[%s11316_s5 + $0x908] sm:$0xff] %v1795_v33  ;;  %v1923_v33 = vld [vmem:[%s11311_s4 + $0x1610] sm:$0xff] }
 0x139   : > { %1798 = vst [vmem:[%s11316_s5 + $0x910] sm:$0xff] %v1797_v34  ;;  %v1925_v34 = vld [vmem:[%s11311_s4 + $0x1620] sm:$0xff] }
 0x13a   : > { %1800 = vst [vmem:[%s11316_s5 + $0x918] sm:$0xff] %v1799_v35  ;;  %v1927_v35 = vld [vmem:[%s11311_s4 + $0x1630] sm:$0xff] }
 0x13b   : > { %1802 = vst [vmem:[%s11316_s5 + $0x920] sm:$0xff] %v1801_v36  ;;  %v1929_v36 = vld [vmem:[%s11311_s4 + $0x1640] sm:$0xff] }
 0x13c   : > { %1804 = vst [vmem:[%s11316_s5 + $0x928] sm:$0xff] %v1803_v37  ;;  %v1931_v37 = vld [vmem:[%s11311_s4 + $0x1650] sm:$0xff] }
 0x13d   : > { %1806 = vst [vmem:[%s11316_s5 + $0x930] sm:$0xff] %v1805_v38  ;;  %v1933_v38 = vld [vmem:[%s11311_s4 + $0x1660] sm:$0xff] }
 0x13e   : > { %1808 = vst [vmem:[%s11316_s5 + $0x938] sm:$0xff] %v1807_v39  ;;  %v1935_v39 = vld [vmem:[%s11311_s4 + $0x1670] sm:$0xff] }
 0x13f   : > { %1810 = vst [vmem:[%s11316_s5 + $0x940] sm:$0xff] %v1809_v40  ;;  %v1937_v40 = vld [vmem:[%s11311_s4 + $0x1680] sm:$0xff] }
 0x140   : > { %1812 = vst [vmem:[%s11316_s5 + $0x948] sm:$0xff] %v1811_v41  ;;  %v1939_v41 = vld [vmem:[%s11311_s4 + $0x1690] sm:$0xff] }
 0x141   : > { %1814 = vst [vmem:[%s11316_s5 + $0x950] sm:$0xff] %v1813_v42  ;;  %v1941_v42 = vld [vmem:[%s11311_s4 + $0x16a0] sm:$0xff] }
 0x142   : > { %1816 = vst [vmem:[%s11316_s5 + $0x958] sm:$0xff] %v1815_v43  ;;  %v1943_v43 = vld [vmem:[%s11311_s4 + $0x16b0] sm:$0xff] }
 0x143   : > { %1818 = vst [vmem:[%s11316_s5 + $0x960] sm:$0xff] %v1817_v44  ;;  %v1945_v44 = vld [vmem:[%s11311_s4 + $0x16c0] sm:$0xff] }
 0x144   : > { %1820 = vst [vmem:[%s11316_s5 + $0x968] sm:$0xff] %v1819_v45  ;;  %v1947_v45 = vld [vmem:[%s11311_s4 + $0x16d0] sm:$0xff] }
 0x145   : > { %1822 = vst [vmem:[%s11316_s5 + $0x970] sm:$0xff] %v1821_v46  ;;  %v1949_v46 = vld [vmem:[%s11311_s4 + $0x16e0] sm:$0xff] }
 0x146   : > { %1824 = vst [vmem:[%s11316_s5 + $0x978] sm:$0xff] %v1823_v47  ;;  %v1951_v47 = vld [vmem:[%s11311_s4 + $0x16f0] sm:$0xff] }
 0x147   : > { %1826 = vst [vmem:[%s11316_s5 + $0x980] sm:$0xff] %v1825_v48  ;;  %v1953_v48 = vld [vmem:[%s11311_s4 + $0x1700] sm:$0xff] }
 0x148   : > { %1828 = vst [vmem:[%s11316_s5 + $0x988] sm:$0xff] %v1827_v49  ;;  %v1955_v49 = vld [vmem:[%s11311_s4 + $0x1710] sm:$0xff] }
 0x149   : > { %1830 = vst [vmem:[%s11316_s5 + $0x990] sm:$0xff] %v1829_v50  ;;  %v1957_v50 = vld [vmem:[%s11311_s4 + $0x1720] sm:$0xff] }
 0x14a   : > { %1832 = vst [vmem:[%s11316_s5 + $0x998] sm:$0xff] %v1831_v51  ;;  %v1959_v51 = vld [vmem:[%s11311_s4 + $0x1730] sm:$0xff] }
 0x14b   : > { %1834 = vst [vmem:[%s11316_s5 + $0x9a0] sm:$0xff] %v1833_v52  ;;  %v1961_v52 = vld [vmem:[%s11311_s4 + $0x1740] sm:$0xff] }
 0x14c   : > { %1836 = vst [vmem:[%s11316_s5 + $0x9a8] sm:$0xff] %v1835_v53  ;;  %v1963_v53 = vld [vmem:[%s11311_s4 + $0x1750] sm:$0xff] }
 0x14d   : > { %1838 = vst [vmem:[%s11316_s5 + $0x9b0] sm:$0xff] %v1837_v54  ;;  %v1965_v54 = vld [vmem:[%s11311_s4 + $0x1760] sm:$0xff] }
 0x14e   : > { %1840 = vst [vmem:[%s11316_s5 + $0x9b8] sm:$0xff] %v1839_v55  ;;  %v1967_v55 = vld [vmem:[%s11311_s4 + $0x1770] sm:$0xff] }
 0x14f   : > { %1842 = vst [vmem:[%s11316_s5 + $0x9c0] sm:$0xff] %v1841_v56  ;;  %v1969_v56 = vld [vmem:[%s11311_s4 + $0x1780] sm:$0xff] }
 0x150   : > { %1844 = vst [vmem:[%s11316_s5 + $0x9c8] sm:$0xff] %v1843_v57  ;;  %v1971_v57 = vld [vmem:[%s11311_s4 + $0x1790] sm:$0xff] }
 0x151   : > { %1846 = vst [vmem:[%s11316_s5 + $0x9d0] sm:$0xff] %v1845_v58  ;;  %v1973_v58 = vld [vmem:[%s11311_s4 + $0x17a0] sm:$0xff] }
 0x152   : > { %1848 = vst [vmem:[%s11316_s5 + $0x9d8] sm:$0xff] %v1847_v59  ;;  %v1975_v59 = vld [vmem:[%s11311_s4 + $0x17b0] sm:$0xff] }
 0x153   : > { %1850 = vst [vmem:[%s11316_s5 + $0x9e0] sm:$0xff] %v1849_v60  ;;  %v1977_v60 = vld [vmem:[%s11311_s4 + $0x17c0] sm:$0xff] }
 0x154   : > { %1852 = vst [vmem:[%s11316_s5 + $0x9e8] sm:$0xff] %v1851_v61  ;;  %v1979_v61 = vld [vmem:[%s11311_s4 + $0x17d0] sm:$0xff] }
 0x155   : > { %1854 = vst [vmem:[%s11316_s5 + $0x9f0] sm:$0xff] %v1853_v62  ;;  %v1981_v62 = vld [vmem:[%s11311_s4 + $0x17e0] sm:$0xff] }
 0x156   : > { %1856 = vst [vmem:[%s11316_s5 + $0x9f8] sm:$0xff] %v1855_v63  ;;  %v1983_v63 = vld [vmem:[%s11311_s4 + $0x17f0] sm:$0xff] }
 0x157   : > { %1858 = vst [vmem:[%s11316_s5 + $0xa00] sm:$0xff] %v1857_v0  ;;  %v1985_v0 = vld [vmem:[%s11311_s4 + $0x1800] sm:$0xff] }
 0x158   : > { %1860 = vst [vmem:[%s11316_s5 + $0xa08] sm:$0xff] %v1859_v1  ;;  %v1987_v1 = vld [vmem:[%s11311_s4 + $0x1810] sm:$0xff] }
 0x159   : > { %1862 = vst [vmem:[%s11316_s5 + $0xa10] sm:$0xff] %v1861_v2  ;;  %v1989_v2 = vld [vmem:[%s11311_s4 + $0x1820] sm:$0xff] }
 0x15a   : > { %1864 = vst [vmem:[%s11316_s5 + $0xa18] sm:$0xff] %v1863_v3  ;;  %v1991_v3 = vld [vmem:[%s11311_s4 + $0x1830] sm:$0xff] }
 0x15b   : > { %1866 = vst [vmem:[%s11316_s5 + $0xa20] sm:$0xff] %v1865_v4  ;;  %v1993_v4 = vld [vmem:[%s11311_s4 + $0x1840] sm:$0xff] }
 0x15c   : > { %1868 = vst [vmem:[%s11316_s5 + $0xa28] sm:$0xff] %v1867_v5  ;;  %v1995_v5 = vld [vmem:[%s11311_s4 + $0x1850] sm:$0xff] }
 0x15d   : > { %1870 = vst [vmem:[%s11316_s5 + $0xa30] sm:$0xff] %v1869_v6  ;;  %v1997_v6 = vld [vmem:[%s11311_s4 + $0x1860] sm:$0xff] }
 0x15e   : > { %1872 = vst [vmem:[%s11316_s5 + $0xa38] sm:$0xff] %v1871_v7  ;;  %v1999_v7 = vld [vmem:[%s11311_s4 + $0x1870] sm:$0xff] }
 0x15f   : > { %1874 = vst [vmem:[%s11316_s5 + $0xa40] sm:$0xff] %v1873_v8  ;;  %v2001_v8 = vld [vmem:[%s11311_s4 + $0x1880] sm:$0xff] }
 0x160   : > { %1876 = vst [vmem:[%s11316_s5 + $0xa48] sm:$0xff] %v1875_v9  ;;  %v2003_v9 = vld [vmem:[%s11311_s4 + $0x1890] sm:$0xff] }
 0x161   : > { %1878 = vst [vmem:[%s11316_s5 + $0xa50] sm:$0xff] %v1877_v10  ;;  %v2005_v10 = vld [vmem:[%s11311_s4 + $0x18a0] sm:$0xff] }
 0x162   : > { %1880 = vst [vmem:[%s11316_s5 + $0xa58] sm:$0xff] %v1879_v11  ;;  %v2007_v11 = vld [vmem:[%s11311_s4 + $0x18b0] sm:$0xff] }
 0x163   : > { %1882 = vst [vmem:[%s11316_s5 + $0xa60] sm:$0xff] %v1881_v12  ;;  %v2009_v12 = vld [vmem:[%s11311_s4 + $0x18c0] sm:$0xff] }
 0x164   : > { %1884 = vst [vmem:[%s11316_s5 + $0xa68] sm:$0xff] %v1883_v13  ;;  %v2011_v13 = vld [vmem:[%s11311_s4 + $0x18d0] sm:$0xff] }
 0x165   : > { %1886 = vst [vmem:[%s11316_s5 + $0xa70] sm:$0xff] %v1885_v14  ;;  %v2013_v14 = vld [vmem:[%s11311_s4 + $0x18e0] sm:$0xff] }
 0x166   : > { %1888 = vst [vmem:[%s11316_s5 + $0xa78] sm:$0xff] %v1887_v15  ;;  %v2015_v15 = vld [vmem:[%s11311_s4 + $0x18f0] sm:$0xff] }
 0x167   : > { %1890 = vst [vmem:[%s11316_s5 + $0xa80] sm:$0xff] %v1889_v16  ;;  %v2017_v16 = vld [vmem:[%s11311_s4 + $0x1900] sm:$0xff] }
 0x168   : > { %1892 = vst [vmem:[%s11316_s5 + $0xa88] sm:$0xff] %v1891_v17  ;;  %v2019_v17 = vld [vmem:[%s11311_s4 + $0x1910] sm:$0xff] }
 0x169   : > { %1894 = vst [vmem:[%s11316_s5 + $0xa90] sm:$0xff] %v1893_v18  ;;  %v2021_v18 = vld [vmem:[%s11311_s4 + $0x1920] sm:$0xff] }
 0x16a   : > { %1896 = vst [vmem:[%s11316_s5 + $0xa98] sm:$0xff] %v1895_v19  ;;  %v2023_v19 = vld [vmem:[%s11311_s4 + $0x1930] sm:$0xff] }
 0x16b   : > { %1898 = vst [vmem:[%s11316_s5 + $0xaa0] sm:$0xff] %v1897_v20  ;;  %v2025_v20 = vld [vmem:[%s11311_s4 + $0x1940] sm:$0xff] }
 0x16c   : > { %1900 = vst [vmem:[%s11316_s5 + $0xaa8] sm:$0xff] %v1899_v21  ;;  %v2027_v21 = vld [vmem:[%s11311_s4 + $0x1950] sm:$0xff] }
 0x16d   : > { %1902 = vst [vmem:[%s11316_s5 + $0xab0] sm:$0xff] %v1901_v22  ;;  %v2029_v22 = vld [vmem:[%s11311_s4 + $0x1960] sm:$0xff] }
 0x16e   : > { %1904 = vst [vmem:[%s11316_s5 + $0xab8] sm:$0xff] %v1903_v23  ;;  %v2031_v23 = vld [vmem:[%s11311_s4 + $0x1970] sm:$0xff] }
 0x16f   : > { %1906 = vst [vmem:[%s11316_s5 + $0xac0] sm:$0xff] %v1905_v24  ;;  %v2033_v24 = vld [vmem:[%s11311_s4 + $0x1980] sm:$0xff] }
 0x170   : > { %1908 = vst [vmem:[%s11316_s5 + $0xac8] sm:$0xff] %v1907_v25  ;;  %v2035_v25 = vld [vmem:[%s11311_s4 + $0x1990] sm:$0xff] }
 0x171   : > { %1910 = vst [vmem:[%s11316_s5 + $0xad0] sm:$0xff] %v1909_v26  ;;  %v2037_v26 = vld [vmem:[%s11311_s4 + $0x19a0] sm:$0xff] }
 0x172   : > { %1912 = vst [vmem:[%s11316_s5 + $0xad8] sm:$0xff] %v1911_v27  ;;  %v2039_v27 = vld [vmem:[%s11311_s4 + $0x19b0] sm:$0xff] }
 0x173   : > { %1914 = vst [vmem:[%s11316_s5 + $0xae0] sm:$0xff] %v1913_v28  ;;  %v2041_v28 = vld [vmem:[%s11311_s4 + $0x19c0] sm:$0xff] }
 0x174   : > { %1916 = vst [vmem:[%s11316_s5 + $0xae8] sm:$0xff] %v1915_v29  ;;  %v2043_v29 = vld [vmem:[%s11311_s4 + $0x19d0] sm:$0xff] }
 0x175   : > { %1918 = vst [vmem:[%s11316_s5 + $0xaf0] sm:$0xff] %v1917_v30  ;;  %v2045_v30 = vld [vmem:[%s11311_s4 + $0x19e0] sm:$0xff] }
 0x176   : > { %1920 = vst [vmem:[%s11316_s5 + $0xaf8] sm:$0xff] %v1919_v31  ;;  %v2047_v31 = vld [vmem:[%s11311_s4 + $0x19f0] sm:$0xff] }
 0x177   : > { %1922 = vst [vmem:[%s11316_s5 + $0xb00] sm:$0xff] %v1921_v32  ;;  %v2049_v32 = vld [vmem:[%s11311_s4 + $0x1a00] sm:$0xff] }
 0x178   : > { %1924 = vst [vmem:[%s11316_s5 + $0xb08] sm:$0xff] %v1923_v33  ;;  %v2051_v33 = vld [vmem:[%s11311_s4 + $0x1a10] sm:$0xff] }
 0x179   : > { %1926 = vst [vmem:[%s11316_s5 + $0xb10] sm:$0xff] %v1925_v34  ;;  %v2053_v34 = vld [vmem:[%s11311_s4 + $0x1a20] sm:$0xff] }
 0x17a   : > { %1928 = vst [vmem:[%s11316_s5 + $0xb18] sm:$0xff] %v1927_v35  ;;  %v2055_v35 = vld [vmem:[%s11311_s4 + $0x1a30] sm:$0xff] }
 0x17b   : > { %1930 = vst [vmem:[%s11316_s5 + $0xb20] sm:$0xff] %v1929_v36  ;;  %v2057_v36 = vld [vmem:[%s11311_s4 + $0x1a40] sm:$0xff] }
 0x17c   : > { %1932 = vst [vmem:[%s11316_s5 + $0xb28] sm:$0xff] %v1931_v37  ;;  %v2059_v37 = vld [vmem:[%s11311_s4 + $0x1a50] sm:$0xff] }
 0x17d   : > { %1934 = vst [vmem:[%s11316_s5 + $0xb30] sm:$0xff] %v1933_v38  ;;  %v2061_v38 = vld [vmem:[%s11311_s4 + $0x1a60] sm:$0xff] }
 0x17e   : > { %1936 = vst [vmem:[%s11316_s5 + $0xb38] sm:$0xff] %v1935_v39  ;;  %v2063_v39 = vld [vmem:[%s11311_s4 + $0x1a70] sm:$0xff] }
 0x17f   : > { %1938 = vst [vmem:[%s11316_s5 + $0xb40] sm:$0xff] %v1937_v40  ;;  %v2065_v40 = vld [vmem:[%s11311_s4 + $0x1a80] sm:$0xff] }
 0x180   : > { %1940 = vst [vmem:[%s11316_s5 + $0xb48] sm:$0xff] %v1939_v41  ;;  %v2067_v41 = vld [vmem:[%s11311_s4 + $0x1a90] sm:$0xff] }
 0x181   : > { %1942 = vst [vmem:[%s11316_s5 + $0xb50] sm:$0xff] %v1941_v42  ;;  %v2069_v42 = vld [vmem:[%s11311_s4 + $0x1aa0] sm:$0xff] }
 0x182   : > { %1944 = vst [vmem:[%s11316_s5 + $0xb58] sm:$0xff] %v1943_v43  ;;  %v2071_v43 = vld [vmem:[%s11311_s4 + $0x1ab0] sm:$0xff] }
 0x183   : > { %1946 = vst [vmem:[%s11316_s5 + $0xb60] sm:$0xff] %v1945_v44  ;;  %v2073_v44 = vld [vmem:[%s11311_s4 + $0x1ac0] sm:$0xff] }
 0x184   : > { %1948 = vst [vmem:[%s11316_s5 + $0xb68] sm:$0xff] %v1947_v45  ;;  %v2075_v45 = vld [vmem:[%s11311_s4 + $0x1ad0] sm:$0xff] }
 0x185   : > { %1950 = vst [vmem:[%s11316_s5 + $0xb70] sm:$0xff] %v1949_v46  ;;  %v2077_v46 = vld [vmem:[%s11311_s4 + $0x1ae0] sm:$0xff] }
 0x186   : > { %1952 = vst [vmem:[%s11316_s5 + $0xb78] sm:$0xff] %v1951_v47  ;;  %v2079_v47 = vld [vmem:[%s11311_s4 + $0x1af0] sm:$0xff] }
 0x187   : > { %1954 = vst [vmem:[%s11316_s5 + $0xb80] sm:$0xff] %v1953_v48  ;;  %v2081_v48 = vld [vmem:[%s11311_s4 + $0x1b00] sm:$0xff] }
 0x188   : > { %1956 = vst [vmem:[%s11316_s5 + $0xb88] sm:$0xff] %v1955_v49  ;;  %v2083_v49 = vld [vmem:[%s11311_s4 + $0x1b10] sm:$0xff] }
 0x189   : > { %1958 = vst [vmem:[%s11316_s5 + $0xb90] sm:$0xff] %v1957_v50  ;;  %v2085_v50 = vld [vmem:[%s11311_s4 + $0x1b20] sm:$0xff] }
 0x18a   : > { %1960 = vst [vmem:[%s11316_s5 + $0xb98] sm:$0xff] %v1959_v51  ;;  %v2087_v51 = vld [vmem:[%s11311_s4 + $0x1b30] sm:$0xff] }
 0x18b   : > { %1962 = vst [vmem:[%s11316_s5 + $0xba0] sm:$0xff] %v1961_v52  ;;  %v2089_v52 = vld [vmem:[%s11311_s4 + $0x1b40] sm:$0xff] }
 0x18c   : > { %1964 = vst [vmem:[%s11316_s5 + $0xba8] sm:$0xff] %v1963_v53  ;;  %v2091_v53 = vld [vmem:[%s11311_s4 + $0x1b50] sm:$0xff] }
 0x18d   : > { %1966 = vst [vmem:[%s11316_s5 + $0xbb0] sm:$0xff] %v1965_v54  ;;  %v2093_v54 = vld [vmem:[%s11311_s4 + $0x1b60] sm:$0xff] }
 0x18e   : > { %1968 = vst [vmem:[%s11316_s5 + $0xbb8] sm:$0xff] %v1967_v55  ;;  %v2095_v55 = vld [vmem:[%s11311_s4 + $0x1b70] sm:$0xff] }
 0x18f   : > { %1970 = vst [vmem:[%s11316_s5 + $0xbc0] sm:$0xff] %v1969_v56  ;;  %v2097_v56 = vld [vmem:[%s11311_s4 + $0x1b80] sm:$0xff] }
 0x190   : > { %1972 = vst [vmem:[%s11316_s5 + $0xbc8] sm:$0xff] %v1971_v57  ;;  %v2099_v57 = vld [vmem:[%s11311_s4 + $0x1b90] sm:$0xff] }
 0x191   : > { %1974 = vst [vmem:[%s11316_s5 + $0xbd0] sm:$0xff] %v1973_v58  ;;  %v2101_v58 = vld [vmem:[%s11311_s4 + $0x1ba0] sm:$0xff] }
 0x192   : > { %1976 = vst [vmem:[%s11316_s5 + $0xbd8] sm:$0xff] %v1975_v59  ;;  %v2103_v59 = vld [vmem:[%s11311_s4 + $0x1bb0] sm:$0xff] }
 0x193   : > { %1978 = vst [vmem:[%s11316_s5 + $0xbe0] sm:$0xff] %v1977_v60  ;;  %v2105_v60 = vld [vmem:[%s11311_s4 + $0x1bc0] sm:$0xff] }
 0x194   : > { %1980 = vst [vmem:[%s11316_s5 + $0xbe8] sm:$0xff] %v1979_v61  ;;  %v2107_v61 = vld [vmem:[%s11311_s4 + $0x1bd0] sm:$0xff] }
 0x195   : > { %1982 = vst [vmem:[%s11316_s5 + $0xbf0] sm:$0xff] %v1981_v62  ;;  %v2109_v62 = vld [vmem:[%s11311_s4 + $0x1be0] sm:$0xff] }
 0x196   : > { %1984 = vst [vmem:[%s11316_s5 + $0xbf8] sm:$0xff] %v1983_v63  ;;  %v2111_v63 = vld [vmem:[%s11311_s4 + $0x1bf0] sm:$0xff] }
 0x197   : > { %1986 = vst [vmem:[%s11316_s5 + $0xc00] sm:$0xff] %v1985_v0  ;;  %v2113_v0 = vld [vmem:[%s11311_s4 + $0x1c00] sm:$0xff] }
 0x198   : > { %1988 = vst [vmem:[%s11316_s5 + $0xc08] sm:$0xff] %v1987_v1  ;;  %v2115_v1 = vld [vmem:[%s11311_s4 + $0x1c10] sm:$0xff] }
 0x199   : > { %1990 = vst [vmem:[%s11316_s5 + $0xc10] sm:$0xff] %v1989_v2  ;;  %v2117_v2 = vld [vmem:[%s11311_s4 + $0x1c20] sm:$0xff] }
 0x19a   : > { %1992 = vst [vmem:[%s11316_s5 + $0xc18] sm:$0xff] %v1991_v3  ;;  %v2119_v3 = vld [vmem:[%s11311_s4 + $0x1c30] sm:$0xff] }
 0x19b   : > { %1994 = vst [vmem:[%s11316_s5 + $0xc20] sm:$0xff] %v1993_v4  ;;  %v2121_v4 = vld [vmem:[%s11311_s4 + $0x1c40] sm:$0xff] }
 0x19c   : > { %1996 = vst [vmem:[%s11316_s5 + $0xc28] sm:$0xff] %v1995_v5  ;;  %v2123_v5 = vld [vmem:[%s11311_s4 + $0x1c50] sm:$0xff] }
 0x19d   : > { %1998 = vst [vmem:[%s11316_s5 + $0xc30] sm:$0xff] %v1997_v6  ;;  %v2125_v6 = vld [vmem:[%s11311_s4 + $0x1c60] sm:$0xff] }
 0x19e   : > { %2000 = vst [vmem:[%s11316_s5 + $0xc38] sm:$0xff] %v1999_v7  ;;  %v2127_v7 = vld [vmem:[%s11311_s4 + $0x1c70] sm:$0xff] }
 0x19f   : > { %2002 = vst [vmem:[%s11316_s5 + $0xc40] sm:$0xff] %v2001_v8  ;;  %v2129_v8 = vld [vmem:[%s11311_s4 + $0x1c80] sm:$0xff] }
 0x1a0   : > { %2004 = vst [vmem:[%s11316_s5 + $0xc48] sm:$0xff] %v2003_v9  ;;  %v2131_v9 = vld [vmem:[%s11311_s4 + $0x1c90] sm:$0xff] }
 0x1a1   : > { %2006 = vst [vmem:[%s11316_s5 + $0xc50] sm:$0xff] %v2005_v10  ;;  %v2133_v10 = vld [vmem:[%s11311_s4 + $0x1ca0] sm:$0xff] }
 0x1a2   : > { %2008 = vst [vmem:[%s11316_s5 + $0xc58] sm:$0xff] %v2007_v11  ;;  %v2135_v11 = vld [vmem:[%s11311_s4 + $0x1cb0] sm:$0xff] }
 0x1a3   : > { %2010 = vst [vmem:[%s11316_s5 + $0xc60] sm:$0xff] %v2009_v12  ;;  %v2137_v12 = vld [vmem:[%s11311_s4 + $0x1cc0] sm:$0xff] }
 0x1a4   : > { %2012 = vst [vmem:[%s11316_s5 + $0xc68] sm:$0xff] %v2011_v13  ;;  %v2139_v13 = vld [vmem:[%s11311_s4 + $0x1cd0] sm:$0xff] }
 0x1a5   : > { %2014 = vst [vmem:[%s11316_s5 + $0xc70] sm:$0xff] %v2013_v14  ;;  %v2141_v14 = vld [vmem:[%s11311_s4 + $0x1ce0] sm:$0xff] }
 0x1a6   : > { %2016 = vst [vmem:[%s11316_s5 + $0xc78] sm:$0xff] %v2015_v15  ;;  %v2143_v15 = vld [vmem:[%s11311_s4 + $0x1cf0] sm:$0xff] }
 0x1a7   : > { %2018 = vst [vmem:[%s11316_s5 + $0xc80] sm:$0xff] %v2017_v16  ;;  %v2145_v16 = vld [vmem:[%s11311_s4 + $0x1d00] sm:$0xff] }
 0x1a8   : > { %2020 = vst [vmem:[%s11316_s5 + $0xc88] sm:$0xff] %v2019_v17  ;;  %v2147_v17 = vld [vmem:[%s11311_s4 + $0x1d10] sm:$0xff] }
 0x1a9   : > { %2022 = vst [vmem:[%s11316_s5 + $0xc90] sm:$0xff] %v2021_v18  ;;  %v2149_v18 = vld [vmem:[%s11311_s4 + $0x1d20] sm:$0xff] }
 0x1aa   : > { %2024 = vst [vmem:[%s11316_s5 + $0xc98] sm:$0xff] %v2023_v19  ;;  %v2151_v19 = vld [vmem:[%s11311_s4 + $0x1d30] sm:$0xff] }
 0x1ab   : > { %2026 = vst [vmem:[%s11316_s5 + $0xca0] sm:$0xff] %v2025_v20  ;;  %v2153_v20 = vld [vmem:[%s11311_s4 + $0x1d40] sm:$0xff] }
 0x1ac   : > { %2028 = vst [vmem:[%s11316_s5 + $0xca8] sm:$0xff] %v2027_v21  ;;  %v2155_v21 = vld [vmem:[%s11311_s4 + $0x1d50] sm:$0xff] }
 0x1ad   : > { %2030 = vst [vmem:[%s11316_s5 + $0xcb0] sm:$0xff] %v2029_v22  ;;  %v2157_v22 = vld [vmem:[%s11311_s4 + $0x1d60] sm:$0xff] }
 0x1ae   : > { %2032 = vst [vmem:[%s11316_s5 + $0xcb8] sm:$0xff] %v2031_v23  ;;  %v2159_v23 = vld [vmem:[%s11311_s4 + $0x1d70] sm:$0xff] }
 0x1af   : > { %2034 = vst [vmem:[%s11316_s5 + $0xcc0] sm:$0xff] %v2033_v24  ;;  %v2161_v24 = vld [vmem:[%s11311_s4 + $0x1d80] sm:$0xff] }
 0x1b0   : > { %2036 = vst [vmem:[%s11316_s5 + $0xcc8] sm:$0xff] %v2035_v25  ;;  %v2163_v25 = vld [vmem:[%s11311_s4 + $0x1d90] sm:$0xff] }
 0x1b1   : > { %2038 = vst [vmem:[%s11316_s5 + $0xcd0] sm:$0xff] %v2037_v26  ;;  %v2165_v26 = vld [vmem:[%s11311_s4 + $0x1da0] sm:$0xff] }
 0x1b2   : > { %2040 = vst [vmem:[%s11316_s5 + $0xcd8] sm:$0xff] %v2039_v27  ;;  %v2167_v27 = vld [vmem:[%s11311_s4 + $0x1db0] sm:$0xff] }
 0x1b3   : > { %2042 = vst [vmem:[%s11316_s5 + $0xce0] sm:$0xff] %v2041_v28  ;;  %v2169_v28 = vld [vmem:[%s11311_s4 + $0x1dc0] sm:$0xff] }
 0x1b4   : > { %2044 = vst [vmem:[%s11316_s5 + $0xce8] sm:$0xff] %v2043_v29  ;;  %v2171_v29 = vld [vmem:[%s11311_s4 + $0x1dd0] sm:$0xff] }
 0x1b5   : > { %2046 = vst [vmem:[%s11316_s5 + $0xcf0] sm:$0xff] %v2045_v30  ;;  %v2173_v30 = vld [vmem:[%s11311_s4 + $0x1de0] sm:$0xff] }
 0x1b6   : > { %2048 = vst [vmem:[%s11316_s5 + $0xcf8] sm:$0xff] %v2047_v31  ;;  %v2175_v31 = vld [vmem:[%s11311_s4 + $0x1df0] sm:$0xff] }
 0x1b7   : > { %2050 = vst [vmem:[%s11316_s5 + $0xd00] sm:$0xff] %v2049_v32  ;;  %v2177_v32 = vld [vmem:[%s11311_s4 + $0x1e00] sm:$0xff] }
 0x1b8   : > { %2052 = vst [vmem:[%s11316_s5 + $0xd08] sm:$0xff] %v2051_v33  ;;  %v2179_v33 = vld [vmem:[%s11311_s4 + $0x1e10] sm:$0xff] }
 0x1b9   : > { %2054 = vst [vmem:[%s11316_s5 + $0xd10] sm:$0xff] %v2053_v34  ;;  %v2181_v34 = vld [vmem:[%s11311_s4 + $0x1e20] sm:$0xff] }
 0x1ba   : > { %2056 = vst [vmem:[%s11316_s5 + $0xd18] sm:$0xff] %v2055_v35  ;;  %v2183_v35 = vld [vmem:[%s11311_s4 + $0x1e30] sm:$0xff] }
 0x1bb   : > { %2058 = vst [vmem:[%s11316_s5 + $0xd20] sm:$0xff] %v2057_v36  ;;  %v2185_v36 = vld [vmem:[%s11311_s4 + $0x1e40] sm:$0xff] }
 0x1bc   : > { %2060 = vst [vmem:[%s11316_s5 + $0xd28] sm:$0xff] %v2059_v37  ;;  %v2187_v37 = vld [vmem:[%s11311_s4 + $0x1e50] sm:$0xff] }
 0x1bd   : > { %2062 = vst [vmem:[%s11316_s5 + $0xd30] sm:$0xff] %v2061_v38  ;;  %v2189_v38 = vld [vmem:[%s11311_s4 + $0x1e60] sm:$0xff] }
 0x1be   : > { %2064 = vst [vmem:[%s11316_s5 + $0xd38] sm:$0xff] %v2063_v39  ;;  %v2191_v39 = vld [vmem:[%s11311_s4 + $0x1e70] sm:$0xff] }
 0x1bf   : > { %2066 = vst [vmem:[%s11316_s5 + $0xd40] sm:$0xff] %v2065_v40  ;;  %v2193_v40 = vld [vmem:[%s11311_s4 + $0x1e80] sm:$0xff] }
 0x1c0   : > { %2068 = vst [vmem:[%s11316_s5 + $0xd48] sm:$0xff] %v2067_v41  ;;  %v2195_v41 = vld [vmem:[%s11311_s4 + $0x1e90] sm:$0xff] }
 0x1c1   : > { %2070 = vst [vmem:[%s11316_s5 + $0xd50] sm:$0xff] %v2069_v42  ;;  %v2197_v42 = vld [vmem:[%s11311_s4 + $0x1ea0] sm:$0xff] }
 0x1c2   : > { %2072 = vst [vmem:[%s11316_s5 + $0xd58] sm:$0xff] %v2071_v43  ;;  %v2199_v43 = vld [vmem:[%s11311_s4 + $0x1eb0] sm:$0xff] }
 0x1c3   : > { %2074 = vst [vmem:[%s11316_s5 + $0xd60] sm:$0xff] %v2073_v44  ;;  %v2201_v44 = vld [vmem:[%s11311_s4 + $0x1ec0] sm:$0xff] }
 0x1c4   : > { %2076 = vst [vmem:[%s11316_s5 + $0xd68] sm:$0xff] %v2075_v45  ;;  %v2203_v45 = vld [vmem:[%s11311_s4 + $0x1ed0] sm:$0xff] }
 0x1c5   : > { %2078 = vst [vmem:[%s11316_s5 + $0xd70] sm:$0xff] %v2077_v46  ;;  %v2205_v46 = vld [vmem:[%s11311_s4 + $0x1ee0] sm:$0xff] }
 0x1c6   : > { %2080 = vst [vmem:[%s11316_s5 + $0xd78] sm:$0xff] %v2079_v47  ;;  %v2207_v47 = vld [vmem:[%s11311_s4 + $0x1ef0] sm:$0xff] }
 0x1c7   : > { %2082 = vst [vmem:[%s11316_s5 + $0xd80] sm:$0xff] %v2081_v48  ;;  %v2209_v48 = vld [vmem:[%s11311_s4 + $0x1f00] sm:$0xff] }
 0x1c8   : > { %2084 = vst [vmem:[%s11316_s5 + $0xd88] sm:$0xff] %v2083_v49  ;;  %v2211_v49 = vld [vmem:[%s11311_s4 + $0x1f10] sm:$0xff] }
 0x1c9   : > { %2086 = vst [vmem:[%s11316_s5 + $0xd90] sm:$0xff] %v2085_v50  ;;  %v2213_v50 = vld [vmem:[%s11311_s4 + $0x1f20] sm:$0xff] }
 0x1ca   : > { %2088 = vst [vmem:[%s11316_s5 + $0xd98] sm:$0xff] %v2087_v51  ;;  %v2215_v51 = vld [vmem:[%s11311_s4 + $0x1f30] sm:$0xff] }
 0x1cb   : > { %2090 = vst [vmem:[%s11316_s5 + $0xda0] sm:$0xff] %v2089_v52  ;;  %v2217_v52 = vld [vmem:[%s11311_s4 + $0x1f40] sm:$0xff] }
 0x1cc   : > { %2092 = vst [vmem:[%s11316_s5 + $0xda8] sm:$0xff] %v2091_v53  ;;  %v2219_v53 = vld [vmem:[%s11311_s4 + $0x1f50] sm:$0xff] }
 0x1cd   : > { %2094 = vst [vmem:[%s11316_s5 + $0xdb0] sm:$0xff] %v2093_v54  ;;  %v2221_v54 = vld [vmem:[%s11311_s4 + $0x1f60] sm:$0xff] }
 0x1ce   : > { %2096 = vst [vmem:[%s11316_s5 + $0xdb8] sm:$0xff] %v2095_v55  ;;  %v2223_v55 = vld [vmem:[%s11311_s4 + $0x1f70] sm:$0xff] }
 0x1cf   : > { %2098 = vst [vmem:[%s11316_s5 + $0xdc0] sm:$0xff] %v2097_v56  ;;  %v2225_v56 = vld [vmem:[%s11311_s4 + $0x1f80] sm:$0xff] }
 0x1d0   : > { %2100 = vst [vmem:[%s11316_s5 + $0xdc8] sm:$0xff] %v2099_v57  ;;  %v2227_v57 = vld [vmem:[%s11311_s4 + $0x1f90] sm:$0xff] }
 0x1d1   : > { %2102 = vst [vmem:[%s11316_s5 + $0xdd0] sm:$0xff] %v2101_v58  ;;  %v2229_v58 = vld [vmem:[%s11311_s4 + $0x1fa0] sm:$0xff] }
 0x1d2   : > { %2104 = vst [vmem:[%s11316_s5 + $0xdd8] sm:$0xff] %v2103_v59  ;;  %v2231_v59 = vld [vmem:[%s11311_s4 + $0x1fb0] sm:$0xff] }
 0x1d3   : > { %2106 = vst [vmem:[%s11316_s5 + $0xde0] sm:$0xff] %v2105_v60  ;;  %v2233_v60 = vld [vmem:[%s11311_s4 + $0x1fc0] sm:$0xff] }
 0x1d4   : > { %2108 = vst [vmem:[%s11316_s5 + $0xde8] sm:$0xff] %v2107_v61  ;;  %v2235_v61 = vld [vmem:[%s11311_s4 + $0x1fd0] sm:$0xff] }
 0x1d5   : > { %2110 = vst [vmem:[%s11316_s5 + $0xdf0] sm:$0xff] %v2109_v62  ;;  %v2237_v62 = vld [vmem:[%s11311_s4 + $0x1fe0] sm:$0xff] }
 0x1d6   : > { %2112 = vst [vmem:[%s11316_s5 + $0xdf8] sm:$0xff] %v2111_v63  ;;  %v2239_v63 = vld [vmem:[%s11311_s4 + $0x1ff0] sm:$0xff] }
 0x1d7   : > { %2114 = vst [vmem:[%s11316_s5 + $0xe00] sm:$0xff] %v2113_v0 }
 0x1d8   : > { %2116 = vst [vmem:[%s11316_s5 + $0xe08] sm:$0xff] %v2115_v1 }
 0x1d9   : > { %2118 = vst [vmem:[%s11316_s5 + $0xe10] sm:$0xff] %v2117_v2 }
 0x1da   : > { %2120 = vst [vmem:[%s11316_s5 + $0xe18] sm:$0xff] %v2119_v3 }
 0x1db   : > { %2122 = vst [vmem:[%s11316_s5 + $0xe20] sm:$0xff] %v2121_v4 }
 0x1dc   : > { %2124 = vst [vmem:[%s11316_s5 + $0xe28] sm:$0xff] %v2123_v5 }
 0x1dd   : > { %2126 = vst [vmem:[%s11316_s5 + $0xe30] sm:$0xff] %v2125_v6 }
 0x1de   : > { %2128 = vst [vmem:[%s11316_s5 + $0xe38] sm:$0xff] %v2127_v7 }
 0x1df   : > { %2130 = vst [vmem:[%s11316_s5 + $0xe40] sm:$0xff] %v2129_v8 }
 0x1e0   : > { %2132 = vst [vmem:[%s11316_s5 + $0xe48] sm:$0xff] %v2131_v9 }
 0x1e1   : > { %2134 = vst [vmem:[%s11316_s5 + $0xe50] sm:$0xff] %v2133_v10 }
 0x1e2   : > { %2136 = vst [vmem:[%s11316_s5 + $0xe58] sm:$0xff] %v2135_v11 }
 0x1e3   : > { %2138 = vst [vmem:[%s11316_s5 + $0xe60] sm:$0xff] %v2137_v12 }
 0x1e4   : > { %2140 = vst [vmem:[%s11316_s5 + $0xe68] sm:$0xff] %v2139_v13 }
 0x1e5   : > { %2142 = vst [vmem:[%s11316_s5 + $0xe70] sm:$0xff] %v2141_v14 }
 0x1e6   : > { %2144 = vst [vmem:[%s11316_s5 + $0xe78] sm:$0xff] %v2143_v15 }
 0x1e7   : > { %2146 = vst [vmem:[%s11316_s5 + $0xe80] sm:$0xff] %v2145_v16 }
 0x1e8   : > { %2148 = vst [vmem:[%s11316_s5 + $0xe88] sm:$0xff] %v2147_v17 }
 0x1e9   : > { %2150 = vst [vmem:[%s11316_s5 + $0xe90] sm:$0xff] %v2149_v18 }
 0x1ea   : > { %2152 = vst [vmem:[%s11316_s5 + $0xe98] sm:$0xff] %v2151_v19 }
 0x1eb   : > { %2154 = vst [vmem:[%s11316_s5 + $0xea0] sm:$0xff] %v2153_v20 }
 0x1ec   : > { %2156 = vst [vmem:[%s11316_s5 + $0xea8] sm:$0xff] %v2155_v21 }
 0x1ed   : > { %2158 = vst [vmem:[%s11316_s5 + $0xeb0] sm:$0xff] %v2157_v22 }
 0x1ee   : > { %2160 = vst [vmem:[%s11316_s5 + $0xeb8] sm:$0xff] %v2159_v23 }
 0x1ef   : > { %2162 = vst [vmem:[%s11316_s5 + $0xec0] sm:$0xff] %v2161_v24 }
 0x1f0   : > { %2164 = vst [vmem:[%s11316_s5 + $0xec8] sm:$0xff] %v2163_v25 }
 0x1f1   : > { %2166 = vst [vmem:[%s11316_s5 + $0xed0] sm:$0xff] %v2165_v26 }
 0x1f2   : > { %2168 = vst [vmem:[%s11316_s5 + $0xed8] sm:$0xff] %v2167_v27 }
 0x1f3   : > { %2170 = vst [vmem:[%s11316_s5 + $0xee0] sm:$0xff] %v2169_v28 }
 0x1f4   : > { %2172 = vst [vmem:[%s11316_s5 + $0xee8] sm:$0xff] %v2171_v29 }
 0x1f5   : > { %2174 = vst [vmem:[%s11316_s5 + $0xef0] sm:$0xff] %v2173_v30 }
 0x1f6   : > { %2176 = vst [vmem:[%s11316_s5 + $0xef8] sm:$0xff] %v2175_v31 }
 0x1f7   : > { %2178 = vst [vmem:[%s11316_s5 + $0xf00] sm:$0xff] %v2177_v32 }
 0x1f8   : > { %2180 = vst [vmem:[%s11316_s5 + $0xf08] sm:$0xff] %v2179_v33 }
 0x1f9   : > { %2182 = vst [vmem:[%s11316_s5 + $0xf10] sm:$0xff] %v2181_v34 }
 0x1fa   : > { %2184 = vst [vmem:[%s11316_s5 + $0xf18] sm:$0xff] %v2183_v35 }
 0x1fb   : > { %2186 = vst [vmem:[%s11316_s5 + $0xf20] sm:$0xff] %v2185_v36 }
 0x1fc   : > { %2188 = vst [vmem:[%s11316_s5 + $0xf28] sm:$0xff] %v2187_v37 }
 0x1fd   : > { %2190 = vst [vmem:[%s11316_s5 + $0xf30] sm:$0xff] %v2189_v38 }
 0x1fe   : > { %2192 = vst [vmem:[%s11316_s5 + $0xf38] sm:$0xff] %v2191_v39 }
 0x1ff   : > { %2194 = vst [vmem:[%s11316_s5 + $0xf40] sm:$0xff] %v2193_v40 }
 0x200   : > { %2196 = vst [vmem:[%s11316_s5 + $0xf48] sm:$0xff] %v2195_v41 }
 0x201   : > { %2198 = vst [vmem:[%s11316_s5 + $0xf50] sm:$0xff] %v2197_v42 }
 0x202   : > { %2200 = vst [vmem:[%s11316_s5 + $0xf58] sm:$0xff] %v2199_v43 }
 0x203   : > { %2202 = vst [vmem:[%s11316_s5 + $0xf60] sm:$0xff] %v2201_v44 }
 0x204   : > { %2204 = vst [vmem:[%s11316_s5 + $0xf68] sm:$0xff] %v2203_v45 }
 0x205   : > { %2206 = vst [vmem:[%s11316_s5 + $0xf70] sm:$0xff] %v2205_v46 }
 0x206   : > { %2208 = vst [vmem:[%s11316_s5 + $0xf78] sm:$0xff] %v2207_v47 }
 0x207   : > { %2210 = vst [vmem:[%s11316_s5 + $0xf80] sm:$0xff] %v2209_v48 }
 0x208   : > { %2212 = vst [vmem:[%s11316_s5 + $0xf88] sm:$0xff] %v2211_v49 }
 0x209   : > { %2214 = vst [vmem:[%s11316_s5 + $0xf90] sm:$0xff] %v2213_v50 }
 0x20a   : > { %2216 = vst [vmem:[%s11316_s5 + $0xf98] sm:$0xff] %v2215_v51 }
 0x20b   : > { %2218 = vst [vmem:[%s11316_s5 + $0xfa0] sm:$0xff] %v2217_v52 }
 0x20c   : > { %2220 = vst [vmem:[%s11316_s5 + $0xfa8] sm:$0xff] %v2219_v53 }
 0x20d   : > { %2222 = vst [vmem:[%s11316_s5 + $0xfb0] sm:$0xff] %v2221_v54 }
 0x20e   : > { %2224 = vst [vmem:[%s11316_s5 + $0xfb8] sm:$0xff] %v2223_v55 }
 0x20f   : > { %2226 = vst [vmem:[%s11316_s5 + $0xfc0] sm:$0xff] %v2225_v56 }
 0x210   : > { %2228 = vst [vmem:[%s11316_s5 + $0xfc8] sm:$0xff] %v2227_v57 }
 0x211   : > { %2230 = vst [vmem:[%s11316_s5 + $0xfd0] sm:$0xff] %v2229_v58 }
 0x212   : > { %2232 = vst [vmem:[%s11316_s5 + $0xfd8] sm:$0xff] %v2231_v59 }
 0x213   : > { %2234 = vst [vmem:[%s11316_s5 + $0xfe0] sm:$0xff] %v2233_v60 }
 0x214   : > { %2236 = vst [vmem:[%s11316_s5 + $0xfe8] sm:$0xff] %v2235_v61 }
 0x215   : > { %2238 = vst [vmem:[%s11316_s5 + $0xff0] sm:$0xff] %v2237_v62 }
 0x216   : > { %2240 = vst [vmem:[%s11316_s5 + $0xff8] sm:$0xff] %v2239_v63 }
 0x217 PF: > { %p8514_p11 = scmp.ge.s32.totalorder %s11227_s17, 1  ;;  %p4336_p12 = scmp.lt.s32.totalorder %s11227_s17, 3 }
 0x219   : > { %p4337_p13 = pnand %p8514_p11, %p4336_p12 }
 0x21a   : > { %s12342_s6 = sand.u32 (!%p4337_p13), 1, %s11211_s13   ;;  %s8517_s23 = sshll.u32 (!%p4337_p13), %s11219_s15, 1 }
 0x21b   : > { %4340 = sbr.rel (%p4337_p13) target bundleno = 1203 (0x4b3), region = 80  ;;  %s8515_s7 = sshll.u32 (!%p4337_p13), %s12342_s6, 12 }
 0x21c   : > { %s12345_s8 = scalar_lea.vmem (!%p4337_p13), [#allocation2], %s8515_s7  ;;  %p12745_p0 = scmp.lt.s32.totalorder (!%p4337_p13), %s8517_s23, 3 }
 0x21d   : > { %s8516_s5 = sshll.u32 (!%p4337_p13), %s12342_s6, 2  ;;  %s11084_s7 = sshll.u32 (!%p4337_p13), %s11219_s15, 2 }
 0x21e   : > { %s8392_s10 = scalar_lea.hbm (!%p4337_p13), %s13569_s3, %s11084_s7  ;;  %s4373_s11 = scalar_lea.vmem (!%p4337_p13), [#allocation3], %s8516_s5 }
 0x21f   : > { %s8394_s18 = sshll.u32 (!%p4337_p13), %s4373_s11, 4  ;;  %s8396_s19 = sshll.u32 (!%p4337_p13), %s8392_s10, 4  ;;  %s8395_s18 = int_to_ptr.vmem [resolvable:$true] %s8394_s18  ;;  %s8397_s19 = int_to_ptr.hbm [resolvable:$true] %s8396_s19 }
 0x220   : > { %v8576_v0 = vld [vmem:[%s12345_s8 + $0x70] sm:$0xf]  ;;  %v10587_v1 = vld [vmem:[%s12345_s8 + $0x74] sm:$0xf0]  ;;  %v8568_v11 = vld [vmem:[%s12345_s8 + $0x60] sm:$0xf] }
 0x221   : > { %v8640_v2 = vld [vmem:[%s12345_s8 + $0xf0] sm:$0xf]  ;;  %v8577_v3 = vor.u32 %v10587_v1, %v8576_v0  ;;  %v10603_v4 = vld [vmem:[%s12345_s8 + $0xf4] sm:$0xf0]  ;;  %v10585_v13 = vld [vmem:[%s12345_s8 + $0x64] sm:$0xf0] }
 0x222   : > { %v8704_v5 = vld [vmem:[%s12345_s8 + $0x170] sm:$0xf]  ;;  %v10619_v6 = vld [vmem:[%s12345_s8 + $0x174] sm:$0xf0]  ;;  %v8641_v7 = vor.u32 %v10603_v4, %v8640_v2  ;;  %v8632_v14 = vld [vmem:[%s12345_s8 + $0xe0] sm:$0xf]  ;;  %v8569_v16 = vor.u32 %v10585_v13, %v8568_v11 }
 0x223   : > { %v8705_v8 = vor.u32 %v10619_v6, %v8704_v5  ;;  %v8768_v9 = vld [vmem:[%s12345_s8 + $0x1f0] sm:$0xf]  ;;  %v10635_v10 = vld [vmem:[%s12345_s8 + $0x1f4] sm:$0xf0]  ;;  %7539 = vmatpush.bf16.msra.mxu0 %v8577_v3  ;;  %v10601_v15 = vld [vmem:[%s12345_s8 + $0xe4] sm:$0xf0] }
 0x224   : > { %v8769_v12 = vor.u32 %v10635_v10, %v8768_v9  ;;  %7552 = vmatpush.bf16.msra.mxu1 %v8641_v7  ;;  %v8633_v17 = vor.u32 %v10601_v15, %v8632_v14  ;;  %v8696_v18 = vld [vmem:[%s12345_s8 + $0x160] sm:$0xf]  ;;  %v10617_v19 = vld [vmem:[%s12345_s8 + $0x164] sm:$0xf0]  ;;  %v8560_v23 = vld [vmem:[%s12345_s8 + $0x50] sm:$0xf] }
 0x225   : > { %7565 = vmatpush.bf16.msra.mxu2 %v8705_v8  ;;  %v8760_v20 = vld [vmem:[%s12345_s8 + $0x1e0] sm:$0xf]  ;;  %v8697_v21 = vor.u32 %v10617_v19, %v8696_v18  ;;  %v10633_v22 = vld [vmem:[%s12345_s8 + $0x1e4] sm:$0xf0]  ;;  %v10583_v24 = vld [vmem:[%s12345_s8 + $0x54] sm:$0xf0] }
 0x226   : > { %7578 = vmatpush.bf16.msra.mxu3 %v8769_v12  ;;  %v8761_v25 = vor.u32 %v10633_v22, %v8760_v20  ;;  %v8624_v26 = vld [vmem:[%s12345_s8 + $0xd0] sm:$0xf]  ;;  %v10599_v27 = vld [vmem:[%s12345_s8 + $0xd4] sm:$0xf0]  ;;  %v8561_v29 = vor.u32 %v10583_v24, %v8560_v23  ;;  %v8552_v35 = vld [vmem:[%s12345_s8 + $0x40] sm:$0xf] }
 0x227   : > { %v8688_v28 = vld [vmem:[%s12345_s8 + $0x150] sm:$0xf]  ;;  %7540 = vmatpush.bf16.msra.mxu0 %v8569_v16  ;;  %v10615_v30 = vld [vmem:[%s12345_s8 + $0x154] sm:$0xf0]  ;;  %v8625_v33 = vor.u32 %v10599_v27, %v8624_v26  ;;  %v10581_v36 = vld [vmem:[%s12345_s8 + $0x44] sm:$0xf0] }
 0x228   : > { %v8752_v31 = vld [vmem:[%s12345_s8 + $0x1d0] sm:$0xf]  ;;  %v10631_v32 = vld [vmem:[%s12345_s8 + $0x1d4] sm:$0xf0]  ;;  %7553 = vmatpush.bf16.msra.mxu1 %v8633_v17  ;;  %v8689_v34 = vor.u32 %v10615_v30, %v8688_v28  ;;  %v8616_v37 = vld [vmem:[%s12345_s8 + $0xc0] sm:$0xf]  ;;  %v8553_v44 = vor.u32 %v10581_v36, %v8552_v35 }
 0x229   : > { %7566 = vmatpush.bf16.msra.mxu2 %v8697_v21  ;;  %v8753_v38 = vor.u32 %v10631_v32, %v8752_v31  ;;  %v10597_v39 = vld [vmem:[%s12345_s8 + $0xc4] sm:$0xf0]  ;;  %v8680_v40 = vld [vmem:[%s12345_s8 + $0x140] sm:$0xf]  ;;  %v8544_v47 = vld [vmem:[%s12345_s8 + $0x30] sm:$0xf] }
 0x22a   : > { %7579 = vmatpush.bf16.msra.mxu3 %v8761_v25  ;;  %v10613_v41 = vld [vmem:[%s12345_s8 + $0x144] sm:$0xf0]  ;;  %v8744_v42 = vld [vmem:[%s12345_s8 + $0x1c0] sm:$0xf]  ;;  %v8617_v45 = vor.u32 %v10597_v39, %v8616_v37  ;;  %v10579_v48 = vld [vmem:[%s12345_s8 + $0x34] sm:$0xf0] }
 0x22b   : > { %v10629_v43 = vld [vmem:[%s12345_s8 + $0x1c4] sm:$0xf0]  ;;  %7541 = vmatpush.bf16.msra.mxu0 %v8561_v29  ;;  %v8681_v46 = vor.u32 %v10613_v41, %v8680_v40  ;;  %v8608_v49 = vld [vmem:[%s12345_s8 + $0xb0] sm:$0xf]  ;;  %v10595_v51 = vld [vmem:[%s12345_s8 + $0xb4] sm:$0xf0]  ;;  %v8545_v56 = vor.u32 %v10579_v48, %v8544_v47 }
 0x22c   : > { %7554 = vmatpush.bf16.msra.mxu1 %v8625_v33  ;;  %v8745_v50 = vor.u32 %v10629_v43, %v8744_v42  ;;  %v8672_v52 = vld [vmem:[%s12345_s8 + $0x130] sm:$0xf]  ;;  %v10611_v53 = vld [vmem:[%s12345_s8 + $0x134] sm:$0xf0]  ;;  %v8609_v57 = vor.u32 %v10595_v51, %v8608_v49  ;;  %v8536_v59 = vld [vmem:[%s12345_s8 + $0x20] sm:$0xf] }
 0x22d   : > { %7567 = vmatpush.bf16.msra.mxu2 %v8689_v34  ;;  %v8736_v54 = vld [vmem:[%s12345_s8 + $0x1b0] sm:$0xf]  ;;  %v10627_v55 = vld [vmem:[%s12345_s8 + $0x1b4] sm:$0xf0]  ;;  %v8673_v58 = vor.u32 %v10611_v53, %v8672_v52  ;;  %v10577_v60 = vld [vmem:[%s12345_s8 + $0x24] sm:$0xf0] }
 0x22e   : > { %7580 = vmatpush.bf16.msra.mxu3 %v8753_v38  ;;  %v8600_v61 = vld [vmem:[%s12345_s8 + $0xa0] sm:$0xf]  ;;  %v8737_v62 = vor.u32 %v10627_v55, %v8736_v54  ;;  %v10593_v63 = vld [vmem:[%s12345_s8 + $0xa4] sm:$0xf0]  ;;  %v8537_v4 = vor.u32 %v10577_v60, %v8536_v59  ;;  %v8528_v7 = vld [vmem:[%s12345_s8 + $0x10] sm:$0xf] }
 0x22f   : > { %7542 = vmatpush.bf16.msra.mxu0 %v8553_v44  ;;  %v8664_v0 = vld [vmem:[%s12345_s8 + $0x120] sm:$0xf]  ;;  %v10609_v1 = vld [vmem:[%s12345_s8 + $0x124] sm:$0xf0]  ;;  %v8601_v5 = vor.u32 %v10593_v63, %v8600_v61  ;;  %v10575_v8 = vld [vmem:[%s12345_s8 + $0x14] sm:$0xf0] }
 0x230   : > { %7555 = vmatpush.bf16.msra.mxu1 %v8617_v45  ;;  %v8728_v2 = vld [vmem:[%s12345_s8 + $0x1a0] sm:$0xf]  ;;  %v10625_v3 = vld [vmem:[%s12345_s8 + $0x1a4] sm:$0xf0]  ;;  %v8665_v6 = vor.u32 %v10609_v1, %v8664_v0  ;;  %v8592_v9 = vld [vmem:[%s12345_s8 + $0x90] sm:$0xf]  ;;  %v8529_v16 = vor.u32 %v10575_v8, %v8528_v7 }
 0x231   : > { %7568 = vmatpush.bf16.msra.mxu2 %v8681_v46  ;;  %v8729_v10 = vor.u32 %v10625_v3, %v8728_v2  ;;  %v10591_v11 = vld [vmem:[%s12345_s8 + $0x94] sm:$0xf0]  ;;  %v8656_v12 = vld [vmem:[%s12345_s8 + $0x110] sm:$0xf]  ;;  %v8520_v17 = vld [vmem:[%s12345_s8] sm:$0xf] }
 0x232   : > { %7581 = vmatpush.bf16.msra.mxu3 %v8745_v50  ;;  %v10607_v13 = vld [vmem:[%s12345_s8 + $0x114] sm:$0xf0]  ;;  %v8720_v14 = vld [vmem:[%s12345_s8 + $0x190] sm:$0xf]  ;;  %v10573_v18 = vld [vmem:[%s12345_s8 + $0x4] sm:$0xf0]  ;;  %v8593_v19 = vor.u32 %v10591_v11, %v8592_v9 }
 0x233   : > { %7543 = vmatpush.bf16.msra.mxu0 %v8545_v56  ;;  %v10623_v15 = vld [vmem:[%s12345_s8 + $0x194] sm:$0xf0]  ;;  %v8657_v20 = vor.u32 %v10607_v13, %v8656_v12  ;;  %v8584_v21 = vld [vmem:[%s12345_s8 + $0x80] sm:$0xf]  ;;  %v10589_v22 = vld [vmem:[%s12345_s8 + $0x84] sm:$0xf0]  ;;  %v8521_v31 = vor.u32 %v10573_v18, %v8520_v17 }
 0x234   : > { %7556 = vmatpush.bf16.msra.mxu1 %v8609_v57  ;;  %v8648_v23 = vld [vmem:[%s12345_s8 + $0x100] sm:$0xf]  ;;  %v8721_v24 = vor.u32 %v10623_v15, %v8720_v14  ;;  %v10605_v25 = vld [vmem:[%s12345_s8 + $0x104] sm:$0xf0]  ;;  %v8832_v28 = vld [vmem:[%s12345_s8 + $0x270] sm:$0xf]  ;;  %v8585_v35 = vor.u32 %v10589_v22, %v8584_v21 }
 0x235   : > { %7569 = vmatpush.bf16.msra.mxu2 %v8673_v58  ;;  %v8712_v26 = vld [vmem:[%s12345_s8 + $0x180] sm:$0xf]  ;;  %v10621_v27 = vld [vmem:[%s12345_s8 + $0x184] sm:$0xf0]  ;;  %v10651_v29 = vld [vmem:[%s12345_s8 + $0x274] sm:$0xf0]  ;;  %v8649_v36 = vor.u32 %v10605_v25, %v8648_v23 }
 0x236   : > { %7582 = vmatpush.bf16.msra.mxu3 %v8737_v62  ;;  %v8896_v30 = vld [vmem:[%s12345_s8 + $0x2f0] sm:$0xf]  ;;  %v10667_v32 = vld [vmem:[%s12345_s8 + $0x2f4] sm:$0xf0]  ;;  %v8713_v39 = vor.u32 %v10621_v27, %v8712_v26  ;;  %v8833_v40 = vor.u32 %v10651_v29, %v8832_v28  ;;  %v8824_v43 = vld [vmem:[%s12345_s8 + $0x260] sm:$0xf] }
 0x237   : > { %7544 = vmatpush.bf16.msra.mxu0 %v8537_v4  ;;  %v8960_v33 = vld [vmem:[%s12345_s8 + $0x370] sm:$0xf]  ;;  %v10683_v34 = vld [vmem:[%s12345_s8 + $0x374] sm:$0xf0]  ;;  %v8897_v41 = vor.u32 %v10667_v32, %v8896_v30  ;;  %v10649_v44 = vld [vmem:[%s12345_s8 + $0x264] sm:$0xf0] }
 0x238   : > { %7557 = vmatpush.bf16.msra.mxu1 %v8601_v5  ;;  %v9024_v37 = vld [vmem:[%s12345_s8 + $0x3f0] sm:$0xf]  ;;  %v10699_v38 = vld [vmem:[%s12345_s8 + $0x3f4] sm:$0xf0]  ;;  %v8961_v42 = vor.u32 %v10683_v34, %v8960_v33  ;;  %v8888_v45 = vld [vmem:[%s12345_s8 + $0x2e0] sm:$0xf]  ;;  %v8825_v52 = vor.u32 %v10649_v44, %v8824_v43 }
 0x239   : > { %7570 = vmatpush.bf16.msra.mxu2 %v8665_v6  ;;  %v9025_v46 = vor.u32 %v10699_v38, %v9024_v37  ;;  %v10665_v47 = vld [vmem:[%s12345_s8 + $0x2e4] sm:$0xf0]  ;;  %v8952_v48 = vld [vmem:[%s12345_s8 + $0x360] sm:$0xf]  ;;  %v8816_v53 = vld [vmem:[%s12345_s8 + $0x250] sm:$0xf] }
 0x23a   : > { %7583 = vmatpush.bf16.msra.mxu3 %v8729_v10  ;;  %v10681_v49 = vld [vmem:[%s12345_s8 + $0x364] sm:$0xf0]  ;;  %v9016_v50 = vld [vmem:[%s12345_s8 + $0x3e0] sm:$0xf]  ;;  %v10647_v54 = vld [vmem:[%s12345_s8 + $0x254] sm:$0xf0]  ;;  %v8889_v55 = vor.u32 %v10665_v47, %v8888_v45 }
 0x23b   : > { %7545 = vmatpush.bf16.msra.mxu0 %v8529_v16  ;;  %v10697_v51 = vld [vmem:[%s12345_s8 + $0x3e4] sm:$0xf0]  ;;  %v8953_v56 = vor.u32 %v10681_v49, %v8952_v48  ;;  %v8880_v57 = vld [vmem:[%s12345_s8 + $0x2d0] sm:$0xf]  ;;  %v10663_v58 = vld [vmem:[%s12345_s8 + $0x2d4] sm:$0xf0]  ;;  %v8817_v1 = vor.u32 %v10647_v54, %v8816_v53 }
 0x23c   : > { %7558 = vmatpush.bf16.msra.mxu1 %v8593_v19  ;;  %v4385_v59 = vld [vmem:[%s13566_s0] sm:$0xff]  ;;  %v9017_v60 = vor.u32 %v10697_v51, %v9016_v50  ;;  %v8944_v61 = vld [vmem:[%s12345_s8 + $0x350] sm:$0xf]  ;;  %v8881_v2 = vor.u32 %v10663_v58, %v8880_v57  ;;  %v8808_v4 = vld [vmem:[%s12345_s8 + $0x240] sm:$0xf]  ;;  %s13581_s23 = smov (!%p12745_p0, %s8517_s23), 3 }
 0x23d   : > { %7571 = vmatpush.bf16.msra.mxu2 %v8657_v20  ;;  %v10679_v62 = vld [vmem:[%s12345_s8 + $0x354] sm:$0xf0]  ;;  %4908 = vst [vmem:[#allocation1] ss:$9 sm:$0xff] %v4385_v59  ;;  %v9008_v63 = vld [vmem:[%s12345_s8 + $0x3d0] sm:$0xf]  ;;  %s12782_s29 = scalar_lea.vmem %s13568_s2, %s13581_s23 }
 0x23e   : > { %7584 = vmatpush.bf16.msra.mxu3 %v8721_v24  ;;  %v10695_v0 = vld [vmem:[%s12345_s8 + $0x3d4] sm:$0xf0]  ;;  %v8945_v3 = vor.u32 %v10679_v62, %v8944_v61  ;;  %v10645_v5 = vld [vmem:[%s12345_s8 + $0x244] sm:$0xf0]  ;;  %v8872_v6 = vld [vmem:[%s12345_s8 + $0x2c0] sm:$0xf] }
 0x23f   : > { %7546 = vmatpush.bf16.msra.mxu0 %v8521_v31  ;;  %v9009_v7 = vor.u32 %v10695_v0, %v9008_v63  ;;  %v10661_v8 = vld [vmem:[%s12345_s8 + $0x2c4] sm:$0xf0]  ;;  %v8936_v9 = vld [vmem:[%s12345_s8 + $0x340] sm:$0xf]  ;;  %v8800_v13 = vld [vmem:[%s12345_s8 + $0x230] sm:$0xf]  ;;  %v8809_v14 = vor.u32 %v10645_v5, %v8808_v4 }
 0x240   : > { %7559 = vmatpush.bf16.msra.mxu1 %v8585_v35  ;;  %v10677_v10 = vld [vmem:[%s12345_s8 + $0x344] sm:$0xf0]  ;;  %v9000_v11 = vld [vmem:[%s12345_s8 + $0x3c0] sm:$0xf]  ;;  %v10643_v15 = vld [vmem:[%s12345_s8 + $0x234] sm:$0xf0]  ;;  %v8873_v18 = vor.u32 %v10661_v8, %v8872_v6 }
 0x241   : > { %7572 = vmatpush.bf16.msra.mxu2 %v8649_v36  ;;  %v10693_v12 = vld [vmem:[%s12345_s8 + $0x3c4] sm:$0xf0]  ;;  %v8864_v16 = vld [vmem:[%s12345_s8 + $0x2b0] sm:$0xf]  ;;  %v10659_v17 = vld [vmem:[%s12345_s8 + $0x2b4] sm:$0xf0]  ;;  %v8937_v19 = vor.u32 %v10677_v10, %v8936_v9  ;;  %v8801_v29 = vor.u32 %v10643_v15, %v8800_v13 }
 0x242   : > { %7585 = vmatpush.bf16.msra.mxu3 %v8713_v39  ;;  %v9001_v23 = vor.u32 %v10693_v12, %v9000_v11  ;;  %v8928_v24 = vld [vmem:[%s12345_s8 + $0x330] sm:$0xf]  ;;  %v10675_v25 = vld [vmem:[%s12345_s8 + $0x334] sm:$0xf0]  ;;  %v8865_v30 = vor.u32 %v10659_v17, %v8864_v16  ;;  %v8792_v32 = vld [vmem:[%s12345_s8 + $0x220] sm:$0xf] }
 0x243   : > { %7591 = vmatpush.bf16.msrb.mxu0 %v8833_v40  ;;  %v8992_v27 = vld [vmem:[%s12345_s8 + $0x3b0] sm:$0xf]  ;;  %v10691_v28 = vld [vmem:[%s12345_s8 + $0x3b4] sm:$0xf0]  ;;  %v8929_v31 = vor.u32 %v10675_v25, %v8928_v24  ;;  %v10641_v33 = vld [vmem:[%s12345_s8 + $0x224] sm:$0xf0] }
 0x244   : > { %7604 = vmatpush.bf16.msrb.mxu1 %v8897_v41  ;;  %v12450_v20 = vld [vmem:[#allocation1 + $0x12] sm:$0xff]  ;;  %v12452_v21 = vld [vmem:[#allocation1] sm:$0xff]  ;;  %v12459_v26 = vld [vmem:[#allocation1 + $0x9] sm:$0xff]  ;;  %v8993_v35 = vor.u32 %v10691_v28, %v8992_v27  ;;  %v8793_v41 = vor.u32 %v10641_v33, %v8792_v32  ;;  %vm8374_vm0 = vcmask 1041408   ;;  %s8379_s15 = scalar_lea.sflag [#allocation4], %s12342_s6  ;;  %s11163_s21 = sshra.s32 %s8397_s19, 4  ;;  %s11164_s21 = int_to_ptr.hbm [resolvable:$true] %s11163_s21 }
 0x245   : > { %7617 = vmatpush.bf16.msrb.mxu2 %v8961_v42  ;;  %v12454_v22 = vld [vmem:[#allocation1 + $0x1b] sm:$0xff]  ;;  %7547 = vmatmul.bf16.vlgmr.msra.gmra.mxu0 %v12452_v21  ;;  %v8856_v34 = vld [vmem:[%s12345_s8 + $0x2a0] sm:$0xf]  ;;  %v10657_v36 = vld [vmem:[%s12345_s8 + $0x2a4] sm:$0xf0]  ;;  %s11165_s23 = scalar_lea.hbm %s11164_s21, 4  ;;  %p11170_p4 = scmp.lt.s32.totalorder %s11164_s21, %s13569_s3 }
 0x246   : > { %7630 = vmatpush.bf16.msrb.mxu3 %v9025_v46  ;;  %7573 = vmatmul.bf16.vlgmr.msra.gmra.mxu2 %v12450_v20  ;;  %v8920_v37 = vld [vmem:[%s12345_s8 + $0x320] sm:$0xf]  ;;  %v10673_v38 = vld [vmem:[%s12345_s8 + $0x324] sm:$0xf0]  ;;  %v8784_v42 = vld [vmem:[%s12345_s8 + $0x210] sm:$0xf]  ;;  %v8857_v43 = vor.u32 %v10657_v36, %v8856_v34  ;;  %p11166_p1 = scmp.ne.s32.totalorder %s11164_s21, %s11165_s23 }
 0x247   : > { %7592 = vmatpush.bf16.msrb.mxu0 %v8825_v52  ;;  %7586 = vmatmul.bf16.vlgmr.msra.gmra.mxu3 %v12454_v22  ;;  %v8984_v39 = vld [vmem:[%s12345_s8 + $0x3a0] sm:$0xf]  ;;  %v10689_v40 = vld [vmem:[%s12345_s8 + $0x3a4] sm:$0xf0]  ;;  %v8921_v44 = vor.u32 %v10673_v38, %v8920_v37  ;;  %v10639_v45 = vld [vmem:[%s12345_s8 + $0x214] sm:$0xf0] }
 0x248   : > { %7605 = vmatpush.bf16.msrb.mxu1 %v8889_v55  ;;  %v8848_v46 = vld [vmem:[%s12345_s8 + $0x290] sm:$0xf]  ;;  %v10655_v47 = vld [vmem:[%s12345_s8 + $0x294] sm:$0xf0]  ;;  %v8985_v48 = vor.u32 %v10689_v40, %v8984_v39  ;;  %v8776_v53 = vld [vmem:[%s12345_s8 + $0x200] sm:$0xf]  ;;  %v8785_v55 = vor.u32 %v10639_v45, %v8784_v42  ;;  %p11167_p2 = pnand %p11166_p1, %p11288_p5 }
 0x249   : > { %7618 = vmatpush.bf16.msrb.mxu2 %v8953_v56  ;;  %7560 = vmatmul.bf16.vlgmr.msra.gmra.mxu1 %v12459_v26  ;;  %v8912_v49 = vld [vmem:[%s12345_s8 + $0x310] sm:$0xf]  ;;  %v10671_v50 = vld [vmem:[%s12345_s8 + $0x314] sm:$0xf0]  ;;  %v10637_v54 = vld [vmem:[%s12345_s8 + $0x204] sm:$0xf0]  ;;  %v8849_v62 = vor.u32 %v10655_v47, %v8848_v46 }
 0x24a   : > { %7631 = vmatpush.bf16.msrb.mxu3 %v9017_v60  ;;  %v8976_v51 = vld [vmem:[%s12345_s8 + $0x390] sm:$0xf]  ;;  %v10687_v52 = vld [vmem:[%s12345_s8 + $0x394] sm:$0xf0]  ;;  %v8840_v56 = vld [vmem:[%s12345_s8 + $0x280] sm:$0xf]  ;;  %v8913_v63 = vor.u32 %v10671_v50, %v8912_v49  ;;  %v8777_v9 = vor.u32 %v10637_v54, %v8776_v53  ;;  %p11168_p3 = pneg %p11167_p2 }
 0x24b   : > { %7593 = vmatpush.bf16.msrb.mxu0 %v8817_v1  ;;  %v10653_v57 = vld [vmem:[%s12345_s8 + $0x284] sm:$0xf0]  ;;  %v8904_v58 = vld [vmem:[%s12345_s8 + $0x300] sm:$0xf]  ;;  %v12488_v60 = vld [vmem:[#allocation1 + $0x36] sm:$0xff]  ;;  %s11169_s28 = scalar_lea.hbm %s13569_s3, 8 }
 0x24c   : > { %7606 = vmatpush.bf16.msrb.mxu1 %v8881_v2  ;;  %v10669_v59 = vld [vmem:[%s12345_s8 + $0x304] sm:$0xf0]  ;;  %v4386_v61 = vld [vmem:[%s13566_s0 + $0x8] sm:$0xff]  ;;  %v12495_v1 = vld [vmem:[#allocation1 + $0x3f] sm:$0xff]  ;;  %v8841_v13 = vor.u32 %v10653_v57, %v8840_v56  ;;  %p11171_p6 = scmp.lt.s32.totalorder %s11169_s28, %s11165_s23 }
 0x24d   : > { %7619 = vmatpush.bf16.msrb.mxu2 %v8945_v3  ;;  %v12493_v0 = vld [vmem:[#allocation1 + $0x24] sm:$0xff]  ;;  %v12497_v2 = vld [vmem:[#allocation1 + $0x2d] sm:$0xff]  ;;  %v8977_v3 = vor.u32 %v10687_v52, %v8976_v51  ;;  %v9088_v6 = vld [vmem:[%s12345_s8 + $0x470] sm:$0xf] }
 0x24e   : > { %7632 = vmatpush.bf16.msrb.mxu3 %v9009_v7  ;;  %v8968_v4 = vld [vmem:[%s12345_s8 + $0x380] sm:$0xf]  ;;  %v10685_v5 = vld [vmem:[%s12345_s8 + $0x384] sm:$0xf0]  ;;  %4918 = vst [vmem:[#allocation1] ss:$9 sm:$0xff] %v4386_v61  ;;  %p11172_p7 = por %p11171_p6, %p11170_p4 }
 0x24f   : > { %7594 = vmatpush.bf16.msrb.mxu0 %v8809_v14  ;;  %v10715_v7 = vld [vmem:[%s12345_s8 + $0x474] sm:$0xf0]  ;;  %v9152_v8 = vld [vmem:[%s12345_s8 + $0x4f0] sm:$0xf]  ;;  %v8905_v14 = vor.u32 %v10669_v59, %v8904_v58  ;;  %v8969_v17 = vor.u32 %v10685_v5, %v8968_v4  ;;  %v9080_v24 = vld [vmem:[%s12345_s8 + $0x460] sm:$0xf] }
 0x250   : > { %7607 = vmatpush.bf16.msrb.mxu1 %v8873_v18  ;;  %v10731_v10 = vld [vmem:[%s12345_s8 + $0x4f4] sm:$0xf0]  ;;  %v9216_v11 = vld [vmem:[%s12345_s8 + $0x570] sm:$0xf]  ;;  %v9089_v18 = vor.u32 %v10715_v7, %v9088_v6  ;;  %v10713_v25 = vld [vmem:[%s12345_s8 + $0x464] sm:$0xf0]  ;;  %p11173_p8 = pnand %p11172_p7, %p11168_p3 }
 0x251   : > { %7620 = vmatpush.bf16.msrb.mxu2 %v8937_v19  ;;  %v10747_v12 = vld [vmem:[%s12345_s8 + $0x574] sm:$0xf0]  ;;  %v9280_v15 = vld [vmem:[%s12345_s8 + $0x5f0] sm:$0xf]  ;;  %v9153_v19 = vor.u32 %v10731_v10, %v9152_v8  ;;  %v9144_v27 = vld [vmem:[%s12345_s8 + $0x4e0] sm:$0xf]  ;;  %v9081_v34 = vor.u32 %v10713_v25, %v9080_v24 }
 0x252   : > { %7633 = vmatpush.bf16.msrb.mxu3 %v9001_v23  ;;  %v10763_v16 = vld [vmem:[%s12345_s8 + $0x5f4] sm:$0xf0]  ;;  %v9217_v23 = vor.u32 %v10747_v12, %v9216_v11  ;;  %v9272_v32 = vld [vmem:[%s12345_s8 + $0x5e0] sm:$0xf]  ;;  %v10761_v33 = vld [vmem:[%s12345_s8 + $0x5e4] sm:$0xf0] }
 0x253   : > { %7595 = vmatpush.bf16.msrb.mxu0 %v8801_v29  ;;  %v9281_v28 = vor.u32 %v10763_v16, %v9280_v15  ;;  %v10729_v29 = vld [vmem:[%s12345_s8 + $0x4e4] sm:$0xf0]  ;;  %v9072_v37 = vld [vmem:[%s12345_s8 + $0x450] sm:$0xf]  ;;  %v10711_v38 = vld [vmem:[%s12345_s8 + $0x454] sm:$0xf0]  ;;  %v9273_v40 = vor.u32 %v10761_v33, %v9272_v32 }
 0x254   : > { %7608 = vmatpush.bf16.msrb.mxu1 %v8865_v30  ;;  %v9208_v30 = vld [vmem:[%s12345_s8 + $0x560] sm:$0xf]  ;;  %v9136_v39 = vld [vmem:[%s12345_s8 + $0x4d0] sm:$0xf]  ;;  %v10759_v45 = vld [vmem:[%s12345_s8 + $0x5d4] sm:$0xf0]  ;;  %v9073_v46 = vor.u32 %v10711_v38, %v9072_v37 }
 0x255   : > { %7621 = vmatpush.bf16.msrb.mxu2 %v8929_v31  ;;  %v10745_v31 = vld [vmem:[%s12345_s8 + $0x564] sm:$0xf0]  ;;  %v9200_v42 = vld [vmem:[%s12345_s8 + $0x550] sm:$0xf]  ;;  %v9064_v49 = vld [vmem:[%s12345_s8 + $0x440] sm:$0xf] }
 0x256   : > { %7634 = vmatpush.bf16.msrb.mxu3 %v8993_v35  ;;  %v9145_v35 = vor.u32 %v10729_v29, %v9144_v27  ;;  %v9209_v36 = vor.u32 %v10745_v31, %v9208_v30  ;;  %v10709_v50 = vld [vmem:[%s12345_s8 + $0x444] sm:$0xf0]  ;;  %v9128_v51 = vld [vmem:[%s12345_s8 + $0x4c0] sm:$0xf]  ;;  %v10723_v5 = vld [vmem:[%s12345_s8 + $0x4b4] sm:$0xf0] }
 0x257   : > { %7596 = vmatpush.bf16.msrb.mxu0 %v8793_v41  ;;  %v10727_v41 = vld [vmem:[%s12345_s8 + $0x4d4] sm:$0xf0]  ;;  %v10725_v53 = vld [vmem:[%s12345_s8 + $0x4c4] sm:$0xf0]  ;;  %v9192_v54 = vld [vmem:[%s12345_s8 + $0x540] sm:$0xf]  ;;  %v9065_v58 = vor.u32 %v10709_v50, %v9064_v49 }
 0x258   : > { %7609 = vmatpush.bf16.msrb.mxu1 %v8857_v43  ;;  %v10743_v43 = vld [vmem:[%s12345_s8 + $0x554] sm:$0xf0]  ;;  %v9137_v47 = vor.u32 %v10727_v41, %v9136_v39  ;;  %v9256_v56 = vld [vmem:[%s12345_s8 + $0x5c0] sm:$0xf]  ;;  %v10757_v57 = vld [vmem:[%s12345_s8 + $0x5c4] sm:$0xf0]  ;;  %v9129_v59 = vor.u32 %v10725_v53, %v9128_v51 }
 0x259   : > { %7622 = vmatpush.bf16.msrb.mxu2 %v8921_v44  ;;  %v9264_v44 = vld [vmem:[%s12345_s8 + $0x5d0] sm:$0xf]  ;;  %v9257_v4 = vor.u32 %v10757_v57, %v9256_v56  ;;  %v10739_v7 = vld [vmem:[%s12345_s8 + $0x534] sm:$0xf0]  ;;  %v9112_v15 = vld [vmem:[%s12345_s8 + $0x4a0] sm:$0xf] }
 0x25a   : > { %7635 = vmatpush.bf16.msrb.mxu3 %v8985_v48  ;;  %v9201_v48 = vor.u32 %v10743_v43, %v9200_v42  ;;  %v9265_v52 = vor.u32 %v10759_v45, %v9264_v44  ;;  %v9184_v6 = vld [vmem:[%s12345_s8 + $0x530] sm:$0xf]  ;;  %v10753_v24 = vld [vmem:[%s12345_s8 + $0x5a4] sm:$0xf0]  ;;  %v10703_v30 = vld [vmem:[%s12345_s8 + $0x414] sm:$0xf0] }
 0x25b   : > { %7597 = vmatpush.bf16.msrb.mxu0 %v8785_v55  ;;  %v10741_v55 = vld [vmem:[%s12345_s8 + $0x544] sm:$0xf0]  ;;  %v9248_v8 = vld [vmem:[%s12345_s8 + $0x5b0] sm:$0xf]  ;;  %v9185_v12 = vor.u32 %v10739_v7, %v9184_v6  ;;  %v10719_v33 = vld [vmem:[%s12345_s8 + $0x494] sm:$0xf0] }
 0x25c   : > { %7610 = vmatpush.bf16.msrb.mxu1 %v8849_v62  ;;  %v9193_v61 = vor.u32 %v10741_v55, %v9192_v54  ;;  %v9056_v62 = vld [vmem:[%s12345_s8 + $0x430] sm:$0xf]  ;;  %v10751_v37 = vld [vmem:[%s12345_s8 + $0x594] sm:$0xf0]  ;;  %v9032_v39 = vld [vmem:[%s12345_s8 + $0x400] sm:$0xf] }
 0x25d   : > { %7623 = vmatpush.bf16.msrb.mxu2 %v8913_v63  ;;  %v10707_v63 = vld [vmem:[%s12345_s8 + $0x434] sm:$0xf0]  ;;  %v9040_v29 = vld [vmem:[%s12345_s8 + $0x410] sm:$0xf]  ;;  %v9096_v43 = vld [vmem:[%s12345_s8 + $0x480] sm:$0xf] }
 0x25e   : > { %7636 = vmatpush.bf16.msrb.mxu3 %v8977_v3  ;;  %v9120_v3 = vld [vmem:[%s12345_s8 + $0x4b0] sm:$0xf]  ;;  %v9057_v10 = vor.u32 %v10707_v63, %v9056_v62  ;;  %v9041_v38 = vor.u32 %v10703_v30, %v9040_v29  ;;  %v10717_v44 = vld [vmem:[%s12345_s8 + $0x484] sm:$0xf0]  ;;  %v9160_v45 = vld [vmem:[%s12345_s8 + $0x500] sm:$0xf] }
 0x25f   : > { %7598 = vmatpush.bf16.msrb.mxu0 %v8777_v9  ;;  %v10755_v9 = vld [vmem:[%s12345_s8 + $0x5b4] sm:$0xf0]  ;;  %v9121_v11 = vor.u32 %v10723_v5, %v9120_v3  ;;  %v9104_v31 = vld [vmem:[%s12345_s8 + $0x490] sm:$0xf]  ;;  %v10749_v49 = vld [vmem:[%s12345_s8 + $0x584] sm:$0xf0]  ;;  %v9097_v57 = vor.u32 %v10717_v44, %v9096_v43 }
 0x260   : > { %7611 = vmatpush.bf16.msrb.mxu1 %v8841_v13  ;;  %v9048_v13 = vld [vmem:[%s12345_s8 + $0x420] sm:$0xf]  ;;  %v9249_v16 = vor.u32 %v10755_v9, %v9248_v8  ;;  %v9105_v41 = vor.u32 %v10719_v33, %v9104_v31  ;;  %v9344_v50 = vld [vmem:[%s12345_s8 + $0x670] sm:$0xf]  ;;  %v10779_v51 = vld [vmem:[%s12345_s8 + $0x674] sm:$0xf0] }
 0x261   : > { %7624 = vmatpush.bf16.msrb.mxu2 %v8905_v14  ;;  %v10705_v14 = vld [vmem:[%s12345_s8 + $0x424] sm:$0xf0]  ;;  %v10795_v54 = vld [vmem:[%s12345_s8 + $0x6f4] sm:$0xf0]  ;;  %v9472_v55 = vld [vmem:[%s12345_s8 + $0x770] sm:$0xf]  ;;  %v9345_v63 = vor.u32 %v10779_v51, %v9344_v50 }
 0x262   : > { %7637 = vmatpush.bf16.msrb.mxu3 %v8969_v17  ;;  %7599 = vmatmul.bf16.vlgmr.msrb.gmra.mxu0 %v12493_v0  ;;  %v10721_v17 = vld [vmem:[%s12345_s8 + $0x4a4] sm:$0xf0]  ;;  %v9049_v25 = vor.u32 %v10705_v14, %v9048_v13  ;;  %v10811_v56 = vld [vmem:[%s12345_s8 + $0x774] sm:$0xf0]  ;;  %v9336_v5 = vld [vmem:[%s12345_s8 + $0x660] sm:$0xf] }
 0x263   : > { %7643 = vmatpush.bf16.msra.mxu0 %v9089_v18  ;;  %7612 = vmatmul.bf16.vlgmr.msrb.gmra.mxu1 %v12497_v2  ;;  %v9176_v18 = vld [vmem:[%s12345_s8 + $0x520] sm:$0xf]  ;;  %v9113_v27 = vor.u32 %v10721_v17, %v9112_v15  ;;  %v10777_v6 = vld [vmem:[%s12345_s8 + $0x664] sm:$0xf0]  ;;  %v12591_v17 = vld [vmem:[#allocation1 + $0x1b] sm:$0xff] }
 0x264   : > { %7656 = vmatpush.bf16.msra.mxu1 %v9153_v19  ;;  %7625 = vmatmul.bf16.vlgmr.msrb.gmra.mxu2 %v12488_v60  ;;  %v10737_v19 = vld [vmem:[%s12345_s8 + $0x524] sm:$0xf0]  ;;  %v9400_v7 = vld [vmem:[%s12345_s8 + $0x6e0] sm:$0xf]  ;;  %v10791_v29 = vld [vmem:[%s12345_s8 + $0x6d4] sm:$0xf0] }
 0x265   : > { %7669 = vmatpush.bf16.msra.mxu2 %v9217_v23  ;;  %7638 = vmatmul.bf16.vlgmr.msrb.gmra.mxu3 %v12495_v1  ;;  %v9240_v23 = vld [vmem:[%s12345_s8 + $0x5a0] sm:$0xf]  ;;  %v10793_v9 = vld [vmem:[%s12345_s8 + $0x6e4] sm:$0xf0]  ;;  %v9456_v30 = vld [vmem:[%s12345_s8 + $0x750] sm:$0xf] }
 0x266   : > { %7682 = vmatpush.bf16.msra.mxu3 %v9281_v28  ;;  %v9177_v28 = vor.u32 %v10737_v19, %v9176_v18  ;;  %v9241_v32 = vor.u32 %v10753_v24, %v9240_v23  ;;  %v9528_v13 = vld [vmem:[%s12345_s8 + $0x7e0] sm:$0xf]  ;;  %v10825_v14 = vld [vmem:[%s12345_s8 + $0x7e4] sm:$0xf0]  ;;  %v9337_v18 = vor.u32 %v10777_v6, %v9336_v5  ;;  %v9401_v19 = vor.u32 %v10793_v9, %v9400_v7  ;;  %v9328_v24 = vld [vmem:[%s12345_s8 + $0x650] sm:$0xf] }
 0x267   : > { %7644 = vmatpush.bf16.msra.mxu0 %v9081_v34  ;;  %v9168_v34 = vld [vmem:[%s12345_s8 + $0x510] sm:$0xf]  ;;  %v10807_v31 = vld [vmem:[%s12345_s8 + $0x754] sm:$0xf0]  ;;  %v10805_v43 = vld [vmem:[%s12345_s8 + $0x744] sm:$0xf0] }
 0x268   : > { %7657 = vmatpush.bf16.msra.mxu1 %v9145_v35  ;;  %v10735_v35 = vld [vmem:[%s12345_s8 + $0x514] sm:$0xf0]  ;;  %v12587_v15 = vld [vmem:[#allocation1 + $0x12] sm:$0xff]  ;;  %v9512_v44 = vld [vmem:[%s12345_s8 + $0x7c0] sm:$0xf] }
 0x269   : > { %7670 = vmatpush.bf16.msra.mxu2 %v9209_v36  ;;  %v9232_v36 = vld [vmem:[%s12345_s8 + $0x590] sm:$0xf]  ;;  %v9169_v42 = vor.u32 %v10735_v35, %v9168_v34  ;;  %v10823_v33 = vld [vmem:[%s12345_s8 + $0x7d4] sm:$0xf0]  ;;  %v10785_v5 = vld [vmem:[%s12345_s8 + $0x6a4] sm:$0xf0] }
 0x26a   : > { %7683 = vmatpush.bf16.msra.mxu3 %v9273_v40  ;;  %v10701_v40 = vld [vmem:[%s12345_s8 + $0x404] sm:$0xf0]  ;;  %v10771_v50 = vld [vmem:[%s12345_s8 + $0x634] sm:$0xf0]  ;;  %v9376_v51 = vld [vmem:[%s12345_s8 + $0x6b0] sm:$0xf] }
 0x26b   : > { %7645 = vmatpush.bf16.msra.mxu0 %v9073_v46  ;;  %v9233_v46 = vor.u32 %v10751_v37, %v9232_v36  ;;  %v9033_v53 = vor.u32 %v10701_v40, %v9032_v39  ;;  %v9457_v36 = vor.u32 %v10807_v31, %v9456_v30  ;;  %v9320_v37 = vld [vmem:[%s12345_s8 + $0x640] sm:$0xf]  ;;  %v10801_v7 = vld [vmem:[%s12345_s8 + $0x724] sm:$0xf0] }
 0x26c   : > { %7658 = vmatpush.bf16.msra.mxu1 %v9137_v47  ;;  %v10733_v47 = vld [vmem:[%s12345_s8 + $0x504] sm:$0xf0]  ;;  %v9384_v39 = vld [vmem:[%s12345_s8 + $0x6c0] sm:$0xf] }
 0x26d   : > { %7671 = vmatpush.bf16.msra.mxu2 %v9201_v48  ;;  %v9224_v48 = vld [vmem:[%s12345_s8 + $0x580] sm:$0xf]  ;;  %v10817_v9 = vld [vmem:[%s12345_s8 + $0x7a4] sm:$0xf0] }
 0x26e   : > { %7684 = vmatpush.bf16.msra.mxu3 %v9265_v52  ;;  %v9408_v52 = vld [vmem:[%s12345_s8 + $0x6f0] sm:$0xf]  ;;  %v9225_v62 = vor.u32 %v10749_v49, %v9224_v48  ;;  %v9432_v6 = vld [vmem:[%s12345_s8 + $0x720] sm:$0xf]  ;;  %v10765_v31 = vld [vmem:[%s12345_s8 + $0x604] sm:$0xf0] }
 0x26f   : > { %7646 = vmatpush.bf16.msra.mxu0 %v9065_v58  ;;  %v9161_v58 = vor.u32 %v10733_v47, %v9160_v45  ;;  %v9409_v3 = vor.u32 %v10795_v54, %v9408_v52  ;;  %v10821_v45 = vld [vmem:[%s12345_s8 + $0x7c4] sm:$0xf0]  ;;  %v9312_v49 = vld [vmem:[%s12345_s8 + $0x630] sm:$0xf]  ;;  %v9288_v30 = vld [vmem:[%s12345_s8 + $0x600] sm:$0xf] }
 0x270   : > { %7659 = vmatpush.bf16.msra.mxu1 %v9129_v59  ;;  %v9536_v59 = vld [vmem:[%s12345_s8 + $0x7f0] sm:$0xf]  ;;  %v9513_v52 = vor.u32 %v10821_v45, %v9512_v44  ;;  %v10859_v45 = vld [vmem:[%s12345_s8 + $0x8f4] sm:$0xf0] }
 0x271   : > { %7672 = vmatpush.bf16.msra.mxu2 %v9193_v61  ;;  %v10827_v61 = vld [vmem:[%s12345_s8 + $0x7f4] sm:$0xf0]  ;;  %v9440_v54 = vld [vmem:[%s12345_s8 + $0x730] sm:$0xf] }
 0x272   : > { %7685 = vmatpush.bf16.msra.mxu3 %v9257_v4  ;;  %v9473_v4 = vor.u32 %v10811_v56, %v9472_v55  ;;  %v9537_v8 = vor.u32 %v10827_v61, %v9536_v59  ;;  %v10803_v55 = vld [vmem:[%s12345_s8 + $0x734] sm:$0xf0]  ;;  %v9504_v56 = vld [vmem:[%s12345_s8 + $0x7b0] sm:$0xf] }
 0x273   : > { %7647 = vmatpush.bf16.msra.mxu0 %v9057_v10  ;;  %v9464_v10 = vld [vmem:[%s12345_s8 + $0x760] sm:$0xf]  ;;  %v9441_v61 = vor.u32 %v10803_v55, %v9440_v54  ;;  %v9664_v44 = vld [vmem:[%s12345_s8 + $0x8f0] sm:$0xf] }
 0x274   : > { %7660 = vmatpush.bf16.msra.mxu1 %v9121_v11  ;;  %v10809_v11 = vld [vmem:[%s12345_s8 + $0x764] sm:$0xf0] }
 0x275   : > { %7673 = vmatpush.bf16.msra.mxu2 %v9185_v12  ;;  %v12583_v12 = vld [vmem:[#allocation1] sm:$0xff]  ;;  %v9465_v23 = vor.u32 %v10809_v11, %v9464_v10  ;;  %v9296_v11 = vld [vmem:[%s12345_s8 + $0x610] sm:$0xf] }
 0x276   : > { %7686 = vmatpush.bf16.msra.mxu3 %v9249_v16  ;;  %v12589_v16 = vld [vmem:[#allocation1 + $0x9] sm:$0xff] }
 0x277   : > { %7648 = vmatpush.bf16.msra.mxu0 %v9049_v25  ;;  %v10775_v25 = vld [vmem:[%s12345_s8 + $0x654] sm:$0xf0] }
 0x278   : > { %7661 = vmatpush.bf16.msra.mxu1 %v9113_v27  ;;  %v9392_v27 = vld [vmem:[%s12345_s8 + $0x6d0] sm:$0xf]  ;;  %v9329_v34 = vor.u32 %v10775_v25, %v9328_v24 }
 0x279   : > { %7674 = vmatpush.bf16.msra.mxu2 %v9177_v28  ;;  %v9529_v28 = vor.u32 %v10825_v14, %v9528_v13  ;;  %v9393_v35 = vor.u32 %v10791_v29, %v9392_v27  ;;  %v9433_v14 = vor.u32 %v10801_v7, %v9432_v6  ;;  %v9424_v25 = vld [vmem:[%s12345_s8 + $0x710] sm:$0xf]  ;;  %v10799_v27 = vld [vmem:[%s12345_s8 + $0x714] sm:$0xf0]  ;;  %v10857_v6 = vld [vmem:[%s12345_s8 + $0x8e4] sm:$0xf0] }
 0x27a   : > { %7687 = vmatpush.bf16.msra.mxu3 %v9241_v32  ;;  %v9520_v32 = vld [vmem:[%s12345_s8 + $0x7d0] sm:$0xf]  ;;  %v10815_v29 = vld [vmem:[%s12345_s8 + $0x794] sm:$0xf0]  ;;  %v9720_v7 = vld [vmem:[%s12345_s8 + $0x960] sm:$0xf] }
 0x27b   : > { %7649 = vmatpush.bf16.msra.mxu0 %v9041_v38  ;;  %v10773_v38 = vld [vmem:[%s12345_s8 + $0x644] sm:$0xf0]  ;;  %v9521_v40 = vor.u32 %v10823_v33, %v9520_v32  ;;  %v9352_v33 = vld [vmem:[%s12345_s8 + $0x680] sm:$0xf] }
 0x27c   : > { %7662 = vmatpush.bf16.msra.mxu1 %v9105_v41  ;;  %v10789_v41 = vld [vmem:[%s12345_s8 + $0x6c4] sm:$0xf0] }
 0x27d   : > { %7675 = vmatpush.bf16.msra.mxu2 %v9169_v42  ;;  %v9448_v42 = vld [vmem:[%s12345_s8 + $0x740] sm:$0xf]  ;;  %v9385_v47 = vor.u32 %v10789_v41, %v9384_v39  ;;  %v9600_v41 = vld [vmem:[%s12345_s8 + $0x870] sm:$0xf] }
 0x27e   : > { %7688 = vmatpush.bf16.msra.mxu3 %v9233_v46  ;;  %v9321_v46 = vor.u32 %v10773_v38, %v9320_v37  ;;  %v9449_v48 = vor.u32 %v10805_v43, %v9448_v42  ;;  %v9425_v38 = vor.u32 %v10799_v27, %v9424_v25  ;;  %v9480_v39 = vld [vmem:[%s12345_s8 + $0x780] sm:$0xf]  ;;  %v10843_v42 = vld [vmem:[%s12345_s8 + $0x874] sm:$0xf0]  ;;  %v9712_v27 = vld [vmem:[%s12345_s8 + $0x950] sm:$0xf] }
 0x27f   : > { %7650 = vmatpush.bf16.msra.mxu0 %v9033_v53  ;;  %v10787_v53 = vld [vmem:[%s12345_s8 + $0x6b4] sm:$0xf0] }
 0x280   : > { %7663 = vmatpush.bf16.msra.mxu1 %v9097_v57  ;;  %v10819_v57 = vld [vmem:[%s12345_s8 + $0x7b4] sm:$0xf0]  ;;  %v9377_v59 = vor.u32 %v10787_v53, %v9376_v51  ;;  %v9289_v51 = vor.u32 %v10765_v31, %v9288_v30 }
 0x281   : > { %7676 = vmatpush.bf16.msra.mxu2 %v9161_v58  ;;  %v9313_v58 = vor.u32 %v10771_v50, %v9312_v49  ;;  %v12655_v49 = vld [vmem:[#allocation1 + $0x3f] sm:$0xff]  ;;  %v4387_v50 = vld [vmem:[%s13566_s0 + $0x10] sm:$0xff] }
 0x282   : > { %7689 = vmatpush.bf16.msra.mxu3 %v9225_v62  ;;  %7651 = vmatmul.bf16.vlgmr.msra.gmra.mxu0 %v12583_v12  ;;  %v9304_v62 = vld [vmem:[%s12345_s8 + $0x620] sm:$0xf]  ;;  %v10875_v53 = vld [vmem:[%s12345_s8 + $0x974] sm:$0xf0] }
 0x283   : > { %7695 = vmatpush.bf16.msrb.mxu0 %v9345_v63  ;;  %7664 = vmatmul.bf16.vlgmr.msra.gmra.mxu1 %v12589_v16  ;;  %v10769_v63 = vld [vmem:[%s12345_s8 + $0x624] sm:$0xf0]  ;;  %v10855_v25 = vld [vmem:[%s12345_s8 + $0x8d4] sm:$0xf0] }
 0x284   : > { %7708 = vmatpush.bf16.msrb.mxu1 %v9409_v3  ;;  %7677 = vmatmul.bf16.vlgmr.msra.gmra.mxu2 %v12587_v15  ;;  %v9368_v3 = vld [vmem:[%s12345_s8 + $0x6a0] sm:$0xf]  ;;  %v9305_v10 = vor.u32 %v10769_v63, %v9304_v62  ;;  %v10887_v30 = vld [vmem:[%s12345_s8 + $0x9d4] sm:$0xf0] }
 0x285   : > { %7721 = vmatpush.bf16.msrb.mxu2 %v9473_v4  ;;  %7690 = vmatmul.bf16.vlgmr.msra.gmra.mxu3 %v12591_v17  ;;  %v9505_v4 = vor.u32 %v10819_v57, %v9504_v56  ;;  %v9369_v13 = vor.u32 %v10785_v5, %v9368_v3  ;;  %v9792_v56 = vld [vmem:[%s12345_s8 + $0x9f0] sm:$0xf]  ;;  %v10891_v57 = vld [vmem:[%s12345_s8 + $0x9f4] sm:$0xf0]  ;;  %v9592_v63 = vld [vmem:[%s12345_s8 + $0x860] sm:$0xf] }
 0x286   : > { %7734 = vmatpush.bf16.msrb.mxu3 %v9537_v8  ;;  %v9496_v8 = vld [vmem:[%s12345_s8 + $0x7a0] sm:$0xf]  ;;  %v10841_v3 = vld [vmem:[%s12345_s8 + $0x864] sm:$0xf0]  ;;  %v9793_v5 = vor.u32 %v10891_v57, %v9792_v56  ;;  %v10867_v56 = vld [vmem:[%s12345_s8 + $0x934] sm:$0xf0] }
 0x287   : > { %7696 = vmatpush.bf16.msrb.mxu0 %v9337_v18  ;;  %v10767_v18 = vld [vmem:[%s12345_s8 + $0x614] sm:$0xf0]  ;;  %v9497_v24 = vor.u32 %v10817_v9, %v9496_v8  ;;  %v10873_v8 = vld [vmem:[%s12345_s8 + $0x964] sm:$0xf0]  ;;  %v9784_v9 = vld [vmem:[%s12345_s8 + $0x9e0] sm:$0xf] }
 0x288   : > { %7709 = vmatpush.bf16.msrb.mxu1 %v9401_v19  ;;  %v9360_v19 = vld [vmem:[%s12345_s8 + $0x690] sm:$0xf]  ;;  %v9297_v32 = vor.u32 %v10767_v18, %v9296_v11  ;;  %v9593_v11 = vor.u32 %v10841_v3, %v9592_v63  ;;  %v9560_v63 = vld [vmem:[%s12345_s8 + $0x820] sm:$0xf]  ;;  %v10833_v3 = vld [vmem:[%s12345_s8 + $0x824] sm:$0xf0] }
 0x289   : > { %7722 = vmatpush.bf16.msrb.mxu2 %v9465_v23  ;;  %v10783_v23 = vld [vmem:[%s12345_s8 + $0x694] sm:$0xf0]  ;;  %v9584_v18 = vld [vmem:[%s12345_s8 + $0x850] sm:$0xf] }
 0x28a   : > { %7735 = vmatpush.bf16.msrb.mxu3 %v9529_v28  ;;  %v9488_v28 = vld [vmem:[%s12345_s8 + $0x790] sm:$0xf]  ;;  %v9361_v37 = vor.u32 %v10783_v23, %v9360_v19  ;;  %v10839_v19 = vld [vmem:[%s12345_s8 + $0x854] sm:$0xf0] }
 0x28b   : > { %7697 = vmatpush.bf16.msrb.mxu0 %v9329_v34  ;;  %v10781_v34 = vld [vmem:[%s12345_s8 + $0x684] sm:$0xf0]  ;;  %v9489_v43 = vor.u32 %v10815_v29, %v9488_v28  ;;  %v9648_v23 = vld [vmem:[%s12345_s8 + $0x8d0] sm:$0xf]  ;;  %v10871_v28 = vld [vmem:[%s12345_s8 + $0x954] sm:$0xf0]  ;;  %v9585_v31 = vor.u32 %v10839_v19, %v9584_v18 }
 0x28c   : > { %7710 = vmatpush.bf16.msrb.mxu1 %v9393_v35  ;;  %v9416_v35 = vld [vmem:[%s12345_s8 + $0x700] sm:$0xf]  ;;  %v9353_v54 = vor.u32 %v10781_v34, %v9352_v33  ;;  %v9776_v29 = vld [vmem:[%s12345_s8 + $0x9d0] sm:$0xf]  ;;  %v9713_v33 = vor.u32 %v10871_v28, %v9712_v27  ;;  %v10831_v19 = vld [vmem:[%s12345_s8 + $0x814] sm:$0xf0] }
 0x28d   : > { %7723 = vmatpush.bf16.msrb.mxu2 %v9457_v36  ;;  %v10797_v36 = vld [vmem:[%s12345_s8 + $0x704] sm:$0xf0]  ;;  %v9576_v34 = vld [vmem:[%s12345_s8 + $0x840] sm:$0xf]  ;;  %v9760_v57 = vld [vmem:[%s12345_s8 + $0x9b0] sm:$0xf] }
 0x28e   : > { %7736 = vmatpush.bf16.msrb.mxu3 %v9521_v40  ;;  %v10813_v40 = vld [vmem:[%s12345_s8 + $0x784] sm:$0xf0]  ;;  %v9417_v55 = vor.u32 %v10797_v36, %v9416_v35  ;;  %v9640_v36 = vld [vmem:[%s12345_s8 + $0x8c0] sm:$0xf]  ;;  %v9552_v18 = vld [vmem:[%s12345_s8 + $0x810] sm:$0xf] }
 0x28f   : > { %7698 = vmatpush.bf16.msrb.mxu0 %v9321_v46  ;;  %v12649_v46 = vld [vmem:[#allocation1 + $0x24] sm:$0xff]  ;;  %v10837_v35 = vld [vmem:[%s12345_s8 + $0x844] sm:$0xf0]  ;;  %v9680_v27 = vld [vmem:[%s12345_s8 + $0x910] sm:$0xf] }
 0x290   : > { %7711 = vmatpush.bf16.msrb.mxu1 %v9385_v47  ;;  %v12651_v47 = vld [vmem:[#allocation1 + $0x36] sm:$0xff]  ;;  %v10863_v28 = vld [vmem:[%s12345_s8 + $0x914] sm:$0xf0] }
 0x291   : > { %7724 = vmatpush.bf16.msrb.mxu2 %v9449_v48  ;;  %v12653_v48 = vld [vmem:[#allocation1 + $0x2d] sm:$0xff] }
 0x292   : > { %7737 = vmatpush.bf16.msrb.mxu3 %v9513_v52  ;;  %v9728_v52 = vld [vmem:[%s12345_s8 + $0x970] sm:$0xf]  ;;  %4928 = vst [vmem:[#allocation1] ss:$9 sm:$0xff] %v4387_v50 }
 0x293   : > { %7699 = vmatpush.bf16.msrb.mxu0 %v9313_v58  ;;  %v9481_v58 = vor.u32 %v10813_v40, %v9480_v39  ;;  %v9729_v62 = vor.u32 %v10875_v53, %v9728_v52  ;;  %v9704_v39 = vld [vmem:[%s12345_s8 + $0x940] sm:$0xf]  ;;  %v10869_v40 = vld [vmem:[%s12345_s8 + $0x944] sm:$0xf0]  ;;  %v9568_v50 = vld [vmem:[%s12345_s8 + $0x830] sm:$0xf] }
 0x294   : > { %7712 = vmatpush.bf16.msrb.mxu1 %v9377_v59  ;;  %v9601_v59 = vor.u32 %v10843_v42, %v9600_v41  ;;  %v9768_v41 = vld [vmem:[%s12345_s8 + $0x9c0] sm:$0xf]  ;;  %v10885_v42 = vld [vmem:[%s12345_s8 + $0x9c4] sm:$0xf0]  ;;  %v9632_v52 = vld [vmem:[%s12345_s8 + $0x8b0] sm:$0xf] }
 0x295   : > { %7725 = vmatpush.bf16.msrb.mxu2 %v9441_v61  ;;  %v9665_v61 = vor.u32 %v10859_v45, %v9664_v44  ;;  %v9705_v45 = vor.u32 %v10869_v40, %v9704_v39  ;;  %v9769_v53 = vor.u32 %v10885_v42, %v9768_v41  ;;  %v10861_v40 = vld [vmem:[%s12345_s8 + $0x904] sm:$0xf0]  ;;  %v9736_v41 = vld [vmem:[%s12345_s8 + $0x980] sm:$0xf] }
 0x296   : > { %7738 = vmatpush.bf16.msrb.mxu3 %v9505_v4  ;;  %v9656_v4 = vld [vmem:[%s12345_s8 + $0x8e0] sm:$0xf]  ;;  %v10877_v42 = vld [vmem:[%s12345_s8 + $0x984] sm:$0xf0] }
 0x297   : > { %7700 = vmatpush.bf16.msrb.mxu0 %v9305_v10  ;;  %v10889_v10 = vld [vmem:[%s12345_s8 + $0x9e4] sm:$0xf0] }
 0x298   : > { %7713 = vmatpush.bf16.msrb.mxu1 %v9369_v13  ;;  %v9657_v13 = vor.u32 %v10857_v6, %v9656_v4  ;;  %v9624_v4 = vld [vmem:[%s12345_s8 + $0x8a0] sm:$0xf]  ;;  %v10849_v6 = vld [vmem:[%s12345_s8 + $0x8a4] sm:$0xf0] }
 0x299   : > { %7726 = vmatpush.bf16.msrb.mxu2 %v9433_v14  ;;  %v9721_v14 = vor.u32 %v10873_v8, %v9720_v7  ;;  %v9688_v7 = vld [vmem:[%s12345_s8 + $0x920] sm:$0xf]  ;;  %v10865_v8 = vld [vmem:[%s12345_s8 + $0x924] sm:$0xf0] }
 0x29a   : > { %7739 = vmatpush.bf16.msrb.mxu3 %v9497_v24  ;;  %v9785_v24 = vor.u32 %v10889_v10, %v9784_v9  ;;  %v9752_v9 = vld [vmem:[%s12345_s8 + $0x9a0] sm:$0xf]  ;;  %v10881_v10 = vld [vmem:[%s12345_s8 + $0x9a4] sm:$0xf0] }
 0x29b   : > { %7701 = vmatpush.bf16.msrb.mxu0 %v9297_v32  ;;  %v9649_v32 = vor.u32 %v10855_v25, %v9648_v23  ;;  %v9616_v23 = vld [vmem:[%s12345_s8 + $0x890] sm:$0xf]  ;;  %v10847_v25 = vld [vmem:[%s12345_s8 + $0x894] sm:$0xf0] }
 0x29c   : > { %7714 = vmatpush.bf16.msrb.mxu1 %v9361_v37  ;;  %v9777_v37 = vor.u32 %v10887_v30, %v9776_v29  ;;  %v9744_v29 = vld [vmem:[%s12345_s8 + $0x990] sm:$0xf]  ;;  %v10879_v30 = vld [vmem:[%s12345_s8 + $0x994] sm:$0xf0] }
 0x29d   : > { %7727 = vmatpush.bf16.msrb.mxu2 %v9425_v38  ;;  %v10853_v38 = vld [vmem:[%s12345_s8 + $0x8c4] sm:$0xf0]  ;;  %v9745_v39 = vor.u32 %v10879_v30, %v9744_v29  ;;  %v10919_v30 = vld [vmem:[%s12345_s8 + $0xad4] sm:$0xf0] }
 0x29e   : > { %7740 = vmatpush.bf16.msrb.mxu3 %v9489_v43  ;;  %v9577_v43 = vor.u32 %v10837_v35, %v9576_v34  ;;  %v9641_v44 = vor.u32 %v10853_v38, %v9640_v36  ;;  %v9617_v34 = vor.u32 %v10847_v25, %v9616_v23  ;;  %v9681_v35 = vor.u32 %v10863_v28, %v9680_v27  ;;  %v9608_v36 = vld [vmem:[%s12345_s8 + $0x880] sm:$0xf]  ;;  %v9840_v25 = vld [vmem:[%s12345_s8 + $0xa50] sm:$0xf]  ;;  %v10903_v27 = vld [vmem:[%s12345_s8 + $0xa54] sm:$0xf0] }
 0x29f   : > { %7702 = vmatpush.bf16.msrb.mxu0 %v9289_v51  ;;  %v10835_v51 = vld [vmem:[%s12345_s8 + $0x834] sm:$0xf0]  ;;  %v9672_v38 = vld [vmem:[%s12345_s8 + $0x900] sm:$0xf]  ;;  %v9904_v28 = vld [vmem:[%s12345_s8 + $0xad0] sm:$0xf] }
 0x2a0   : > { %7715 = vmatpush.bf16.msrb.mxu1 %v9353_v54  ;;  %v10851_v54 = vld [vmem:[%s12345_s8 + $0x8b4] sm:$0xf0] }
 0x2a1   : > { %7728 = vmatpush.bf16.msrb.mxu2 %v9417_v55  ;;  %v9696_v55 = vld [vmem:[%s12345_s8 + $0x930] sm:$0xf] }
 0x2a2   : > { %7741 = vmatpush.bf16.msrb.mxu3 %v9481_v58  ;;  %7703 = vmatmul.bf16.vlgmr.msrb.gmra.mxu0 %v12649_v46  ;;  %v10883_v58 = vld [vmem:[%s12345_s8 + $0x9b4] sm:$0xf0] }
 0x2a3   : > { %7747 = vmatpush.bf16.msra.mxu0 %v9601_v59  ;;  %7716 = vmatmul.bf16.vlgmr.msrb.gmra.mxu1 %v12653_v48  ;;  %v9569_v59 = vor.u32 %v10835_v51, %v9568_v50  ;;  %v10923_v51 = vld [vmem:[%s12345_s8 + $0xaf4] sm:$0xf0] }
 0x2a4   : > { %7760 = vmatpush.bf16.msra.mxu1 %v9665_v61  ;;  %7729 = vmatmul.bf16.vlgmr.msrb.gmra.mxu2 %v12651_v47  ;;  %v9633_v61 = vor.u32 %v10851_v54, %v9632_v52  ;;  %v9984_v52 = vld [vmem:[%s12345_s8 + $0xb70] sm:$0xf] }
 0x2a5   : > { %7773 = vmatpush.bf16.msra.mxu2 %v9729_v62  ;;  %7742 = vmatmul.bf16.vlgmr.msrb.gmra.mxu3 %v12655_v49  ;;  %v9697_v62 = vor.u32 %v10867_v56, %v9696_v55  ;;  %v9673_v55 = vor.u32 %v10861_v40, %v9672_v38  ;;  %v10048_v56 = vld [vmem:[%s12345_s8 + $0xbf0] sm:$0xf]  ;;  %v9832_v38 = vld [vmem:[%s12345_s8 + $0xa40] sm:$0xf] }
 0x2a6   : > { %7786 = vmatpush.bf16.msra.mxu3 %v9793_v5  ;;  %v9761_v5 = vor.u32 %v10883_v58, %v9760_v57  ;;  %v10955_v57 = vld [vmem:[%s12345_s8 + $0xbf4] sm:$0xf0]  ;;  %v9737_v58 = vor.u32 %v10877_v42, %v9736_v41  ;;  %v9896_v40 = vld [vmem:[%s12345_s8 + $0xac0] sm:$0xf]  ;;  %v10917_v42 = vld [vmem:[%s12345_s8 + $0xac4] sm:$0xf0] }
 0x2a7   : > { %7748 = vmatpush.bf16.msra.mxu0 %v9593_v11  ;;  %v9561_v11 = vor.u32 %v10833_v3, %v9560_v63  ;;  %v9848_v63 = vld [vmem:[%s12345_s8 + $0xa60] sm:$0xf]  ;;  %v10905_v3 = vld [vmem:[%s12345_s8 + $0xa64] sm:$0xf0] }
 0x2a8   : > { %7761 = vmatpush.bf16.msra.mxu1 %v9657_v13  ;;  %v9625_v13 = vor.u32 %v10849_v6, %v9624_v4  ;;  %v9912_v4 = vld [vmem:[%s12345_s8 + $0xae0] sm:$0xf]  ;;  %v10921_v6 = vld [vmem:[%s12345_s8 + $0xae4] sm:$0xf0] }
 0x2a9   : > { %7774 = vmatpush.bf16.msra.mxu2 %v9721_v14  ;;  %v9689_v14 = vor.u32 %v10865_v8, %v9688_v7  ;;  %v9976_v7 = vld [vmem:[%s12345_s8 + $0xb60] sm:$0xf]  ;;  %v10937_v8 = vld [vmem:[%s12345_s8 + $0xb64] sm:$0xf0]  ;;  %v9913_v23 = vor.u32 %v10921_v6, %v9912_v4 }
 0x2aa   : > { %7787 = vmatpush.bf16.msra.mxu3 %v9785_v24  ;;  %v9753_v24 = vor.u32 %v10881_v10, %v9752_v9  ;;  %v12739_v9 = vld [vmem:[#allocation1] sm:$0xff]  ;;  %v10040_v10 = vld [vmem:[%s12345_s8 + $0xbe0] sm:$0xf] }
 0x2ab   : > { %7749 = vmatpush.bf16.msra.mxu0 %v9585_v31  ;;  %v9553_v31 = vor.u32 %v10831_v19, %v9552_v18  ;;  %v12753_v18 = vld [vmem:[#allocation1 + $0x1b] sm:$0xff]  ;;  %v9849_v19 = vor.u32 %v10905_v3, %v9848_v63 }
 0x2ac   : > { %7762 = vmatpush.bf16.msra.mxu1 %v9649_v32  ;;  %v9544_v32 = vld [vmem:[%s12345_s8 + $0x800] sm:$0xf]  ;;  %v10016_v63 = vld [vmem:[%s12345_s8 + $0xbb0] sm:$0xf]  ;;  %v10947_v3 = vld [vmem:[%s12345_s8 + $0xbb4] sm:$0xf0] }
 0x2ad   : > { %7775 = vmatpush.bf16.msra.mxu2 %v9713_v33  ;;  %v10829_v33 = vld [vmem:[%s12345_s8 + $0x804] sm:$0xf0] }
 0x2ae   : > { %7788 = vmatpush.bf16.msra.mxu3 %v9777_v37  ;;  %v10845_v37 = vld [vmem:[%s12345_s8 + $0x884] sm:$0xf0]  ;;  %v9545_v50 = vor.u32 %v10829_v33, %v9544_v32  ;;  %v10935_v32 = vld [vmem:[%s12345_s8 + $0xb54] sm:$0xf0]  ;;  %v10032_v33 = vld [vmem:[%s12345_s8 + $0xbd0] sm:$0xf] }
 0x2af   : > { %7750 = vmatpush.bf16.msra.mxu0 %v9577_v43  ;;  %v9856_v43 = vld [vmem:[%s12345_s8 + $0xa70] sm:$0xf]  ;;  %v9609_v54 = vor.u32 %v10845_v37, %v9608_v36  ;;  %v9905_v36 = vor.u32 %v10919_v30, %v9904_v28  ;;  %v10945_v28 = vld [vmem:[%s12345_s8 + $0xba4] sm:$0xf0] }
 0x2b0   : > { %7763 = vmatpush.bf16.msra.mxu1 %v9641_v44  ;;  %v10907_v44 = vld [vmem:[%s12345_s8 + $0xa74] sm:$0xf0]  ;;  %v9808_v30 = vld [vmem:[%s12345_s8 + $0xa10] sm:$0xf] }
 0x2b1   : > { %7776 = vmatpush.bf16.msra.mxu2 %v9705_v45  ;;  %v9920_v45 = vld [vmem:[%s12345_s8 + $0xaf0] sm:$0xf] }
 0x2b2   : > { %7789 = vmatpush.bf16.msra.mxu3 %v9769_v53  ;;  %v10939_v53 = vld [vmem:[%s12345_s8 + $0xb74] sm:$0xf0] }
 0x2b3   : > { %7751 = vmatpush.bf16.msra.mxu0 %v9569_v59  ;;  %v9857_v59 = vor.u32 %v10907_v44, %v9856_v43  ;;  %v9960_v43 = vld [vmem:[%s12345_s8 + $0xb40] sm:$0xf]  ;;  %v10933_v44 = vld [vmem:[%s12345_s8 + $0xb44] sm:$0xf0] }
 0x2b4   : > { %7764 = vmatpush.bf16.msra.mxu1 %v9633_v61  ;;  %v9921_v61 = vor.u32 %v10923_v51, %v9920_v45  ;;  %v10024_v45 = vld [vmem:[%s12345_s8 + $0xbc0] sm:$0xf] }
 0x2b5   : > { %7777 = vmatpush.bf16.msra.mxu2 %v9697_v62  ;;  %v9985_v62 = vor.u32 %v10939_v53, %v9984_v52  ;;  %v9824_v52 = vld [vmem:[%s12345_s8 + $0xa30] sm:$0xf]  ;;  %v9897_v53 = vor.u32 %v10917_v42, %v9896_v40 }
 0x2b6   : > { %7790 = vmatpush.bf16.msra.mxu3 %v9761_v5  ;;  %v10049_v5 = vor.u32 %v10955_v57, %v10048_v56  ;;  %v9888_v56 = vld [vmem:[%s12345_s8 + $0xab0] sm:$0xf]  ;;  %v10915_v57 = vld [vmem:[%s12345_s8 + $0xab4] sm:$0xf0] }
 0x2b7   : > { %7752 = vmatpush.bf16.msra.mxu0 %v9561_v11  ;;  %v10953_v11 = vld [vmem:[%s12345_s8 + $0xbe4] sm:$0xf0]  ;;  %v9889_v6 = vor.u32 %v10915_v57, %v9888_v56  ;;  %v9936_v40 = vld [vmem:[%s12345_s8 + $0xb10] sm:$0xf] }
 0x2b8   : > { %7765 = vmatpush.bf16.msra.mxu1 %v9625_v13  ;;  %v12749_v13 = vld [vmem:[#allocation1 + $0x12] sm:$0xff]  ;;  %v10041_v29 = vor.u32 %v10953_v11, %v10040_v10  ;;  %v9880_v10 = vld [vmem:[%s12345_s8 + $0xaa0] sm:$0xf] }
 0x2b9   : > { %7778 = vmatpush.bf16.msra.mxu2 %v9689_v14  ;;  %v12751_v14 = vld [vmem:[#allocation1 + $0x9] sm:$0xff]  ;;  %v10000_v42 = vld [vmem:[%s12345_s8 + $0xb90] sm:$0xf] }
 0x2ba   : > { %7791 = vmatpush.bf16.msra.mxu3 %v9753_v24  ;;  %v9977_v24 = vor.u32 %v10937_v8, %v9976_v7  ;;  %v10897_v8 = vld [vmem:[%s12345_s8 + $0xa24] sm:$0xf0] }
 0x2bb   : > { %7753 = vmatpush.bf16.msra.mxu0 %v9553_v31  ;;  %v9968_v31 = vld [vmem:[%s12345_s8 + $0xb50] sm:$0xf] }
 0x2bc   : > { %7766 = vmatpush.bf16.msra.mxu1 %v9617_v34  ;;  %v10951_v34 = vld [vmem:[%s12345_s8 + $0xbd4] sm:$0xf0]  ;;  %v9969_v37 = vor.u32 %v10935_v32, %v9968_v31 }
 0x2bd   : > { %7779 = vmatpush.bf16.msra.mxu2 %v9681_v35  ;;  %v9841_v35 = vor.u32 %v10903_v27, %v9840_v25  ;;  %v10033_v41 = vor.u32 %v10951_v34, %v10032_v33  ;;  %v10929_v25 = vld [vmem:[%s12345_s8 + $0xb24] sm:$0xf0]  ;;  %v10008_v27 = vld [vmem:[%s12345_s8 + $0xba0] sm:$0xf]  ;;  %v10895_v34 = vld [vmem:[%s12345_s8 + $0xa14] sm:$0xf0] }
 0x2be   : > { %7792 = vmatpush.bf16.msra.mxu3 %v9745_v39  ;;  %v10901_v39 = vld [vmem:[%s12345_s8 + $0xa44] sm:$0xf0] }
 0x2bf   : > { %7754 = vmatpush.bf16.msra.mxu0 %v9545_v50  ;;  %v10949_v50 = vld [vmem:[%s12345_s8 + $0xbc4] sm:$0xf0]  ;;  %v9833_v51 = vor.u32 %v10901_v39, %v9832_v38  ;;  %v10009_v39 = vor.u32 %v10945_v28, %v10008_v27  ;;  %v11003_v27 = vld [vmem:[%s12345_s8 + $0xd74] sm:$0xf0] }
 0x2c0   : > { %7767 = vmatpush.bf16.msra.mxu1 %v9609_v54  ;;  %v9961_v54 = vor.u32 %v10933_v44, %v9960_v43  ;;  %v10943_v43 = vld [vmem:[%s12345_s8 + $0xb94] sm:$0xf0]  ;;  %v9800_v44 = vld [vmem:[%s12345_s8 + $0xa00] sm:$0xf] }
 0x2c1   : > { %7780 = vmatpush.bf16.msra.mxu2 %v9673_v55  ;;  %v10899_v55 = vld [vmem:[%s12345_s8 + $0xa34] sm:$0xf0] }
 0x2c2   : > { %7793 = vmatpush.bf16.msra.mxu3 %v9737_v58  ;;  %7755 = vmatmul.bf16.vlgmr.msra.gmra.mxu0 %v12739_v9  ;;  %v10025_v58 = vor.u32 %v10949_v50, %v10024_v45  ;;  %v9825_v4 = vor.u32 %v10899_v55, %v9824_v52  ;;  %v7548_v31 = vpop.f32.mrf.mxu0  ;;  %v10893_v45 = vld [vmem:[%s12345_s8 + $0xa04] sm:$0xf0]  ;;  %v9864_v52 = vld [vmem:[%s12345_s8 + $0xa80] sm:$0xf] }
 0x2c3   : > { %7799 = vmatpush.bf16.msrb.mxu0 %v9857_v59  ;;  %7768 = vmatmul.bf16.vlgmr.msra.gmra.mxu1 %v12751_v14  ;;  %v9952_v59 = vld [vmem:[%s12345_s8 + $0xb30] sm:$0xf]  ;;  %v10925_v55 = vld [vmem:[%s12345_s8 + $0xb04] sm:$0xf0] }
 0x2c4   : > { %7812 = vmatpush.bf16.msrb.mxu1 %v9921_v61  ;;  %7781 = vmatmul.bf16.vlgmr.msra.gmra.mxu2 %v12749_v13  ;;  %v10931_v61 = vld [vmem:[%s12345_s8 + $0xb34] sm:$0xf0] }
 0x2c5   : > { %7825 = vmatpush.bf16.msrb.mxu2 %v9985_v62  ;;  %7794 = vmatmul.bf16.vlgmr.msra.gmra.mxu3 %v12753_v18  ;;  %v4901_v62 = vld [vmem:[%s12782_s29] sm:$0x3]  ;;  %v9953_v7 = vor.u32 %v10931_v61, %v9952_v59  ;;  %v10941_v59 = vld [vmem:[%s12345_s8 + $0xb84] sm:$0xf0]  ;;  %v10112_v61 = vld [vmem:[%s12345_s8 + $0xc70] sm:$0xf] }
 0x2c6   : > { %7838 = vmatpush.bf16.msrb.mxu3 %v10049_v5  ;;  %v9816_v5 = vld [vmem:[%s12345_s8 + $0xa20] sm:$0xf]  ;;  %v4903_v11 = vperm.slane %v4901_v62, 0  ;;  %v7561_v38 = vpop.f32.mrf.mxu1  ;;  %v10971_v62 = vld [vmem:[%s12345_s8 + $0xc74] sm:$0xf0] }
 0x2c7   : > { %7800 = vmatpush.bf16.msrb.mxu0 %v9849_v19  ;;  %v10017_v19 = vor.u32 %v10947_v3, %v10016_v63  ;;  %v10001_v3 = vor.u32 %v10943_v43, %v10000_v42  ;;  %v10985_v43 = vld [vmem:[%s12345_s8 + $0xce4] sm:$0xf0] }
 0x2c8   : > { %7813 = vmatpush.bf16.msrb.mxu1 %v9913_v23  ;;  %v10913_v23 = vld [vmem:[%s12345_s8 + $0xaa4] sm:$0xf0] }
 0x2c9   : > { %7826 = vmatpush.bf16.msrb.mxu2 %v9977_v24  ;;  %v9944_v24 = vld [vmem:[%s12345_s8 + $0xb20] sm:$0xf]  ;;  %v9881_v32 = vor.u32 %v10913_v23, %v9880_v10  ;;  %v7574_v63 = vpop.f32.mrf.mxu2  ;;  %v4388_v23 = vld [vmem:[%s13566_s0 + $0x18] sm:$0xff] }
 0x2ca   : > { %7839 = vmatpush.bf16.msrb.mxu3 %v10041_v29  ;;  %v9817_v29 = vor.u32 %v10897_v8, %v9816_v5  ;;  %v9945_v33 = vor.u32 %v10929_v25, %v9944_v24  ;;  %v10987_v5 = vld [vmem:[%s12345_s8 + $0xcf4] sm:$0xf0]  ;;  %v7587_v10 = vpop.f32.mrf.mxu3  ;;  %v9801_v24 = vor.u32 %v10893_v45, %v9800_v44  ;;  %v10240_v25 = vld [vmem:[%s12345_s8 + $0xd70] sm:$0xf]  ;;  %v10232_v44 = vld [vmem:[%s12345_s8 + $0xd60] sm:$0xf] }
 0x2cb   : > { %7801 = vmatpush.bf16.msrb.mxu0 %v9841_v35  ;;  %v9872_v35 = vld [vmem:[%s12345_s8 + $0xa90] sm:$0xf]  ;;  %v11001_v45 = vld [vmem:[%s12345_s8 + $0xd64] sm:$0xf0] }
 0x2cc   : > { %7814 = vmatpush.bf16.msrb.mxu1 %v9905_v36  ;;  %v10911_v36 = vld [vmem:[%s12345_s8 + $0xa94] sm:$0xf0] }
 0x2cd   : > { %7827 = vmatpush.bf16.msrb.mxu2 %v9969_v37  ;;  %v7549_v37 = vadd.f32 %v7548_v31, %v4903_v11  ;;  %v9873_v56 = vor.u32 %v10911_v36, %v9872_v35  ;;  %v12825_v11 = vld [vmem:[#allocation1 + $0x2d] sm:$0xff]  ;;  %v10113_v36 = vor.u32 %v10971_v62, %v10112_v61  ;;  %v10983_v62 = vld [vmem:[%s12345_s8 + $0xcd4] sm:$0xf0] }
 0x2ce   : > { %7840 = vmatpush.bf16.msrb.mxu3 %v10033_v41  ;;  %v10927_v41 = vld [vmem:[%s12345_s8 + $0xb14] sm:$0xf0] }
 0x2cf   : > { %7802 = vmatpush.bf16.msrb.mxu0 %v9833_v51  ;;  %v7562_v50 = vadd.f32 %v7561_v38, %v7549_v37  ;;  %v9809_v51 = vor.u32 %v10895_v34, %v9808_v30  ;;  %v9937_v57 = vor.u32 %v10927_v41, %v9936_v40  ;;  %v7563_v34 = vpop.f32.mrf.mxu1  ;;  %v10241_v38 = vor.u32 %v11003_v27, %v10240_v25  ;;  %v10969_v40 = vld [vmem:[%s12345_s8 + $0xc64] sm:$0xf0]  ;;  %v10168_v41 = vld [vmem:[%s12345_s8 + $0xce0] sm:$0xf] }
 0x2d0   : > { %7815 = vmatpush.bf16.msrb.mxu1 %v9897_v53  ;;  %v10909_v53 = vld [vmem:[%s12345_s8 + $0xa84] sm:$0xf0]  ;;  %v10152_v27 = vld [vmem:[%s12345_s8 + $0xcc0] sm:$0xf] }
 0x2d1   : > { %7828 = vmatpush.bf16.msrb.mxu2 %v9961_v54  ;;  %v9928_v54 = vld [vmem:[%s12345_s8 + $0xb00] sm:$0xf]  ;;  %v7575_v8 = vadd.f32 %v7574_v63, %v7562_v50  ;;  %v9865_v30 = vor.u32 %v10909_v53, %v9864_v52  ;;  %v7576_v52 = vpop.f32.mrf.mxu2  ;;  %v10224_v63 = vld [vmem:[%s12345_s8 + $0xd50] sm:$0xf]  ;;  %v10965_v25 = vld [vmem:[%s12345_s8 + $0xc44] sm:$0xf0] }
 0x2d2   : > { %7841 = vmatpush.bf16.msrb.mxu3 %v10025_v58  ;;  %v9992_v58 = vld [vmem:[%s12345_s8 + $0xb80] sm:$0xf]  ;;  %v9929_v31 = vor.u32 %v10925_v55, %v9928_v54  ;;  %v7589_v54 = vpop.f32.mrf.mxu3  ;;  %v10169_v55 = vor.u32 %v10985_v43, %v10168_v41  ;;  %v11013_v34 = vld [vmem:[%s12345_s8 + $0xdc4] sm:$0xf0]  ;;  %v10144_v41 = vld [vmem:[%s12345_s8 + $0xcb0] sm:$0xf] }
 0x2d3   : > { %7803 = vmatpush.bf16.msrb.mxu0 %v9825_v4  ;;  %v10176_v4 = vld [vmem:[%s12345_s8 + $0xcf0] sm:$0xf]  ;;  %v12834_v28 = vadd.f32 %v7587_v10, %v7575_v8  ;;  %v9993_v35 = vor.u32 %v10941_v59, %v9992_v58  ;;  %v10296_v50 = vld [vmem:[%s12345_s8 + $0xde0] sm:$0xf]  ;;  %v10967_v58 = vld [vmem:[%s12345_s8 + $0xc54] sm:$0xf0] }
 0x2d4   : > { %7816 = vmatpush.bf16.msrb.mxu1 %v9889_v6  ;;  %v12821_v6 = vld [vmem:[#allocation1 + $0x24] sm:$0xff]  ;;  %v10177_v37 = vor.u32 %v10987_v5, %v10176_v4  ;;  %v10160_v59 = vld [vmem:[%s12345_s8 + $0xcd0] sm:$0xf]  ;;  %v11015_v5 = vld [vmem:[%s12345_s8 + $0xdd4] sm:$0xf0] }
 0x2d5   : > { %7829 = vmatpush.bf16.msrb.mxu2 %v9953_v7  ;;  %v12823_v7 = vld [vmem:[#allocation1 + $0x36] sm:$0xff]  ;;  %v10161_v10 = vor.u32 %v10983_v62, %v10160_v59  ;;  %v10136_v59 = vld [vmem:[%s12345_s8 + $0xca0] sm:$0xf] }
 0x2d6   : > { %7842 = vmatpush.bf16.msrb.mxu3 %v10017_v19  ;;  %v12827_v19 = vld [vmem:[#allocation1 + $0x3f] sm:$0xff]  ;;  %v10288_v4 = vld [vmem:[%s12345_s8 + $0xdd0] sm:$0xf] }
 0x2d7   : > { %7804 = vmatpush.bf16.msrb.mxu0 %v9817_v29  ;;  %v7550_v29 = vpop.f32.mrf.mxu0  ;;  %4938 = vst [vmem:[#allocation1] ss:$9 sm:$0xff] %v4388_v23  ;;  %v10272_v52 = vld [vmem:[%s12345_s8 + $0xdb0] sm:$0xf] }
 0x2d8   : > { %7817 = vmatpush.bf16.msrb.mxu1 %v9881_v32  ;;  %v10304_v32 = vld [vmem:[%s12345_s8 + $0xdf0] sm:$0xf]  ;;  %v10289_v29 = vor.u32 %v11015_v5, %v10288_v4  ;;  %v10993_v4 = vld [vmem:[%s12345_s8 + $0xd24] sm:$0xf0] }
 0x2d9   : > { %7830 = vmatpush.bf16.msrb.mxu2 %v9945_v33  ;;  %v11019_v33 = vld [vmem:[%s12345_s8 + $0xdf4] sm:$0xf0] }
 0x2da   : > { %7843 = vmatpush.bf16.msrb.mxu3 %v10009_v39  ;;  %v10104_v39 = vld [vmem:[%s12345_s8 + $0xc60] sm:$0xf]  ;;  %v10305_v42 = vor.u32 %v11019_v33, %v10304_v32  ;;  %v10997_v32 = vld [vmem:[%s12345_s8 + $0xd44] sm:$0xf0] }
 0x2db   : > { %7805 = vmatpush.bf16.msrb.mxu0 %v9809_v51  ;;  %v11017_v51 = vld [vmem:[%s12345_s8 + $0xde4] sm:$0xf0]  ;;  %v10105_v53 = vor.u32 %v10969_v40, %v10104_v39  ;;  %v10280_v33 = vld [vmem:[%s12345_s8 + $0xdc0] sm:$0xf]  ;;  %v10080_v39 = vld [vmem:[%s12345_s8 + $0xc30] sm:$0xf] }
 0x2dc   : > { %7818 = vmatpush.bf16.msrb.mxu1 %v9873_v56  ;;  %v10233_v56 = vor.u32 %v11001_v45, %v10232_v44  ;;  %v10297_v61 = vor.u32 %v11017_v51, %v10296_v50  ;;  %v10963_v40 = vld [vmem:[%s12345_s8 + $0xc34] sm:$0xf0]  ;;  %v10281_v44 = vor.u32 %v11013_v34, %v10280_v33  ;;  %v10208_v50 = vld [vmem:[%s12345_s8 + $0xd30] sm:$0xf] }
 0x2dd   : > { %7831 = vmatpush.bf16.msrb.mxu2 %v9937_v57  ;;  %v10096_v57 = vld [vmem:[%s12345_s8 + $0xc50] sm:$0xf]  ;;  %v10979_v45 = vld [vmem:[%s12345_s8 + $0xcb4] sm:$0xf0] }
 0x2de   : > { %7844 = vmatpush.bf16.msrb.mxu3 %v10001_v3  ;;  %v10999_v3 = vld [vmem:[%s12345_s8 + $0xd54] sm:$0xf0]  ;;  %v10097_v8 = vor.u32 %v10967_v58, %v10096_v57  ;;  %v10072_v57 = vld [vmem:[%s12345_s8 + $0xc20] sm:$0xf]  ;;  %v10961_v58 = vld [vmem:[%s12345_s8 + $0xc24] sm:$0xf0] }
 0x2df   : > { %7806 = vmatpush.bf16.msrb.mxu0 %v9801_v24  ;;  %v10225_v23 = vor.u32 %v10999_v3, %v10224_v63  ;;  %v10088_v24 = vld [vmem:[%s12345_s8 + $0xc40] sm:$0xf]  ;;  %v10995_v51 = vld [vmem:[%s12345_s8 + $0xd34] sm:$0xf0]  ;;  %v10977_v63 = vld [vmem:[%s12345_s8 + $0xca4] sm:$0xf0] }
 0x2e0   : > { %7819 = vmatpush.bf16.msrb.mxu1 %v9865_v30  ;;  %v10981_v30 = vld [vmem:[%s12345_s8 + $0xcc4] sm:$0xf0]  ;;  %v7613_v43 = vpop.f32.mrf.mxu1  ;;  %v10200_v3 = vld [vmem:[%s12345_s8 + $0xd20] sm:$0xf]  ;;  %v10128_v33 = vld [vmem:[%s12345_s8 + $0xc90] sm:$0xf] }
 0x2e1   : > { %7832 = vmatpush.bf16.msrb.mxu2 %v9929_v31  ;;  %v10216_v31 = vld [vmem:[%s12345_s8 + $0xd40] sm:$0xf] }
 0x2e2   : > { %7845 = vmatpush.bf16.msrb.mxu3 %v9993_v35  ;;  %7807 = vmatmul.bf16.vlgmr.msrb.gmra.mxu0 %v12821_v6  ;;  %v10089_v35 = vor.u32 %v10965_v25, %v10088_v24  ;;  %v10073_v24 = vor.u32 %v10961_v58, %v10072_v57  ;;  %v10368_v58 = vld [vmem:[%s12345_s8 + $0xe70] sm:$0xf] }
 0x2e3   : > { %7851 = vmatpush.bf16.msra.mxu0 %v10113_v36  ;;  %7820 = vmatmul.bf16.vlgmr.msrb.gmra.mxu1 %v12825_v11  ;;  %v7600_v36 = vpop.f32.mrf.mxu0 }
 0x2e4   : > { %7864 = vmatpush.bf16.msra.mxu1 %v10177_v37  ;;  %7833 = vmatmul.bf16.vlgmr.msrb.gmra.mxu2 %v12823_v7  ;;  %v10153_v37 = vor.u32 %v10981_v30, %v10152_v27  ;;  %v10201_v30 = vor.u32 %v10993_v4, %v10200_v3  ;;  %v10496_v3 = vld [vmem:[%s12345_s8 + $0xf70] sm:$0xf]  ;;  %v11067_v4 = vld [vmem:[%s12345_s8 + $0xf74] sm:$0xf0] }
 0x2e5   : > { %7877 = vmatpush.bf16.msra.mxu2 %v10241_v38  ;;  %7846 = vmatmul.bf16.vlgmr.msrb.gmra.mxu3 %v12827_v19  ;;  %v10217_v38 = vor.u32 %v10997_v32, %v10216_v31  ;;  %v10064_v31 = vld [vmem:[%s12345_s8 + $0xc10] sm:$0xf]  ;;  %v10959_v32 = vld [vmem:[%s12345_s8 + $0xc14] sm:$0xf0] }
 0x2e6   : > { %7890 = vmatpush.bf16.msra.mxu3 %v10305_v42  ;;  %v7601_v42 = vadd.f32 %v7600_v36, %v12834_v28  ;;  %v10145_v28 = vor.u32 %v10979_v45, %v10144_v41  ;;  %v10975_v36 = vld [vmem:[%s12345_s8 + $0xc94] sm:$0xf0]  ;;  %v10065_v41 = vor.u32 %v10959_v32, %v10064_v31  ;;  %v10360_v31 = vld [vmem:[%s12345_s8 + $0xe60] sm:$0xf]  ;;  %v11033_v32 = vld [vmem:[%s12345_s8 + $0xe64] sm:$0xf0] }
 0x2e7   : > { %7852 = vmatpush.bf16.msra.mxu0 %v10105_v53  ;;  %v11011_v53 = vld [vmem:[%s12345_s8 + $0xdb4] sm:$0xf0] }
 0x2e8   : > { %7865 = vmatpush.bf16.msra.mxu1 %v10169_v55  ;;  %v7614_v54 = vadd.f32 %v7613_v43, %v7601_v42  ;;  %v10081_v55 = vor.u32 %v10963_v40, %v10080_v39  ;;  %v10273_v62 = vor.u32 %v11011_v53, %v10272_v52  ;;  %v7615_v34 = vpop.f32.mrf.mxu1  ;;  %v10256_v39 = vld [vmem:[%s12345_s8 + $0xd90] sm:$0xf]  ;;  %v11007_v40 = vld [vmem:[%s12345_s8 + $0xd94] sm:$0xf0]  ;;  %v10056_v42 = vld [vmem:[%s12345_s8 + $0xc00] sm:$0xf] }
 0x2e9   : > { %7878 = vmatpush.bf16.msra.mxu2 %v10233_v56  ;;  %v10209_v56 = vor.u32 %v10995_v51, %v10208_v50  ;;  %v10957_v43 = vld [vmem:[%s12345_s8 + $0xc04] sm:$0xf0]  ;;  %v10120_v50 = vld [vmem:[%s12345_s8 + $0xc80] sm:$0xf] }
 0x2ea   : > { %7891 = vmatpush.bf16.msra.mxu3 %v10297_v61  ;;  %v7626_v61 = vpop.f32.mrf.mxu2  ;;  %v10973_v51 = vld [vmem:[%s12345_s8 + $0xc84] sm:$0xf0]  ;;  %v10184_v52 = vld [vmem:[%s12345_s8 + $0xd00] sm:$0xf] }
 0x2eb   : > { %7853 = vmatpush.bf16.msra.mxu0 %v10097_v8  ;;  %v7627_v5 = vadd.f32 %v7626_v61, %v7614_v54  ;;  %v7639_v8 = vpop.f32.mrf.mxu3  ;;  %v7602_v27 = vpop.f32.mrf.mxu0  ;;  %v10257_v54 = vor.u32 %v11007_v40, %v10256_v39  ;;  %v10432_v61 = vld [vmem:[%s12345_s8 + $0xef0] sm:$0xf]  ;;  %v10552_v39 = vld [vmem:[%s12345_s8 + $0xfe0] sm:$0xf]  ;;  %v11081_v40 = vld [vmem:[%s12345_s8 + $0xfe4] sm:$0xf0] }
 0x2ec   : > { %7866 = vmatpush.bf16.msra.mxu1 %v10161_v10  ;;  %v10264_v10 = vld [vmem:[%s12345_s8 + $0xda0] sm:$0xf] }
 0x2ed   : > { %7879 = vmatpush.bf16.msra.mxu2 %v10225_v23  ;;  %v11009_v23 = vld [vmem:[%s12345_s8 + $0xda4] sm:$0xf0]  ;;  %v12883_v25 = vadd.f32 %v7639_v8, %v7627_v5  ;;  %v10121_v5 = vor.u32 %v10973_v51, %v10120_v50  ;;  %v10352_v51 = vld [vmem:[%s12345_s8 + $0xe50] sm:$0xf] }
 0x2ee   : > { %7892 = vmatpush.bf16.msra.mxu3 %v10289_v29  ;;  %v10137_v29 = vor.u32 %v10977_v63, %v10136_v59  ;;  %v11035_v59 = vld [vmem:[%s12345_s8 + $0xe74] sm:$0xf0] }
 0x2ef   : > { %7854 = vmatpush.bf16.msra.mxu0 %v10089_v35  ;;  %v10265_v35 = vor.u32 %v11009_v23, %v10264_v10  ;;  %v11051_v63 = vld [vmem:[%s12345_s8 + $0xef4] sm:$0xf0]  ;;  %v10560_v10 = vld [vmem:[%s12345_s8 + $0xff0] sm:$0xf]  ;;  %v10369_v27 = vor.u32 %v11035_v59, %v10368_v58 }
 0x2f0   : > { %7867 = vmatpush.bf16.msra.mxu1 %v10153_v37  ;;  %v10192_v37 = vld [vmem:[%s12345_s8 + $0xd10] sm:$0xf]  ;;  %v11083_v23 = vld [vmem:[%s12345_s8 + $0xff4] sm:$0xf0] }
 0x2f1   : > { %7880 = vmatpush.bf16.msra.mxu2 %v10217_v38  ;;  %v10991_v38 = vld [vmem:[%s12345_s8 + $0xd14] sm:$0xf0]  ;;  %v10561_v34 = vor.u32 %v11083_v23, %v10560_v10  ;;  %v10472_v10 = vld [vmem:[%s12345_s8 + $0xf40] sm:$0xf]  ;;  %v11061_v23 = vld [vmem:[%s12345_s8 + $0xf44] sm:$0xf0] }
 0x2f2   : > { %7893 = vmatpush.bf16.msra.mxu3 %v10281_v44  ;;  %v10129_v44 = vor.u32 %v10975_v36, %v10128_v33  ;;  %v10193_v45 = vor.u32 %v10991_v38, %v10192_v37  ;;  %v7628_v53 = vpop.f32.mrf.mxu2  ;;  %v10424_v33 = vld [vmem:[%s12345_s8 + $0xee0] sm:$0xf]  ;;  %v11065_v37 = vld [vmem:[%s12345_s8 + $0xf64] sm:$0xf0]  ;;  %v4939_v38 = vld [vmem:[#allocation1] sm:$0xff] }
 0x2f3   : > { %7855 = vmatpush.bf16.msra.mxu0 %v10081_v55  ;;  %v10989_v55 = vld [vmem:[%s12345_s8 + $0xd04] sm:$0xf0]  ;;  %v7641_v57 = vpop.f32.mrf.mxu3  ;;  %v10488_v36 = vld [vmem:[%s12345_s8 + $0xf60] sm:$0xf]  ;;  %v10416_v53 = vld [vmem:[%s12345_s8 + $0xed0] sm:$0xf] }
 0x2f4   : > { %7868 = vmatpush.bf16.msra.mxu1 %v10145_v28  ;;  %v10248_v28 = vld [vmem:[%s12345_s8 + $0xd80] sm:$0xf]  ;;  %v10185_v8 = vor.u32 %v10989_v55, %v10184_v52  ;;  %v10489_v50 = vor.u32 %v11065_v37, %v10488_v36  ;;  %v11031_v52 = vld [vmem:[%s12345_s8 + $0xe54] sm:$0xf0]  ;;  %v10544_v57 = vld [vmem:[%s12345_s8 + $0xfd0] sm:$0xf] }
 0x2f5   : > { %7881 = vmatpush.bf16.msra.mxu2 %v10209_v56  ;;  %v11005_v56 = vld [vmem:[%s12345_s8 + $0xd84] sm:$0xf0]  ;;  %v11047_v55 = vld [vmem:[%s12345_s8 + $0xed4] sm:$0xf0]  ;;  %v10353_v59 = vor.u32 %v11031_v52, %v10352_v51  ;;  %v10400_v37 = vld [vmem:[%s12345_s8 + $0xeb0] sm:$0xf] }
 0x2f6   : > { %7894 = vmatpush.bf16.msra.mxu3 %v10273_v62  ;;  %v10057_v62 = vor.u32 %v10957_v43, %v10056_v42  ;;  %v4940_v42 = vld [vmem:[#allocation1 + $0x9] sm:$0xff]  ;;  %v4942_v43 = vld [vmem:[#allocation1 + $0x1b] sm:$0xff] }
 0x2f7   : > { %7856 = vmatpush.bf16.msra.mxu0 %v10073_v24  ;;  %v10249_v24 = vor.u32 %v11005_v56, %v10248_v28  ;;  %v10480_v28 = vld [vmem:[%s12345_s8 + $0xf50] sm:$0xf]  ;;  %v11063_v56 = vld [vmem:[%s12345_s8 + $0xf54] sm:$0xf0]  ;;  %v10328_v51 = vld [vmem:[%s12345_s8 + $0xe20] sm:$0xf] }
 0x2f8   : > { %7869 = vmatpush.bf16.msra.mxu1 %v10137_v29  ;;  %v10433_v29 = vor.u32 %v11051_v63, %v10432_v61  ;;  %v11079_v58 = vld [vmem:[%s12345_s8 + $0xfd4] sm:$0xf0]  ;;  %v10417_v61 = vor.u32 %v11047_v55, %v10416_v53  ;;  %v10344_v63 = vld [vmem:[%s12345_s8 + $0xe40] sm:$0xf]  ;;  %v11025_v52 = vld [vmem:[%s12345_s8 + $0xe24] sm:$0xf0] }
 0x2f9   : > { %7882 = vmatpush.bf16.msra.mxu2 %v10201_v30  ;;  %v10497_v30 = vor.u32 %v11067_v4, %v10496_v3  ;;  %v11029_v3 = vld [vmem:[%s12345_s8 + $0xe44] sm:$0xf0]  ;;  %v10408_v4 = vld [vmem:[%s12345_s8 + $0xec0] sm:$0xf]  ;;  %v11027_v36 = vld [vmem:[%s12345_s8 + $0xe34] sm:$0xf0] }
 0x2fa   : > { %7895 = vmatpush.bf16.msra.mxu3 %v10265_v35  ;;  %v11049_v35 = vld [vmem:[%s12345_s8 + $0xee4] sm:$0xf0]  ;;  %v10392_v53 = vld [vmem:[%s12345_s8 + $0xea0] sm:$0xf] }
 0x2fb   : > { %7857 = vmatpush.bf16.msra.mxu0 %v10065_v41  ;;  %v4941_v41 = vld [vmem:[#allocation1 + $0x12] sm:$0xff] }
 0x2fc   : > { %7870 = vmatpush.bf16.msra.mxu1 %v10129_v44  ;;  %v10361_v44 = vor.u32 %v11033_v32, %v10360_v31  ;;  %v10345_v31 = vor.u32 %v11029_v3, %v10344_v63  ;;  %v10329_v3 = vor.u32 %v11025_v52, %v10328_v51  ;;  %v10586_v51 = vld [vmem:[%s12345_s8 + $0x74] sm:$0xf]  ;;  %v8578_v52 = vld [vmem:[%s12345_s8 + $0x78] sm:$0xf0] }
 0x2fd   : > { %7883 = vmatpush.bf16.msra.mxu2 %v10193_v45  ;;  %v10425_v45 = vor.u32 %v11049_v35, %v10424_v33  ;;  %v10336_v35 = vld [vmem:[%s12345_s8 + $0xe30] sm:$0xf] }
 0x2fe   : > { %7896 = vmatpush.bf16.msra.mxu3 %v10257_v54  ;;  %v10553_v54 = vor.u32 %v11081_v40, %v10552_v39  ;;  %v11043_v40 = vld [vmem:[%s12345_s8 + $0xeb4] sm:$0xf0] }
 0x2ff   : > { %7858 = vmatpush.bf16.msra.mxu0 %v10057_v62  ;;  %v10481_v62 = vor.u32 %v11063_v56, %v10480_v28  ;;  %v11041_v28 = vld [vmem:[%s12345_s8 + $0xea4] sm:$0xf0]  ;;  %v10456_v56 = vld [vmem:[%s12345_s8 + $0xf20] sm:$0xf] }
 0x300   : > { %7871 = vmatpush.bf16.msra.mxu1 %v10121_v5  ;;  %v10545_v5 = vor.u32 %v11079_v58, %v10544_v57  ;;  %v7665_v32 = vpop.f32.mrf.mxu1  ;;  %v11057_v57 = vld [vmem:[%s12345_s8 + $0xf24] sm:$0xf0] }
 0x301   : > { %7884 = vmatpush.bf16.msra.mxu2 %v10185_v8  ;;  %v11045_v8 = vld [vmem:[%s12345_s8 + $0xec4] sm:$0xf0] }
 0x302   : > { %7897 = vmatpush.bf16.msra.mxu3 %v10249_v24  ;;  %7859 = vmatmul.bf16.vlgmr.msra.gmra.mxu0 %v4939_v38  ;;  %v7652_v24 = vpop.f32.mrf.mxu0  ;;  %v10409_v33 = vor.u32 %v11045_v8, %v10408_v4  ;;  %v10393_v8 = vor.u32 %v11041_v28, %v10392_v53  ;;  %v10602_v53 = vld [vmem:[%s12345_s8 + $0xf4] sm:$0xf]  ;;  %v8642_v28 = vld [vmem:[%s12345_s8 + $0xf8] sm:$0xf0] }
 0x303   : > { %7903 = vmatpush.bf16.msrb.mxu0 %v10369_v27  ;;  %7872 = vmatmul.bf16.vlgmr.msra.gmra.mxu1 %v4940_v42  ;;  %v10536_v27 = vld [vmem:[%s12345_s8 + $0xfc0] sm:$0xf]  ;;  %v10528_v42 = vld [vmem:[%s12345_s8 + $0xfb0] sm:$0xf] }
 0x304   : > { %7916 = vmatpush.bf16.msrb.mxu1 %v10433_v29  ;;  %7885 = vmatmul.bf16.vlgmr.msra.gmra.mxu2 %v4941_v41  ;;  %v11077_v29 = vld [vmem:[%s12345_s8 + $0xfc4] sm:$0xf0]  ;;  %v10464_v41 = vld [vmem:[%s12345_s8 + $0xf30] sm:$0xf] }
 0x305   : > { %7929 = vmatpush.bf16.msrb.mxu2 %v10497_v30  ;;  %7898 = vmatmul.bf16.vlgmr.msra.gmra.mxu3 %v4942_v43  ;;  %v7653_v30 = vadd.f32 %v7652_v24, %v12883_v25  ;;  %v10537_v38 = vor.u32 %v11077_v29, %v10536_v27  ;;  %v11059_v25 = vld [vmem:[%s12345_s8 + $0xf34] sm:$0xf0]  ;;  %v10384_v27 = vld [vmem:[%s12345_s8 + $0xe90] sm:$0xf] }
 0x306   : > { %7942 = vmatpush.bf16.msrb.mxu3 %v10561_v34  ;;  %v10473_v34 = vor.u32 %v11061_v23, %v10472_v10  ;;  %v11075_v43 = vld [vmem:[%s12345_s8 + $0xfb4] sm:$0xf0]  ;;  %v10457_v10 = vor.u32 %v11057_v57, %v10456_v56  ;;  %v10320_v23 = vld [vmem:[%s12345_s8 + $0xe10] sm:$0xf]  ;;  %v10618_v56 = vld [vmem:[%s12345_s8 + $0x174] sm:$0xf] }
 0x307   : > { %7904 = vmatpush.bf16.msrb.mxu0 %v10361_v44  ;;  %v7666_v39 = vadd.f32 %v7665_v32, %v7653_v30  ;;  %v10337_v44 = vor.u32 %v11027_v36, %v10336_v35  ;;  %v7678_v55 = vpop.f32.mrf.mxu2  ;;  %v11023_v24 = vld [vmem:[%s12345_s8 + $0xe14] sm:$0xf0]  ;;  %v10312_v36 = vld [vmem:[%s12345_s8 + $0xe00] sm:$0xf]  ;;  %v8706_v57 = vld [vmem:[%s12345_s8 + $0x178] sm:$0xf0] }
 0x308   : > { %7917 = vmatpush.bf16.msrb.mxu1 %v10425_v45  ;;  %v10401_v45 = vor.u32 %v11043_v40, %v10400_v37  ;;  %v7667_v4 = vpop.f32.mrf.mxu1  ;;  %v11039_v30 = vld [vmem:[%s12345_s8 + $0xe94] sm:$0xf0]  ;;  %v10321_v35 = vor.u32 %v11023_v24, %v10320_v23  ;;  %v11021_v37 = vld [vmem:[%s12345_s8 + $0xe04] sm:$0xf0]  ;;  %v10376_v40 = vld [vmem:[%s12345_s8 + $0xe80] sm:$0xf] }
 0x309   : > { %7930 = vmatpush.bf16.msrb.mxu2 %v10489_v50  ;;  %v10465_v50 = vor.u32 %v11059_v25, %v10464_v41  ;;  %v7679_v58 = vadd.f32 %v7678_v55, %v7666_v39  ;;  %v11055_v32 = vld [vmem:[%s12345_s8 + $0xf14] sm:$0xf0]  ;;  %v11037_v41 = vld [vmem:[%s12345_s8 + $0xe84] sm:$0xf0]  ;;  %v10440_v25 = vld [vmem:[%s12345_s8 + $0xf00] sm:$0xf]  ;;  %v10313_v55 = vor.u32 %v11021_v37, %v10312_v36  ;;  %v8645_v4 = vor.u32 %v10602_v53, %v8642_v28 }
 0x30a   : > { %7943 = vmatpush.bf16.msrb.mxu3 %v10553_v54  ;;  %v10529_v54 = vor.u32 %v11075_v43, %v10528_v42  ;;  %v7654_v63 = vpop.f32.mrf.mxu0  ;;  %v11053_v43 = vld [vmem:[%s12345_s8 + $0xf04] sm:$0xf0]  ;;  %v8570_v23 = vld [vmem:[%s12345_s8 + $0x68] sm:$0xf0]  ;;  %v10600_v24 = vld [vmem:[%s12345_s8 + $0xe4] sm:$0xf] }
 0x30b   : > { %7905 = vmatpush.bf16.msrb.mxu0 %v10353_v59  ;;  %v7691_v59 = vpop.f32.mrf.mxu3  ;;  %v4944_v36 = vld [vmem:[#allocation1 + $0x2d] sm:$0xff]  ;;  %v4946_v37 = vld [vmem:[#allocation1 + $0x3f] sm:$0xff] }
 0x30c   : > { %7918 = vmatpush.bf16.msrb.mxu1 %v10417_v61  ;;  %v10520_v61 = vld [vmem:[%s12345_s8 + $0xfa0] sm:$0xf]  ;;  %v10580_v28 = vld [vmem:[%s12345_s8 + $0x44] sm:$0xf] }
 0x30d   : > { %7931 = vmatpush.bf16.msrb.mxu2 %v10481_v62  ;;  %v11073_v62 = vld [vmem:[%s12345_s8 + $0xfa4] sm:$0xf0] }
 0x30e   : > { %7944 = vmatpush.bf16.msrb.mxu3 %v10545_v5  ;;  %v12950_v5 = vadd.f32 %v7691_v59, %v7679_v58  ;;  %v10521_v29 = vor.u32 %v11073_v62, %v10520_v61  ;;  %v10377_v58 = vor.u32 %v11037_v41, %v10376_v40  ;;  %v10441_v59 = vor.u32 %v11053_v43, %v10440_v25  ;;  %v10634_v61 = vld [vmem:[%s12345_s8 + $0x1f4] sm:$0xf]  ;;  %v8770_v62 = vld [vmem:[%s12345_s8 + $0x1f8] sm:$0xf0] }
 0x30f   : > { %7906 = vmatpush.bf16.msrb.mxu0 %v10345_v31  ;;  %v10448_v31 = vld [vmem:[%s12345_s8 + $0xf10] sm:$0xf]  ;;  %v10582_v41 = vld [vmem:[%s12345_s8 + $0x54] sm:$0xf]  ;;  %v8562_v25 = vld [vmem:[%s12345_s8 + $0x58] sm:$0xf0] }
 0x310   : > { %7919 = vmatpush.bf16.msrb.mxu1 %v10409_v33  ;;  %v10512_v33 = vld [vmem:[%s12345_s8 + $0xf90] sm:$0xf]  ;;  %v10449_v39 = vor.u32 %v11055_v32, %v10448_v31  ;;  %v8698_v31 = vld [vmem:[%s12345_s8 + $0x168] sm:$0xf0]  ;;  %v4943_v32 = vld [vmem:[#allocation1 + $0x24] sm:$0xff]  ;;  %v8565_v53 = vor.u32 %v10582_v41, %v8562_v25 }
 0x311   : > { %7932 = vmatpush.bf16.msrb.mxu2 %v10473_v34  ;;  %v11071_v34 = vld [vmem:[%s12345_s8 + $0xf94] sm:$0xf0]  ;;  %v10576_v41 = vld [vmem:[%s12345_s8 + $0x24] sm:$0xf]  ;;  %v8538_v25 = vld [vmem:[%s12345_s8 + $0x28] sm:$0xf0] }
 0x312   : > { %7945 = vmatpush.bf16.msrb.mxu3 %v10537_v38  ;;  %v10385_v38 = vor.u32 %v11039_v30, %v10384_v27  ;;  %v10513_v42 = vor.u32 %v11071_v34, %v10512_v33  ;;  %v8773_v27 = vor.u32 %v10634_v61, %v8770_v62  ;;  %v10616_v30 = vld [vmem:[%s12345_s8 + $0x164] sm:$0xf]  ;;  %v8762_v34 = vld [vmem:[%s12345_s8 + $0x1e8] sm:$0xf0] }
 0x313   : > { %7907 = vmatpush.bf16.msrb.mxu0 %v10337_v44  ;;  %v10504_v44 = vld [vmem:[%s12345_s8 + $0xf80] sm:$0xf]  ;;  %v10632_v33 = vld [vmem:[%s12345_s8 + $0x1e4] sm:$0xf]  ;;  %v8701_v40 = vor.u32 %v10616_v30, %v8698_v31  ;;  %v8682_v62 = vld [vmem:[%s12345_s8 + $0x148] sm:$0xf0] }
 0x314   : > { %7920 = vmatpush.bf16.msrb.mxu1 %v10401_v45  ;;  %v11069_v45 = vld [vmem:[%s12345_s8 + $0xf84] sm:$0xf0]  ;;  %v8765_v43 = vor.u32 %v10632_v33, %v8762_v34  ;;  %v10612_v61 = vld [vmem:[%s12345_s8 + $0x144] sm:$0xf]  ;;  %v8546_v30 = vld [vmem:[%s12345_s8 + $0x38] sm:$0xf0] }
 0x315   : > { %7933 = vmatpush.bf16.msrb.mxu2 %v10465_v50  ;;  %v7680_v50 = vpop.f32.mrf.mxu2  ;;  %v10505_v63 = vor.u32 %v11069_v45, %v10504_v44  ;;  %v8626_v44 = vld [vmem:[%s12345_s8 + $0xd8] sm:$0xf0]  ;;  %v10614_v45 = vld [vmem:[%s12345_s8 + $0x154] sm:$0xf] }
 0x316   : > { %7946 = vmatpush.bf16.msrb.mxu3 %v10529_v54  ;;  %v7693_v54 = vpop.f32.mrf.mxu3  ;;  %v8690_v50 = vld [vmem:[%s12345_s8 + $0x158] sm:$0xf0]  ;;  %v10594_v31 = vld [vmem:[%s12345_s8 + $0xb4] sm:$0xf] }
 0x317   : > { %7908 = vmatpush.bf16.msrb.mxu0 %v10329_v3  ;;  %v8581_v3 = vor.u32 %v10586_v51, %v8578_v52  ;;  %v10630_v51 = vld [vmem:[%s12345_s8 + $0x1d4] sm:$0xf]  ;;  %v8754_v52 = vld [vmem:[%s12345_s8 + $0x1d8] sm:$0xf0] }
 0x318   : > { %7921 = vmatpush.bf16.msrb.mxu1 %v10393_v8  ;;  %v8709_v8 = vor.u32 %v10618_v56, %v8706_v57  ;;  %v8554_v56 = vld [vmem:[%s12345_s8 + $0x48] sm:$0xf0]  ;;  %v10596_v57 = vld [vmem:[%s12345_s8 + $0xc4] sm:$0xf]  ;;  %v8610_v34 = vld [vmem:[%s12345_s8 + $0xb8] sm:$0xf0] }
 0x319   : > { %7934 = vmatpush.bf16.msrb.mxu2 %v10457_v10  ;;  %v10584_v10 = vld [vmem:[%s12345_s8 + $0x64] sm:$0xf] }
 0x31a   : > { %7947 = vmatpush.bf16.msrb.mxu3 %v10521_v29  ;;  %v8634_v29 = vld [vmem:[%s12345_s8 + $0xe8] sm:$0xf0] }
 0x31b   : > { %7909 = vmatpush.bf16.msrb.mxu0 %v10321_v35  ;;  %v4945_v35 = vld [vmem:[#allocation1 + $0x36] sm:$0xff] }
 0x31c   : > { %7922 = vmatpush.bf16.msrb.mxu1 %v10385_v38  ;;  %v8573_v38 = vor.u32 %v10584_v10, %v8570_v23  ;;  %v8557_v10 = vor.u32 %v10580_v28, %v8554_v56  ;;  %v8541_v56 = vor.u32 %v10576_v41, %v8538_v25  ;;  %v10650_v41 = vld [vmem:[%s12345_s8 + $0x274] sm:$0xf]  ;;  %v8834_v25 = vld [vmem:[%s12345_s8 + $0x278] sm:$0xf0] }
 0x31d   : > { %7935 = vmatpush.bf16.msrb.mxu2 %v10449_v39  ;;  %v8637_v39 = vor.u32 %v10600_v24, %v8634_v29  ;;  %v10578_v29 = vld [vmem:[%s12345_s8 + $0x34] sm:$0xf] }
 0x31e   : > { %7948 = vmatpush.bf16.msrb.mxu3 %v10513_v42  ;;  %v10598_v42 = vld [vmem:[%s12345_s8 + $0xd4] sm:$0xf] }
 0x31f   : > { %7910 = vmatpush.bf16.msrb.mxu0 %v10313_v55  ;;  %v8629_v54 = vor.u32 %v10598_v42, %v8626_v44  ;;  %v8693_v55 = vor.u32 %v10614_v45, %v8690_v50  ;;  %v10592_v42 = vld [vmem:[%s12345_s8 + $0xa4] sm:$0xf]  ;;  %v8602_v45 = vld [vmem:[%s12345_s8 + $0xa8] sm:$0xf0] }
 0x320   : > { %7923 = vmatpush.bf16.msrb.mxu1 %v10377_v58  ;;  %v8757_v58 = vor.u32 %v10630_v51, %v8754_v52  ;;  %v7717_v23 = vpop.f32.mrf.mxu1  ;;  %v10608_v50 = vld [vmem:[%s12345_s8 + $0x124] sm:$0xf]  ;;  %v8666_v51 = vld [vmem:[%s12345_s8 + $0x128] sm:$0xf0] }
 0x321   : > { %7936 = vmatpush.bf16.msrb.mxu2 %v10441_v59  ;;  %v8618_v59 = vld [vmem:[%s12345_s8 + $0xc8] sm:$0xf0] }
 0x322   : > { %7949 = vmatpush.bf16.msrb.mxu3 %v10505_v63  ;;  %7911 = vmatmul.bf16.vlgmr.msrb.gmra.mxu0 %v4943_v32  ;;  %v7704_v63 = vpop.f32.mrf.mxu0  ;;  %v8621_v24 = vor.u32 %v10596_v57, %v8618_v59  ;;  %v8605_v59 = vor.u32 %v10592_v42, %v8602_v45  ;;  %v10666_v42 = vld [vmem:[%s12345_s8 + $0x2f4] sm:$0xf]  ;;  %v8898_v45 = vld [vmem:[%s12345_s8 + $0x2f8] sm:$0xf0] }
 0x323   : > { %7955 = vmatpush.bf16.msra.mxu0 %v8581_v3  ;;  %7924 = vmatmul.bf16.vlgmr.msrb.gmra.mxu1 %v4944_v36  ;;  %v10628_v3 = vld [vmem:[%s12345_s8 + $0x1c4] sm:$0xf]  ;;  %v10626_v36 = vld [vmem:[%s12345_s8 + $0x1b4] sm:$0xf] }
 0x324   : > { %7968 = vmatpush.bf16.msra.mxu1 %v8645_v4  ;;  %7937 = vmatmul.bf16.vlgmr.msrb.gmra.mxu2 %v4945_v35  ;;  %v8746_v4 = vld [vmem:[%s12345_s8 + $0x1c8] sm:$0xf0]  ;;  %v10610_v35 = vld [vmem:[%s12345_s8 + $0x134] sm:$0xf] }
 0x325   : > { %7981 = vmatpush.bf16.msra.mxu2 %v8709_v8  ;;  %7950 = vmatmul.bf16.vlgmr.msrb.gmra.mxu3 %v4946_v37  ;;  %v7705_v8 = vadd.f32 %v7704_v63, %v12950_v5  ;;  %v8749_v32 = vor.u32 %v10628_v3, %v8746_v4  ;;  %v8674_v5 = vld [vmem:[%s12345_s8 + $0x138] sm:$0xf0]  ;;  %v10590_v3 = vld [vmem:[%s12345_s8 + $0x94] sm:$0xf] }
 0x326   : > { %7994 = vmatpush.bf16.msra.mxu3 %v8773_v27  ;;  %v8685_v27 = vor.u32 %v10612_v61, %v8682_v62  ;;  %v8738_v37 = vld [vmem:[%s12345_s8 + $0x1b8] sm:$0xf0]  ;;  %v8669_v61 = vor.u32 %v10608_v50, %v8666_v51  ;;  %v10574_v62 = vld [vmem:[%s12345_s8 + $0x14] sm:$0xf] }
 0x327   : > { %7956 = vmatpush.bf16.msra.mxu0 %v8573_v38  ;;  %v7718_v33 = vadd.f32 %v7717_v23, %v7705_v8  ;;  %v8549_v38 = vor.u32 %v10578_v29, %v8546_v30  ;;  %v7730_v44 = vpop.f32.mrf.mxu2  ;;  %v8530_v63 = vld [vmem:[%s12345_s8 + $0x18] sm:$0xf0]  ;;  %v10572_v30 = vld [vmem:[%s12345_s8 + $0x4] sm:$0xf]  ;;  %v10682_v50 = vld [vmem:[%s12345_s8 + $0x374] sm:$0xf] }
 0x328   : > { %7969 = vmatpush.bf16.msra.mxu1 %v8637_v39  ;;  %v8613_v39 = vor.u32 %v10594_v31, %v8610_v34  ;;  %v7719_v57 = vpop.f32.mrf.mxu1  ;;  %v8594_v8 = vld [vmem:[%s12345_s8 + $0x98] sm:$0xf0]  ;;  %v8533_v29 = vor.u32 %v10574_v62, %v8530_v63  ;;  %v8522_v31 = vld [vmem:[%s12345_s8 + $0x8] sm:$0xf0]  ;;  %v10588_v34 = vld [vmem:[%s12345_s8 + $0x84] sm:$0xf] }
 0x329   : > { %7982 = vmatpush.bf16.msra.mxu2 %v8701_v40  ;;  %v8677_v40 = vor.u32 %v10610_v35, %v8674_v5  ;;  %v7731_v52 = vadd.f32 %v7730_v44, %v7718_v33  ;;  %v8658_v23 = vld [vmem:[%s12345_s8 + $0x118] sm:$0xf0]  ;;  %v8586_v35 = vld [vmem:[%s12345_s8 + $0x88] sm:$0xf0]  ;;  %v10604_v5 = vld [vmem:[%s12345_s8 + $0x104] sm:$0xf]  ;;  %v8525_v44 = vor.u32 %v10572_v30, %v8522_v31  ;;  %v8901_v57 = vor.u32 %v10666_v42, %v8898_v45 }
 0x32a   : > { %7995 = vmatpush.bf16.msra.mxu3 %v8765_v43  ;;  %v8741_v43 = vor.u32 %v10626_v36, %v8738_v37  ;;  %v7706_v28 = vpop.f32.mrf.mxu0  ;;  %v8650_v37 = vld [vmem:[%s12345_s8 + $0x108] sm:$0xf0]  ;;  %v8962_v51 = vld [vmem:[%s12345_s8 + $0x378] sm:$0xf0]  ;;  %v10664_v63 = vld [vmem:[%s12345_s8 + $0x2e4] sm:$0xf] }
 0x32b   : > { %7957 = vmatpush.bf16.msra.mxu0 %v8565_v53  ;;  %v7743_v53 = vpop.f32.mrf.mxu3  ;;  %v8826_v62 = vld [vmem:[%s12345_s8 + $0x268] sm:$0xf0]  ;;  %v10646_v31 = vld [vmem:[%s12345_s8 + $0x254] sm:$0xf]  ;;  %v10660_v42 = vld [vmem:[%s12345_s8 + $0x2c4] sm:$0xf] }
 0x32c   : > { %7970 = vmatpush.bf16.msra.mxu1 %v8629_v54  ;;  %v10624_v54 = vld [vmem:[%s12345_s8 + $0x1a4] sm:$0xf] }
 0x32d   : > { %7983 = vmatpush.bf16.msra.mxu2 %v8693_v55  ;;  %v8730_v55 = vld [vmem:[%s12345_s8 + $0x1a8] sm:$0xf0] }
 0x32e   : > { %7996 = vmatpush.bf16.msra.mxu3 %v8757_v58  ;;  %v13017_v58 = vadd.f32 %v7743_v53, %v7731_v52  ;;  %v8733_v4 = vor.u32 %v10624_v54, %v8730_v55  ;;  %v8589_v52 = vor.u32 %v10588_v34, %v8586_v35  ;;  %v8653_v53 = vor.u32 %v10604_v5, %v8650_v37  ;;  %v10698_v54 = vld [vmem:[%s12345_s8 + $0x3f4] sm:$0xf]  ;;  %v9026_v55 = vld [vmem:[%s12345_s8 + $0x3f8] sm:$0xf0] }
 0x32f   : > { %7958 = vmatpush.bf16.msra.mxu0 %v8557_v10  ;;  %v10606_v10 = vld [vmem:[%s12345_s8 + $0x114] sm:$0xf]  ;;  %v8882_v35 = vld [vmem:[%s12345_s8 + $0x2d8] sm:$0xf0] }
 0x330   : > { %7971 = vmatpush.bf16.msra.mxu1 %v8621_v24  ;;  %v10622_v24 = vld [vmem:[%s12345_s8 + $0x194] sm:$0xf]  ;;  %v8661_v33 = vor.u32 %v10606_v10, %v8658_v23  ;;  %v8954_v10 = vld [vmem:[%s12345_s8 + $0x368] sm:$0xf0]  ;;  %v10696_v23 = vld [vmem:[%s12345_s8 + $0x3e4] sm:$0xf] }
 0x331   : > { %7984 = vmatpush.bf16.msra.mxu2 %v8685_v27  ;;  %v8722_v27 = vld [vmem:[%s12345_s8 + $0x198] sm:$0xf0]  ;;  %v10678_v5 = vld [vmem:[%s12345_s8 + $0x354] sm:$0xf] }
 0x332   : > { %7997 = vmatpush.bf16.msra.mxu3 %v8749_v32  ;;  %v8597_v32 = vor.u32 %v10590_v3, %v8594_v8  ;;  %v8725_v36 = vor.u32 %v10622_v24, %v8722_v27  ;;  %v9029_v3 = vor.u32 %v10698_v54, %v9026_v55  ;;  %v10680_v8 = vld [vmem:[%s12345_s8 + $0x364] sm:$0xf]  ;;  %v9018_v24 = vld [vmem:[%s12345_s8 + $0x3e8] sm:$0xf0]  ;;  %v10694_v37 = vld [vmem:[%s12345_s8 + $0x3d4] sm:$0xf] }
 0x333   : > { %7959 = vmatpush.bf16.msra.mxu0 %v8549_v38  ;;  %v10620_v38 = vld [vmem:[%s12345_s8 + $0x184] sm:$0xf]  ;;  %v8957_v30 = vor.u32 %v10680_v8, %v8954_v10  ;;  %v9021_v34 = vor.u32 %v10696_v23, %v9018_v24 }
 0x334   : > { %7972 = vmatpush.bf16.msra.mxu1 %v8613_v39  ;;  %v8714_v39 = vld [vmem:[%s12345_s8 + $0x188] sm:$0xf0]  ;;  %v10640_v24 = vld [vmem:[%s12345_s8 + $0x224] sm:$0xf] }
 0x335   : > { %7985 = vmatpush.bf16.msra.mxu2 %v8677_v40  ;;  %v7732_v40 = vpop.f32.mrf.mxu2  ;;  %v8717_v28 = vor.u32 %v10620_v38, %v8714_v39  ;;  %v9010_v38 = vld [vmem:[%s12345_s8 + $0x3d8] sm:$0xf0] }
 0x336   : > { %7998 = vmatpush.bf16.msra.mxu3 %v8741_v43  ;;  %v7745_v43 = vpop.f32.mrf.mxu3 }
 0x337   : > { %7960 = vmatpush.bf16.msra.mxu0 %v8541_v56  ;;  %v8837_v56 = vor.u32 %v10650_v41, %v8834_v25  ;;  %v8810_v25 = vld [vmem:[%s12345_s8 + $0x248] sm:$0xf0]  ;;  %v9013_v43 = vor.u32 %v10694_v37, %v9010_v38 }
 0x338   : > { %7973 = vmatpush.bf16.msra.mxu1 %v8605_v59  ;;  %v8965_v59 = vor.u32 %v10682_v50, %v8962_v51  ;;  %v10692_v50 = vld [vmem:[%s12345_s8 + $0x3c4] sm:$0xf]  ;;  %v9002_v51 = vld [vmem:[%s12345_s8 + $0x3c8] sm:$0xf0] }
 0x339   : > { %7986 = vmatpush.bf16.msra.mxu2 %v8669_v61  ;;  %v10648_v61 = vld [vmem:[%s12345_s8 + $0x264] sm:$0xf]  ;;  %v8986_v37 = vld [vmem:[%s12345_s8 + $0x3a8] sm:$0xf0] }
 0x33a   : > { %7999 = vmatpush.bf16.msra.mxu3 %v8733_v4  ;;  %v8890_v4 = vld [vmem:[%s12345_s8 + $0x2e8] sm:$0xf0]  ;;  %v8829_v27 = vor.u32 %v10648_v61, %v8826_v62  ;;  %v8866_v62 = vld [vmem:[%s12345_s8 + $0x2b8] sm:$0xf0] }
 0x33b   : > { %7961 = vmatpush.bf16.msra.mxu0 %v8533_v29  ;;  %v8893_v29 = vor.u32 %v10664_v63, %v8890_v4  ;;  %v10674_v63 = vld [vmem:[%s12345_s8 + $0x334] sm:$0xf]  ;;  %v8994_v4 = vld [vmem:[%s12345_s8 + $0x3b8] sm:$0xf0] }
 0x33c   : > { %7974 = vmatpush.bf16.msra.mxu1 %v8597_v32  ;;  %v8818_v32 = vld [vmem:[%s12345_s8 + $0x258] sm:$0xf0] }
 0x33d   : > { %7987 = vmatpush.bf16.msra.mxu2 %v8661_v33  ;;  %v10662_v33 = vld [vmem:[%s12345_s8 + $0x2d4] sm:$0xf]  ;;  %v8821_v39 = vor.u32 %v10646_v31, %v8818_v32  ;;  %v8858_v32 = vld [vmem:[%s12345_s8 + $0x2a8] sm:$0xf0] }
 0x33e   : > { %8000 = vmatpush.bf16.msra.mxu3 %v8725_v36  ;;  %v8946_v36 = vld [vmem:[%s12345_s8 + $0x358] sm:$0xf0]  ;;  %v8885_v40 = vor.u32 %v10662_v33, %v8882_v35  ;;  %v10672_v33 = vld [vmem:[%s12345_s8 + $0x324] sm:$0xf] }
 0x33f   : > { %7962 = vmatpush.bf16.msra.mxu0 %v8525_v44  ;;  %v8949_v41 = vor.u32 %v10678_v5, %v8946_v36  ;;  %v8938_v44 = vld [vmem:[%s12345_s8 + $0x348] sm:$0xf0]  ;;  %v7756_v45 = vpop.f32.mrf.mxu0  ;;  %v10688_v36 = vld [vmem:[%s12345_s8 + $0x3a4] sm:$0xf] }
 0x340   : > { %7975 = vmatpush.bf16.msra.mxu1 %v8589_v52 }
 0x341   : > { %7988 = vmatpush.bf16.msra.mxu2 %v8653_v53  ;;  %v7769_v53 = vpop.f32.mrf.mxu1 }
 0x342   : > { %8001 = vmatpush.bf16.msra.mxu3 %v8717_v28  ;;  %7963 = vmatmul.bf16.vlgmr.msra.gmra.mxu0 %v12452_v21  ;;  %v8874_v21 = vld [vmem:[%s12345_s8 + $0x2c8] sm:$0xf0]  ;;  %v10642_v28 = vld [vmem:[%s12345_s8 + $0x234] sm:$0xf] }
 0x343   : > { %8007 = vmatpush.bf16.msrb.mxu0 %v8837_v56  ;;  %7976 = vmatmul.bf16.vlgmr.msra.gmra.mxu1 %v12459_v26  ;;  %v7757_v26 = vadd.f32 %v7756_v45, %v13017_v58  ;;  %v8877_v54 = vor.u32 %v10660_v42, %v8874_v21  ;;  %v8802_v56 = vld [vmem:[%s12345_s8 + $0x238] sm:$0xf0]  ;;  %v10638_v42 = vld [vmem:[%s12345_s8 + $0x214] sm:$0xf] }
 0x344   : > { %8020 = vmatpush.bf16.msrb.mxu1 %v8901_v57  ;;  %7989 = vmatmul.bf16.vlgmr.msra.gmra.mxu2 %v12450_v20  ;;  %v10644_v20 = vld [vmem:[%s12345_s8 + $0x244] sm:$0xf]  ;;  %v10658_v57 = vld [vmem:[%s12345_s8 + $0x2b4] sm:$0xf]  ;;  %v8930_v58 = vld [vmem:[%s12345_s8 + $0x338] sm:$0xf0]  ;;  %v8805_v8 = vor.u32 %v10642_v28, %v8802_v56 }
 0x345   : > { %8033 = vmatpush.bf16.msrb.mxu2 %v8965_v59  ;;  %8002 = vmatmul.bf16.vlgmr.msra.gmra.mxu3 %v12454_v22  ;;  %v10676_v22 = vld [vmem:[%s12345_s8 + $0x344] sm:$0xf]  ;;  %v8813_v52 = vor.u32 %v10644_v20, %v8810_v25  ;;  %v9005_v59 = vor.u32 %v10692_v50, %v9002_v51  ;;  %v7770_v61 = vadd.f32 %v7769_v53, %v7757_v26  ;;  %v10654_v21 = vld [vmem:[%s12345_s8 + $0x294] sm:$0xf]  ;;  %v8914_v50 = vld [vmem:[%s12345_s8 + $0x318] sm:$0xf0] }
 0x346   : > { %8046 = vmatpush.bf16.msrb.mxu3 %v9029_v3  ;;  %v8941_v55 = vor.u32 %v10676_v22, %v8938_v44  ;;  %v10690_v3 = vld [vmem:[%s12345_s8 + $0x3b4] sm:$0xf]  ;;  %v8869_v10 = vor.u32 %v10658_v57, %v8866_v62  ;;  %v8933_v23 = vor.u32 %v10674_v63, %v8930_v58  ;;  %v8989_v22 = vor.u32 %v10688_v36, %v8986_v37  ;;  %v8850_v44 = vld [vmem:[%s12345_s8 + $0x298] sm:$0xf0]  ;;  %v10636_v53 = vld [vmem:[%s12345_s8 + $0x204] sm:$0xf] }
 0x347   : > { %8008 = vmatpush.bf16.msrb.mxu0 %v8829_v27  ;;  %v8794_v27 = vld [vmem:[%s12345_s8 + $0x228] sm:$0xf0]  ;;  %v7782_v31 = vpop.f32.mrf.mxu2  ;;  %v7758_v38 = vpop.f32.mrf.mxu0  ;;  %v10670_v45 = vld [vmem:[%s12345_s8 + $0x314] sm:$0xf]  ;;  %v8978_v26 = vld [vmem:[%s12345_s8 + $0x398] sm:$0xf0] }
 0x348   : > { %8021 = vmatpush.bf16.msrb.mxu1 %v8893_v29  ;;  %v10656_v29 = vld [vmem:[%s12345_s8 + $0x2a4] sm:$0xf]  ;;  %v7783_v35 = vadd.f32 %v7782_v31, %v7770_v61  ;;  %v7795_v5 = vpop.f32.mrf.mxu3  ;;  %v10686_v51 = vld [vmem:[%s12345_s8 + $0x394] sm:$0xf]  ;;  %v8917_v28 = vor.u32 %v10670_v45, %v8914_v50  ;;  %v8842_v57 = vld [vmem:[%s12345_s8 + $0x288] sm:$0xf0] }
 0x349   : > { %8034 = vmatpush.bf16.msrb.mxu2 %v8957_v30  ;;  %v8997_v30 = vor.u32 %v10690_v3, %v8994_v4  ;;  %v8861_v20 = vor.u32 %v10656_v29, %v8858_v32  ;;  %v10652_v56 = vld [vmem:[%s12345_s8 + $0x284] sm:$0xf]  ;;  %v8981_v61 = vor.u32 %v10686_v51, %v8978_v26  ;;  %v8906_v62 = vld [vmem:[%s12345_s8 + $0x308] sm:$0xf0]  ;;  %v10714_v4 = vld [vmem:[%s12345_s8 + $0x474] sm:$0xf] }
 0x34a   : > { %8047 = vmatpush.bf16.msrb.mxu3 %v9021_v34  ;;  %v8922_v34 = vld [vmem:[%s12345_s8 + $0x328] sm:$0xf0]  ;;  %v10684_v63 = vld [vmem:[%s12345_s8 + $0x384] sm:$0xf]  ;;  %v10746_v29 = vld [vmem:[%s12345_s8 + $0x574] sm:$0xf]  ;;  %v8845_v31 = vor.u32 %v10652_v56, %v8842_v57 }
 0x34b   : > { %8009 = vmatpush.bf16.msrb.mxu0 %v8821_v39  ;;  %v8797_v39 = vor.u32 %v10640_v24, %v8794_v27  ;;  %v8925_v25 = vor.u32 %v10672_v33, %v8922_v34  ;;  %v8970_v58 = vld [vmem:[%s12345_s8 + $0x388] sm:$0xf0]  ;;  %v9154_v27 = vld [vmem:[%s12345_s8 + $0x4f8] sm:$0xf0]  ;;  %v10762_v33 = vld [vmem:[%s12345_s8 + $0x5f4] sm:$0xf] }
 0x34c   : > { %8022 = vmatpush.bf16.msrb.mxu1 %v8885_v40  ;;  %v7771_v40 = vpop.f32.mrf.mxu1  ;;  %v9282_v34 = vld [vmem:[%s12345_s8 + $0x5f8] sm:$0xf0]  ;;  %v10712_v38 = vld [vmem:[%s12345_s8 + $0x464] sm:$0xf]  ;;  %v10710_v51 = vld [vmem:[%s12345_s8 + $0x454] sm:$0xf] }
 0x34d   : > { %8035 = vmatpush.bf16.msrb.mxu2 %v8949_v41  ;;  %v13088_v41 = vadd.f32 %v7795_v5, %v7783_v35  ;;  %v8973_v35 = vor.u32 %v10684_v63, %v8970_v58  ;;  %v10728_v40 = vld [vmem:[%s12345_s8 + $0x4e4] sm:$0xf]  ;;  %v9074_v26 = vld [vmem:[%s12345_s8 + $0x458] sm:$0xf0]  ;;  %v10758_v56 = vld [vmem:[%s12345_s8 + $0x5d4] sm:$0xf] }
 0x34e   : > { %8048 = vmatpush.bf16.msrb.mxu3 %v9013_v43  ;;  %v8786_v43 = vld [vmem:[%s12345_s8 + $0x218] sm:$0xf0]  ;;  %v9066_v63 = vld [vmem:[%s12345_s8 + $0x448] sm:$0xf0]  ;;  %v10724_v58 = vld [vmem:[%s12345_s8 + $0x4c4] sm:$0xf] }
 0x34f   : > { %8010 = vmatpush.bf16.msrb.mxu0 %v8813_v52  ;;  %v8789_v52 = vor.u32 %v10638_v42, %v8786_v43  ;;  %v7784_v3 = vpop.f32.mrf.mxu2  ;;  %v10744_v42 = vld [vmem:[%s12345_s8 + $0x564] sm:$0xf]  ;;  %v9210_v43 = vld [vmem:[%s12345_s8 + $0x568] sm:$0xf0]  ;;  %v9266_v57 = vld [vmem:[%s12345_s8 + $0x5d8] sm:$0xf0] }
 0x350   : > { %8023 = vmatpush.bf16.msrb.mxu1 %v8877_v54  ;;  %v8778_v54 = vld [vmem:[%s12345_s8 + $0x208] sm:$0xf0]  ;;  %v9213_v50 = vor.u32 %v10744_v42, %v9210_v43  ;;  %v9269_v3 = vor.u32 %v10758_v56, %v9266_v57  ;;  %v10720_v43 = vld [vmem:[%s12345_s8 + $0x4a4] sm:$0xf] }
 0x351   : > { %8036 = vmatpush.bf16.msrb.mxu2 %v8941_v55  ;;  %v8853_v55 = vor.u32 %v10654_v21, %v8850_v44  ;;  %v8781_v24 = vor.u32 %v10636_v53, %v8778_v54  ;;  %v10760_v21 = vld [vmem:[%s12345_s8 + $0x5e4] sm:$0xf]  ;;  %v9138_v54 = vld [vmem:[%s12345_s8 + $0x4d8] sm:$0xf0]  ;;  %v9050_v42 = vld [vmem:[%s12345_s8 + $0x428] sm:$0xf0] }
 0x352   : > { %8049 = vmatpush.bf16.msrb.mxu3 %v9005_v59  ;;  %v10668_v59 = vld [vmem:[%s12345_s8 + $0x304] sm:$0xf] }
 0x353   : > { %8011 = vmatpush.bf16.msrb.mxu0 %v8805_v8  ;;  %v9090_v8 = vld [vmem:[%s12345_s8 + $0x478] sm:$0xf0]  ;;  %v8909_v32 = vor.u32 %v10668_v59, %v8906_v62  ;;  %v9077_v59 = vor.u32 %v10710_v51, %v9074_v26  ;;  %v10708_v62 = vld [vmem:[%s12345_s8 + $0x444] sm:$0xf] }
 0x354   : > { %8024 = vmatpush.bf16.msrb.mxu1 %v8869_v10  ;;  %v10730_v10 = vld [vmem:[%s12345_s8 + $0x4f4] sm:$0xf]  ;;  %v9093_v5 = vor.u32 %v10714_v4, %v9090_v8  ;;  %v9194_v4 = vld [vmem:[%s12345_s8 + $0x548] sm:$0xf0] }
 0x355   : > { %8037 = vmatpush.bf16.msrb.mxu2 %v8933_v23  ;;  %v7797_v23 = vpop.f32.mrf.mxu3  ;;  %v9157_v36 = vor.u32 %v10730_v10, %v9154_v27  ;;  %v10756_v10 = vld [vmem:[%s12345_s8 + $0x5c4] sm:$0xf] }
 0x356   : > { %8050 = vmatpush.bf16.msrb.mxu3 %v8997_v30  ;;  %v9218_v30 = vld [vmem:[%s12345_s8 + $0x578] sm:$0xf0]  ;;  %v9258_v23 = vld [vmem:[%s12345_s8 + $0x5c8] sm:$0xf0] }
 0x357   : > { %8012 = vmatpush.bf16.msrb.mxu0 %v8797_v39  ;;  %v9221_v37 = vor.u32 %v10746_v29, %v9218_v30  ;;  %v9082_v39 = vld [vmem:[%s12345_s8 + $0x468] sm:$0xf0] }
 0x358   : > { %8025 = vmatpush.bf16.msrb.mxu1 %v8861_v20  ;;  %v9285_v20 = vor.u32 %v10762_v33, %v9282_v34  ;;  %v9085_v44 = vor.u32 %v10712_v38, %v9082_v39  ;;  %v10722_v33 = vld [vmem:[%s12345_s8 + $0x4b4] sm:$0xf]  ;;  %v9261_v34 = vor.u32 %v10756_v10, %v9258_v23  ;;  %v9250_v38 = vld [vmem:[%s12345_s8 + $0x5b8] sm:$0xf0]  ;;  %v10700_v10 = vld [vmem:[%s12345_s8 + $0x404] sm:$0xf] }
 0x359   : > { %8038 = vmatpush.bf16.msrb.mxu2 %v8925_v25  ;;  %v9146_v25 = vld [vmem:[%s12345_s8 + $0x4e8] sm:$0xf0] }
 0x35a   : > { %8051 = vmatpush.bf16.msrb.mxu3 %v8989_v22  ;;  %v9274_v22 = vld [vmem:[%s12345_s8 + $0x5e8] sm:$0xf0]  ;;  %v9149_v45 = vor.u32 %v10728_v40, %v9146_v25  ;;  %v10704_v25 = vld [vmem:[%s12345_s8 + $0x424] sm:$0xf] }
 0x35b   : > { %8013 = vmatpush.bf16.msrb.mxu0 %v8789_v52  ;;  %v10726_v52 = vld [vmem:[%s12345_s8 + $0x4d4] sm:$0xf]  ;;  %v9277_v53 = vor.u32 %v10760_v21, %v9274_v22  ;;  %v9034_v23 = vld [vmem:[%s12345_s8 + $0x408] sm:$0xf0] }
 0x35c   : > { %8026 = vmatpush.bf16.msrb.mxu1 %v8853_v55  ;;  %v10742_v55 = vld [vmem:[%s12345_s8 + $0x554] sm:$0xf] }
 0x35d   : > { %8039 = vmatpush.bf16.msrb.mxu2 %v8917_v28  ;;  %v9202_v28 = vld [vmem:[%s12345_s8 + $0x558] sm:$0xf0] }
 0x35e   : > { %8052 = vmatpush.bf16.msrb.mxu3 %v8981_v61  ;;  %v9205_v61 = vor.u32 %v10742_v55, %v9202_v28  ;;  %v9053_v55 = vor.u32 %v10704_v25, %v9050_v42 }
 0x35f   : > { %8014 = vmatpush.bf16.msrb.mxu0 %v8781_v24  ;;  %v7808_v8 = vpop.f32.mrf.mxu0  ;;  %v9069_v24 = vor.u32 %v10708_v62, %v9066_v63  ;;  %v10718_v62 = vld [vmem:[%s12345_s8 + $0x494] sm:$0xf] }
 0x360   : > { %8027 = vmatpush.bf16.msrb.mxu1 %v8845_v31  ;;  %v7821_v27 = vpop.f32.mrf.mxu1  ;;  %v10706_v31 = vld [vmem:[%s12345_s8 + $0x434] sm:$0xf] }
 0x361   : > { %8040 = vmatpush.bf16.msrb.mxu2 %v8909_v32  ;;  %v9058_v32 = vld [vmem:[%s12345_s8 + $0x438] sm:$0xf0] }
 0x362   : > { %8053 = vmatpush.bf16.msrb.mxu3 %v8973_v35  ;;  %8015 = vmatmul.bf16.vlgmr.msrb.gmra.mxu0 %v12493_v0  ;;  %v9130_v0 = vld [vmem:[%s12345_s8 + $0x4c8] sm:$0xf0]  ;;  %v9061_v39 = vor.u32 %v10706_v31, %v9058_v32 }
 0x363   : > { %8059 = vmatpush.bf16.msra.mxu0 %v9093_v5  ;;  %8028 = vmatmul.bf16.vlgmr.msrb.gmra.mxu1 %v12497_v2  ;;  %v7809_v2 = vadd.f32 %v7808_v8, %v13088_v41  ;;  %v9133_v29 = vor.u32 %v10724_v58, %v9130_v0  ;;  %v9122_v5 = vld [vmem:[%s12345_s8 + $0x4b8] sm:$0xf0]  ;;  %v9162_v32 = vld [vmem:[%s12345_s8 + $0x508] sm:$0xf0] }
 0x364   : > { %8072 = vmatpush.bf16.msra.mxu1 %v9157_v36  ;;  %8041 = vmatmul.bf16.vlgmr.msrb.gmra.mxu2 %v12488_v60  ;;  %v9141_v60 = vor.u32 %v10726_v52, %v9138_v54  ;;  %v10738_v36 = vld [vmem:[%s12345_s8 + $0x534] sm:$0xf]  ;;  %v9186_v41 = vld [vmem:[%s12345_s8 + $0x538] sm:$0xf0]  ;;  %v9125_v40 = vor.u32 %v10722_v33, %v9122_v5  ;;  %v10752_v52 = vld [vmem:[%s12345_s8 + $0x5a4] sm:$0xf] }
 0x365   : > { %8085 = vmatpush.bf16.msra.mxu2 %v9221_v37  ;;  %8054 = vmatmul.bf16.vlgmr.msrb.gmra.mxu3 %v12495_v1  ;;  %v10740_v1 = vld [vmem:[%s12345_s8 + $0x544] sm:$0xf]  ;;  %v7822_v35 = vadd.f32 %v7821_v27, %v7809_v2  ;;  %v10754_v37 = vld [vmem:[%s12345_s8 + $0x5b4] sm:$0xf]  ;;  %v9106_v58 = vld [vmem:[%s12345_s8 + $0x498] sm:$0xf0] }
 0x366   : > { %8098 = vmatpush.bf16.msra.mxu3 %v9285_v20  ;;  %v9197_v30 = vor.u32 %v10740_v1, %v9194_v4  ;;  %v9189_v20 = vor.u32 %v10738_v36, %v9186_v41  ;;  %v9253_v21 = vor.u32 %v10754_v37, %v9250_v38  ;;  %v9170_v0 = vld [vmem:[%s12345_s8 + $0x518] sm:$0xf0]  ;;  %v10750_v1 = vld [vmem:[%s12345_s8 + $0x594] sm:$0xf]  ;;  %v9109_v2 = vor.u32 %v10718_v62, %v9106_v58  ;;  %v10716_v27 = vld [vmem:[%s12345_s8 + $0x484] sm:$0xf] }
 0x367   : > { %8060 = vmatpush.bf16.msra.mxu0 %v9085_v44  ;;  %v7834_v22 = vpop.f32.mrf.mxu2  ;;  %v9114_v44 = vld [vmem:[%s12345_s8 + $0x4a8] sm:$0xf0]  ;;  %v7810_v54 = vpop.f32.mrf.mxu0  ;;  %v9234_v4 = vld [vmem:[%s12345_s8 + $0x598] sm:$0xf0]  ;;  %v10748_v33 = vld [vmem:[%s12345_s8 + $0x584] sm:$0xf]  ;;  %v9037_v38 = vor.u32 %v10700_v10, %v9034_v23 }
 0x368   : > { %8073 = vmatpush.bf16.msra.mxu1 %v9149_v45  ;;  %v10736_v45 = vld [vmem:[%s12345_s8 + $0x524] sm:$0xf]  ;;  %v7835_v51 = vadd.f32 %v7834_v22, %v7822_v35  ;;  %v7847_v26 = vpop.f32.mrf.mxu3  ;;  %v7823_v28 = vpop.f32.mrf.mxu1  ;;  %v9117_v57 = vor.u32 %v10720_v43, %v9114_v44  ;;  %v9237_v31 = vor.u32 %v10750_v1, %v9234_v4  ;;  %v10778_v5 = vld [vmem:[%s12345_s8 + $0x674] sm:$0xf]  ;;  %v9346_v36 = vld [vmem:[%s12345_s8 + $0x678] sm:$0xf0] }
 0x369   : > { %8086 = vmatpush.bf16.msra.mxu2 %v9213_v50  ;;  %v9178_v50 = vld [vmem:[%s12345_s8 + $0x528] sm:$0xf0]  ;;  %v10794_v41 = vld [vmem:[%s12345_s8 + $0x6f4] sm:$0xf]  ;;  %v9349_v44 = vor.u32 %v10778_v5, %v9346_v36  ;;  %v9330_v58 = vld [vmem:[%s12345_s8 + $0x658] sm:$0xf0] }
 0x36a   : > { %8099 = vmatpush.bf16.msra.mxu3 %v9277_v53  ;;  %v9242_v53 = vld [vmem:[%s12345_s8 + $0x5a8] sm:$0xf0]  ;;  %v13159_v56 = vadd.f32 %v7847_v26, %v7835_v51  ;;  %v10826_v43 = vld [vmem:[%s12345_s8 + $0x7f4] sm:$0xf]  ;;  %v10776_v51 = vld [vmem:[%s12345_s8 + $0x664] sm:$0xf] }
 0x36b   : > { %8061 = vmatpush.bf16.msra.mxu0 %v9077_v59  ;;  %v9181_v59 = vor.u32 %v10736_v45, %v9178_v50  ;;  %v9245_v63 = vor.u32 %v10752_v52, %v9242_v53  ;;  %v9338_v26 = vld [vmem:[%s12345_s8 + $0x668] sm:$0xf0]  ;;  %v10792_v52 = vld [vmem:[%s12345_s8 + $0x6e4] sm:$0xf]  ;;  %v9394_v1 = vld [vmem:[%s12345_s8 + $0x6d8] sm:$0xf0] }
 0x36c   : > { %8074 = vmatpush.bf16.msra.mxu1 %v9141_v60  ;;  %v10702_v60 = vld [vmem:[%s12345_s8 + $0x414] sm:$0xf]  ;;  %v9402_v54 = vld [vmem:[%s12345_s8 + $0x6e8] sm:$0xf0]  ;;  %v9522_v23 = vld [vmem:[%s12345_s8 + $0x7d8] sm:$0xf0] }
 0x36d   : > { %8087 = vmatpush.bf16.msra.mxu2 %v9205_v61  ;;  %v9042_v61 = vld [vmem:[%s12345_s8 + $0x418] sm:$0xf0]  ;;  %v9466_v28 = vld [vmem:[%s12345_s8 + $0x768] sm:$0xf0]  ;;  %v10806_v4 = vld [vmem:[%s12345_s8 + $0x754] sm:$0xf] }
 0x36e   : > { %8100 = vmatpush.bf16.msra.mxu3 %v9269_v3  ;;  %v10734_v3 = vld [vmem:[%s12345_s8 + $0x514] sm:$0xf]  ;;  %v9045_v8 = vor.u32 %v10702_v60, %v9042_v61  ;;  %v9341_v60 = vor.u32 %v10776_v51, %v9338_v26  ;;  %v9405_v61 = vor.u32 %v10792_v52, %v9402_v54  ;;  %v10768_v51 = vld [vmem:[%s12345_s8 + $0x624] sm:$0xf]  ;;  %v9306_v26 = vld [vmem:[%s12345_s8 + $0x628] sm:$0xf0] }
 0x36f   : > { %8062 = vmatpush.bf16.msra.mxu0 %v9069_v24  ;;  %v9173_v24 = vor.u32 %v10734_v3, %v9170_v0  ;;  %v7836_v35 = vpop.f32.mrf.mxu2  ;;  %v10790_v3 = vld [vmem:[%s12345_s8 + $0x6d4] sm:$0xf]  ;;  %v10784_v52 = vld [vmem:[%s12345_s8 + $0x6a4] sm:$0xf] }
 0x370   : > { %8075 = vmatpush.bf16.msra.mxu1 %v9133_v29  ;;  %v9098_v29 = vld [vmem:[%s12345_s8 + $0x488] sm:$0xf0]  ;;  %v7849_v37 = vpop.f32.mrf.mxu3  ;;  %v10822_v10 = vld [vmem:[%s12345_s8 + $0x7d4] sm:$0xf] }
 0x371   : > { %8088 = vmatpush.bf16.msra.mxu2 %v9197_v30  ;;  %v10732_v30 = vld [vmem:[%s12345_s8 + $0x504] sm:$0xf]  ;;  %v9101_v25 = vor.u32 %v10716_v27, %v9098_v29  ;;  %v9322_v29 = vld [vmem:[%s12345_s8 + $0x648] sm:$0xf0] }
 0x372   : > { %8101 = vmatpush.bf16.msra.mxu3 %v9261_v34  ;;  %v9226_v34 = vld [vmem:[%s12345_s8 + $0x588] sm:$0xf0]  ;;  %v9165_v42 = vor.u32 %v10732_v30, %v9162_v32  ;;  %v10772_v27 = vld [vmem:[%s12345_s8 + $0x644] sm:$0xf] }
 0x373   : > { %8063 = vmatpush.bf16.msra.mxu0 %v9061_v39  ;;  %v9410_v39 = vld [vmem:[%s12345_s8 + $0x6f8] sm:$0xf0]  ;;  %v9229_v22 = vor.u32 %v10748_v33, %v9226_v34  ;;  %v9386_v30 = vld [vmem:[%s12345_s8 + $0x6c8] sm:$0xf0]  ;;  %v10820_v33 = vld [vmem:[%s12345_s8 + $0x7c4] sm:$0xf]  ;;  %v9325_v5 = vor.u32 %v10772_v27, %v9322_v29 }
 0x374   : > { %8076 = vmatpush.bf16.msra.mxu1 %v9125_v40  ;;  %v10810_v40 = vld [vmem:[%s12345_s8 + $0x774] sm:$0xf]  ;;  %v9413_v45 = vor.u32 %v10794_v41, %v9410_v39  ;;  %v9450_v32 = vld [vmem:[%s12345_s8 + $0x748] sm:$0xf0]  ;;  %v9314_v39 = vld [vmem:[%s12345_s8 + $0x638] sm:$0xf0] }
 0x375   : > { %8089 = vmatpush.bf16.msra.mxu2 %v9189_v20  ;;  %v9474_v20 = vld [vmem:[%s12345_s8 + $0x778] sm:$0xf0]  ;;  %v9514_v34 = vld [vmem:[%s12345_s8 + $0x7c8] sm:$0xf0]  ;;  %v10814_v29 = vld [vmem:[%s12345_s8 + $0x794] sm:$0xf] }
 0x376   : > { %8102 = vmatpush.bf16.msra.mxu3 %v9253_v21  ;;  %v9538_v21 = vld [vmem:[%s12345_s8 + $0x7f8] sm:$0xf0]  ;;  %v9477_v50 = vor.u32 %v10810_v40, %v9474_v20  ;;  %v10786_v40 = vld [vmem:[%s12345_s8 + $0x6b4] sm:$0xf]  ;;  %v9517_v20 = vor.u32 %v10820_v33, %v9514_v34  ;;  %v10780_v33 = vld [vmem:[%s12345_s8 + $0x684] sm:$0xf] }
 0x377   : > { %8064 = vmatpush.bf16.msra.mxu0 %v9053_v55  ;;  %v9541_v53 = vor.u32 %v10826_v43, %v9538_v21  ;;  %v10808_v55 = vld [vmem:[%s12345_s8 + $0x764] sm:$0xf]  ;;  %v10802_v43 = vld [vmem:[%s12345_s8 + $0x734] sm:$0xf]  ;;  %v9426_v27 = vld [vmem:[%s12345_s8 + $0x718] sm:$0xf0] }
 0x378   : > { %8077 = vmatpush.bf16.msra.mxu1 %v9117_v57  ;;  %v10824_v57 = vld [vmem:[%s12345_s8 + $0x7e4] sm:$0xf]  ;;  %v9469_v62 = vor.u32 %v10808_v55, %v9466_v28  ;;  %v10818_v21 = vld [vmem:[%s12345_s8 + $0x7b4] sm:$0xf]  ;;  %v9370_v55 = vld [vmem:[%s12345_s8 + $0x6a8] sm:$0xf0] }
 0x379   : > { %8090 = vmatpush.bf16.msra.mxu2 %v9181_v59  ;;  %v9530_v59 = vld [vmem:[%s12345_s8 + $0x7e8] sm:$0xf0]  ;;  %v10800_v28 = vld [vmem:[%s12345_s8 + $0x724] sm:$0xf] }
 0x37a   : > { %8103 = vmatpush.bf16.msra.mxu3 %v9245_v63  ;;  %v10774_v63 = vld [vmem:[%s12345_s8 + $0x654] sm:$0xf]  ;;  %v9533_v0 = vor.u32 %v10824_v57, %v9530_v59  ;;  %v9434_v57 = vld [vmem:[%s12345_s8 + $0x728] sm:$0xf0] }
 0x37b   : > { %8065 = vmatpush.bf16.msra.mxu0 %v9045_v8  ;;  %v9458_v8 = vld [vmem:[%s12345_s8 + $0x758] sm:$0xf0]  ;;  %v9354_v34 = vld [vmem:[%s12345_s8 + $0x688] sm:$0xf0] }
 0x37c   : > { %8078 = vmatpush.bf16.msra.mxu1 %v9109_v2  ;;  %v9397_v2 = vor.u32 %v10790_v3, %v9394_v1  ;;  %v9373_v1 = vor.u32 %v10784_v52, %v9370_v55  ;;  %v9594_v55 = vld [vmem:[%s12345_s8 + $0x868] sm:$0xf0] }
 0x37d   : > { %8091 = vmatpush.bf16.msra.mxu2 %v9173_v24  ;;  %v9461_v24 = vor.u32 %v10806_v4, %v9458_v8  ;;  %v9437_v4 = vor.u32 %v10800_v28, %v9434_v57  ;;  %v10766_v8 = vld [vmem:[%s12345_s8 + $0x614] sm:$0xf]  ;;  %v10856_v28 = vld [vmem:[%s12345_s8 + $0x8e4] sm:$0xf] }
 0x37e   : > { %8104 = vmatpush.bf16.msra.mxu3 %v9237_v31  ;;  %v10804_v31 = vld [vmem:[%s12345_s8 + $0x744] sm:$0xf] }
 0x37f   : > { %8066 = vmatpush.bf16.msra.mxu0 %v9037_v38  ;;  %v9453_v37 = vor.u32 %v10804_v31, %v9450_v32  ;;  %v10770_v38 = vld [vmem:[%s12345_s8 + $0x634] sm:$0xf]  ;;  %v9290_v31 = vld [vmem:[%s12345_s8 + $0x608] sm:$0xf0] }
 0x380   : > { %8079 = vmatpush.bf16.msra.mxu1 %v9101_v25  ;;  %v7873_v36 = vpop.f32.mrf.mxu1 }
 0x381   : > { %8092 = vmatpush.bf16.msra.mxu2 %v9165_v42  ;;  %v9378_v42 = vld [vmem:[%s12345_s8 + $0x6b8] sm:$0xf0] }
 0x382   : > { %8105 = vmatpush.bf16.msra.mxu3 %v9229_v22  ;;  %8067 = vmatmul.bf16.vlgmr.msra.gmra.mxu0 %v12583_v12  ;;  %v9333_v12 = vor.u32 %v10774_v63, %v9330_v58  ;;  %v9506_v22 = vld [vmem:[%s12345_s8 + $0x7b8] sm:$0xf0]  ;;  %v9309_v58 = vor.u32 %v10768_v51, %v9306_v26 }
 0x383   : > { %8111 = vmatpush.bf16.msrb.mxu0 %v9349_v44  ;;  %8080 = vmatmul.bf16.vlgmr.msra.gmra.mxu1 %v12589_v16  ;;  %v9525_v16 = vor.u32 %v10822_v10, %v9522_v23  ;;  %v9317_v44 = vor.u32 %v10770_v38, %v9314_v39  ;;  %v9298_v10 = vld [vmem:[%s12345_s8 + $0x618] sm:$0xf0]  ;;  %v10782_v23 = vld [vmem:[%s12345_s8 + $0x694] sm:$0xf] }
 0x384   : > { %8124 = vmatpush.bf16.msrb.mxu1 %v9413_v45  ;;  %8093 = vmatmul.bf16.vlgmr.msra.gmra.mxu2 %v12587_v15  ;;  %v10788_v15 = vld [vmem:[%s12345_s8 + $0x6c4] sm:$0xf]  ;;  %v9381_v45 = vor.u32 %v10786_v40, %v9378_v42  ;;  %v10842_v39 = vld [vmem:[%s12345_s8 + $0x874] sm:$0xf]  ;;  %v9602_v40 = vld [vmem:[%s12345_s8 + $0x878] sm:$0xf0] }
 0x385   : > { %8137 = vmatpush.bf16.msrb.mxu2 %v9477_v50  ;;  %8106 = vmatmul.bf16.vlgmr.msra.gmra.mxu3 %v12591_v17  ;;  %v7860_v17 = vpop.f32.mrf.mxu0  ;;  %v9389_v41 = vor.u32 %v10788_v15, %v9386_v30  ;;  %v9490_v15 = vld [vmem:[%s12345_s8 + $0x798] sm:$0xf0]  ;;  %v10764_v30 = vld [vmem:[%s12345_s8 + $0x604] sm:$0xf]  ;;  %v9605_v26 = vor.u32 %v10842_v39, %v9602_v40  ;;  %v10834_v39 = vld [vmem:[%s12345_s8 + $0x834] sm:$0xf] }
 0x386   : > { %8150 = vmatpush.bf16.msrb.mxu3 %v9541_v53  ;;  %v7861_v35 = vadd.f32 %v7860_v17, %v13159_v56  ;;  %v9442_v56 = vld [vmem:[%s12345_s8 + $0x738] sm:$0xf0]  ;;  %v9509_v53 = vor.u32 %v10818_v21, %v9506_v22  ;;  %v9293_v42 = vor.u32 %v10764_v30, %v9290_v31  ;;  %v9357_v22 = vor.u32 %v10780_v33, %v9354_v34  ;;  %v10836_v30 = vld [vmem:[%s12345_s8 + $0x844] sm:$0xf]  ;;  %v9578_v31 = vld [vmem:[%s12345_s8 + $0x848] sm:$0xf0] }
 0x387   : > { %8112 = vmatpush.bf16.msrb.mxu0 %v9341_v60  ;;  %v9445_v50 = vor.u32 %v10802_v43, %v9442_v56  ;;  %v7886_v54 = vpop.f32.mrf.mxu2  ;;  %v9666_v43 = vld [vmem:[%s12345_s8 + $0x8f8] sm:$0xf0]  ;;  %v10874_v56 = vld [vmem:[%s12345_s8 + $0x974] sm:$0xf]  ;;  %v9706_v33 = vld [vmem:[%s12345_s8 + $0x948] sm:$0xf0] }
 0x388   : > { %8125 = vmatpush.bf16.msrb.mxu1 %v9405_v61  ;;  %v7874_v25 = vadd.f32 %v7873_v36, %v7861_v35  ;;  %v7899_v60 = vpop.f32.mrf.mxu3  ;;  %v10816_v61 = vld [vmem:[%s12345_s8 + $0x7a4] sm:$0xf]  ;;  %v7875_v3 = vpop.f32.mrf.mxu1  ;;  %v9418_v36 = vld [vmem:[%s12345_s8 + $0x708] sm:$0xf0]  ;;  %v9730_v21 = vld [vmem:[%s12345_s8 + $0x978] sm:$0xf0] }
 0x389   : > { %8138 = vmatpush.bf16.msrb.mxu2 %v9469_v62  ;;  %v9498_v62 = vld [vmem:[%s12345_s8 + $0x7a8] sm:$0xf0]  ;;  %v10796_v35 = vld [vmem:[%s12345_s8 + $0x704] sm:$0xf]  ;;  %v9570_v40 = vld [vmem:[%s12345_s8 + $0x838] sm:$0xf0] }
 0x38a   : > { %8151 = vmatpush.bf16.msrb.mxu3 %v9533_v0  ;;  %v7887_v59 = vadd.f32 %v7886_v54, %v7874_v25  ;;  %v10840_v54 = vld [vmem:[%s12345_s8 + $0x864] sm:$0xf] }
 0x38b   : > { %8113 = vmatpush.bf16.msrb.mxu0 %v9333_v12  ;;  %v9501_v12 = vor.u32 %v10816_v61, %v9498_v62  ;;  %v9722_v61 = vld [vmem:[%s12345_s8 + $0x968] sm:$0xf0]  ;;  %v10888_v62 = vld [vmem:[%s12345_s8 + $0x9e4] sm:$0xf] }
 0x38c   : > { %8126 = vmatpush.bf16.msrb.mxu1 %v9397_v2  ;;  %v13230_v0 = vadd.f32 %v7899_v60, %v7887_v59  ;;  %v9362_v2 = vld [vmem:[%s12345_s8 + $0x698] sm:$0xf0]  ;;  %v9658_v59 = vld [vmem:[%s12345_s8 + $0x8e8] sm:$0xf0]  ;;  %v10872_v60 = vld [vmem:[%s12345_s8 + $0x964] sm:$0xf] }
 0x38d   : > { %8139 = vmatpush.bf16.msrb.mxu2 %v9461_v24  ;;  %v7862_v63 = vpop.f32.mrf.mxu0  ;;  %v10798_v24 = vld [vmem:[%s12345_s8 + $0x714] sm:$0xf]  ;;  %v9365_v32 = vor.u32 %v10782_v23, %v9362_v2  ;;  %v9661_v3 = vor.u32 %v10856_v28, %v9658_v59  ;;  %v10884_v34 = vld [vmem:[%s12345_s8 + $0x9c4] sm:$0xf] }
 0x38e   : > { %8152 = vmatpush.bf16.msrb.mxu3 %v9525_v16  ;;  %v9301_v16 = vor.u32 %v10766_v8, %v9298_v10  ;;  %v9429_v17 = vor.u32 %v10798_v24, %v9426_v27  ;;  %v9786_v63 = vld [vmem:[%s12345_s8 + $0x9e8] sm:$0xf0]  ;;  %v9586_v8 = vld [vmem:[%s12345_s8 + $0x858] sm:$0xf0]  ;;  %v10854_v10 = vld [vmem:[%s12345_s8 + $0x8d4] sm:$0xf] }
 0x38f   : > { %8114 = vmatpush.bf16.msrb.mxu0 %v9325_v5  ;;  %v9493_v5 = vor.u32 %v10814_v29, %v9490_v15  ;;  %v7888_v38 = vpop.f32.mrf.mxu2  ;;  %v9789_v23 = vor.u32 %v10888_v62, %v9786_v63  ;;  %v10870_v2 = vld [vmem:[%s12345_s8 + $0x954] sm:$0xf]  ;;  %v9714_v24 = vld [vmem:[%s12345_s8 + $0x958] sm:$0xf0]  ;;  %v10864_v28 = vld [vmem:[%s12345_s8 + $0x924] sm:$0xf] }
 0x390   : > { %8127 = vmatpush.bf16.msrb.mxu1 %v9389_v41  ;;  %v10812_v41 = vld [vmem:[%s12345_s8 + $0x784] sm:$0xf]  ;;  %v7901_v25 = vpop.f32.mrf.mxu3  ;;  %v10886_v27 = vld [vmem:[%s12345_s8 + $0x9d4] sm:$0xf]  ;;  %v9778_v29 = vld [vmem:[%s12345_s8 + $0x9d8] sm:$0xf0] }
 0x391   : > { %8140 = vmatpush.bf16.msrb.mxu2 %v9453_v37  ;;  %v9482_v37 = vld [vmem:[%s12345_s8 + $0x788] sm:$0xf0] }
 0x392   : > { %8153 = vmatpush.bf16.msrb.mxu3 %v9517_v20  ;;  %v10858_v20 = vld [vmem:[%s12345_s8 + $0x8f4] sm:$0xf]  ;;  %v9485_v51 = vor.u32 %v10812_v41, %v9482_v37  ;;  %v9754_v62 = vld [vmem:[%s12345_s8 + $0x9a8] sm:$0xf0] }
 0x393   : > { %8115 = vmatpush.bf16.msrb.mxu0 %v9317_v44  ;;  %v9421_v44 = vor.u32 %v10796_v35, %v9418_v36  ;;  %v9669_v52 = vor.u32 %v10858_v20, %v9666_v43  ;;  %v9770_v35 = vld [vmem:[%s12345_s8 + $0x9c8] sm:$0xf0]  ;;  %v9581_v36 = vor.u32 %v10836_v30, %v9578_v31  ;;  %v10850_v20 = vld [vmem:[%s12345_s8 + $0x8b4] sm:$0xf]  ;;  %v9634_v43 = vld [vmem:[%s12345_s8 + $0x8b8] sm:$0xf0] }
 0x394   : > { %8128 = vmatpush.bf16.msrb.mxu1 %v9381_v45  ;;  %v10890_v45 = vld [vmem:[%s12345_s8 + $0x9f4] sm:$0xf]  ;;  %v9773_v25 = vor.u32 %v10884_v34, %v9770_v35  ;;  %v10828_v30 = vld [vmem:[%s12345_s8 + $0x804] sm:$0xf]  ;;  %v9546_v31 = vld [vmem:[%s12345_s8 + $0x808] sm:$0xf0] }
 0x395   : > { %8141 = vmatpush.bf16.msrb.mxu2 %v9445_v50  ;;  %v9794_v50 = vld [vmem:[%s12345_s8 + $0x9f8] sm:$0xf0]  ;;  %v9674_v34 = vld [vmem:[%s12345_s8 + $0x908] sm:$0xf0]  ;;  %v10876_v35 = vld [vmem:[%s12345_s8 + $0x984] sm:$0xf] }
 0x396   : > { %8154 = vmatpush.bf16.msrb.mxu3 %v9509_v53  ;;  %v9733_v53 = vor.u32 %v10874_v56, %v9730_v21  ;;  %v9797_v57 = vor.u32 %v10890_v45, %v9794_v50  ;;  %v10866_v56 = vld [vmem:[%s12345_s8 + $0x934] sm:$0xf]  ;;  %v9637_v45 = vor.u32 %v10850_v20, %v9634_v43  ;;  %v9922_v20 = vld [vmem:[%s12345_s8 + $0xaf8] sm:$0xf0] }
 0x397   : > { %8116 = vmatpush.bf16.msrb.mxu0 %v9309_v58  ;;  %v9597_v58 = vor.u32 %v10840_v54, %v9594_v55  ;;  %v10882_v21 = vld [vmem:[%s12345_s8 + $0x9b4] sm:$0xf]  ;;  %v9626_v55 = vld [vmem:[%s12345_s8 + $0x8a8] sm:$0xf0] }
 0x398   : > { %8129 = vmatpush.bf16.msrb.mxu1 %v9373_v1  ;;  %v9725_v1 = vor.u32 %v10872_v60, %v9722_v61  ;;  %v10880_v61 = vld [vmem:[%s12345_s8 + $0x9a4] sm:$0xf] }
 0x399   : > { %8142 = vmatpush.bf16.msrb.mxu2 %v9437_v4  ;;  %v10838_v4 = vld [vmem:[%s12345_s8 + $0x854] sm:$0xf] }
 0x39a   : > { %8155 = vmatpush.bf16.msrb.mxu3 %v9501_v12  ;;  %v9650_v12 = vld [vmem:[%s12345_s8 + $0x8d8] sm:$0xf0] }
 0x39b   : > { %8117 = vmatpush.bf16.msrb.mxu0 %v9301_v16  ;;  %v9653_v15 = vor.u32 %v10854_v10, %v9650_v12  ;;  %v9717_v16 = vor.u32 %v10870_v2, %v9714_v24  ;;  %v10830_v10 = vld [vmem:[%s12345_s8 + $0x814] sm:$0xf]  ;;  %v9757_v2 = vor.u32 %v10880_v61, %v9754_v62  ;;  %v9618_v24 = vld [vmem:[%s12345_s8 + $0x898] sm:$0xf0] }
 0x39c   : > { %8130 = vmatpush.bf16.msrb.mxu1 %v9365_v32  ;;  %v9642_v32 = vld [vmem:[%s12345_s8 + $0x8c8] sm:$0xf0]  ;;  %v10846_v12 = vld [vmem:[%s12345_s8 + $0x894] sm:$0xf] }
 0x39d   : > { %8143 = vmatpush.bf16.msrb.mxu2 %v9429_v17  ;;  %v10868_v17 = vld [vmem:[%s12345_s8 + $0x944] sm:$0xf] }
 0x39e   : > { %8156 = vmatpush.bf16.msrb.mxu3 %v9493_v5  ;;  %v9709_v38 = vor.u32 %v10868_v17, %v9706_v33  ;;  %v9610_v17 = vld [vmem:[%s12345_s8 + $0x888] sm:$0xf0]  ;;  %v10860_v33 = vld [vmem:[%s12345_s8 + $0x904] sm:$0xf] }
 0x39f   : > { %8118 = vmatpush.bf16.msrb.mxu0 %v9293_v42 }
 0x3a0   : > { %8131 = vmatpush.bf16.msrb.mxu1 %v9357_v22  ;;  %v7925_v41 = vpop.f32.mrf.mxu1  ;;  %v9762_v22 = vld [vmem:[%s12345_s8 + $0x9b8] sm:$0xf0] }
 0x3a1   : > { %8144 = vmatpush.bf16.msrb.mxu2 %v9421_v44  ;;  %v9573_v44 = vor.u32 %v10834_v39, %v9570_v40  ;;  %v9549_v40 = vor.u32 %v10828_v30, %v9546_v31  ;;  %v10932_v30 = vld [vmem:[%s12345_s8 + $0xb44] sm:$0xf]  ;;  %v9962_v31 = vld [vmem:[%s12345_s8 + $0xb48] sm:$0xf0] }
 0x3a2   : > { %8157 = vmatpush.bf16.msrb.mxu3 %v9485_v51  ;;  %8119 = vmatmul.bf16.vlgmr.msrb.gmra.mxu0 %v12649_v46  ;;  %v9589_v46 = vor.u32 %v10838_v4, %v9586_v8  ;;  %v10832_v51 = vld [vmem:[%s12345_s8 + $0x824] sm:$0xf] }
 0x3a3   : > { %8163 = vmatpush.bf16.msra.mxu0 %v9605_v26  ;;  %8132 = vmatmul.bf16.vlgmr.msrb.gmra.mxu1 %v12653_v48  ;;  %v9781_v48 = vor.u32 %v10886_v27, %v9778_v29  ;;  %v9562_v26 = vld [vmem:[%s12345_s8 + $0x828] sm:$0xf0]  ;;  %v10862_v27 = vld [vmem:[%s12345_s8 + $0x914] sm:$0xf]  ;;  %v9682_v29 = vld [vmem:[%s12345_s8 + $0x918] sm:$0xf0] }
 0x3a4   : > { %8176 = vmatpush.bf16.msra.mxu1 %v9669_v52  ;;  %8145 = vmatmul.bf16.vlgmr.msrb.gmra.mxu2 %v12651_v47  ;;  %v10852_v47 = vld [vmem:[%s12345_s8 + $0x8c4] sm:$0xf] }
 0x3a5   : > { %8189 = vmatpush.bf16.msra.mxu2 %v9733_v53  ;;  %8158 = vmatmul.bf16.vlgmr.msrb.gmra.mxu3 %v12655_v49  ;;  %v7912_v49 = vpop.f32.mrf.mxu0  ;;  %v9645_v37 = vor.u32 %v10852_v47, %v9642_v32  ;;  %v10848_v52 = vld [vmem:[%s12345_s8 + $0x8a4] sm:$0xf]  ;;  %v9765_v53 = vor.u32 %v10882_v21, %v9762_v22  ;;  %v9621_v47 = vor.u32 %v10846_v12, %v9618_v24  ;;  %v10050_v21 = vld [vmem:[%s12345_s8 + $0xbf8] sm:$0xf0]  ;;  %v10950_v12 = vld [vmem:[%s12345_s8 + $0xbd4] sm:$0xf] }
 0x3a6   : > { %8202 = vmatpush.bf16.msra.mxu3 %v9797_v57  ;;  %v7913_v5 = vadd.f32 %v7912_v49, %v13230_v0  ;;  %v9698_v0 = vld [vmem:[%s12345_s8 + $0x938] sm:$0xf0]  ;;  %v9690_v57 = vld [vmem:[%s12345_s8 + $0x928] sm:$0xf0]  ;;  %v9629_v4 = vor.u32 %v10848_v52, %v9626_v55  ;;  %v10844_v32 = vld [vmem:[%s12345_s8 + $0x884] sm:$0xf] }
 0x3a7   : > { %8164 = vmatpush.bf16.msra.mxu0 %v9597_v58  ;;  %v9701_v50 = vor.u32 %v10866_v56, %v9698_v0  ;;  %v7938_v54 = vpop.f32.mrf.mxu2  ;;  %v9565_v58 = vor.u32 %v10832_v51, %v9562_v26  ;;  %v9693_v8 = vor.u32 %v10864_v28, %v9690_v57  ;;  %v9613_v43 = vor.u32 %v10844_v32, %v9610_v17  ;;  %v10954_v0 = vld [vmem:[%s12345_s8 + $0xbf4] sm:$0xf]  ;;  %v10904_v51 = vld [vmem:[%s12345_s8 + $0xa64] sm:$0xf]  ;;  %v9850_v26 = vld [vmem:[%s12345_s8 + $0xa68] sm:$0xf0] }
 0x3a8   : > { %8177 = vmatpush.bf16.msra.mxu1 %v9661_v3  ;;  %v7926_v42 = vadd.f32 %v7925_v41, %v7913_v5  ;;  %v7951_v60 = vpop.f32.mrf.mxu3  ;;  %v7927_v3 = vpop.f32.mrf.mxu1  ;;  %v9738_v5 = vld [vmem:[%s12345_s8 + $0x988] sm:$0xf0]  ;;  %v10906_v41 = vld [vmem:[%s12345_s8 + $0xa74] sm:$0xf]  ;;  %v9677_v56 = vor.u32 %v10860_v33, %v9674_v34  ;;  %v10920_v52 = vld [vmem:[%s12345_s8 + $0xae4] sm:$0xf] }
 0x3a9   : > { %8190 = vmatpush.bf16.msra.mxu2 %v9725_v1  ;;  %v9741_v22 = vor.u32 %v10876_v35, %v9738_v5  ;;  %v10936_v55 = vld [vmem:[%s12345_s8 + $0xb64] sm:$0xf]  ;;  %v9978_v28 = vld [vmem:[%s12345_s8 + $0xb68] sm:$0xf0]  ;;  %v10918_v3 = vld [vmem:[%s12345_s8 + $0xad4] sm:$0xf] }
 0x3aa   : > { %8203 = vmatpush.bf16.msra.mxu3 %v9789_v23  ;;  %v7939_v59 = vadd.f32 %v7938_v54, %v7926_v42  ;;  %v9554_v23 = vld [vmem:[%s12345_s8 + $0x818] sm:$0xf0]  ;;  %v9914_v54 = vld [vmem:[%s12345_s8 + $0xae8] sm:$0xf0]  ;;  %v10952_v57 = vld [vmem:[%s12345_s8 + $0xbe4] sm:$0xf]  ;;  %v9981_v62 = vor.u32 %v10936_v55, %v9978_v28 }
 0x3ab   : > { %8165 = vmatpush.bf16.msra.mxu0 %v9589_v46  ;;  %v10878_v46 = vld [vmem:[%s12345_s8 + $0x994] sm:$0xf]  ;;  %v9986_v42 = vld [vmem:[%s12345_s8 + $0xb78] sm:$0xf0]  ;;  %v9917_v61 = vor.u32 %v10920_v52, %v9914_v54  ;;  %v10900_v24 = vld [vmem:[%s12345_s8 + $0xa44] sm:$0xf] }
 0x3ac   : > { %8178 = vmatpush.bf16.msra.mxu1 %v9653_v15  ;;  %v13301_v1 = vadd.f32 %v7951_v60, %v7939_v59  ;;  %v9746_v15 = vld [vmem:[%s12345_s8 + $0x998] sm:$0xf0]  ;;  %v10042_v59 = vld [vmem:[%s12345_s8 + $0xbe8] sm:$0xf0]  ;;  %v9853_v60 = vor.u32 %v10904_v51, %v9850_v26  ;;  %v10898_v34 = vld [vmem:[%s12345_s8 + $0xa34] sm:$0xf] }
 0x3ad   : > { %8191 = vmatpush.bf16.msra.mxu2 %v9717_v16  ;;  %v7914_v63 = vpop.f32.mrf.mxu0  ;;  %v9557_v16 = vor.u32 %v10830_v10, %v9554_v23  ;;  %v9749_v49 = vor.u32 %v10878_v46, %v9746_v15  ;;  %v10934_v10 = vld [vmem:[%s12345_s8 + $0xb54] sm:$0xf]  ;;  %v9970_v23 = vld [vmem:[%s12345_s8 + $0xb58] sm:$0xf0]  ;;  %v9834_v46 = vld [vmem:[%s12345_s8 + $0xa48] sm:$0xf0] }
 0x3ae   : > { %8204 = vmatpush.bf16.msra.mxu3 %v9781_v48  ;;  %v9685_v48 = vor.u32 %v10862_v27, %v9682_v29  ;;  %v10902_v63 = vld [vmem:[%s12345_s8 + $0xa54] sm:$0xf]  ;;  %v9973_v29 = vor.u32 %v10934_v10, %v9970_v23  ;;  %v11140_v15 = vld [vmem:[%s12782_s29] sm:$0x3]  ;;  %v9837_v32 = vor.u32 %v10900_v24, %v9834_v46  ;;  %v9826_v35 = vld [vmem:[%s12345_s8 + $0xa38] sm:$0xf0] }
 0x3af   : > { %8166 = vmatpush.bf16.msra.mxu0 %v9581_v36  ;;  %v7940_v36 = vpop.f32.mrf.mxu2  ;;  %v10914_v5 = vld [vmem:[%s12345_s8 + $0xab4] sm:$0xf]  ;;  %v9882_v51 = vld [vmem:[%s12345_s8 + $0xaa8] sm:$0xf0]  ;;  %v10928_v26 = vld [vmem:[%s12345_s8 + $0xb24] sm:$0xf] }
 0x3b0   : > { %8179 = vmatpush.bf16.msra.mxu1 %v9645_v37  ;;  %v9858_v37 = vld [vmem:[%s12345_s8 + $0xa78] sm:$0xf0]  ;;  %v7953_v39 = vpop.f32.mrf.mxu3  ;;  %v9946_v52 = vld [vmem:[%s12345_s8 + $0xb28] sm:$0xf0]  ;;  %v10944_v55 = vld [vmem:[%s12345_s8 + $0xba4] sm:$0xf] }
 0x3b1   : > { %8192 = vmatpush.bf16.msra.mxu2 %v9709_v38  ;;  %v10922_v38 = vld [vmem:[%s12345_s8 + $0xaf4] sm:$0xf]  ;;  %v10010_v28 = vld [vmem:[%s12345_s8 + $0xba8] sm:$0xf0]  ;;  %v9874_v10 = vld [vmem:[%s12345_s8 + $0xa98] sm:$0xf0] }
 0x3b2   : > { %8205 = vmatpush.bf16.msra.mxu3 %v9773_v25  ;;  %v10938_v25 = vld [vmem:[%s12345_s8 + $0xb74] sm:$0xf] }
 0x3b3   : > { %8167 = vmatpush.bf16.msra.mxu0 %v9573_v44  ;;  %v9861_v44 = vor.u32 %v10906_v41, %v9858_v37  ;;  %v10930_v39 = vld [vmem:[%s12345_s8 + $0xb34] sm:$0xf] }
 0x3b4   : > { %8180 = vmatpush.bf16.msra.mxu1 %v9637_v45  ;;  %v9925_v45 = vor.u32 %v10922_v38, %v9922_v20  ;;  %v9890_v38 = vld [vmem:[%s12345_s8 + $0xab8] sm:$0xf0]  ;;  %v10946_v20 = vld [vmem:[%s12345_s8 + $0xbb4] sm:$0xf] }
 0x3b5   : > { %8193 = vmatpush.bf16.msra.mxu2 %v9701_v50  ;;  %v9989_v50 = vor.u32 %v10938_v25, %v9986_v42  ;;  %v10018_v25 = vld [vmem:[%s12345_s8 + $0xbb8] sm:$0xf0]  ;;  %v10926_v23 = vld [vmem:[%s12345_s8 + $0xb14] sm:$0xf] }
 0x3b6   : > { %8206 = vmatpush.bf16.msra.mxu3 %v9765_v53  ;;  %v10053_v53 = vor.u32 %v10954_v0, %v10050_v21  ;;  %v10896_v21 = vld [vmem:[%s12345_s8 + $0xa24] sm:$0xf] }
 0x3b7   : > { %8168 = vmatpush.bf16.msra.mxu0 %v9565_v58  ;;  %v9842_v58 = vld [vmem:[%s12345_s8 + $0xa58] sm:$0xf0] }
 0x3b8   : > { %8181 = vmatpush.bf16.msra.mxu1 %v9629_v4  ;;  %v10045_v4 = vor.u32 %v10952_v57, %v10042_v59 }
 0x3b9   : > { %8194 = vmatpush.bf16.msra.mxu2 %v9693_v8  ;;  %v9906_v8 = vld [vmem:[%s12345_s8 + $0xad8] sm:$0xf0] }
 0x3ba   : > { %8207 = vmatpush.bf16.msra.mxu3 %v9757_v2  ;;  %v10034_v2 = vld [vmem:[%s12345_s8 + $0xbd8] sm:$0xf0]  ;;  %v9909_v27 = vor.u32 %v10918_v3, %v9906_v8  ;;  %v10910_v3 = vld [vmem:[%s12345_s8 + $0xa94] sm:$0xf]  ;;  %v10013_v8 = vor.u32 %v10944_v55, %v10010_v28 }
 0x3bb   : > { %8169 = vmatpush.bf16.msra.mxu0 %v9557_v16  ;;  %v10037_v16 = vor.u32 %v10950_v12, %v10034_v2  ;;  %v9938_v12 = vld [vmem:[%s12345_s8 + $0xb18] sm:$0xf0]  ;;  %v10942_v2 = vld [vmem:[%s12345_s8 + $0xb94] sm:$0xf]  ;;  %v9877_v46 = vor.u32 %v10910_v3, %v9874_v10  ;;  %v10090_v10 = vld [vmem:[%s12345_s8 + $0xc48] sm:$0xf0] }
 0x3bc   : > { %8182 = vmatpush.bf16.msra.mxu1 %v9621_v47  ;;  %v10948_v47 = vld [vmem:[%s12345_s8 + $0xbc4] sm:$0xf]  ;;  %v10098_v55 = vld [vmem:[%s12345_s8 + $0xc58] sm:$0xf0]  ;;  %v10982_v28 = vld [vmem:[%s12345_s8 + $0xcd4] sm:$0xf] }
 0x3bd   : > { %8195 = vmatpush.bf16.msra.mxu2 %v9685_v48  ;;  %v10026_v48 = vld [vmem:[%s12345_s8 + $0xbc8] sm:$0xf0] }
 0x3be   : > { %8208 = vmatpush.bf16.msra.mxu3 %v9749_v49  ;;  %v9965_v49 = vor.u32 %v10932_v30, %v9962_v31  ;;  %v10029_v37 = vor.u32 %v10948_v47, %v10026_v48  ;;  %v9930_v31 = vld [vmem:[%s12345_s8 + $0xb08] sm:$0xf0]  ;;  %v10940_v47 = vld [vmem:[%s12345_s8 + $0xb84] sm:$0xf] }
 0x3bf   : > { %8170 = vmatpush.bf16.msra.mxu0 %v9549_v40  ;;  %v7964_v17 = vpop.f32.mrf.mxu0  ;;  %v9954_v40 = vld [vmem:[%s12345_s8 + $0xb38] sm:$0xf0]  ;;  %v9994_v48 = vld [vmem:[%s12345_s8 + $0xb88] sm:$0xf0] }
 0x3c0   : > { %8183 = vmatpush.bf16.msra.mxu1 %v9613_v43  ;;  %v7977_v41 = vpop.f32.mrf.mxu1  ;;  %v9829_v43 = vor.u32 %v10898_v34, %v9826_v35  ;;  %v9957_v0 = vor.u32 %v10930_v39, %v9954_v40  ;;  %v10178_v35 = vld [vmem:[%s12345_s8 + $0xcf8] sm:$0xf0]  ;;  %v9997_v40 = vor.u32 %v10940_v47, %v9994_v48  ;;  %v10994_v47 = vld [vmem:[%s12345_s8 + $0xd34] sm:$0xf] }
 0x3c1   : > { %8196 = vmatpush.bf16.msra.mxu2 %v9677_v56  ;;  %v9893_v56 = vor.u32 %v10914_v5, %v9890_v38  ;;  %v11002_v5 = vld [vmem:[%s12345_s8 + $0xd74] sm:$0xf]  ;;  %v10306_v39 = vld [vmem:[%s12345_s8 + $0xdf8] sm:$0xf0] }
 0x3c2   : > { %8209 = vmatpush.bf16.msra.mxu3 %v9741_v22  ;;  %8171 = vmatmul.bf16.vlgmr.msra.gmra.mxu0 %v12739_v9  ;;  %v9845_v9 = vor.u32 %v10902_v63, %v9842_v58  ;;  %v9818_v22 = vld [vmem:[%s12345_s8 + $0xa28] sm:$0xf0]  ;;  %v10894_v63 = vld [vmem:[%s12345_s8 + $0xa14] sm:$0xf]  ;;  %v9810_v58 = vld [vmem:[%s12345_s8 + $0xa18] sm:$0xf0] }
 0x3c3   : > { %8215 = vmatpush.bf16.msrb.mxu0 %v9861_v44  ;;  %8184 = vmatmul.bf16.vlgmr.msra.gmra.mxu1 %v12751_v14  ;;  %v4904_v14 = vperm.slane %v11140_v15, 1  ;;  %v10912_v44 = vld [vmem:[%s12345_s8 + $0xaa4] sm:$0xf]  ;;  %v9821_v57 = vor.u32 %v10896_v21, %v9818_v22  ;;  %v9813_v24 = vor.u32 %v10894_v63, %v9810_v58  ;;  %v11018_v38 = vld [vmem:[%s12345_s8 + $0xdf4] sm:$0xf] }
 0x3c4   : > { %8228 = vmatpush.bf16.msrb.mxu1 %v9925_v45  ;;  %8197 = vmatmul.bf16.vlgmr.msra.gmra.mxu2 %v12749_v13  ;;  %v10916_v13 = vld [vmem:[%s12345_s8 + $0xac4] sm:$0xf]  ;;  %v10309_v21 = vor.u32 %v11018_v38, %v10306_v39  ;;  %v10170_v22 = vld [vmem:[%s12345_s8 + $0xce8] sm:$0xf0]  ;;  %v11014_v63 = vld [vmem:[%s12345_s8 + $0xdd4] sm:$0xf] }
 0x3c5   : > { %8241 = vmatpush.bf16.msrb.mxu2 %v9989_v50  ;;  %8210 = vmatmul.bf16.vlgmr.msra.gmra.mxu3 %v12753_v18  ;;  %v9898_v18 = vld [vmem:[%s12345_s8 + $0xac8] sm:$0xf0]  ;;  %v7965_v36 = vadd.f32 %v7964_v17, %v4904_v14  ;;  %v10021_v50 = vor.u32 %v10946_v20, %v10018_v25  ;;  %v10908_v15 = vld [vmem:[%s12345_s8 + $0xa84] sm:$0xf]  ;;  %v10970_v17 = vld [vmem:[%s12345_s8 + $0xc74] sm:$0xf] }
 0x3c6   : > { %8254 = vmatpush.bf16.msrb.mxu3 %v10053_v53  ;;  %v9901_v33 = vor.u32 %v10916_v13, %v9898_v18  ;;  %v9941_v13 = vor.u32 %v10926_v23, %v9938_v12  ;;  %v9866_v14 = vld [vmem:[%s12345_s8 + $0xa88] sm:$0xf0]  ;;  %v10290_v58 = vld [vmem:[%s12345_s8 + $0xdd8] sm:$0xf0]  ;;  %v10996_v12 = vld [vmem:[%s12345_s8 + $0xd44] sm:$0xf] }
 0x3c7   : > { %8216 = vmatpush.bf16.msrb.mxu0 %v9853_v60  ;;  %v7978_v42 = vadd.f32 %v7977_v41, %v7965_v36  ;;  %v7990_v45 = vpop.f32.mrf.mxu2  ;;  %v7966_v60 = vpop.f32.mrf.mxu0  ;;  %v10242_v36 = vld [vmem:[%s12345_s8 + $0xd78] sm:$0xf0]  ;;  %v9869_v41 = vor.u32 %v10908_v15, %v9866_v14  ;;  %v10154_v23 = vld [vmem:[%s12345_s8 + $0xcc8] sm:$0xf0]  ;;  %v10978_v14 = vld [vmem:[%s12345_s8 + $0xcb4] sm:$0xf] }
 0x3c8   : > { %8229 = vmatpush.bf16.msrb.mxu1 %v9917_v61  ;;  %v8003_v54 = vpop.f32.mrf.mxu3  ;;  %v9885_v61 = vor.u32 %v10912_v44, %v9882_v51  ;;  %v11000_v44 = vld [vmem:[%s12345_s8 + $0xd64] sm:$0xf]  ;;  %v10298_v51 = vld [vmem:[%s12345_s8 + $0xde8] sm:$0xf0]  ;;  %v10162_v60 = vld [vmem:[%s12345_s8 + $0xcd8] sm:$0xf0] }
 0x3c9   : > { %8242 = vmatpush.bf16.msrb.mxu2 %v9981_v62  ;;  %v7991_v53 = vadd.f32 %v7990_v45, %v7978_v42  ;;  %v9949_v62 = vor.u32 %v10928_v26, %v9946_v52  ;;  %v10245_v42 = vor.u32 %v11002_v5, %v10242_v36  ;;  %v10234_v45 = vld [vmem:[%s12345_s8 + $0xd68] sm:$0xf0]  ;;  %v10165_v3 = vor.u32 %v10982_v28, %v10162_v60  ;;  %v10082_v15 = vld [vmem:[%s12345_s8 + $0xc38] sm:$0xf0]  ;;  %v10976_v36 = vld [vmem:[%s12345_s8 + $0xca4] sm:$0xf] }
 0x3ca   : > { %8255 = vmatpush.bf16.msrb.mxu3 %v10045_v4  ;;  %v7979_v4 = vpop.f32.mrf.mxu1  ;;  %v10210_v48 = vld [vmem:[%s12345_s8 + $0xd38] sm:$0xf0]  ;;  %v10074_v5 = vld [vmem:[%s12345_s8 + $0xc28] sm:$0xf0]  ;;  %v10992_v39 = vld [vmem:[%s12345_s8 + $0xd24] sm:$0xf] }
 0x3cb   : > { %8217 = vmatpush.bf16.msrb.mxu0 %v9845_v9  ;;  %v13372_v59 = vadd.f32 %v8003_v54, %v7991_v53  ;;  %v10002_v9 = vld [vmem:[%s12345_s8 + $0xb98] sm:$0xf0]  ;;  %v10237_v53 = vor.u32 %v11000_v44, %v10234_v45  ;;  %v10966_v54 = vld [vmem:[%s12345_s8 + $0xc54] sm:$0xf]  ;;  %v10138_v38 = vld [vmem:[%s12345_s8 + $0xca8] sm:$0xf0] }
 0x3cc   : > { %8230 = vmatpush.bf16.msrb.mxu1 %v9909_v27  ;;  %v10892_v27 = vld [vmem:[%s12345_s8 + $0xa04] sm:$0xf]  ;;  %v10005_v30 = vor.u32 %v10942_v2, %v10002_v9  ;;  %v10218_v2 = vld [vmem:[%s12345_s8 + $0xd48] sm:$0xf0]  ;;  %v10958_v45 = vld [vmem:[%s12345_s8 + $0xc14] sm:$0xf] }
 0x3cd   : > { %8243 = vmatpush.bf16.msrb.mxu2 %v9973_v29  ;;  %v9802_v29 = vld [vmem:[%s12345_s8 + $0xa08] sm:$0xf0]  ;;  %v11012_v9 = vld [vmem:[%s12345_s8 + $0xdc4] sm:$0xf]  ;;  %v11006_v28 = vld [vmem:[%s12345_s8 + $0xd94] sm:$0xf] }
 0x3ce   : > { %8256 = vmatpush.bf16.msrb.mxu3 %v10037_v16  ;;  %v10924_v16 = vld [vmem:[%s12345_s8 + $0xb04] sm:$0xf]  ;;  %v9805_v34 = vor.u32 %v10892_v27, %v9802_v29 }
 0x3cf   : > { %8218 = vmatpush.bf16.msrb.mxu0 %v9837_v32  ;;  %v7992_v18 = vpop.f32.mrf.mxu2 }
 0x3d0   : > { %8231 = vmatpush.bf16.msrb.mxu1 %v9901_v33  ;;  %v8005_v32 = vpop.f32.mrf.mxu3  ;;  %v10114_v33 = vld [vmem:[%s12345_s8 + $0xc78] sm:$0xf0] }
 0x3d1   : > { %8244 = vmatpush.bf16.msrb.mxu2 %v9965_v49  ;;  %v10986_v49 = vld [vmem:[%s12345_s8 + $0xcf4] sm:$0xf]  ;;  %v10117_v20 = vor.u32 %v10970_v17, %v10114_v33  ;;  %v10274_v17 = vld [vmem:[%s12345_s8 + $0xdb8] sm:$0xf0] }
 0x3d2   : > { %8257 = vmatpush.bf16.msrb.mxu3 %v10029_v37  ;;  %v9933_v37 = vor.u32 %v10924_v16, %v9930_v31  ;;  %v10181_v25 = vor.u32 %v10986_v49, %v10178_v35  ;;  %v10146_v31 = vld [vmem:[%s12345_s8 + $0xcb8] sm:$0xf0]  ;;  %v11010_v32 = vld [vmem:[%s12345_s8 + $0xdb4] sm:$0xf]  ;;  %v10960_v35 = vld [vmem:[%s12345_s8 + $0xc24] sm:$0xf] }
 0x3d3   : > { %8219 = vmatpush.bf16.msrb.mxu0 %v9829_v43  ;;  %v10968_v43 = vld [vmem:[%s12345_s8 + $0xc64] sm:$0xf] }
 0x3d4   : > { %8232 = vmatpush.bf16.msrb.mxu1 %v9893_v56  ;;  %v10106_v56 = vld [vmem:[%s12345_s8 + $0xc68] sm:$0xf0] }
 0x3d5   : > { %8245 = vmatpush.bf16.msrb.mxu2 %v9957_v0  ;;  %v10984_v0 = vld [vmem:[%s12345_s8 + $0xce4] sm:$0xf]  ;;  %v10109_v26 = vor.u32 %v10968_v43, %v10106_v56  ;;  %v10266_v43 = vld [vmem:[%s12345_s8 + $0xda8] sm:$0xf0]  ;;  %v10077_v56 = vor.u32 %v10960_v35, %v10074_v5 }
 0x3d6   : > { %8258 = vmatpush.bf16.msrb.mxu3 %v10021_v50  ;;  %v11016_v50 = vld [vmem:[%s12345_s8 + $0xde4] sm:$0xf]  ;;  %v10173_v52 = vor.u32 %v10984_v0, %v10170_v22  ;;  %v10141_v22 = vor.u32 %v10976_v36, %v10138_v38  ;;  %v10554_v5 = vld [vmem:[%s12345_s8 + $0xfe8] sm:$0xf0]  ;;  %v11030_v38 = vld [vmem:[%s12345_s8 + $0xe54] sm:$0xf] }
 0x3d7   : > { %8220 = vmatpush.bf16.msrb.mxu0 %v9821_v57  ;;  %v10301_v57 = vor.u32 %v11016_v50, %v10298_v51  ;;  %v10066_v50 = vld [vmem:[%s12345_s8 + $0xc18] sm:$0xf0]  ;;  %v10974_v51 = vld [vmem:[%s12345_s8 + $0xc94] sm:$0xf]  ;;  %v11080_v35 = vld [vmem:[%s12345_s8 + $0xfe4] sm:$0xf] }
 0x3d8   : > { %8233 = vmatpush.bf16.msrb.mxu1 %v9885_v61  ;;  %v10998_v61 = vld [vmem:[%s12345_s8 + $0xd54] sm:$0xf]  ;;  %v10069_v60 = vor.u32 %v10958_v45, %v10066_v50  ;;  %v10546_v45 = vld [vmem:[%s12345_s8 + $0xfd8] sm:$0xf0] }
 0x3d9   : > { %8246 = vmatpush.bf16.msrb.mxu2 %v9949_v62  ;;  %v10226_v62 = vld [vmem:[%s12345_s8 + $0xd58] sm:$0xf0]  ;;  %v11144_v50 = vld [vmem:[#allocation1 + $0x1b] sm:$0xff] }
 0x3da   : > { %8259 = vmatpush.bf16.msrb.mxu3 %v10013_v8  ;;  %v10229_v4 = vor.u32 %v10998_v61, %v10226_v62  ;;  %v10964_v8 = vld [vmem:[%s12345_s8 + $0xc44] sm:$0xf]  ;;  %v10058_v62 = vld [vmem:[%s12345_s8 + $0xc08] sm:$0xf0] }
 0x3db   : > { %8221 = vmatpush.bf16.msrb.mxu0 %v9813_v24  ;;  %v10093_v24 = vor.u32 %v10964_v8, %v10090_v10  ;;  %v10956_v61 = vld [vmem:[%s12345_s8 + $0xc04] sm:$0xf] }
 0x3dc   : > { %8234 = vmatpush.bf16.msrb.mxu1 %v9877_v46  ;;  %v10221_v46 = vor.u32 %v10996_v12, %v10218_v2  ;;  %v11034_v2 = vld [vmem:[%s12345_s8 + $0xe74] sm:$0xf] }
 0x3dd   : > { %8247 = vmatpush.bf16.msrb.mxu2 %v9941_v13  ;;  %v10962_v13 = vld [vmem:[%s12345_s8 + $0xc34] sm:$0xf] }
 0x3de   : > { %8260 = vmatpush.bf16.msrb.mxu3 %v10005_v30  ;;  %v10085_v49 = vor.u32 %v10962_v13, %v10082_v15 }
 0x3df   : > { %8222 = vmatpush.bf16.msrb.mxu0 %v9805_v34  ;;  %v8016_v27 = vpop.f32.mrf.mxu0  ;;  %v10213_v34 = vor.u32 %v10994_v47, %v10210_v48  ;;  %v11032_v48 = vld [vmem:[%s12345_s8 + $0xe64] sm:$0xf] }
 0x3e0   : > { %8235 = vmatpush.bf16.msrb.mxu1 %v9869_v41  ;;  %v8017_v16 = vadd.f32 %v8016_v27, %v13372_v59  ;;  %v8029_v18 = vpop.f32.mrf.mxu1  ;;  %v10149_v59 = vor.u32 %v10978_v14, %v10146_v31  ;;  %v10434_v27 = vld [vmem:[%s12345_s8 + $0xef8] sm:$0xf0]  ;;  %v11082_v14 = vld [vmem:[%s12345_s8 + $0xff4] sm:$0xf] }
 0x3e1   : > { %8248 = vmatpush.bf16.msrb.mxu2 %v9933_v37  ;;  %v10277_v37 = vor.u32 %v11010_v32, %v10274_v17  ;;  %v10362_v32 = vld [vmem:[%s12345_s8 + $0xe68] sm:$0xf0]  ;;  %v11048_v17 = vld [vmem:[%s12345_s8 + $0xee4] sm:$0xf] }
 0x3e2   : > { %8261 = vmatpush.bf16.msrb.mxu3 %v9997_v40  ;;  %8223 = vmatmul.bf16.vlgmr.msrb.gmra.mxu0 %v12821_v6  ;;  %v10101_v6 = vor.u32 %v10966_v54, %v10098_v55  ;;  %v8030_v33 = vadd.f32 %v8029_v18, %v8017_v16  ;;  %v10202_v40 = vld [vmem:[%s12345_s8 + $0xd28] sm:$0xf0]  ;;  %v10990_v54 = vld [vmem:[%s12345_s8 + $0xd14] sm:$0xf]  ;;  %v10194_v55 = vld [vmem:[%s12345_s8 + $0xd18] sm:$0xf0]  ;;  %v10365_v36 = vor.u32 %v11032_v48, %v10362_v32 }
 0x3e3   : > { %8267 = vmatpush.bf16.msra.mxu0 %v10117_v20  ;;  %8236 = vmatmul.bf16.vlgmr.msrb.gmra.mxu1 %v12825_v11  ;;  %v10293_v11 = vor.u32 %v11014_v63, %v10290_v58  ;;  %v10205_v44 = vor.u32 %v10992_v39, %v10202_v40  ;;  %v10197_v58 = vor.u32 %v10990_v54, %v10194_v55  ;;  %v10562_v16 = vld [vmem:[%s12345_s8 + $0xff8] sm:$0xf0]  ;;  %v11046_v40 = vld [vmem:[%s12345_s8 + $0xed4] sm:$0xf]  ;;  %v10346_v54 = vld [vmem:[%s12345_s8 + $0xe48] sm:$0xf0] }
 0x3e4   : > { %8280 = vmatpush.bf16.msra.mxu1 %v10181_v25  ;;  %8249 = vmatmul.bf16.vlgmr.msrb.gmra.mxu2 %v12823_v7  ;;  %v10980_v7 = vld [vmem:[%s12345_s8 + $0xcc4] sm:$0xf]  ;;  %v10354_v39 = vld [vmem:[%s12345_s8 + $0xe58] sm:$0xf0]  ;;  %v10458_v48 = vld [vmem:[%s12345_s8 + $0xf28] sm:$0xf0] }
 0x3e5   : > { %8293 = vmatpush.bf16.msra.mxu2 %v10245_v42  ;;  %8262 = vmatmul.bf16.vlgmr.msrb.gmra.mxu3 %v12827_v19  ;;  %v10282_v19 = vld [vmem:[%s12345_s8 + $0xdc8] sm:$0xf0]  ;;  %v10157_v29 = vor.u32 %v10980_v7, %v10154_v23  ;;  %v11008_v42 = vld [vmem:[%s12345_s8 + $0xda4] sm:$0xf] }
 0x3e6   : > { %8306 = vmatpush.bf16.msra.mxu3 %v10309_v21  ;;  %v10285_v30 = vor.u32 %v11012_v9, %v10282_v19  ;;  %v10186_v7 = vld [vmem:[%s12345_s8 + $0xd08] sm:$0xf0]  ;;  %v10370_v9 = vld [vmem:[%s12345_s8 + $0xe78] sm:$0xf0]  ;;  %v11050_v19 = vld [vmem:[%s12345_s8 + $0xef4] sm:$0xf] }
 0x3e7   : > { %8268 = vmatpush.bf16.msra.mxu0 %v10109_v26  ;;  %v8042_v41 = vpop.f32.mrf.mxu2  ;;  %v8018_v21 = vpop.f32.mrf.mxu0  ;;  %v10250_v23 = vld [vmem:[%s12345_s8 + $0xd88] sm:$0xf0]  ;;  %v10437_v31 = vor.u32 %v11050_v19, %v10434_v27  ;;  %v11044_v55 = vld [vmem:[%s12345_s8 + $0xec4] sm:$0xf]  ;;  %v11058_v19 = vld [vmem:[%s12345_s8 + $0xf34] sm:$0xf] }
 0x3e8   : > { %8281 = vmatpush.bf16.msra.mxu1 %v10173_v52  ;;  %v8043_v20 = vadd.f32 %v8042_v41, %v8030_v33  ;;  %v8055_v25 = vpop.f32.mrf.mxu3  ;;  %v8031_v26 = vpop.f32.mrf.mxu1  ;;  %v10269_v52 = vor.u32 %v11008_v42, %v10266_v43  ;;  %v10565_v33 = vor.u32 %v11082_v14, %v10562_v16  ;;  %v10418_v42 = vld [vmem:[%s12345_s8 + $0xed8] sm:$0xf0]  ;;  %v11062_v43 = vld [vmem:[%s12345_s8 + $0xf54] sm:$0xf]  ;;  %v11142_v21 = vld [vmem:[#allocation1 + $0x12] sm:$0xff] }
 0x3e9   : > { %8294 = vmatpush.bf16.msra.mxu2 %v10237_v53  ;;  %v10130_v53 = vld [vmem:[%s12345_s8 + $0xc98] sm:$0xf0]  ;;  %v10421_v26 = vor.u32 %v11046_v40, %v10418_v42  ;;  %v10330_v14 = vld [vmem:[%s12345_s8 + $0xe28] sm:$0xf0]  ;;  %v11040_v16 = vld [vmem:[%s12345_s8 + $0xea4] sm:$0xf] }
 0x3ea   : > { %8307 = vmatpush.bf16.msra.mxu3 %v10301_v57  ;;  %v13443_v0 = vadd.f32 %v8055_v25, %v8043_v20  ;;  %v10258_v57 = vld [vmem:[%s12345_s8 + $0xd98] sm:$0xf0]  ;;  %v10133_v63 = vor.u32 %v10974_v51, %v10130_v53  ;;  %v10557_v25 = vor.u32 %v11080_v35, %v10554_v5  ;;  %v10357_v51 = vor.u32 %v11030_v38, %v10354_v39  ;;  %v11028_v53 = vld [vmem:[%s12345_s8 + $0xe44] sm:$0xf]  ;;  %v11038_v39 = vld [vmem:[%s12345_s8 + $0xe94] sm:$0xf] }
 0x3eb   : > { %8269 = vmatpush.bf16.msra.mxu0 %v10101_v6  ;;  %v10972_v6 = vld [vmem:[%s12345_s8 + $0xc84] sm:$0xf]  ;;  %v10261_v10 = vor.u32 %v11006_v28, %v10258_v57  ;;  %v11141_v20 = vld [vmem:[#allocation1] sm:$0xff]  ;;  %v10410_v57 = vld [vmem:[%s12345_s8 + $0xec8] sm:$0xf0] }
 0x3ec   : > { %8282 = vmatpush.bf16.msra.mxu1 %v10165_v3  ;;  %v10122_v3 = vld [vmem:[%s12345_s8 + $0xc88] sm:$0xf0]  ;;  %v10530_v27 = vld [vmem:[%s12345_s8 + $0xfb8] sm:$0xf0] }
 0x3ed   : > { %8295 = vmatpush.bf16.msra.mxu2 %v10229_v4  ;;  %v10988_v4 = vld [vmem:[%s12345_s8 + $0xd04] sm:$0xf]  ;;  %v10125_v13 = vor.u32 %v10972_v6, %v10122_v3  ;;  %v10349_v3 = vor.u32 %v11028_v53, %v10346_v54  ;;  %v10322_v38 = vld [vmem:[%s12345_s8 + $0xe18] sm:$0xf0]  ;;  %v10442_v54 = vld [vmem:[%s12345_s8 + $0xf08] sm:$0xf0] }
 0x3ee   : > { %8308 = vmatpush.bf16.msra.mxu3 %v10293_v11  ;;  %v11004_v11 = vld [vmem:[%s12345_s8 + $0xd84] sm:$0xf]  ;;  %v10189_v15 = vor.u32 %v10988_v4, %v10186_v7  ;;  %v11026_v7 = vld [vmem:[%s12345_s8 + $0xe34] sm:$0xf]  ;;  %v10450_v42 = vld [vmem:[%s12345_s8 + $0xf18] sm:$0xf0] }
 0x3ef   : > { %8270 = vmatpush.bf16.msra.mxu0 %v10093_v24  ;;  %v8044_v8 = vpop.f32.mrf.mxu2  ;;  %v10061_v24 = vor.u32 %v10956_v61, %v10058_v62  ;;  %v10253_v18 = vor.u32 %v11004_v11, %v10250_v23  ;;  %v10474_v61 = vld [vmem:[%s12345_s8 + $0xf48] sm:$0xf0]  ;;  %v10338_v11 = vld [vmem:[%s12345_s8 + $0xe38] sm:$0xf0]  ;;  %v11042_v23 = vld [vmem:[%s12345_s8 + $0xeb4] sm:$0xf] }
 0x3f0   : > { %8283 = vmatpush.bf16.msra.mxu1 %v10157_v29  ;;  %v8057_v12 = vpop.f32.mrf.mxu3  ;;  %v11066_v29 = vld [vmem:[%s12345_s8 + $0xf74] sm:$0xf]  ;;  %v10413_v8 = vor.u32 %v11044_v55, %v10410_v57  ;;  %v11052_v53 = vld [vmem:[%s12345_s8 + $0xf04] sm:$0xf]  ;;  %v10506_v57 = vld [vmem:[%s12345_s8 + $0xf88] sm:$0xf0] }
 0x3f1   : > { %8296 = vmatpush.bf16.msra.mxu2 %v10221_v46  ;;  %v10498_v46 = vld [vmem:[%s12345_s8 + $0xf78] sm:$0xf0] }
 0x3f2   : > { %8309 = vmatpush.bf16.msra.mxu3 %v10285_v30  ;;  %v10373_v30 = vor.u32 %v11034_v2, %v10370_v9  ;;  %v10501_v47 = vor.u32 %v11066_v29, %v10498_v46  ;;  %v10402_v9 = vld [vmem:[%s12345_s8 + $0xeb8] sm:$0xf0]  ;;  %v10341_v29 = vor.u32 %v11026_v7, %v10338_v11 }
 0x3f3   : > { %8271 = vmatpush.bf16.msra.mxu0 %v10085_v49  ;;  %v10426_v49 = vld [vmem:[%s12345_s8 + $0xee8] sm:$0xf0]  ;;  %v10405_v46 = vor.u32 %v11042_v23, %v10402_v9 }
 0x3f4   : > { %8284 = vmatpush.bf16.msra.mxu1 %v10149_v59  ;;  %v11064_v59 = vld [vmem:[%s12345_s8 + $0xf64] sm:$0xf]  ;;  %v10429_v41 = vor.u32 %v11048_v17, %v10426_v49  ;;  %v10522_v49 = vld [vmem:[%s12345_s8 + $0xfa8] sm:$0xf0] }
 0x3f5   : > { %8297 = vmatpush.bf16.msra.mxu2 %v10213_v34  ;;  %v10490_v34 = vld [vmem:[%s12345_s8 + $0xf68] sm:$0xf0] }
 0x3f6   : > { %8310 = vmatpush.bf16.msra.mxu3 %v10277_v37  ;;  %v10493_v37 = vor.u32 %v11064_v59, %v10490_v34 }
 0x3f7   : > { %8272 = vmatpush.bf16.msra.mxu0 %v10077_v56  ;;  %v10482_v56 = vld [vmem:[%s12345_s8 + $0xf58] sm:$0xf0] }
 0x3f8   : > { %8285 = vmatpush.bf16.msra.mxu1 %v10141_v22  ;;  %v11143_v22 = vld [vmem:[#allocation1 + $0x9] sm:$0xff] }
 0x3f9   : > { %8298 = vmatpush.bf16.msra.mxu2 %v10205_v44  ;;  %v11078_v44 = vld [vmem:[%s12345_s8 + $0xfd4] sm:$0xf] }
 0x3fa   : > { %8311 = vmatpush.bf16.msra.mxu3 %v10269_v52  ;;  %v10485_v52 = vor.u32 %v11062_v43, %v10482_v56  ;;  %v10549_v28 = vor.u32 %v11078_v44, %v10546_v45  ;;  %v11070_v43 = vld [vmem:[%s12345_s8 + $0xf94] sm:$0xf]  ;;  %v10514_v56 = vld [vmem:[%s12345_s8 + $0xf98] sm:$0xf0]  ;;  %v11020_v45 = vld [vmem:[%s12345_s8 + $0xe04] sm:$0xf] }
 0x3fb   : > { %8273 = vmatpush.bf16.msra.mxu0 %v10069_v60  ;;  %v11060_v60 = vld [vmem:[%s12345_s8 + $0xf44] sm:$0xf] }
 0x3fc   : > { %8286 = vmatpush.bf16.msra.mxu1 %v10133_v63  ;;  %v11076_v63 = vld [vmem:[%s12345_s8 + $0xfc4] sm:$0xf] }
 0x3fd   : > { %8299 = vmatpush.bf16.msra.mxu2 %v10197_v58  ;;  %v10538_v58 = vld [vmem:[%s12345_s8 + $0xfc8] sm:$0xf0] }
 0x3fe   : > { %8312 = vmatpush.bf16.msra.mxu3 %v10261_v10  ;;  %v10477_v10 = vor.u32 %v11060_v60, %v10474_v61  ;;  %v10541_v12 = vor.u32 %v11076_v63, %v10538_v58  ;;  %v10445_v63 = vor.u32 %v11052_v53, %v10442_v54 }
 0x3ff   : > { %8274 = vmatpush.bf16.msra.mxu0 %v10061_v24  ;;  %v8068_v62 = vpop.f32.mrf.mxu0  ;;  %v11074_v24 = vld [vmem:[%s12345_s8 + $0xfb4] sm:$0xf] }
 0x400   : > { %8287 = vmatpush.bf16.msra.mxu1 %v10125_v13  ;;  %v8069_v6 = vadd.f32 %v8068_v62, %v13443_v0  ;;  %v8081_v4 = vpop.f32.mrf.mxu1  ;;  %v10466_v0 = vld [vmem:[%s12345_s8 + $0xf38] sm:$0xf0] }
 0x401   : > { %8300 = vmatpush.bf16.msra.mxu2 %v10189_v15  ;;  %v10469_v13 = vor.u32 %v11058_v19, %v10466_v0  ;;  %v11024_v15 = vld [vmem:[%s12345_s8 + $0xe24] sm:$0xf] }
 0x402   : > { %8313 = vmatpush.bf16.msra.mxu3 %v10253_v18  ;;  %8275 = vmatmul.bf16.vlgmr.msra.gmra.mxu0 %v11141_v20  ;;  %v8082_v2 = vadd.f32 %v8081_v4, %v8069_v6  ;;  %v10533_v18 = vor.u32 %v11074_v24, %v10530_v27  ;;  %v10333_v34 = vor.u32 %v11024_v15, %v10330_v14  ;;  %v10386_v20 = vld [vmem:[%s12345_s8 + $0xe98] sm:$0xf0]  ;;  %v11147_v4 = vld [vmem:[#allocation1 + $0x36] sm:$0xff] }
 0x403   : > { %8319 = vmatpush.bf16.msrb.mxu0 %v10373_v30  ;;  %8288 = vmatmul.bf16.vlgmr.msra.gmra.mxu1 %v11143_v22  ;;  %v10389_v22 = vor.u32 %v11038_v39, %v10386_v20  ;;  %v11145_v6 = vld [vmem:[#allocation1 + $0x24] sm:$0xff] }
 0x404   : > { %8332 = vmatpush.bf16.msrb.mxu1 %v10437_v31  ;;  %8301 = vmatmul.bf16.vlgmr.msra.gmra.mxu2 %v11142_v21  ;;  %v10394_v31 = vld [vmem:[%s12345_s8 + $0xea8] sm:$0xf0] }
 0x405   : > { %8345 = vmatpush.bf16.msrb.mxu2 %v10501_v47  ;;  %8314 = vmatmul.bf16.vlgmr.msra.gmra.mxu3 %v11144_v50  ;;  %v11056_v47 = vld [vmem:[%s12345_s8 + $0xf24] sm:$0xf]  ;;  %v10314_v50 = vld [vmem:[%s12345_s8 + $0xe08] sm:$0xf0] }
 0x406   : > { %8358 = vmatpush.bf16.msrb.mxu3 %v10565_v33  ;;  %v11072_v33 = vld [vmem:[%s12345_s8 + $0xfa4] sm:$0xf]  ;;  %v10317_v61 = vor.u32 %v11020_v45, %v10314_v50 }
 0x407   : > { %8320 = vmatpush.bf16.msrb.mxu0 %v10365_v36  ;;  %v8094_v30 = vpop.f32.mrf.mxu2  ;;  %v8070_v59 = vpop.f32.mrf.mxu0  ;;  %v10397_v36 = vor.u32 %v11040_v16, %v10394_v31  ;;  %v10525_v40 = vor.u32 %v11072_v33, %v10522_v49 }
 0x408   : > { %8333 = vmatpush.bf16.msrb.mxu1 %v10429_v41  ;;  %v8095_v32 = vadd.f32 %v8094_v30, %v8082_v2  ;;  %v8107_v17 = vpop.f32.mrf.mxu3  ;;  %v8083_v35 = vpop.f32.mrf.mxu1  ;;  %v10461_v41 = vor.u32 %v11056_v47, %v10458_v48 }
 0x409   : > { %8346 = vmatpush.bf16.msrb.mxu2 %v10493_v37  ;;  %v11022_v37 = vld [vmem:[%s12345_s8 + $0xe14] sm:$0xf] }
 0x40a   : > { %8359 = vmatpush.bf16.msrb.mxu3 %v10557_v25  ;;  %v8108_v5 = vadd.f32 %v8107_v17, %v8095_v32  ;;  %v11054_v25 = vld [vmem:[%s12345_s8 + $0xf14] sm:$0xf]  ;;  %v10325_v21 = vor.u32 %v11022_v37, %v10322_v38 }
 0x40b   : > { %8321 = vmatpush.bf16.msrb.mxu0 %v10357_v51  ;;  %v10453_v44 = vor.u32 %v11054_v25, %v10450_v42  ;;  %v11036_v51 = vld [vmem:[%s12345_s8 + $0xe84] sm:$0xf] }
 0x40c   : > { %8334 = vmatpush.bf16.msrb.mxu1 %v10421_v26  ;;  %v10517_v26 = vor.u32 %v11070_v43, %v10514_v56 }
 0x40d   : > { %8347 = vmatpush.bf16.msrb.mxu2 %v10485_v52  ;;  %v10378_v52 = vld [vmem:[%s12345_s8 + $0xe88] sm:$0xf0] }
 0x40e   : > { %8360 = vmatpush.bf16.msrb.mxu3 %v10549_v28  ;;  %v11068_v28 = vld [vmem:[%s12345_s8 + $0xf84] sm:$0xf]  ;;  %v10381_v62 = vor.u32 %v11036_v51, %v10378_v52 }
 0x40f   : > { %8322 = vmatpush.bf16.msrb.mxu0 %v10349_v3  ;;  %v8096_v55 = vpop.f32.mrf.mxu2  ;;  %v10509_v58 = vor.u32 %v11068_v28, %v10506_v57  ;;  %v11146_v3 = vld [vmem:[#allocation1 + $0x2d] sm:$0xff] }
 0x410   : > { %8335 = vmatpush.bf16.msrb.mxu1 %v10413_v8  ;;  %v8109_v60 = vpop.f32.mrf.mxu3  ;;  %v11148_v8 = vld [vmem:[#allocation1 + $0x3f] sm:$0xff] }
 0x411   : > { %8348 = vmatpush.bf16.msrb.mxu2 %v10477_v10 }
 0x412   : > { %8361 = vmatpush.bf16.msrb.mxu3 %v10541_v12 }
 0x413   : > { %8323 = vmatpush.bf16.msrb.mxu0 %v10341_v29 }
 0x414   : > { %8336 = vmatpush.bf16.msrb.mxu1 %v10405_v46 }
 0x415   : > { %8349 = vmatpush.bf16.msrb.mxu2 %v10469_v13 }
 0x416   : > { %8362 = vmatpush.bf16.msrb.mxu3 %v10533_v18 }
 0x417   : > { %8324 = vmatpush.bf16.msrb.mxu0 %v10333_v34 }
 0x418   : > { %8337 = vmatpush.bf16.msrb.mxu1 %v10397_v36 }
 0x419   : > { %8350 = vmatpush.bf16.msrb.mxu2 %v10461_v41 }
 0x41a   : > { %8363 = vmatpush.bf16.msrb.mxu3 %v10525_v40 }
 0x41b   : > { %8325 = vmatpush.bf16.msrb.mxu0 %v10325_v21 }
 0x41c   : > { %8338 = vmatpush.bf16.msrb.mxu1 %v10389_v22 }
 0x41d   : > { %8351 = vmatpush.bf16.msrb.mxu2 %v10453_v44 }
 0x41e   : > { %8364 = vmatpush.bf16.msrb.mxu3 %v10517_v26 }
 0x41f   : > { %8326 = vmatpush.bf16.msrb.mxu0 %v10317_v61  ;;  %v8120_v10 = vpop.f32.mrf.mxu0 }
 0x420   : > { %8339 = vmatpush.bf16.msrb.mxu1 %v10381_v62  ;;  %v8121_v7 = vadd.f32 %v8120_v10, %v8108_v5  ;;  %v8133_v11 = vpop.f32.mrf.mxu1 }
 0x421   : > { %8352 = vmatpush.bf16.msrb.mxu2 %v10445_v63 }
 0x422   : > { %8365 = vmatpush.bf16.msrb.mxu3 %v10509_v58  ;;  %8327 = vmatmul.bf16.vlgmr.msrb.gmra.mxu0 %v11145_v6  ;;  %v8134_v23 = vadd.f32 %v8133_v11, %v8121_v7 }
 0x423   : > { %8340 = vmatmul.bf16.vlgmr.msrb.gmra.mxu1 %v11146_v3 }
 0x424   : > { %8353 = vmatmul.bf16.vlgmr.msrb.gmra.mxu2 %v11147_v4 }
 0x425   : > { %8366 = vmatmul.bf16.vlgmr.msrb.gmra.mxu3 %v11148_v8 }
 0x427   : > { %v8146_v12 = vpop.f32.mrf.mxu2  ;;  %v8122_v19 = vpop.f32.mrf.mxu0 }
 0x428   : > { %v8147_v2 = vadd.f32 %v8146_v12, %v8134_v23  ;;  %v8159_v9 = vpop.f32.mrf.mxu3  ;;  %v8135_v0 = vpop.f32.mrf.mxu1 }
 0x42a   : > { %v8160_v24 = vadd.f32 %v8159_v9, %v8147_v2 }
 0x42f   : > { %v8148_v27 = vpop.f32.mrf.mxu2 }
 0x430   : > { %v8161_v29 = vpop.f32.mrf.mxu3 }
 0x43f   : > { %v8172_v46 = vpop.f32.mrf.mxu0 }
 0x440   : > { %v8173_v13 = vadd.f32 %v8172_v46, %v8160_v24  ;;  %v8185_v15 = vpop.f32.mrf.mxu1 }
 0x442   : > { %v8186_v14 = vadd.f32 %v8185_v15, %v8173_v13 }
 0x447   : > { %v8198_v16 = vpop.f32.mrf.mxu2  ;;  %v8174_v31 = vpop.f32.mrf.mxu0 }
 0x448   : > { %v8199_v18 = vadd.f32 %v8198_v16, %v8186_v14  ;;  %v8211_v30 = vpop.f32.mrf.mxu3  ;;  %v8187_v47 = vpop.f32.mrf.mxu1 }
 0x44a   : > { %v8212_v48 = vadd.f32 %v8211_v30, %v8199_v18 }
 0x44f   : > { %v8200_v32 = vpop.f32.mrf.mxu2 }
 0x450   : > { %v8213_v17 = vpop.f32.mrf.mxu3 }
 0x45f   : > { %v8224_v33 = vpop.f32.mrf.mxu0 }
 0x460   : > { %v8237_v49 = vpop.f32.mrf.mxu1  ;;  %v8225_v39 = vadd.f32 %v8224_v33, %v8212_v48 }
 0x462   : > { %v8238_v43 = vadd.f32 %v8237_v49, %v8225_v39 }
 0x467   : > { %v8250_v59 = vpop.f32.mrf.mxu2  ;;  %v8226_v35 = vpop.f32.mrf.mxu0 }
 0x468   : > { %v8263_v34 = vpop.f32.mrf.mxu3  ;;  %v8239_v5 = vpop.f32.mrf.mxu1  ;;  %v8251_v56 = vadd.f32 %v8250_v59, %v8238_v43 }
 0x46a   : > { %v8264_v44 = vadd.f32 %v8263_v34, %v8251_v56 }
 0x46f   : > { %v8252_v36 = vpop.f32.mrf.mxu2 }
 0x470   : > { %v8265_v41 = vpop.f32.mrf.mxu3 }
 0x47f   : > { %v8276_v37 = vpop.f32.mrf.mxu0 }
 0x480   : > { %v8289_v38 = vpop.f32.mrf.mxu1  ;;  %v8277_v45 = vadd.f32 %v8276_v37, %v8264_v44 }
 0x482   : > { %v8290_v50 = vadd.f32 %v8289_v38, %v8277_v45 }
 0x487   : > { %v8302_v40 = vpop.f32.mrf.mxu2  ;;  %v8278_v25 = vpop.f32.mrf.mxu0 }
 0x488   : > { %v8315_v20 = vpop.f32.mrf.mxu3  ;;  %v8291_v42 = vpop.f32.mrf.mxu1  ;;  %v8303_v51 = vadd.f32 %v8302_v40, %v8290_v50 }
 0x48a   : > { %v8316_v26 = vadd.f32 %v8315_v20, %v8303_v51 }
 0x48f   : > { %v8304_v21 = vpop.f32.mrf.mxu2 }
 0x490   : > { %v8317_v22 = vpop.f32.mrf.mxu3 }
 0x49f   : > { %v8328_v52 = vpop.f32.mrf.mxu0 }
 0x4a0   : > { %v8341_v53 = vpop.f32.mrf.mxu1  ;;  %v8329_v54 = vadd.f32 %v8328_v52, %v8316_v26 }
 0x4a2   : > { %v8342_v55 = vadd.f32 %v8341_v53, %v8329_v54 }
 0x4a7   : > { %v8354_v28 = vpop.f32.mrf.mxu2  ;;  %v8330_v61 = vpop.f32.mrf.mxu0 }
 0x4a8   : > { %v8355_v57 = vadd.f32 %v8354_v28, %v8342_v55  ;;  %v8367_v60 = vpop.f32.mrf.mxu3  ;;  %v8343_v62 = vpop.f32.mrf.mxu1 }
 0x4aa   : > { %v8368_v63 = vadd.f32 %v8367_v60, %v8355_v57 }
 0x4ac   : > { %v8373_v58 = vrot.slane %v8368_v63, 6 }
 0x4ae   : > { %v8375_v6 = vsel %vm8374_vm0, %v13301_v1, %v8373_v58 }
 0x4af   : > { %v8356_v3 = vpop.f32.mrf.mxu2  ;;  %8377 = vst [vmem:[%s4373_s11] sm:$0xf] %v8375_v6 }
 0x4b0   : > { %v8369_v4 = vpop.f32.mrf.mxu3 }
 0x4b1   : > { %11176 = shalt.err (!%p11173_p8)
}
 0x4b2   : > { %11085 = dma.vmem_to_hbm [thread:$0]  (%p11288_p5), %s8395_s18, 64, %s8397_s19, %s8379_s15  }
 0x4b3 PF: > { %s8408_s6 = sand.u32 1, %s11207_s12   ;;  %p11088_p11 = pnand %p8510_p10, %p11299_p9 }
 0x4b4   : > { %s8409_s4 = scalar_lea.sflag [#allocation4], %s8408_s6 }
 0x4b5   : > { %p11089_p12 = pneg %p11088_p11 }
 0x4b7   : > { %11202 = dma.done.wait (%p11089_p12), %s8409_s4, 64  }
 0x4b8   : > { %11204 = vsyncadd (%p11089_p12), %s8409_s4, 4294967232  ;;  %s16_s17 = sadd.s32 1, %s11227_s17   ;;  %s13573_s12 = smov %s11211_s13 }
 0x4b9   : > { %p13_p13 = scmp.ge.s32.totalorder %s16_s17, 4   ;;  %s13574_s13 = smov %s11215_s14 }
 0x4ba   : > { %s13575_s14 = smov %s11297_s24  ;;  %s13576_s15 = smov %s11223_s16 }
 0x4bb   : > { %s13577_s16 = smov %s13579_s20  ;;  %15 = sbr.rel (!%p13_p13) target bundleno = 4 (0x4), region = 136 }
 0x4c0   :  { %8415 = vsyncpa [#allocation4], 1 }
 0x4c1   :  { %8417 = vsyncpa [#allocation4 + $0x1], 1 }

</bundles_post_ra>
